<compile_context>
chip_gen: v7x
topology: tpu7x:2x2x1
jax: 0.10.0
libtpu: 0.0.40
codegen_flags: <defaults>
</compile_context>

<pallas_src>
import functools

import jax
import jax.numpy as jnp
from jax import lax
from jax.experimental import pallas as pl
from jax.experimental.pallas import tpu as pltpu


# ----------------------------- in-kernel math -------------------------------

def _layernorm(x, g, b, eps=1e-5):
    mu = jnp.mean(x, axis=-1, keepdims=True)
    var = jnp.mean((x - mu) ** 2, axis=-1, keepdims=True)
    return (x - mu) * lax.rsqrt(var + eps) * g + b


def _mha(x, w_qkv, b_qkv, w_o, b_o, num_heads):
    """Multi-head self-attention on a single (S, D) token block (values only)."""
    S, D = x.shape
    Dh = D // num_heads
    scale = 1.0 / (Dh ** 0.5)
    qkv = jnp.dot(x, w_qkv, preferred_element_type=jnp.float32) + b_qkv   # (S, 3D)
    proj = jnp.zeros((S, D), jnp.float32)
    for h in range(num_heads):                       # static, unrolled
        lo = h * Dh
        qh = qkv[:, lo:lo + Dh] * scale              # (S, Dh)
        kh = qkv[:, D + lo:D + lo + Dh]              # (S, Dh)
        vh = qkv[:, 2 * D + lo:2 * D + lo + Dh]      # (S, Dh)
        # q @ k^T via dot_general contracting the last dims (no explicit .T).
        s = lax.dot_general(qh, kh, (((1,), (1,)), ((), ())),
                            preferred_element_type=jnp.float32)           # (S, S)
        s = s - jnp.max(s, axis=-1, keepdims=True)
        p = jnp.exp(s)
        p = p * pl.reciprocal(jnp.sum(p, axis=-1, keepdims=True), approx=True)
        oh = jnp.dot(p, vh, preferred_element_type=jnp.float32)           # (S, Dh)
        # concat-over-heads + W_o  ==  sum_h  o_h @ W_o[h*Dh:(h+1)*Dh, :]
        proj = proj + jnp.dot(oh, w_o[lo:lo + Dh, :],
                              preferred_element_type=jnp.float32)
    return proj + b_o


def _fused_forward_kernel(num_heads,
                          patches_ref, qst_ref,
                          patch_w_ref, patch_b_ref,
                          q_w_ref, q_b_ref, cls_ref,
                          w_qkv_ref, b_qkv_ref, w_o_ref, b_o_ref,
                          ln1_g_ref, ln1_b_ref,
                          w1_ref, b1_ref, w2_ref, b2_ref,
                          ln2_g_ref, ln2_b_ref,
                          head_w_ref, head_b_ref,
                          out_ref, tok_ref):
    B, n, _ = patches_ref.shape
    num_layers = w_qkv_ref.shape[0]

    # Question embeddings for the whole batch: (B, 18) @ (18, D) + b.
    q_emb = (jnp.dot(qst_ref[...], q_w_ref[...],
                     preferred_element_type=jnp.float32) + q_b_ref[...])
    cls_tok = cls_ref[...]                 # (1, D)
    patch_w = patch_w_ref[...]
    patch_b = patch_b_ref[...]

    # ---- token assembly [cls, question, patches] per batch element --------
    xs = []
    for b in range(B):                     # static, fully unrolled (B=2)
        pe = (jnp.dot(patches_ref[b], patch_w,
                      preferred_element_type=jnp.float32) + patch_b)      # (n, D)
        tok_ref[pl.ds(0, 1), :] = cls_tok
        tok_ref[pl.ds(1, 1), :] = q_emb[b:b + 1, :]
        tok_ref[pl.ds(2, n), :] = pe
        xs.append(tok_ref[...])            # snapshot value (S, D), f32

    # ---- encoder layers (layer-outer so each layer's weights load once) ---
    for l in range(num_layers):            # static, fully unrolled (L=2)
        w_qkv = w_qkv_ref[l]
        b_qkv = b_qkv_ref[l]
        w_o = w_o_ref[l]
        b_o = b_o_ref[l]
        ln1_g = ln1_g_ref[l]
        ln1_b = ln1_b_ref[l]
        w1 = w1_ref[l]
        b1 = b1_ref[l]
        w2 = w2_ref[l]
        b2 = b2_ref[l]
        ln2_g = ln2_g_ref[l]
        ln2_b = ln2_b_ref[l]
        for b in range(B):
            x = xs[b]
            attn = _mha(x, w_qkv, b_qkv, w_o, b_o, num_heads)
            x = _layernorm(x + attn, ln1_g, ln1_b)
            h1 = jnp.maximum(
                jnp.dot(x, w1, preferred_element_type=jnp.float32) + b1,
                0.0)                                                      # f32 ReLU
            ff = jnp.dot(h1, w2, preferred_element_type=jnp.float32) + b2
            xs[b] = _layernorm(x + ff, ln2_g, ln2_b)

    # ---- classifier head on the cls token + exact log_softmax -------------
    head_w = head_w_ref[...]
    head_b = head_b_ref[...]
    for b in range(B):
        logits = (jnp.dot(xs[b][0:1, :], head_w,
                          preferred_element_type=jnp.float32) + head_b)   # (1, C)
        z = logits - jnp.max(logits, axis=-1, keepdims=True)
        lse = jnp.log(jnp.sum(jnp.exp(z), axis=-1, keepdims=True))
        out_ref[pl.ds(b, 1), :] = (z - lse).astype(out_ref.dtype)


# ----------------------------- model wrapper --------------------------------

def transformer_forward(params, img, qst, *, patch_size, num_heads):
    B, C, H, W = img.shape
    p = patch_size
    h, w = H // p, W // p
    n = h * w
    D = params["cls"].shape[-1]
    S = n + 2
    num_classes = params["head_b"].shape[-1]

    # einops: 'b c (h p1) (w p2) -> b (h w) (p1 p2 c)'   (pure layout glue)
    patches = (img.reshape(B, C, h, p, w, p)
                  .transpose(0, 2, 4, 3, 5, 1)
                  .reshape(B, n, p * p * C))

    stack = lambda name: jnp.stack([lp[name] for lp in params["layers"]], axis=0)

    kernel = functools.partial(_fused_forward_kernel, num_heads)
    return pl.pallas_call(
        kernel,
        out_shape=jax.ShapeDtypeStruct((B, num_classes), jnp.float32),
        scratch_shapes=[pltpu.VMEM((S, D), jnp.float32)],
    )(patches, qst,
      params["patch_w"], params["patch_b"],
      params["q_w"], params["q_b"], params["cls"],
      stack("w_qkv"), stack("b_qkv"), stack("w_o"), stack("b_o"),
      stack("ln1_g"), stack("ln1_b"),
      stack("w1"), stack("b1"), stack("w2"), stack("b2"),
      stack("ln2_g"), stack("ln2_b"),
      params["head_w"], params["head_b"])


# ----------------------------- parameter init -------------------------------

def init_params(key, *, patch_dim, h_dim, ffn_dim, num_layers, num_classes):
    def nrm(k, shape, scale=0.02):
        return (scale * jax.random.normal(k, shape)).astype(jnp.float32)

    keys = jax.random.split(key, 4 + num_layers)
    params = {
        "patch_w": nrm(keys[0], (patch_dim, h_dim)),
        "patch_b": jnp.zeros((1, h_dim), jnp.float32),
        "q_w": nrm(keys[1], (18, h_dim)),
        "q_b": jnp.zeros((1, h_dim), jnp.float32),
        "cls": nrm(keys[2], (1, h_dim), scale=1.0),
        "head_w": nrm(keys[3], (h_dim, num_classes)),
        "head_b": jnp.zeros((1, num_classes), jnp.float32),
        "layers": [],
    }
    for l in range(num_layers):
        lk = jax.random.split(keys[4 + l], 4)
        params["layers"].append({
            "w_qkv": nrm(lk[0], (h_dim, 3 * h_dim)),
            "b_qkv": jnp.zeros((1, 3 * h_dim), jnp.float32),
            "w_o": nrm(lk[1], (h_dim, h_dim)),
            "b_o": jnp.zeros((1, h_dim), jnp.float32),
            "ln1_g": jnp.ones((1, h_dim), jnp.float32),
            "ln1_b": jnp.zeros((1, h_dim), jnp.float32),
            "w1": nrm(lk[2], (h_dim, ffn_dim)),
            "b1": jnp.zeros((1, ffn_dim), jnp.float32),
            "w2": nrm(lk[3], (ffn_dim, h_dim)),
            "b2": jnp.zeros((1, h_dim), jnp.float32),
            "ln2_g": jnp.ones((1, h_dim), jnp.float32),
            "ln2_b": jnp.zeros((1, h_dim), jnp.float32),
        })
    return params


# --------------------------------- main --------------------------------------

if __name__ == "__main__":
    # Shapes consistent with the module: image_size=16, patch_size=4,
    # channels=3, h_dim=32, num_heads=4, num_layers=2, ffn=512, qst dim=18.
    batch = 2
    image_size = 16
    patch_size = 4
    channels = 3
    h_dim = 32
    num_heads = 4
    num_layers = 2
    ffn_dim = 512
    num_classes = 10
    patch_dim = channels * patch_size ** 2

    key = jax.random.PRNGKey(0)
    k_img, k_qst, k_par = jax.random.split(key, 3)

    img = jax.random.normal(k_img, (batch, channels, image_size, image_size),
                            dtype=jnp.float32)          # NCHW, like PyTorch
    qst = jax.random.normal(k_qst, (batch, 18), dtype=jnp.float32)

    params = init_params(k_par, patch_dim=patch_dim, h_dim=h_dim,
                         ffn_dim=ffn_dim, num_layers=num_layers,
                         num_classes=num_classes)

    fwd = jax.jit(functools.partial(transformer_forward,
                                    patch_size=patch_size,
                                    num_heads=num_heads))
    out = fwd(params, img, qst)
    out = jax.block_until_ready(out)

    assert out.shape == (batch, num_classes)
    # log_softmax rows must sum to ~1 in prob space
    assert jnp.allclose(jnp.sum(jnp.exp(out), axis=-1), 1.0, atol=1e-4)
    print("KERNEL_OK")
</pallas_src>

<mosaic_0001>
module attributes {stable_mosaic.version = 11 : i64} {
  func.func @_fused_forward_kernel(%arg0: memref<2x16x48xf32, #tpu.memory_space<vmem>>, %arg1: memref<2x18xf32, #tpu.memory_space<vmem>>, %arg2: memref<48x32xf32, #tpu.memory_space<vmem>>, %arg3: memref<1x32xf32, #tpu.memory_space<vmem>>, %arg4: memref<18x32xf32, #tpu.memory_space<vmem>>, %arg5: memref<1x32xf32, #tpu.memory_space<vmem>>, %arg6: memref<1x32xf32, #tpu.memory_space<vmem>>, %arg7: memref<2x32x96xf32, #tpu.memory_space<vmem>>, %arg8: memref<2x1x96xf32, #tpu.memory_space<vmem>>, %arg9: memref<2x32x32xf32, #tpu.memory_space<vmem>>, %arg10: memref<2x1x32xf32, #tpu.memory_space<vmem>>, %arg11: memref<2x1x32xf32, #tpu.memory_space<vmem>>, %arg12: memref<2x1x32xf32, #tpu.memory_space<vmem>>, %arg13: memref<2x32x512xf32, #tpu.memory_space<vmem>>, %arg14: memref<2x1x512xf32, #tpu.memory_space<vmem>>, %arg15: memref<2x512x32xf32, #tpu.memory_space<vmem>>, %arg16: memref<2x1x32xf32, #tpu.memory_space<vmem>>, %arg17: memref<2x1x32xf32, #tpu.memory_space<vmem>>, %arg18: memref<2x1x32xf32, #tpu.memory_space<vmem>>, %arg19: memref<32x10xf32, #tpu.memory_space<vmem>>, %arg20: memref<1x10xf32, #tpu.memory_space<vmem>>, %arg21: memref<2x10xf32, #tpu.memory_space<vmem>>, %arg22: memref<18x32xf32, #tpu.memory_space<vmem>>) attributes {dimension_semantics = [], scalar_prefetch = 0 : i64, scratch_operands = 1 : i64, tpu.core_type = #tpu.core_type<tc>} {
    %c0 = arith.constant 0 : index
    %c0_0 = arith.constant 0 : index
    %0 = vector.load %arg1[%c0, %c0_0] : memref<2x18xf32, #tpu.memory_space<vmem>>, vector<2x18xf32>
    %c0_1 = arith.constant 0 : index
    %c0_2 = arith.constant 0 : index
    %1 = vector.load %arg4[%c0_1, %c0_2] : memref<18x32xf32, #tpu.memory_space<vmem>>, vector<18x32xf32>
    %cst = arith.constant dense<0.000000e+00> : vector<2x32xf32>
    %2 = tpu.matmul %0, %1, %cst {dimension_numbers = #tpu.dot_dimension_numbers<[1], [0], [0], [1], [0, 0, 1, 1], [], []>} : vector<2x18xf32>, vector<18x32xf32>, vector<2x32xf32> -> vector<2x32xf32>
    %c0_3 = arith.constant 0 : index
    %c0_4 = arith.constant 0 : index
    %3 = vector.load %arg5[%c0_3, %c0_4] : memref<1x32xf32, #tpu.memory_space<vmem>>, vector<1x32xf32>
    %4 = vector.broadcast %3 : vector<1x32xf32> to vector<2x32xf32>
    %5 = arith.addf %2, %4 : vector<2x32xf32>
    %c0_5 = arith.constant 0 : index
    %c0_6 = arith.constant 0 : index
    %6 = vector.load %arg6[%c0_5, %c0_6] : memref<1x32xf32, #tpu.memory_space<vmem>>, vector<1x32xf32>
    %c0_7 = arith.constant 0 : index
    %c0_8 = arith.constant 0 : index
    %7 = vector.load %arg2[%c0_7, %c0_8] : memref<48x32xf32, #tpu.memory_space<vmem>>, vector<48x32xf32>
    %c0_9 = arith.constant 0 : index
    %c0_10 = arith.constant 0 : index
    %8 = vector.load %arg3[%c0_9, %c0_10] : memref<1x32xf32, #tpu.memory_space<vmem>>, vector<1x32xf32>
    %c0_11 = arith.constant 0 : index
    %c0_12 = arith.constant 0 : index
    %c0_13 = arith.constant 0 : index
    %9 = vector.load %arg0[%c0_11, %c0_12, %c0_13] : memref<2x16x48xf32, #tpu.memory_space<vmem>>, vector<1x16x48xf32>
    %10 = vector.shape_cast %9 : vector<1x16x48xf32> to vector<16x48xf32>
    %cst_14 = arith.constant dense<0.000000e+00> : vector<16x32xf32>
    %11 = tpu.matmul %10, %7, %cst_14 {dimension_numbers = #tpu.dot_dimension_numbers<[1], [0], [0], [1], [0, 0, 1, 1], [], []>} : vector<16x48xf32>, vector<48x32xf32>, vector<16x32xf32> -> vector<16x32xf32>
    %12 = vector.broadcast %8 : vector<1x32xf32> to vector<16x32xf32>
    %13 = arith.addf %11, %12 : vector<16x32xf32>
    %c0_15 = arith.constant 0 : index
    %c0_16 = arith.constant 0 : index
    %14 = vector.load %arg22[%c0_15, %c0_16] : memref<18x32xf32, #tpu.memory_space<vmem>>, vector<1x32xf32>
    tpu.vector_store %arg22[%c0_15, %c0_16], %6 {strides = array<i32>} : memref<18x32xf32, #tpu.memory_space<vmem>>, vector<1x32xf32>,
    %15 = vector.extract_strided_slice %5 {offsets = [0, 0], sizes = [1, 32], strides = [1, 1]} : vector<2x32xf32> to vector<1x32xf32>
    %c1 = arith.constant 1 : index
    %c0_17 = arith.constant 0 : index
    %16 = vector.load %arg22[%c1, %c0_17] : memref<18x32xf32, #tpu.memory_space<vmem>>, vector<1x32xf32>
    tpu.vector_store %arg22[%c1, %c0_17], %15 {strides = array<i32>} : memref<18x32xf32, #tpu.memory_space<vmem>>, vector<1x32xf32>,
    %c2 = arith.constant 2 : index
    %c0_18 = arith.constant 0 : index
    %17 = vector.load %arg22[%c2, %c0_18] : memref<18x32xf32, #tpu.memory_space<vmem>>, vector<16x32xf32>
    tpu.vector_store %arg22[%c2, %c0_18], %13 {strides = array<i32>} : memref<18x32xf32, #tpu.memory_space<vmem>>, vector<16x32xf32>,
    %c0_19 = arith.constant 0 : index
    %c0_20 = arith.constant 0 : index
    %18 = vector.load %arg22[%c0_19, %c0_20] : memref<18x32xf32, #tpu.memory_space<vmem>>, vector<18x32xf32>
    %c1_21 = arith.constant 1 : index
    %c0_22 = arith.constant 0 : index
    %c0_23 = arith.constant 0 : index
    %19 = vector.load %arg0[%c1_21, %c0_22, %c0_23] : memref<2x16x48xf32, #tpu.memory_space<vmem>>, vector<1x16x48xf32>
    %20 = vector.shape_cast %19 : vector<1x16x48xf32> to vector<16x48xf32>
    %cst_24 = arith.constant dense<0.000000e+00> : vector<16x32xf32>
    %21 = tpu.matmul %20, %7, %cst_24 {dimension_numbers = #tpu.dot_dimension_numbers<[1], [0], [0], [1], [0, 0, 1, 1], [], []>} : vector<16x48xf32>, vector<48x32xf32>, vector<16x32xf32> -> vector<16x32xf32>
    %22 = vector.broadcast %8 : vector<1x32xf32> to vector<16x32xf32>
    %23 = arith.addf %21, %22 : vector<16x32xf32>
    %c0_25 = arith.constant 0 : index
    %c0_26 = arith.constant 0 : index
    %24 = vector.load %arg22[%c0_25, %c0_26] : memref<18x32xf32, #tpu.memory_space<vmem>>, vector<1x32xf32>
    tpu.vector_store %arg22[%c0_25, %c0_26], %6 {strides = array<i32>} : memref<18x32xf32, #tpu.memory_space<vmem>>, vector<1x32xf32>,
    %25 = vector.extract_strided_slice %5 {offsets = [1, 0], sizes = [1, 32], strides = [1, 1]} : vector<2x32xf32> to vector<1x32xf32>
    %c1_27 = arith.constant 1 : index
    %c0_28 = arith.constant 0 : index
    %26 = vector.load %arg22[%c1_27, %c0_28] : memref<18x32xf32, #tpu.memory_space<vmem>>, vector<1x32xf32>
    tpu.vector_store %arg22[%c1_27, %c0_28], %25 {strides = array<i32>} : memref<18x32xf32, #tpu.memory_space<vmem>>, vector<1x32xf32>,
    %c2_29 = arith.constant 2 : index
    %c0_30 = arith.constant 0 : index
    %27 = vector.load %arg22[%c2_29, %c0_30] : memref<18x32xf32, #tpu.memory_space<vmem>>, vector<16x32xf32>
    tpu.vector_store %arg22[%c2_29, %c0_30], %23 {strides = array<i32>} : memref<18x32xf32, #tpu.memory_space<vmem>>, vector<16x32xf32>,
    %c0_31 = arith.constant 0 : index
    %c0_32 = arith.constant 0 : index
    %28 = vector.load %arg22[%c0_31, %c0_32] : memref<18x32xf32, #tpu.memory_space<vmem>>, vector<18x32xf32>
    %c0_33 = arith.constant 0 : index
    %c0_34 = arith.constant 0 : index
    %c0_35 = arith.constant 0 : index
    %29 = vector.load %arg7[%c0_33, %c0_34, %c0_35] : memref<2x32x96xf32, #tpu.memory_space<vmem>>, vector<1x32x96xf32>
    %30 = vector.shape_cast %29 : vector<1x32x96xf32> to vector<32x96xf32>
    %c0_36 = arith.constant 0 : index
    %c0_37 = arith.constant 0 : index
    %c0_38 = arith.constant 0 : index
    %31 = vector.load %arg8[%c0_36, %c0_37, %c0_38] : memref<2x1x96xf32, #tpu.memory_space<vmem>>, vector<1x1x96xf32>
    %32 = vector.shape_cast %31 : vector<1x1x96xf32> to vector<1x96xf32>
    %c0_39 = arith.constant 0 : index
    %c0_40 = arith.constant 0 : index
    %c0_41 = arith.constant 0 : index
    %33 = vector.load %arg9[%c0_39, %c0_40, %c0_41] : memref<2x32x32xf32, #tpu.memory_space<vmem>>, vector<1x32x32xf32>
    %34 = vector.shape_cast %33 : vector<1x32x32xf32> to vector<32x32xf32>
    %c0_42 = arith.constant 0 : index
    %c0_43 = arith.constant 0 : index
    %c0_44 = arith.constant 0 : index
    %35 = vector.load %arg10[%c0_42, %c0_43, %c0_44] : memref<2x1x32xf32, #tpu.memory_space<vmem>>, vector<1x1x32xf32>
    %36 = vector.shape_cast %35 : vector<1x1x32xf32> to vector<1x32xf32>
    %c0_45 = arith.constant 0 : index
    %c0_46 = arith.constant 0 : index
    %c0_47 = arith.constant 0 : index
    %37 = vector.load %arg11[%c0_45, %c0_46, %c0_47] : memref<2x1x32xf32, #tpu.memory_space<vmem>>, vector<1x1x32xf32>
    %38 = vector.shape_cast %37 : vector<1x1x32xf32> to vector<1x32xf32>
    %c0_48 = arith.constant 0 : index
    %c0_49 = arith.constant 0 : index
    %c0_50 = arith.constant 0 : index
    %39 = vector.load %arg12[%c0_48, %c0_49, %c0_50] : memref<2x1x32xf32, #tpu.memory_space<vmem>>, vector<1x1x32xf32>
    %40 = vector.shape_cast %39 : vector<1x1x32xf32> to vector<1x32xf32>
    %c0_51 = arith.constant 0 : index
    %c0_52 = arith.constant 0 : index
    %c0_53 = arith.constant 0 : index
    %41 = vector.load %arg13[%c0_51, %c0_52, %c0_53] : memref<2x32x512xf32, #tpu.memory_space<vmem>>, vector<1x32x512xf32>
    %42 = vector.shape_cast %41 : vector<1x32x512xf32> to vector<32x512xf32>
    %c0_54 = arith.constant 0 : index
    %c0_55 = arith.constant 0 : index
    %c0_56 = arith.constant 0 : index
    %43 = vector.load %arg14[%c0_54, %c0_55, %c0_56] : memref<2x1x512xf32, #tpu.memory_space<vmem>>, vector<1x1x512xf32>
    %44 = vector.shape_cast %43 : vector<1x1x512xf32> to vector<1x512xf32>
    %c0_57 = arith.constant 0 : index
    %c0_58 = arith.constant 0 : index
    %c0_59 = arith.constant 0 : index
    %45 = vector.load %arg15[%c0_57, %c0_58, %c0_59] : memref<2x512x32xf32, #tpu.memory_space<vmem>>, vector<1x512x32xf32>
    %46 = vector.shape_cast %45 : vector<1x512x32xf32> to vector<512x32xf32>
    %c0_60 = arith.constant 0 : index
    %c0_61 = arith.constant 0 : index
    %c0_62 = arith.constant 0 : index
    %47 = vector.load %arg16[%c0_60, %c0_61, %c0_62] : memref<2x1x32xf32, #tpu.memory_space<vmem>>, vector<1x1x32xf32>
    %48 = vector.shape_cast %47 : vector<1x1x32xf32> to vector<1x32xf32>
    %c0_63 = arith.constant 0 : index
    %c0_64 = arith.constant 0 : index
    %c0_65 = arith.constant 0 : index
    %49 = vector.load %arg17[%c0_63, %c0_64, %c0_65] : memref<2x1x32xf32, #tpu.memory_space<vmem>>, vector<1x1x32xf32>
    %50 = vector.shape_cast %49 : vector<1x1x32xf32> to vector<1x32xf32>
    %c0_66 = arith.constant 0 : index
    %c0_67 = arith.constant 0 : index
    %c0_68 = arith.constant 0 : index
    %51 = vector.load %arg18[%c0_66, %c0_67, %c0_68] : memref<2x1x32xf32, #tpu.memory_space<vmem>>, vector<1x1x32xf32>
    %52 = vector.shape_cast %51 : vector<1x1x32xf32> to vector<1x32xf32>
    %cst_69 = arith.constant dense<0.000000e+00> : vector<18x96xf32>
    %53 = tpu.matmul %18, %30, %cst_69 {dimension_numbers = #tpu.dot_dimension_numbers<[1], [0], [0], [1], [0, 0, 1, 1], [], []>} : vector<18x32xf32>, vector<32x96xf32>, vector<18x96xf32> -> vector<18x96xf32>
    %54 = vector.broadcast %32 : vector<1x96xf32> to vector<18x96xf32>
    %55 = arith.addf %53, %54 : vector<18x96xf32>
    %cst_70 = arith.constant 0.000000e+00 : f32
    %56 = vector.broadcast %cst_70 : f32 to vector<18x32xf32>
    %57 = vector.extract_strided_slice %55 {offsets = [0, 0], sizes = [18, 8], strides = [1, 1]} : vector<18x96xf32> to vector<18x8xf32>
    %cst_71 = arith.constant 0.353553385 : f32
    %58 = vector.broadcast %cst_71 : f32 to vector<18x8xf32>
    %59 = arith.mulf %57, %58 : vector<18x8xf32>
    %60 = vector.extract_strided_slice %55 {offsets = [0, 32], sizes = [18, 8], strides = [1, 1]} : vector<18x96xf32> to vector<18x8xf32>
    %61 = vector.extract_strided_slice %55 {offsets = [0, 64], sizes = [18, 8], strides = [1, 1]} : vector<18x96xf32> to vector<18x8xf32>
    %cst_72 = arith.constant dense<0.000000e+00> : vector<18x18xf32>
    %62 = tpu.matmul %59, %60, %cst_72 {dimension_numbers = #tpu.dot_dimension_numbers<[1], [1], [0], [0], [0, 0, 1, 0], [], []>} : vector<18x8xf32>, vector<18x8xf32>, vector<18x18xf32> -> vector<18x18xf32>
    %cst_73 = arith.constant dense<0xFF800000> : vector<18xf32>
    %63 = vector.multi_reduction <maximumf>, %62, %cst_73 [1] : vector<18x18xf32> to vector<18xf32>
    %64 = vector.shape_cast %63 : vector<18xf32> to vector<18x1xf32>
    %65 = vector.broadcast %64 : vector<18x1xf32> to vector<18x18xf32>
    %66 = arith.subf %62, %65 : vector<18x18xf32>
    %67 = math.exp %66 : vector<18x18xf32>
    %cst_74 = arith.constant dense<0.000000e+00> : vector<18xf32>
    %68 = vector.multi_reduction <add>, %67, %cst_74 [1] : vector<18x18xf32> to vector<18xf32>
    %69 = vector.shape_cast %68 : vector<18xf32> to vector<18x1xf32>
    %70 = tpu.reciprocal %69 {approx = true} : vector<18x1xf32> -> vector<18x1xf32>
    %71 = vector.broadcast %70 : vector<18x1xf32> to vector<18x18xf32>
    %72 = arith.mulf %67, %71 : vector<18x18xf32>
    %cst_75 = arith.constant dense<0.000000e+00> : vector<18x8xf32>
    %73 = tpu.matmul %72, %61, %cst_75 {dimension_numbers = #tpu.dot_dimension_numbers<[1], [0], [0], [1], [0, 0, 1, 1], [], []>} : vector<18x18xf32>, vector<18x8xf32>, vector<18x8xf32> -> vector<18x8xf32>
    %74 = vector.extract_strided_slice %34 {offsets = [0, 0], sizes = [8, 32], strides = [1, 1]} : vector<32x32xf32> to vector<8x32xf32>
    %cst_76 = arith.constant dense<0.000000e+00> : vector<18x32xf32>
    %75 = tpu.matmul %73, %74, %cst_76 {dimension_numbers = #tpu.dot_dimension_numbers<[1], [0], [0], [1], [0, 0, 1, 1], [], []>} : vector<18x8xf32>, vector<8x32xf32>, vector<18x32xf32> -> vector<18x32xf32>
    %76 = arith.addf %56, %75 : vector<18x32xf32>
    %77 = vector.extract_strided_slice %55 {offsets = [0, 8], sizes = [18, 8], strides = [1, 1]} : vector<18x96xf32> to vector<18x8xf32>
    %cst_77 = arith.constant 0.353553385 : f32
    %78 = vector.broadcast %cst_77 : f32 to vector<18x8xf32>
    %79 = arith.mulf %77, %78 : vector<18x8xf32>
    %80 = vector.extract_strided_slice %55 {offsets = [0, 40], sizes = [18, 8], strides = [1, 1]} : vector<18x96xf32> to vector<18x8xf32>
    %81 = vector.extract_strided_slice %55 {offsets = [0, 72], sizes = [18, 8], strides = [1, 1]} : vector<18x96xf32> to vector<18x8xf32>
    %cst_78 = arith.constant dense<0.000000e+00> : vector<18x18xf32>
    %82 = tpu.matmul %79, %80, %cst_78 {dimension_numbers = #tpu.dot_dimension_numbers<[1], [1], [0], [0], [0, 0, 1, 0], [], []>} : vector<18x8xf32>, vector<18x8xf32>, vector<18x18xf32> -> vector<18x18xf32>
    %cst_79 = arith.constant dense<0xFF800000> : vector<18xf32>
    %83 = vector.multi_reduction <maximumf>, %82, %cst_79 [1] : vector<18x18xf32> to vector<18xf32>
    %84 = vector.shape_cast %83 : vector<18xf32> to vector<18x1xf32>
    %85 = vector.broadcast %84 : vector<18x1xf32> to vector<18x18xf32>
    %86 = arith.subf %82, %85 : vector<18x18xf32>
    %87 = math.exp %86 : vector<18x18xf32>
    %cst_80 = arith.constant dense<0.000000e+00> : vector<18xf32>
    %88 = vector.multi_reduction <add>, %87, %cst_80 [1] : vector<18x18xf32> to vector<18xf32>
    %89 = vector.shape_cast %88 : vector<18xf32> to vector<18x1xf32>
    %90 = tpu.reciprocal %89 {approx = true} : vector<18x1xf32> -> vector<18x1xf32>
    %91 = vector.broadcast %90 : vector<18x1xf32> to vector<18x18xf32>
    %92 = arith.mulf %87, %91 : vector<18x18xf32>
    %cst_81 = arith.constant dense<0.000000e+00> : vector<18x8xf32>
    %93 = tpu.matmul %92, %81, %cst_81 {dimension_numbers = #tpu.dot_dimension_numbers<[1], [0], [0], [1], [0, 0, 1, 1], [], []>} : vector<18x18xf32>, vector<18x8xf32>, vector<18x8xf32> -> vector<18x8xf32>
    %94 = vector.extract_strided_slice %34 {offsets = [8, 0], sizes = [8, 32], strides = [1, 1]} : vector<32x32xf32> to vector<8x32xf32>
    %cst_82 = arith.constant dense<0.000000e+00> : vector<18x32xf32>
    %95 = tpu.matmul %93, %94, %cst_82 {dimension_numbers = #tpu.dot_dimension_numbers<[1], [0], [0], [1], [0, 0, 1, 1], [], []>} : vector<18x8xf32>, vector<8x32xf32>, vector<18x32xf32> -> vector<18x32xf32>
    %96 = arith.addf %76, %95 : vector<18x32xf32>
    %97 = vector.extract_strided_slice %55 {offsets = [0, 16], sizes = [18, 8], strides = [1, 1]} : vector<18x96xf32> to vector<18x8xf32>
    %cst_83 = arith.constant 0.353553385 : f32
    %98 = vector.broadcast %cst_83 : f32 to vector<18x8xf32>
    %99 = arith.mulf %97, %98 : vector<18x8xf32>
    %100 = vector.extract_strided_slice %55 {offsets = [0, 48], sizes = [18, 8], strides = [1, 1]} : vector<18x96xf32> to vector<18x8xf32>
    %101 = vector.extract_strided_slice %55 {offsets = [0, 80], sizes = [18, 8], strides = [1, 1]} : vector<18x96xf32> to vector<18x8xf32>
    %cst_84 = arith.constant dense<0.000000e+00> : vector<18x18xf32>
    %102 = tpu.matmul %99, %100, %cst_84 {dimension_numbers = #tpu.dot_dimension_numbers<[1], [1], [0], [0], [0, 0, 1, 0], [], []>} : vector<18x8xf32>, vector<18x8xf32>, vector<18x18xf32> -> vector<18x18xf32>
    %cst_85 = arith.constant dense<0xFF800000> : vector<18xf32>
    %103 = vector.multi_reduction <maximumf>, %102, %cst_85 [1] : vector<18x18xf32> to vector<18xf32>
    %104 = vector.shape_cast %103 : vector<18xf32> to vector<18x1xf32>
    %105 = vector.broadcast %104 : vector<18x1xf32> to vector<18x18xf32>
    %106 = arith.subf %102, %105 : vector<18x18xf32>
    %107 = math.exp %106 : vector<18x18xf32>
    %cst_86 = arith.constant dense<0.000000e+00> : vector<18xf32>
    %108 = vector.multi_reduction <add>, %107, %cst_86 [1] : vector<18x18xf32> to vector<18xf32>
    %109 = vector.shape_cast %108 : vector<18xf32> to vector<18x1xf32>
    %110 = tpu.reciprocal %109 {approx = true} : vector<18x1xf32> -> vector<18x1xf32>
    %111 = vector.broadcast %110 : vector<18x1xf32> to vector<18x18xf32>
    %112 = arith.mulf %107, %111 : vector<18x18xf32>
    %cst_87 = arith.constant dense<0.000000e+00> : vector<18x8xf32>
    %113 = tpu.matmul %112, %101, %cst_87 {dimension_numbers = #tpu.dot_dimension_numbers<[1], [0], [0], [1], [0, 0, 1, 1], [], []>} : vector<18x18xf32>, vector<18x8xf32>, vector<18x8xf32> -> vector<18x8xf32>
    %114 = vector.extract_strided_slice %34 {offsets = [16, 0], sizes = [8, 32], strides = [1, 1]} : vector<32x32xf32> to vector<8x32xf32>
    %cst_88 = arith.constant dense<0.000000e+00> : vector<18x32xf32>
    %115 = tpu.matmul %113, %114, %cst_88 {dimension_numbers = #tpu.dot_dimension_numbers<[1], [0], [0], [1], [0, 0, 1, 1], [], []>} : vector<18x8xf32>, vector<8x32xf32>, vector<18x32xf32> -> vector<18x32xf32>
    %116 = arith.addf %96, %115 : vector<18x32xf32>
    %117 = vector.extract_strided_slice %55 {offsets = [0, 24], sizes = [18, 8], strides = [1, 1]} : vector<18x96xf32> to vector<18x8xf32>
    %cst_89 = arith.constant 0.353553385 : f32
    %118 = vector.broadcast %cst_89 : f32 to vector<18x8xf32>
    %119 = arith.mulf %117, %118 : vector<18x8xf32>
    %120 = vector.extract_strided_slice %55 {offsets = [0, 56], sizes = [18, 8], strides = [1, 1]} : vector<18x96xf32> to vector<18x8xf32>
    %121 = vector.extract_strided_slice %55 {offsets = [0, 88], sizes = [18, 8], strides = [1, 1]} : vector<18x96xf32> to vector<18x8xf32>
    %cst_90 = arith.constant dense<0.000000e+00> : vector<18x18xf32>
    %122 = tpu.matmul %119, %120, %cst_90 {dimension_numbers = #tpu.dot_dimension_numbers<[1], [1], [0], [0], [0, 0, 1, 0], [], []>} : vector<18x8xf32>, vector<18x8xf32>, vector<18x18xf32> -> vector<18x18xf32>
    %cst_91 = arith.constant dense<0xFF800000> : vector<18xf32>
    %123 = vector.multi_reduction <maximumf>, %122, %cst_91 [1] : vector<18x18xf32> to vector<18xf32>
    %124 = vector.shape_cast %123 : vector<18xf32> to vector<18x1xf32>
    %125 = vector.broadcast %124 : vector<18x1xf32> to vector<18x18xf32>
    %126 = arith.subf %122, %125 : vector<18x18xf32>
    %127 = math.exp %126 : vector<18x18xf32>
    %cst_92 = arith.constant dense<0.000000e+00> : vector<18xf32>
    %128 = vector.multi_reduction <add>, %127, %cst_92 [1] : vector<18x18xf32> to vector<18xf32>
    %129 = vector.shape_cast %128 : vector<18xf32> to vector<18x1xf32>
    %130 = tpu.reciprocal %129 {approx = true} : vector<18x1xf32> -> vector<18x1xf32>
    %131 = vector.broadcast %130 : vector<18x1xf32> to vector<18x18xf32>
    %132 = arith.mulf %127, %131 : vector<18x18xf32>
    %cst_93 = arith.constant dense<0.000000e+00> : vector<18x8xf32>
    %133 = tpu.matmul %132, %121, %cst_93 {dimension_numbers = #tpu.dot_dimension_numbers<[1], [0], [0], [1], [0, 0, 1, 1], [], []>} : vector<18x18xf32>, vector<18x8xf32>, vector<18x8xf32> -> vector<18x8xf32>
    %134 = vector.extract_strided_slice %34 {offsets = [24, 0], sizes = [8, 32], strides = [1, 1]} : vector<32x32xf32> to vector<8x32xf32>
    %cst_94 = arith.constant dense<0.000000e+00> : vector<18x32xf32>
    %135 = tpu.matmul %133, %134, %cst_94 {dimension_numbers = #tpu.dot_dimension_numbers<[1], [0], [0], [1], [0, 0, 1, 1], [], []>} : vector<18x8xf32>, vector<8x32xf32>, vector<18x32xf32> -> vector<18x32xf32>
    %136 = arith.addf %116, %135 : vector<18x32xf32>
    %137 = vector.broadcast %36 : vector<1x32xf32> to vector<18x32xf32>
    %138 = arith.addf %136, %137 : vector<18x32xf32>
    %139 = arith.addf %18, %138 : vector<18x32xf32>
    %cst_95 = arith.constant dense<0.000000e+00> : vector<18xf32>
    %140 = vector.multi_reduction <add>, %139, %cst_95 [1] : vector<18x32xf32> to vector<18xf32>
    %141 = vector.shape_cast %140 : vector<18xf32> to vector<18x1xf32>
    %cst_96 = arith.constant 3.200000e+01 : f32
    %142 = vector.broadcast %cst_96 : f32 to vector<18x1xf32>
    %143 = arith.divf %141, %142 : vector<18x1xf32>
    %144 = vector.broadcast %143 : vector<18x1xf32> to vector<18x32xf32>
    %145 = arith.subf %139, %144 : vector<18x32xf32>
    %146 = arith.mulf %145, %145 : vector<18x32xf32>
    %cst_97 = arith.constant dense<0.000000e+00> : vector<18xf32>
    %147 = vector.multi_reduction <add>, %146, %cst_97 [1] : vector<18x32xf32> to vector<18xf32>
    %148 = vector.shape_cast %147 : vector<18xf32> to vector<18x1xf32>
    %cst_98 = arith.constant 3.200000e+01 : f32
    %149 = vector.broadcast %cst_98 : f32 to vector<18x1xf32>
    %150 = arith.divf %148, %149 : vector<18x1xf32>
    %151 = vector.broadcast %143 : vector<18x1xf32> to vector<18x32xf32>
    %152 = arith.subf %139, %151 : vector<18x32xf32>
    %cst_99 = arith.constant 9.99999974E-6 : f32
    %153 = vector.broadcast %cst_99 : f32 to vector<18x1xf32>
    %154 = arith.addf %150, %153 : vector<18x1xf32>
    %155 = math.rsqrt %154 : vector<18x1xf32>
    %156 = vector.broadcast %155 : vector<18x1xf32> to vector<18x32xf32>
    %157 = arith.mulf %152, %156 : vector<18x32xf32>
    %158 = vector.broadcast %38 : vector<1x32xf32> to vector<18x32xf32>
    %159 = arith.mulf %157, %158 : vector<18x32xf32>
    %160 = vector.broadcast %40 : vector<1x32xf32> to vector<18x32xf32>
    %161 = arith.addf %159, %160 : vector<18x32xf32>
    %cst_100 = arith.constant dense<0.000000e+00> : vector<18x512xf32>
    %162 = tpu.matmul %161, %42, %cst_100 {dimension_numbers = #tpu.dot_dimension_numbers<[1], [0], [0], [1], [0, 0, 1, 1], [], []>} : vector<18x32xf32>, vector<32x512xf32>, vector<18x512xf32> -> vector<18x512xf32>
    %163 = vector.broadcast %44 : vector<1x512xf32> to vector<18x512xf32>
    %164 = arith.addf %162, %163 : vector<18x512xf32>
    %cst_101 = arith.constant 0.000000e+00 : f32
    %165 = vector.broadcast %cst_101 : f32 to vector<18x512xf32>
    %166 = arith.maximumf %164, %165 : vector<18x512xf32>
    %cst_102 = arith.constant dense<0.000000e+00> : vector<18x32xf32>
    %167 = tpu.matmul %166, %46, %cst_102 {dimension_numbers = #tpu.dot_dimension_numbers<[1], [0], [0], [1], [0, 0, 1, 1], [], []>} : vector<18x512xf32>, vector<512x32xf32>, vector<18x32xf32> -> vector<18x32xf32>
    %168 = vector.broadcast %48 : vector<1x32xf32> to vector<18x32xf32>
    %169 = arith.addf %167, %168 : vector<18x32xf32>
    %170 = arith.addf %161, %169 : vector<18x32xf32>
    %cst_103 = arith.constant dense<0.000000e+00> : vector<18xf32>
    %171 = vector.multi_reduction <add>, %170, %cst_103 [1] : vector<18x32xf32> to vector<18xf32>
    %172 = vector.shape_cast %171 : vector<18xf32> to vector<18x1xf32>
    %cst_104 = arith.constant 3.200000e+01 : f32
    %173 = vector.broadcast %cst_104 : f32 to vector<18x1xf32>
    %174 = arith.divf %172, %173 : vector<18x1xf32>
    %175 = vector.broadcast %174 : vector<18x1xf32> to vector<18x32xf32>
    %176 = arith.subf %170, %175 : vector<18x32xf32>
    %177 = arith.mulf %176, %176 : vector<18x32xf32>
    %cst_105 = arith.constant dense<0.000000e+00> : vector<18xf32>
    %178 = vector.multi_reduction <add>, %177, %cst_105 [1] : vector<18x32xf32> to vector<18xf32>
    %179 = vector.shape_cast %178 : vector<18xf32> to vector<18x1xf32>
    %cst_106 = arith.constant 3.200000e+01 : f32
    %180 = vector.broadcast %cst_106 : f32 to vector<18x1xf32>
    %181 = arith.divf %179, %180 : vector<18x1xf32>
    %182 = vector.broadcast %174 : vector<18x1xf32> to vector<18x32xf32>
    %183 = arith.subf %170, %182 : vector<18x32xf32>
    %cst_107 = arith.constant 9.99999974E-6 : f32
    %184 = vector.broadcast %cst_107 : f32 to vector<18x1xf32>
    %185 = arith.addf %181, %184 : vector<18x1xf32>
    %186 = math.rsqrt %185 : vector<18x1xf32>
    %187 = vector.broadcast %186 : vector<18x1xf32> to vector<18x32xf32>
    %188 = arith.mulf %183, %187 : vector<18x32xf32>
    %189 = vector.broadcast %50 : vector<1x32xf32> to vector<18x32xf32>
    %190 = arith.mulf %188, %189 : vector<18x32xf32>
    %191 = vector.broadcast %52 : vector<1x32xf32> to vector<18x32xf32>
    %192 = arith.addf %190, %191 : vector<18x32xf32>
    %cst_108 = arith.constant dense<0.000000e+00> : vector<18x96xf32>
    %193 = tpu.matmul %28, %30, %cst_108 {dimension_numbers = #tpu.dot_dimension_numbers<[1], [0], [0], [1], [0, 0, 1, 1], [], []>} : vector<18x32xf32>, vector<32x96xf32>, vector<18x96xf32> -> vector<18x96xf32>
    %194 = vector.broadcast %32 : vector<1x96xf32> to vector<18x96xf32>
    %195 = arith.addf %193, %194 : vector<18x96xf32>
    %cst_109 = arith.constant 0.000000e+00 : f32
    %196 = vector.broadcast %cst_109 : f32 to vector<18x32xf32>
    %197 = vector.extract_strided_slice %195 {offsets = [0, 0], sizes = [18, 8], strides = [1, 1]} : vector<18x96xf32> to vector<18x8xf32>
    %cst_110 = arith.constant 0.353553385 : f32
    %198 = vector.broadcast %cst_110 : f32 to vector<18x8xf32>
    %199 = arith.mulf %197, %198 : vector<18x8xf32>
    %200 = vector.extract_strided_slice %195 {offsets = [0, 32], sizes = [18, 8], strides = [1, 1]} : vector<18x96xf32> to vector<18x8xf32>
    %201 = vector.extract_strided_slice %195 {offsets = [0, 64], sizes = [18, 8], strides = [1, 1]} : vector<18x96xf32> to vector<18x8xf32>
    %cst_111 = arith.constant dense<0.000000e+00> : vector<18x18xf32>
    %202 = tpu.matmul %199, %200, %cst_111 {dimension_numbers = #tpu.dot_dimension_numbers<[1], [1], [0], [0], [0, 0, 1, 0], [], []>} : vector<18x8xf32>, vector<18x8xf32>, vector<18x18xf32> -> vector<18x18xf32>
    %cst_112 = arith.constant dense<0xFF800000> : vector<18xf32>
    %203 = vector.multi_reduction <maximumf>, %202, %cst_112 [1] : vector<18x18xf32> to vector<18xf32>
    %204 = vector.shape_cast %203 : vector<18xf32> to vector<18x1xf32>
    %205 = vector.broadcast %204 : vector<18x1xf32> to vector<18x18xf32>
    %206 = arith.subf %202, %205 : vector<18x18xf32>
    %207 = math.exp %206 : vector<18x18xf32>
    %cst_113 = arith.constant dense<0.000000e+00> : vector<18xf32>
    %208 = vector.multi_reduction <add>, %207, %cst_113 [1] : vector<18x18xf32> to vector<18xf32>
    %209 = vector.shape_cast %208 : vector<18xf32> to vector<18x1xf32>
    %210 = tpu.reciprocal %209 {approx = true} : vector<18x1xf32> -> vector<18x1xf32>
    %211 = vector.broadcast %210 : vector<18x1xf32> to vector<18x18xf32>
    %212 = arith.mulf %207, %211 : vector<18x18xf32>
    %cst_114 = arith.constant dense<0.000000e+00> : vector<18x8xf32>
    %213 = tpu.matmul %212, %201, %cst_114 {dimension_numbers = #tpu.dot_dimension_numbers<[1], [0], [0], [1], [0, 0, 1, 1], [], []>} : vector<18x18xf32>, vector<18x8xf32>, vector<18x8xf32> -> vector<18x8xf32>
    %214 = vector.extract_strided_slice %34 {offsets = [0, 0], sizes = [8, 32], strides = [1, 1]} : vector<32x32xf32> to vector<8x32xf32>
    %cst_115 = arith.constant dense<0.000000e+00> : vector<18x32xf32>
    %215 = tpu.matmul %213, %214, %cst_115 {dimension_numbers = #tpu.dot_dimension_numbers<[1], [0], [0], [1], [0, 0, 1, 1], [], []>} : vector<18x8xf32>, vector<8x32xf32>, vector<18x32xf32> -> vector<18x32xf32>
    %216 = arith.addf %196, %215 : vector<18x32xf32>
    %217 = vector.extract_strided_slice %195 {offsets = [0, 8], sizes = [18, 8], strides = [1, 1]} : vector<18x96xf32> to vector<18x8xf32>
    %cst_116 = arith.constant 0.353553385 : f32
    %218 = vector.broadcast %cst_116 : f32 to vector<18x8xf32>
    %219 = arith.mulf %217, %218 : vector<18x8xf32>
    %220 = vector.extract_strided_slice %195 {offsets = [0, 40], sizes = [18, 8], strides = [1, 1]} : vector<18x96xf32> to vector<18x8xf32>
    %221 = vector.extract_strided_slice %195 {offsets = [0, 72], sizes = [18, 8], strides = [1, 1]} : vector<18x96xf32> to vector<18x8xf32>
    %cst_117 = arith.constant dense<0.000000e+00> : vector<18x18xf32>
    %222 = tpu.matmul %219, %220, %cst_117 {dimension_numbers = #tpu.dot_dimension_numbers<[1], [1], [0], [0], [0, 0, 1, 0], [], []>} : vector<18x8xf32>, vector<18x8xf32>, vector<18x18xf32> -> vector<18x18xf32>
    %cst_118 = arith.constant dense<0xFF800000> : vector<18xf32>
    %223 = vector.multi_reduction <maximumf>, %222, %cst_118 [1] : vector<18x18xf32> to vector<18xf32>
    %224 = vector.shape_cast %223 : vector<18xf32> to vector<18x1xf32>
    %225 = vector.broadcast %224 : vector<18x1xf32> to vector<18x18xf32>
    %226 = arith.subf %222, %225 : vector<18x18xf32>
    %227 = math.exp %226 : vector<18x18xf32>
    %cst_119 = arith.constant dense<0.000000e+00> : vector<18xf32>
    %228 = vector.multi_reduction <add>, %227, %cst_119 [1] : vector<18x18xf32> to vector<18xf32>
    %229 = vector.shape_cast %228 : vector<18xf32> to vector<18x1xf32>
    %230 = tpu.reciprocal %229 {approx = true} : vector<18x1xf32> -> vector<18x1xf32>
    %231 = vector.broadcast %230 : vector<18x1xf32> to vector<18x18xf32>
    %232 = arith.mulf %227, %231 : vector<18x18xf32>
    %cst_120 = arith.constant dense<0.000000e+00> : vector<18x8xf32>
    %233 = tpu.matmul %232, %221, %cst_120 {dimension_numbers = #tpu.dot_dimension_numbers<[1], [0], [0], [1], [0, 0, 1, 1], [], []>} : vector<18x18xf32>, vector<18x8xf32>, vector<18x8xf32> -> vector<18x8xf32>
    %234 = vector.extract_strided_slice %34 {offsets = [8, 0], sizes = [8, 32], strides = [1, 1]} : vector<32x32xf32> to vector<8x32xf32>
    %cst_121 = arith.constant dense<0.000000e+00> : vector<18x32xf32>
    %235 = tpu.matmul %233, %234, %cst_121 {dimension_numbers = #tpu.dot_dimension_numbers<[1], [0], [0], [1], [0, 0, 1, 1], [], []>} : vector<18x8xf32>, vector<8x32xf32>, vector<18x32xf32> -> vector<18x32xf32>
    %236 = arith.addf %216, %235 : vector<18x32xf32>
    %237 = vector.extract_strided_slice %195 {offsets = [0, 16], sizes = [18, 8], strides = [1, 1]} : vector<18x96xf32> to vector<18x8xf32>
    %cst_122 = arith.constant 0.353553385 : f32
    %238 = vector.broadcast %cst_122 : f32 to vector<18x8xf32>
    %239 = arith.mulf %237, %238 : vector<18x8xf32>
    %240 = vector.extract_strided_slice %195 {offsets = [0, 48], sizes = [18, 8], strides = [1, 1]} : vector<18x96xf32> to vector<18x8xf32>
    %241 = vector.extract_strided_slice %195 {offsets = [0, 80], sizes = [18, 8], strides = [1, 1]} : vector<18x96xf32> to vector<18x8xf32>
    %cst_123 = arith.constant dense<0.000000e+00> : vector<18x18xf32>
    %242 = tpu.matmul %239, %240, %cst_123 {dimension_numbers = #tpu.dot_dimension_numbers<[1], [1], [0], [0], [0, 0, 1, 0], [], []>} : vector<18x8xf32>, vector<18x8xf32>, vector<18x18xf32> -> vector<18x18xf32>
    %cst_124 = arith.constant dense<0xFF800000> : vector<18xf32>
    %243 = vector.multi_reduction <maximumf>, %242, %cst_124 [1] : vector<18x18xf32> to vector<18xf32>
    %244 = vector.shape_cast %243 : vector<18xf32> to vector<18x1xf32>
    %245 = vector.broadcast %244 : vector<18x1xf32> to vector<18x18xf32>
    %246 = arith.subf %242, %245 : vector<18x18xf32>
    %247 = math.exp %246 : vector<18x18xf32>
    %cst_125 = arith.constant dense<0.000000e+00> : vector<18xf32>
    %248 = vector.multi_reduction <add>, %247, %cst_125 [1] : vector<18x18xf32> to vector<18xf32>
    %249 = vector.shape_cast %248 : vector<18xf32> to vector<18x1xf32>
    %250 = tpu.reciprocal %249 {approx = true} : vector<18x1xf32> -> vector<18x1xf32>
    %251 = vector.broadcast %250 : vector<18x1xf32> to vector<18x18xf32>
    %252 = arith.mulf %247, %251 : vector<18x18xf32>
    %cst_126 = arith.constant dense<0.000000e+00> : vector<18x8xf32>
    %253 = tpu.matmul %252, %241, %cst_126 {dimension_numbers = #tpu.dot_dimension_numbers<[1], [0], [0], [1], [0, 0, 1, 1], [], []>} : vector<18x18xf32>, vector<18x8xf32>, vector<18x8xf32> -> vector<18x8xf32>
    %254 = vector.extract_strided_slice %34 {offsets = [16, 0], sizes = [8, 32], strides = [1, 1]} : vector<32x32xf32> to vector<8x32xf32>
    %cst_127 = arith.constant dense<0.000000e+00> : vector<18x32xf32>
    %255 = tpu.matmul %253, %254, %cst_127 {dimension_numbers = #tpu.dot_dimension_numbers<[1], [0], [0], [1], [0, 0, 1, 1], [], []>} : vector<18x8xf32>, vector<8x32xf32>, vector<18x32xf32> -> vector<18x32xf32>
    %256 = arith.addf %236, %255 : vector<18x32xf32>
    %257 = vector.extract_strided_slice %195 {offsets = [0, 24], sizes = [18, 8], strides = [1, 1]} : vector<18x96xf32> to vector<18x8xf32>
    %cst_128 = arith.constant 0.353553385 : f32
    %258 = vector.broadcast %cst_128 : f32 to vector<18x8xf32>
    %259 = arith.mulf %257, %258 : vector<18x8xf32>
    %260 = vector.extract_strided_slice %195 {offsets = [0, 56], sizes = [18, 8], strides = [1, 1]} : vector<18x96xf32> to vector<18x8xf32>
    %261 = vector.extract_strided_slice %195 {offsets = [0, 88], sizes = [18, 8], strides = [1, 1]} : vector<18x96xf32> to vector<18x8xf32>
    %cst_129 = arith.constant dense<0.000000e+00> : vector<18x18xf32>
    %262 = tpu.matmul %259, %260, %cst_129 {dimension_numbers = #tpu.dot_dimension_numbers<[1], [1], [0], [0], [0, 0, 1, 0], [], []>} : vector<18x8xf32>, vector<18x8xf32>, vector<18x18xf32> -> vector<18x18xf32>
    %cst_130 = arith.constant dense<0xFF800000> : vector<18xf32>
    %263 = vector.multi_reduction <maximumf>, %262, %cst_130 [1] : vector<18x18xf32> to vector<18xf32>
    %264 = vector.shape_cast %263 : vector<18xf32> to vector<18x1xf32>
    %265 = vector.broadcast %264 : vector<18x1xf32> to vector<18x18xf32>
    %266 = arith.subf %262, %265 : vector<18x18xf32>
    %267 = math.exp %266 : vector<18x18xf32>
    %cst_131 = arith.constant dense<0.000000e+00> : vector<18xf32>
    %268 = vector.multi_reduction <add>, %267, %cst_131 [1] : vector<18x18xf32> to vector<18xf32>
    %269 = vector.shape_cast %268 : vector<18xf32> to vector<18x1xf32>
    %270 = tpu.reciprocal %269 {approx = true} : vector<18x1xf32> -> vector<18x1xf32>
    %271 = vector.broadcast %270 : vector<18x1xf32> to vector<18x18xf32>
    %272 = arith.mulf %267, %271 : vector<18x18xf32>
    %cst_132 = arith.constant dense<0.000000e+00> : vector<18x8xf32>
    %273 = tpu.matmul %272, %261, %cst_132 {dimension_numbers = #tpu.dot_dimension_numbers<[1], [0], [0], [1], [0, 0, 1, 1], [], []>} : vector<18x18xf32>, vector<18x8xf32>, vector<18x8xf32> -> vector<18x8xf32>
    %274 = vector.extract_strided_slice %34 {offsets = [24, 0], sizes = [8, 32], strides = [1, 1]} : vector<32x32xf32> to vector<8x32xf32>
    %cst_133 = arith.constant dense<0.000000e+00> : vector<18x32xf32>
    %275 = tpu.matmul %273, %274, %cst_133 {dimension_numbers = #tpu.dot_dimension_numbers<[1], [0], [0], [1], [0, 0, 1, 1], [], []>} : vector<18x8xf32>, vector<8x32xf32>, vector<18x32xf32> -> vector<18x32xf32>
    %276 = arith.addf %256, %275 : vector<18x32xf32>
    %277 = vector.broadcast %36 : vector<1x32xf32> to vector<18x32xf32>
    %278 = arith.addf %276, %277 : vector<18x32xf32>
    %279 = arith.addf %28, %278 : vector<18x32xf32>
    %cst_134 = arith.constant dense<0.000000e+00> : vector<18xf32>
    %280 = vector.multi_reduction <add>, %279, %cst_134 [1] : vector<18x32xf32> to vector<18xf32>
    %281 = vector.shape_cast %280 : vector<18xf32> to vector<18x1xf32>
    %cst_135 = arith.constant 3.200000e+01 : f32
    %282 = vector.broadcast %cst_135 : f32 to vector<18x1xf32>
    %283 = arith.divf %281, %282 : vector<18x1xf32>
    %284 = vector.broadcast %283 : vector<18x1xf32> to vector<18x32xf32>
    %285 = arith.subf %279, %284 : vector<18x32xf32>
    %286 = arith.mulf %285, %285 : vector<18x32xf32>
    %cst_136 = arith.constant dense<0.000000e+00> : vector<18xf32>
    %287 = vector.multi_reduction <add>, %286, %cst_136 [1] : vector<18x32xf32> to vector<18xf32>
    %288 = vector.shape_cast %287 : vector<18xf32> to vector<18x1xf32>
    %cst_137 = arith.constant 3.200000e+01 : f32
    %289 = vector.broadcast %cst_137 : f32 to vector<18x1xf32>
    %290 = arith.divf %288, %289 : vector<18x1xf32>
    %291 = vector.broadcast %283 : vector<18x1xf32> to vector<18x32xf32>
    %292 = arith.subf %279, %291 : vector<18x32xf32>
    %cst_138 = arith.constant 9.99999974E-6 : f32
    %293 = vector.broadcast %cst_138 : f32 to vector<18x1xf32>
    %294 = arith.addf %290, %293 : vector<18x1xf32>
    %295 = math.rsqrt %294 : vector<18x1xf32>
    %296 = vector.broadcast %295 : vector<18x1xf32> to vector<18x32xf32>
    %297 = arith.mulf %292, %296 : vector<18x32xf32>
    %298 = vector.broadcast %38 : vector<1x32xf32> to vector<18x32xf32>
    %299 = arith.mulf %297, %298 : vector<18x32xf32>
    %300 = vector.broadcast %40 : vector<1x32xf32> to vector<18x32xf32>
    %301 = arith.addf %299, %300 : vector<18x32xf32>
    %cst_139 = arith.constant dense<0.000000e+00> : vector<18x512xf32>
    %302 = tpu.matmul %301, %42, %cst_139 {dimension_numbers = #tpu.dot_dimension_numbers<[1], [0], [0], [1], [0, 0, 1, 1], [], []>} : vector<18x32xf32>, vector<32x512xf32>, vector<18x512xf32> -> vector<18x512xf32>
    %303 = vector.broadcast %44 : vector<1x512xf32> to vector<18x512xf32>
    %304 = arith.addf %302, %303 : vector<18x512xf32>
    %cst_140 = arith.constant 0.000000e+00 : f32
    %305 = vector.broadcast %cst_140 : f32 to vector<18x512xf32>
    %306 = arith.maximumf %304, %305 : vector<18x512xf32>
    %cst_141 = arith.constant dense<0.000000e+00> : vector<18x32xf32>
    %307 = tpu.matmul %306, %46, %cst_141 {dimension_numbers = #tpu.dot_dimension_numbers<[1], [0], [0], [1], [0, 0, 1, 1], [], []>} : vector<18x512xf32>, vector<512x32xf32>, vector<18x32xf32> -> vector<18x32xf32>
    %308 = vector.broadcast %48 : vector<1x32xf32> to vector<18x32xf32>
    %309 = arith.addf %307, %308 : vector<18x32xf32>
    %310 = arith.addf %301, %309 : vector<18x32xf32>
    %cst_142 = arith.constant dense<0.000000e+00> : vector<18xf32>
    %311 = vector.multi_reduction <add>, %310, %cst_142 [1] : vector<18x32xf32> to vector<18xf32>
    %312 = vector.shape_cast %311 : vector<18xf32> to vector<18x1xf32>
    %cst_143 = arith.constant 3.200000e+01 : f32
    %313 = vector.broadcast %cst_143 : f32 to vector<18x1xf32>
    %314 = arith.divf %312, %313 : vector<18x1xf32>
    %315 = vector.broadcast %314 : vector<18x1xf32> to vector<18x32xf32>
    %316 = arith.subf %310, %315 : vector<18x32xf32>
    %317 = arith.mulf %316, %316 : vector<18x32xf32>
    %cst_144 = arith.constant dense<0.000000e+00> : vector<18xf32>
    %318 = vector.multi_reduction <add>, %317, %cst_144 [1] : vector<18x32xf32> to vector<18xf32>
    %319 = vector.shape_cast %318 : vector<18xf32> to vector<18x1xf32>
    %cst_145 = arith.constant 3.200000e+01 : f32
    %320 = vector.broadcast %cst_145 : f32 to vector<18x1xf32>
    %321 = arith.divf %319, %320 : vector<18x1xf32>
    %322 = vector.broadcast %314 : vector<18x1xf32> to vector<18x32xf32>
    %323 = arith.subf %310, %322 : vector<18x32xf32>
    %cst_146 = arith.constant 9.99999974E-6 : f32
    %324 = vector.broadcast %cst_146 : f32 to vector<18x1xf32>
    %325 = arith.addf %321, %324 : vector<18x1xf32>
    %326 = math.rsqrt %325 : vector<18x1xf32>
    %327 = vector.broadcast %326 : vector<18x1xf32> to vector<18x32xf32>
    %328 = arith.mulf %323, %327 : vector<18x32xf32>
    %329 = vector.broadcast %50 : vector<1x32xf32> to vector<18x32xf32>
    %330 = arith.mulf %328, %329 : vector<18x32xf32>
    %331 = vector.broadcast %52 : vector<1x32xf32> to vector<18x32xf32>
    %332 = arith.addf %330, %331 : vector<18x32xf32>
    %c1_147 = arith.constant 1 : index
    %c0_148 = arith.constant 0 : index
    %c0_149 = arith.constant 0 : index
    %333 = vector.load %arg7[%c1_147, %c0_148, %c0_149] : memref<2x32x96xf32, #tpu.memory_space<vmem>>, vector<1x32x96xf32>
    %334 = vector.shape_cast %333 : vector<1x32x96xf32> to vector<32x96xf32>
    %c1_150 = arith.constant 1 : index
    %c0_151 = arith.constant 0 : index
    %c0_152 = arith.constant 0 : index
    %335 = vector.load %arg8[%c1_150, %c0_151, %c0_152] : memref<2x1x96xf32, #tpu.memory_space<vmem>>, vector<1x1x96xf32>
    %336 = vector.shape_cast %335 : vector<1x1x96xf32> to vector<1x96xf32>
    %c1_153 = arith.constant 1 : index
    %c0_154 = arith.constant 0 : index
    %c0_155 = arith.constant 0 : index
    %337 = vector.load %arg9[%c1_153, %c0_154, %c0_155] : memref<2x32x32xf32, #tpu.memory_space<vmem>>, vector<1x32x32xf32>
    %338 = vector.shape_cast %337 : vector<1x32x32xf32> to vector<32x32xf32>
    %c1_156 = arith.constant 1 : index
    %c0_157 = arith.constant 0 : index
    %c0_158 = arith.constant 0 : index
    %339 = vector.load %arg10[%c1_156, %c0_157, %c0_158] : memref<2x1x32xf32, #tpu.memory_space<vmem>>, vector<1x1x32xf32>
    %340 = vector.shape_cast %339 : vector<1x1x32xf32> to vector<1x32xf32>
    %c1_159 = arith.constant 1 : index
    %c0_160 = arith.constant 0 : index
    %c0_161 = arith.constant 0 : index
    %341 = vector.load %arg11[%c1_159, %c0_160, %c0_161] : memref<2x1x32xf32, #tpu.memory_space<vmem>>, vector<1x1x32xf32>
    %342 = vector.shape_cast %341 : vector<1x1x32xf32> to vector<1x32xf32>
    %c1_162 = arith.constant 1 : index
    %c0_163 = arith.constant 0 : index
    %c0_164 = arith.constant 0 : index
    %343 = vector.load %arg12[%c1_162, %c0_163, %c0_164] : memref<2x1x32xf32, #tpu.memory_space<vmem>>, vector<1x1x32xf32>
    %344 = vector.shape_cast %343 : vector<1x1x32xf32> to vector<1x32xf32>
    %c1_165 = arith.constant 1 : index
    %c0_166 = arith.constant 0 : index
    %c0_167 = arith.constant 0 : index
    %345 = vector.load %arg13[%c1_165, %c0_166, %c0_167] : memref<2x32x512xf32, #tpu.memory_space<vmem>>, vector<1x32x512xf32>
    %346 = vector.shape_cast %345 : vector<1x32x512xf32> to vector<32x512xf32>
    %c1_168 = arith.constant 1 : index
    %c0_169 = arith.constant 0 : index
    %c0_170 = arith.constant 0 : index
    %347 = vector.load %arg14[%c1_168, %c0_169, %c0_170] : memref<2x1x512xf32, #tpu.memory_space<vmem>>, vector<1x1x512xf32>
    %348 = vector.shape_cast %347 : vector<1x1x512xf32> to vector<1x512xf32>
    %c1_171 = arith.constant 1 : index
    %c0_172 = arith.constant 0 : index
    %c0_173 = arith.constant 0 : index
    %349 = vector.load %arg15[%c1_171, %c0_172, %c0_173] : memref<2x512x32xf32, #tpu.memory_space<vmem>>, vector<1x512x32xf32>
    %350 = vector.shape_cast %349 : vector<1x512x32xf32> to vector<512x32xf32>
    %c1_174 = arith.constant 1 : index
    %c0_175 = arith.constant 0 : index
    %c0_176 = arith.constant 0 : index
    %351 = vector.load %arg16[%c1_174, %c0_175, %c0_176] : memref<2x1x32xf32, #tpu.memory_space<vmem>>, vector<1x1x32xf32>
    %352 = vector.shape_cast %351 : vector<1x1x32xf32> to vector<1x32xf32>
    %c1_177 = arith.constant 1 : index
    %c0_178 = arith.constant 0 : index
    %c0_179 = arith.constant 0 : index
    %353 = vector.load %arg17[%c1_177, %c0_178, %c0_179] : memref<2x1x32xf32, #tpu.memory_space<vmem>>, vector<1x1x32xf32>
    %354 = vector.shape_cast %353 : vector<1x1x32xf32> to vector<1x32xf32>
    %c1_180 = arith.constant 1 : index
    %c0_181 = arith.constant 0 : index
    %c0_182 = arith.constant 0 : index
    %355 = vector.load %arg18[%c1_180, %c0_181, %c0_182] : memref<2x1x32xf32, #tpu.memory_space<vmem>>, vector<1x1x32xf32>
    %356 = vector.shape_cast %355 : vector<1x1x32xf32> to vector<1x32xf32>
    %cst_183 = arith.constant dense<0.000000e+00> : vector<18x96xf32>
    %357 = tpu.matmul %192, %334, %cst_183 {dimension_numbers = #tpu.dot_dimension_numbers<[1], [0], [0], [1], [0, 0, 1, 1], [], []>} : vector<18x32xf32>, vector<32x96xf32>, vector<18x96xf32> -> vector<18x96xf32>
    %358 = vector.broadcast %336 : vector<1x96xf32> to vector<18x96xf32>
    %359 = arith.addf %357, %358 : vector<18x96xf32>
    %cst_184 = arith.constant 0.000000e+00 : f32
    %360 = vector.broadcast %cst_184 : f32 to vector<18x32xf32>
    %361 = vector.extract_strided_slice %359 {offsets = [0, 0], sizes = [18, 8], strides = [1, 1]} : vector<18x96xf32> to vector<18x8xf32>
    %cst_185 = arith.constant 0.353553385 : f32
    %362 = vector.broadcast %cst_185 : f32 to vector<18x8xf32>
    %363 = arith.mulf %361, %362 : vector<18x8xf32>
    %364 = vector.extract_strided_slice %359 {offsets = [0, 32], sizes = [18, 8], strides = [1, 1]} : vector<18x96xf32> to vector<18x8xf32>
    %365 = vector.extract_strided_slice %359 {offsets = [0, 64], sizes = [18, 8], strides = [1, 1]} : vector<18x96xf32> to vector<18x8xf32>
    %cst_186 = arith.constant dense<0.000000e+00> : vector<18x18xf32>
    %366 = tpu.matmul %363, %364, %cst_186 {dimension_numbers = #tpu.dot_dimension_numbers<[1], [1], [0], [0], [0, 0, 1, 0], [], []>} : vector<18x8xf32>, vector<18x8xf32>, vector<18x18xf32> -> vector<18x18xf32>
    %cst_187 = arith.constant dense<0xFF800000> : vector<18xf32>
    %367 = vector.multi_reduction <maximumf>, %366, %cst_187 [1] : vector<18x18xf32> to vector<18xf32>
    %368 = vector.shape_cast %367 : vector<18xf32> to vector<18x1xf32>
    %369 = vector.broadcast %368 : vector<18x1xf32> to vector<18x18xf32>
    %370 = arith.subf %366, %369 : vector<18x18xf32>
    %371 = math.exp %370 : vector<18x18xf32>
    %cst_188 = arith.constant dense<0.000000e+00> : vector<18xf32>
    %372 = vector.multi_reduction <add>, %371, %cst_188 [1] : vector<18x18xf32> to vector<18xf32>
    %373 = vector.shape_cast %372 : vector<18xf32> to vector<18x1xf32>
    %374 = tpu.reciprocal %373 {approx = true} : vector<18x1xf32> -> vector<18x1xf32>
    %375 = vector.broadcast %374 : vector<18x1xf32> to vector<18x18xf32>
    %376 = arith.mulf %371, %375 : vector<18x18xf32>
    %cst_189 = arith.constant dense<0.000000e+00> : vector<18x8xf32>
    %377 = tpu.matmul %376, %365, %cst_189 {dimension_numbers = #tpu.dot_dimension_numbers<[1], [0], [0], [1], [0, 0, 1, 1], [], []>} : vector<18x18xf32>, vector<18x8xf32>, vector<18x8xf32> -> vector<18x8xf32>
    %378 = vector.extract_strided_slice %338 {offsets = [0, 0], sizes = [8, 32], strides = [1, 1]} : vector<32x32xf32> to vector<8x32xf32>
    %cst_190 = arith.constant dense<0.000000e+00> : vector<18x32xf32>
    %379 = tpu.matmul %377, %378, %cst_190 {dimension_numbers = #tpu.dot_dimension_numbers<[1], [0], [0], [1], [0, 0, 1, 1], [], []>} : vector<18x8xf32>, vector<8x32xf32>, vector<18x32xf32> -> vector<18x32xf32>
    %380 = arith.addf %360, %379 : vector<18x32xf32>
    %381 = vector.extract_strided_slice %359 {offsets = [0, 8], sizes = [18, 8], strides = [1, 1]} : vector<18x96xf32> to vector<18x8xf32>
    %cst_191 = arith.constant 0.353553385 : f32
    %382 = vector.broadcast %cst_191 : f32 to vector<18x8xf32>
    %383 = arith.mulf %381, %382 : vector<18x8xf32>
    %384 = vector.extract_strided_slice %359 {offsets = [0, 40], sizes = [18, 8], strides = [1, 1]} : vector<18x96xf32> to vector<18x8xf32>
    %385 = vector.extract_strided_slice %359 {offsets = [0, 72], sizes = [18, 8], strides = [1, 1]} : vector<18x96xf32> to vector<18x8xf32>
    %cst_192 = arith.constant dense<0.000000e+00> : vector<18x18xf32>
    %386 = tpu.matmul %383, %384, %cst_192 {dimension_numbers = #tpu.dot_dimension_numbers<[1], [1], [0], [0], [0, 0, 1, 0], [], []>} : vector<18x8xf32>, vector<18x8xf32>, vector<18x18xf32> -> vector<18x18xf32>
    %cst_193 = arith.constant dense<0xFF800000> : vector<18xf32>
    %387 = vector.multi_reduction <maximumf>, %386, %cst_193 [1] : vector<18x18xf32> to vector<18xf32>
    %388 = vector.shape_cast %387 : vector<18xf32> to vector<18x1xf32>
    %389 = vector.broadcast %388 : vector<18x1xf32> to vector<18x18xf32>
    %390 = arith.subf %386, %389 : vector<18x18xf32>
    %391 = math.exp %390 : vector<18x18xf32>
    %cst_194 = arith.constant dense<0.000000e+00> : vector<18xf32>
    %392 = vector.multi_reduction <add>, %391, %cst_194 [1] : vector<18x18xf32> to vector<18xf32>
    %393 = vector.shape_cast %392 : vector<18xf32> to vector<18x1xf32>
    %394 = tpu.reciprocal %393 {approx = true} : vector<18x1xf32> -> vector<18x1xf32>
    %395 = vector.broadcast %394 : vector<18x1xf32> to vector<18x18xf32>
    %396 = arith.mulf %391, %395 : vector<18x18xf32>
    %cst_195 = arith.constant dense<0.000000e+00> : vector<18x8xf32>
    %397 = tpu.matmul %396, %385, %cst_195 {dimension_numbers = #tpu.dot_dimension_numbers<[1], [0], [0], [1], [0, 0, 1, 1], [], []>} : vector<18x18xf32>, vector<18x8xf32>, vector<18x8xf32> -> vector<18x8xf32>
    %398 = vector.extract_strided_slice %338 {offsets = [8, 0], sizes = [8, 32], strides = [1, 1]} : vector<32x32xf32> to vector<8x32xf32>
    %cst_196 = arith.constant dense<0.000000e+00> : vector<18x32xf32>
    %399 = tpu.matmul %397, %398, %cst_196 {dimension_numbers = #tpu.dot_dimension_numbers<[1], [0], [0], [1], [0, 0, 1, 1], [], []>} : vector<18x8xf32>, vector<8x32xf32>, vector<18x32xf32> -> vector<18x32xf32>
    %400 = arith.addf %380, %399 : vector<18x32xf32>
    %401 = vector.extract_strided_slice %359 {offsets = [0, 16], sizes = [18, 8], strides = [1, 1]} : vector<18x96xf32> to vector<18x8xf32>
    %cst_197 = arith.constant 0.353553385 : f32
    %402 = vector.broadcast %cst_197 : f32 to vector<18x8xf32>
    %403 = arith.mulf %401, %402 : vector<18x8xf32>
    %404 = vector.extract_strided_slice %359 {offsets = [0, 48], sizes = [18, 8], strides = [1, 1]} : vector<18x96xf32> to vector<18x8xf32>
    %405 = vector.extract_strided_slice %359 {offsets = [0, 80], sizes = [18, 8], strides = [1, 1]} : vector<18x96xf32> to vector<18x8xf32>
    %cst_198 = arith.constant dense<0.000000e+00> : vector<18x18xf32>
    %406 = tpu.matmul %403, %404, %cst_198 {dimension_numbers = #tpu.dot_dimension_numbers<[1], [1], [0], [0], [0, 0, 1, 0], [], []>} : vector<18x8xf32>, vector<18x8xf32>, vector<18x18xf32> -> vector<18x18xf32>
    %cst_199 = arith.constant dense<0xFF800000> : vector<18xf32>
    %407 = vector.multi_reduction <maximumf>, %406, %cst_199 [1] : vector<18x18xf32> to vector<18xf32>
    %408 = vector.shape_cast %407 : vector<18xf32> to vector<18x1xf32>
    %409 = vector.broadcast %408 : vector<18x1xf32> to vector<18x18xf32>
    %410 = arith.subf %406, %409 : vector<18x18xf32>
    %411 = math.exp %410 : vector<18x18xf32>
    %cst_200 = arith.constant dense<0.000000e+00> : vector<18xf32>
    %412 = vector.multi_reduction <add>, %411, %cst_200 [1] : vector<18x18xf32> to vector<18xf32>
    %413 = vector.shape_cast %412 : vector<18xf32> to vector<18x1xf32>
    %414 = tpu.reciprocal %413 {approx = true} : vector<18x1xf32> -> vector<18x1xf32>
    %415 = vector.broadcast %414 : vector<18x1xf32> to vector<18x18xf32>
    %416 = arith.mulf %411, %415 : vector<18x18xf32>
    %cst_201 = arith.constant dense<0.000000e+00> : vector<18x8xf32>
    %417 = tpu.matmul %416, %405, %cst_201 {dimension_numbers = #tpu.dot_dimension_numbers<[1], [0], [0], [1], [0, 0, 1, 1], [], []>} : vector<18x18xf32>, vector<18x8xf32>, vector<18x8xf32> -> vector<18x8xf32>
    %418 = vector.extract_strided_slice %338 {offsets = [16, 0], sizes = [8, 32], strides = [1, 1]} : vector<32x32xf32> to vector<8x32xf32>
    %cst_202 = arith.constant dense<0.000000e+00> : vector<18x32xf32>
    %419 = tpu.matmul %417, %418, %cst_202 {dimension_numbers = #tpu.dot_dimension_numbers<[1], [0], [0], [1], [0, 0, 1, 1], [], []>} : vector<18x8xf32>, vector<8x32xf32>, vector<18x32xf32> -> vector<18x32xf32>
    %420 = arith.addf %400, %419 : vector<18x32xf32>
    %421 = vector.extract_strided_slice %359 {offsets = [0, 24], sizes = [18, 8], strides = [1, 1]} : vector<18x96xf32> to vector<18x8xf32>
    %cst_203 = arith.constant 0.353553385 : f32
    %422 = vector.broadcast %cst_203 : f32 to vector<18x8xf32>
    %423 = arith.mulf %421, %422 : vector<18x8xf32>
    %424 = vector.extract_strided_slice %359 {offsets = [0, 56], sizes = [18, 8], strides = [1, 1]} : vector<18x96xf32> to vector<18x8xf32>
    %425 = vector.extract_strided_slice %359 {offsets = [0, 88], sizes = [18, 8], strides = [1, 1]} : vector<18x96xf32> to vector<18x8xf32>
    %cst_204 = arith.constant dense<0.000000e+00> : vector<18x18xf32>
    %426 = tpu.matmul %423, %424, %cst_204 {dimension_numbers = #tpu.dot_dimension_numbers<[1], [1], [0], [0], [0, 0, 1, 0], [], []>} : vector<18x8xf32>, vector<18x8xf32>, vector<18x18xf32> -> vector<18x18xf32>
    %cst_205 = arith.constant dense<0xFF800000> : vector<18xf32>
    %427 = vector.multi_reduction <maximumf>, %426, %cst_205 [1] : vector<18x18xf32> to vector<18xf32>
    %428 = vector.shape_cast %427 : vector<18xf32> to vector<18x1xf32>
    %429 = vector.broadcast %428 : vector<18x1xf32> to vector<18x18xf32>
    %430 = arith.subf %426, %429 : vector<18x18xf32>
    %431 = math.exp %430 : vector<18x18xf32>
    %cst_206 = arith.constant dense<0.000000e+00> : vector<18xf32>
    %432 = vector.multi_reduction <add>, %431, %cst_206 [1] : vector<18x18xf32> to vector<18xf32>
    %433 = vector.shape_cast %432 : vector<18xf32> to vector<18x1xf32>
    %434 = tpu.reciprocal %433 {approx = true} : vector<18x1xf32> -> vector<18x1xf32>
    %435 = vector.broadcast %434 : vector<18x1xf32> to vector<18x18xf32>
    %436 = arith.mulf %431, %435 : vector<18x18xf32>
    %cst_207 = arith.constant dense<0.000000e+00> : vector<18x8xf32>
    %437 = tpu.matmul %436, %425, %cst_207 {dimension_numbers = #tpu.dot_dimension_numbers<[1], [0], [0], [1], [0, 0, 1, 1], [], []>} : vector<18x18xf32>, vector<18x8xf32>, vector<18x8xf32> -> vector<18x8xf32>
    %438 = vector.extract_strided_slice %338 {offsets = [24, 0], sizes = [8, 32], strides = [1, 1]} : vector<32x32xf32> to vector<8x32xf32>
    %cst_208 = arith.constant dense<0.000000e+00> : vector<18x32xf32>
    %439 = tpu.matmul %437, %438, %cst_208 {dimension_numbers = #tpu.dot_dimension_numbers<[1], [0], [0], [1], [0, 0, 1, 1], [], []>} : vector<18x8xf32>, vector<8x32xf32>, vector<18x32xf32> -> vector<18x32xf32>
    %440 = arith.addf %420, %439 : vector<18x32xf32>
    %441 = vector.broadcast %340 : vector<1x32xf32> to vector<18x32xf32>
    %442 = arith.addf %440, %441 : vector<18x32xf32>
    %443 = arith.addf %192, %442 : vector<18x32xf32>
    %cst_209 = arith.constant dense<0.000000e+00> : vector<18xf32>
    %444 = vector.multi_reduction <add>, %443, %cst_209 [1] : vector<18x32xf32> to vector<18xf32>
    %445 = vector.shape_cast %444 : vector<18xf32> to vector<18x1xf32>
    %cst_210 = arith.constant 3.200000e+01 : f32
    %446 = vector.broadcast %cst_210 : f32 to vector<18x1xf32>
    %447 = arith.divf %445, %446 : vector<18x1xf32>
    %448 = vector.broadcast %447 : vector<18x1xf32> to vector<18x32xf32>
    %449 = arith.subf %443, %448 : vector<18x32xf32>
    %450 = arith.mulf %449, %449 : vector<18x32xf32>
    %cst_211 = arith.constant dense<0.000000e+00> : vector<18xf32>
    %451 = vector.multi_reduction <add>, %450, %cst_211 [1] : vector<18x32xf32> to vector<18xf32>
    %452 = vector.shape_cast %451 : vector<18xf32> to vector<18x1xf32>
    %cst_212 = arith.constant 3.200000e+01 : f32
    %453 = vector.broadcast %cst_212 : f32 to vector<18x1xf32>
    %454 = arith.divf %452, %453 : vector<18x1xf32>
    %455 = vector.broadcast %447 : vector<18x1xf32> to vector<18x32xf32>
    %456 = arith.subf %443, %455 : vector<18x32xf32>
    %cst_213 = arith.constant 9.99999974E-6 : f32
    %457 = vector.broadcast %cst_213 : f32 to vector<18x1xf32>
    %458 = arith.addf %454, %457 : vector<18x1xf32>
    %459 = math.rsqrt %458 : vector<18x1xf32>
    %460 = vector.broadcast %459 : vector<18x1xf32> to vector<18x32xf32>
    %461 = arith.mulf %456, %460 : vector<18x32xf32>
    %462 = vector.broadcast %342 : vector<1x32xf32> to vector<18x32xf32>
    %463 = arith.mulf %461, %462 : vector<18x32xf32>
    %464 = vector.broadcast %344 : vector<1x32xf32> to vector<18x32xf32>
    %465 = arith.addf %463, %464 : vector<18x32xf32>
    %cst_214 = arith.constant dense<0.000000e+00> : vector<18x512xf32>
    %466 = tpu.matmul %465, %346, %cst_214 {dimension_numbers = #tpu.dot_dimension_numbers<[1], [0], [0], [1], [0, 0, 1, 1], [], []>} : vector<18x32xf32>, vector<32x512xf32>, vector<18x512xf32> -> vector<18x512xf32>
    %467 = vector.broadcast %348 : vector<1x512xf32> to vector<18x512xf32>
    %468 = arith.addf %466, %467 : vector<18x512xf32>
    %cst_215 = arith.constant 0.000000e+00 : f32
    %469 = vector.broadcast %cst_215 : f32 to vector<18x512xf32>
    %470 = arith.maximumf %468, %469 : vector<18x512xf32>
    %cst_216 = arith.constant dense<0.000000e+00> : vector<18x32xf32>
    %471 = tpu.matmul %470, %350, %cst_216 {dimension_numbers = #tpu.dot_dimension_numbers<[1], [0], [0], [1], [0, 0, 1, 1], [], []>} : vector<18x512xf32>, vector<512x32xf32>, vector<18x32xf32> -> vector<18x32xf32>
    %472 = vector.broadcast %352 : vector<1x32xf32> to vector<18x32xf32>
    %473 = arith.addf %471, %472 : vector<18x32xf32>
    %474 = arith.addf %465, %473 : vector<18x32xf32>
    %cst_217 = arith.constant dense<0.000000e+00> : vector<18xf32>
    %475 = vector.multi_reduction <add>, %474, %cst_217 [1] : vector<18x32xf32> to vector<18xf32>
    %476 = vector.shape_cast %475 : vector<18xf32> to vector<18x1xf32>
    %cst_218 = arith.constant 3.200000e+01 : f32
    %477 = vector.broadcast %cst_218 : f32 to vector<18x1xf32>
    %478 = arith.divf %476, %477 : vector<18x1xf32>
    %479 = vector.broadcast %478 : vector<18x1xf32> to vector<18x32xf32>
    %480 = arith.subf %474, %479 : vector<18x32xf32>
    %481 = arith.mulf %480, %480 : vector<18x32xf32>
    %cst_219 = arith.constant dense<0.000000e+00> : vector<18xf32>
    %482 = vector.multi_reduction <add>, %481, %cst_219 [1] : vector<18x32xf32> to vector<18xf32>
    %483 = vector.shape_cast %482 : vector<18xf32> to vector<18x1xf32>
    %cst_220 = arith.constant 3.200000e+01 : f32
    %484 = vector.broadcast %cst_220 : f32 to vector<18x1xf32>
    %485 = arith.divf %483, %484 : vector<18x1xf32>
    %486 = vector.broadcast %478 : vector<18x1xf32> to vector<18x32xf32>
    %487 = arith.subf %474, %486 : vector<18x32xf32>
    %cst_221 = arith.constant 9.99999974E-6 : f32
    %488 = vector.broadcast %cst_221 : f32 to vector<18x1xf32>
    %489 = arith.addf %485, %488 : vector<18x1xf32>
    %490 = math.rsqrt %489 : vector<18x1xf32>
    %491 = vector.broadcast %490 : vector<18x1xf32> to vector<18x32xf32>
    %492 = arith.mulf %487, %491 : vector<18x32xf32>
    %493 = vector.broadcast %354 : vector<1x32xf32> to vector<18x32xf32>
    %494 = arith.mulf %492, %493 : vector<18x32xf32>
    %495 = vector.broadcast %356 : vector<1x32xf32> to vector<18x32xf32>
    %496 = arith.addf %494, %495 : vector<18x32xf32>
    %cst_222 = arith.constant dense<0.000000e+00> : vector<18x96xf32>
    %497 = tpu.matmul %332, %334, %cst_222 {dimension_numbers = #tpu.dot_dimension_numbers<[1], [0], [0], [1], [0, 0, 1, 1], [], []>} : vector<18x32xf32>, vector<32x96xf32>, vector<18x96xf32> -> vector<18x96xf32>
    %498 = vector.broadcast %336 : vector<1x96xf32> to vector<18x96xf32>
    %499 = arith.addf %497, %498 : vector<18x96xf32>
    %cst_223 = arith.constant 0.000000e+00 : f32
    %500 = vector.broadcast %cst_223 : f32 to vector<18x32xf32>
    %501 = vector.extract_strided_slice %499 {offsets = [0, 0], sizes = [18, 8], strides = [1, 1]} : vector<18x96xf32> to vector<18x8xf32>
    %cst_224 = arith.constant 0.353553385 : f32
    %502 = vector.broadcast %cst_224 : f32 to vector<18x8xf32>
    %503 = arith.mulf %501, %502 : vector<18x8xf32>
    %504 = vector.extract_strided_slice %499 {offsets = [0, 32], sizes = [18, 8], strides = [1, 1]} : vector<18x96xf32> to vector<18x8xf32>
    %505 = vector.extract_strided_slice %499 {offsets = [0, 64], sizes = [18, 8], strides = [1, 1]} : vector<18x96xf32> to vector<18x8xf32>
    %cst_225 = arith.constant dense<0.000000e+00> : vector<18x18xf32>
    %506 = tpu.matmul %503, %504, %cst_225 {dimension_numbers = #tpu.dot_dimension_numbers<[1], [1], [0], [0], [0, 0, 1, 0], [], []>} : vector<18x8xf32>, vector<18x8xf32>, vector<18x18xf32> -> vector<18x18xf32>
    %cst_226 = arith.constant dense<0xFF800000> : vector<18xf32>
    %507 = vector.multi_reduction <maximumf>, %506, %cst_226 [1] : vector<18x18xf32> to vector<18xf32>
    %508 = vector.shape_cast %507 : vector<18xf32> to vector<18x1xf32>
    %509 = vector.broadcast %508 : vector<18x1xf32> to vector<18x18xf32>
    %510 = arith.subf %506, %509 : vector<18x18xf32>
    %511 = math.exp %510 : vector<18x18xf32>
    %cst_227 = arith.constant dense<0.000000e+00> : vector<18xf32>
    %512 = vector.multi_reduction <add>, %511, %cst_227 [1] : vector<18x18xf32> to vector<18xf32>
    %513 = vector.shape_cast %512 : vector<18xf32> to vector<18x1xf32>
    %514 = tpu.reciprocal %513 {approx = true} : vector<18x1xf32> -> vector<18x1xf32>
    %515 = vector.broadcast %514 : vector<18x1xf32> to vector<18x18xf32>
    %516 = arith.mulf %511, %515 : vector<18x18xf32>
    %cst_228 = arith.constant dense<0.000000e+00> : vector<18x8xf32>
    %517 = tpu.matmul %516, %505, %cst_228 {dimension_numbers = #tpu.dot_dimension_numbers<[1], [0], [0], [1], [0, 0, 1, 1], [], []>} : vector<18x18xf32>, vector<18x8xf32>, vector<18x8xf32> -> vector<18x8xf32>
    %518 = vector.extract_strided_slice %338 {offsets = [0, 0], sizes = [8, 32], strides = [1, 1]} : vector<32x32xf32> to vector<8x32xf32>
    %cst_229 = arith.constant dense<0.000000e+00> : vector<18x32xf32>
    %519 = tpu.matmul %517, %518, %cst_229 {dimension_numbers = #tpu.dot_dimension_numbers<[1], [0], [0], [1], [0, 0, 1, 1], [], []>} : vector<18x8xf32>, vector<8x32xf32>, vector<18x32xf32> -> vector<18x32xf32>
    %520 = arith.addf %500, %519 : vector<18x32xf32>
    %521 = vector.extract_strided_slice %499 {offsets = [0, 8], sizes = [18, 8], strides = [1, 1]} : vector<18x96xf32> to vector<18x8xf32>
    %cst_230 = arith.constant 0.353553385 : f32
    %522 = vector.broadcast %cst_230 : f32 to vector<18x8xf32>
    %523 = arith.mulf %521, %522 : vector<18x8xf32>
    %524 = vector.extract_strided_slice %499 {offsets = [0, 40], sizes = [18, 8], strides = [1, 1]} : vector<18x96xf32> to vector<18x8xf32>
    %525 = vector.extract_strided_slice %499 {offsets = [0, 72], sizes = [18, 8], strides = [1, 1]} : vector<18x96xf32> to vector<18x8xf32>
    %cst_231 = arith.constant dense<0.000000e+00> : vector<18x18xf32>
    %526 = tpu.matmul %523, %524, %cst_231 {dimension_numbers = #tpu.dot_dimension_numbers<[1], [1], [0], [0], [0, 0, 1, 0], [], []>} : vector<18x8xf32>, vector<18x8xf32>, vector<18x18xf32> -> vector<18x18xf32>
    %cst_232 = arith.constant dense<0xFF800000> : vector<18xf32>
    %527 = vector.multi_reduction <maximumf>, %526, %cst_232 [1] : vector<18x18xf32> to vector<18xf32>
    %528 = vector.shape_cast %527 : vector<18xf32> to vector<18x1xf32>
    %529 = vector.broadcast %528 : vector<18x1xf32> to vector<18x18xf32>
    %530 = arith.subf %526, %529 : vector<18x18xf32>
    %531 = math.exp %530 : vector<18x18xf32>
    %cst_233 = arith.constant dense<0.000000e+00> : vector<18xf32>
    %532 = vector.multi_reduction <add>, %531, %cst_233 [1] : vector<18x18xf32> to vector<18xf32>
    %533 = vector.shape_cast %532 : vector<18xf32> to vector<18x1xf32>
    %534 = tpu.reciprocal %533 {approx = true} : vector<18x1xf32> -> vector<18x1xf32>
    %535 = vector.broadcast %534 : vector<18x1xf32> to vector<18x18xf32>
    %536 = arith.mulf %531, %535 : vector<18x18xf32>
    %cst_234 = arith.constant dense<0.000000e+00> : vector<18x8xf32>
    %537 = tpu.matmul %536, %525, %cst_234 {dimension_numbers = #tpu.dot_dimension_numbers<[1], [0], [0], [1], [0, 0, 1, 1], [], []>} : vector<18x18xf32>, vector<18x8xf32>, vector<18x8xf32> -> vector<18x8xf32>
    %538 = vector.extract_strided_slice %338 {offsets = [8, 0], sizes = [8, 32], strides = [1, 1]} : vector<32x32xf32> to vector<8x32xf32>
    %cst_235 = arith.constant dense<0.000000e+00> : vector<18x32xf32>
    %539 = tpu.matmul %537, %538, %cst_235 {dimension_numbers = #tpu.dot_dimension_numbers<[1], [0], [0], [1], [0, 0, 1, 1], [], []>} : vector<18x8xf32>, vector<8x32xf32>, vector<18x32xf32> -> vector<18x32xf32>
    %540 = arith.addf %520, %539 : vector<18x32xf32>
    %541 = vector.extract_strided_slice %499 {offsets = [0, 16], sizes = [18, 8], strides = [1, 1]} : vector<18x96xf32> to vector<18x8xf32>
    %cst_236 = arith.constant 0.353553385 : f32
    %542 = vector.broadcast %cst_236 : f32 to vector<18x8xf32>
    %543 = arith.mulf %541, %542 : vector<18x8xf32>
    %544 = vector.extract_strided_slice %499 {offsets = [0, 48], sizes = [18, 8], strides = [1, 1]} : vector<18x96xf32> to vector<18x8xf32>
    %545 = vector.extract_strided_slice %499 {offsets = [0, 80], sizes = [18, 8], strides = [1, 1]} : vector<18x96xf32> to vector<18x8xf32>
    %cst_237 = arith.constant dense<0.000000e+00> : vector<18x18xf32>
    %546 = tpu.matmul %543, %544, %cst_237 {dimension_numbers = #tpu.dot_dimension_numbers<[1], [1], [0], [0], [0, 0, 1, 0], [], []>} : vector<18x8xf32>, vector<18x8xf32>, vector<18x18xf32> -> vector<18x18xf32>
    %cst_238 = arith.constant dense<0xFF800000> : vector<18xf32>
    %547 = vector.multi_reduction <maximumf>, %546, %cst_238 [1] : vector<18x18xf32> to vector<18xf32>
    %548 = vector.shape_cast %547 : vector<18xf32> to vector<18x1xf32>
    %549 = vector.broadcast %548 : vector<18x1xf32> to vector<18x18xf32>
    %550 = arith.subf %546, %549 : vector<18x18xf32>
    %551 = math.exp %550 : vector<18x18xf32>
    %cst_239 = arith.constant dense<0.000000e+00> : vector<18xf32>
    %552 = vector.multi_reduction <add>, %551, %cst_239 [1] : vector<18x18xf32> to vector<18xf32>
    %553 = vector.shape_cast %552 : vector<18xf32> to vector<18x1xf32>
    %554 = tpu.reciprocal %553 {approx = true} : vector<18x1xf32> -> vector<18x1xf32>
    %555 = vector.broadcast %554 : vector<18x1xf32> to vector<18x18xf32>
    %556 = arith.mulf %551, %555 : vector<18x18xf32>
    %cst_240 = arith.constant dense<0.000000e+00> : vector<18x8xf32>
    %557 = tpu.matmul %556, %545, %cst_240 {dimension_numbers = #tpu.dot_dimension_numbers<[1], [0], [0], [1], [0, 0, 1, 1], [], []>} : vector<18x18xf32>, vector<18x8xf32>, vector<18x8xf32> -> vector<18x8xf32>
    %558 = vector.extract_strided_slice %338 {offsets = [16, 0], sizes = [8, 32], strides = [1, 1]} : vector<32x32xf32> to vector<8x32xf32>
    %cst_241 = arith.constant dense<0.000000e+00> : vector<18x32xf32>
    %559 = tpu.matmul %557, %558, %cst_241 {dimension_numbers = #tpu.dot_dimension_numbers<[1], [0], [0], [1], [0, 0, 1, 1], [], []>} : vector<18x8xf32>, vector<8x32xf32>, vector<18x32xf32> -> vector<18x32xf32>
    %560 = arith.addf %540, %559 : vector<18x32xf32>
    %561 = vector.extract_strided_slice %499 {offsets = [0, 24], sizes = [18, 8], strides = [1, 1]} : vector<18x96xf32> to vector<18x8xf32>
    %cst_242 = arith.constant 0.353553385 : f32
    %562 = vector.broadcast %cst_242 : f32 to vector<18x8xf32>
    %563 = arith.mulf %561, %562 : vector<18x8xf32>
    %564 = vector.extract_strided_slice %499 {offsets = [0, 56], sizes = [18, 8], strides = [1, 1]} : vector<18x96xf32> to vector<18x8xf32>
    %565 = vector.extract_strided_slice %499 {offsets = [0, 88], sizes = [18, 8], strides = [1, 1]} : vector<18x96xf32> to vector<18x8xf32>
    %cst_243 = arith.constant dense<0.000000e+00> : vector<18x18xf32>
    %566 = tpu.matmul %563, %564, %cst_243 {dimension_numbers = #tpu.dot_dimension_numbers<[1], [1], [0], [0], [0, 0, 1, 0], [], []>} : vector<18x8xf32>, vector<18x8xf32>, vector<18x18xf32> -> vector<18x18xf32>
    %cst_244 = arith.constant dense<0xFF800000> : vector<18xf32>
    %567 = vector.multi_reduction <maximumf>, %566, %cst_244 [1] : vector<18x18xf32> to vector<18xf32>
    %568 = vector.shape_cast %567 : vector<18xf32> to vector<18x1xf32>
    %569 = vector.broadcast %568 : vector<18x1xf32> to vector<18x18xf32>
    %570 = arith.subf %566, %569 : vector<18x18xf32>
    %571 = math.exp %570 : vector<18x18xf32>
    %cst_245 = arith.constant dense<0.000000e+00> : vector<18xf32>
    %572 = vector.multi_reduction <add>, %571, %cst_245 [1] : vector<18x18xf32> to vector<18xf32>
    %573 = vector.shape_cast %572 : vector<18xf32> to vector<18x1xf32>
    %574 = tpu.reciprocal %573 {approx = true} : vector<18x1xf32> -> vector<18x1xf32>
    %575 = vector.broadcast %574 : vector<18x1xf32> to vector<18x18xf32>
    %576 = arith.mulf %571, %575 : vector<18x18xf32>
    %cst_246 = arith.constant dense<0.000000e+00> : vector<18x8xf32>
    %577 = tpu.matmul %576, %565, %cst_246 {dimension_numbers = #tpu.dot_dimension_numbers<[1], [0], [0], [1], [0, 0, 1, 1], [], []>} : vector<18x18xf32>, vector<18x8xf32>, vector<18x8xf32> -> vector<18x8xf32>
    %578 = vector.extract_strided_slice %338 {offsets = [24, 0], sizes = [8, 32], strides = [1, 1]} : vector<32x32xf32> to vector<8x32xf32>
    %cst_247 = arith.constant dense<0.000000e+00> : vector<18x32xf32>
    %579 = tpu.matmul %577, %578, %cst_247 {dimension_numbers = #tpu.dot_dimension_numbers<[1], [0], [0], [1], [0, 0, 1, 1], [], []>} : vector<18x8xf32>, vector<8x32xf32>, vector<18x32xf32> -> vector<18x32xf32>
    %580 = arith.addf %560, %579 : vector<18x32xf32>
    %581 = vector.broadcast %340 : vector<1x32xf32> to vector<18x32xf32>
    %582 = arith.addf %580, %581 : vector<18x32xf32>
    %583 = arith.addf %332, %582 : vector<18x32xf32>
    %cst_248 = arith.constant dense<0.000000e+00> : vector<18xf32>
    %584 = vector.multi_reduction <add>, %583, %cst_248 [1] : vector<18x32xf32> to vector<18xf32>
    %585 = vector.shape_cast %584 : vector<18xf32> to vector<18x1xf32>
    %cst_249 = arith.constant 3.200000e+01 : f32
    %586 = vector.broadcast %cst_249 : f32 to vector<18x1xf32>
    %587 = arith.divf %585, %586 : vector<18x1xf32>
    %588 = vector.broadcast %587 : vector<18x1xf32> to vector<18x32xf32>
    %589 = arith.subf %583, %588 : vector<18x32xf32>
    %590 = arith.mulf %589, %589 : vector<18x32xf32>
    %cst_250 = arith.constant dense<0.000000e+00> : vector<18xf32>
    %591 = vector.multi_reduction <add>, %590, %cst_250 [1] : vector<18x32xf32> to vector<18xf32>
    %592 = vector.shape_cast %591 : vector<18xf32> to vector<18x1xf32>
    %cst_251 = arith.constant 3.200000e+01 : f32
    %593 = vector.broadcast %cst_251 : f32 to vector<18x1xf32>
    %594 = arith.divf %592, %593 : vector<18x1xf32>
    %595 = vector.broadcast %587 : vector<18x1xf32> to vector<18x32xf32>
    %596 = arith.subf %583, %595 : vector<18x32xf32>
    %cst_252 = arith.constant 9.99999974E-6 : f32
    %597 = vector.broadcast %cst_252 : f32 to vector<18x1xf32>
    %598 = arith.addf %594, %597 : vector<18x1xf32>
    %599 = math.rsqrt %598 : vector<18x1xf32>
    %600 = vector.broadcast %599 : vector<18x1xf32> to vector<18x32xf32>
    %601 = arith.mulf %596, %600 : vector<18x32xf32>
    %602 = vector.broadcast %342 : vector<1x32xf32> to vector<18x32xf32>
    %603 = arith.mulf %601, %602 : vector<18x32xf32>
    %604 = vector.broadcast %344 : vector<1x32xf32> to vector<18x32xf32>
    %605 = arith.addf %603, %604 : vector<18x32xf32>
    %cst_253 = arith.constant dense<0.000000e+00> : vector<18x512xf32>
    %606 = tpu.matmul %605, %346, %cst_253 {dimension_numbers = #tpu.dot_dimension_numbers<[1], [0], [0], [1], [0, 0, 1, 1], [], []>} : vector<18x32xf32>, vector<32x512xf32>, vector<18x512xf32> -> vector<18x512xf32>
    %607 = vector.broadcast %348 : vector<1x512xf32> to vector<18x512xf32>
    %608 = arith.addf %606, %607 : vector<18x512xf32>
    %cst_254 = arith.constant 0.000000e+00 : f32
    %609 = vector.broadcast %cst_254 : f32 to vector<18x512xf32>
    %610 = arith.maximumf %608, %609 : vector<18x512xf32>
    %cst_255 = arith.constant dense<0.000000e+00> : vector<18x32xf32>
    %611 = tpu.matmul %610, %350, %cst_255 {dimension_numbers = #tpu.dot_dimension_numbers<[1], [0], [0], [1], [0, 0, 1, 1], [], []>} : vector<18x512xf32>, vector<512x32xf32>, vector<18x32xf32> -> vector<18x32xf32>
    %612 = vector.broadcast %352 : vector<1x32xf32> to vector<18x32xf32>
    %613 = arith.addf %611, %612 : vector<18x32xf32>
    %614 = arith.addf %605, %613 : vector<18x32xf32>
    %cst_256 = arith.constant dense<0.000000e+00> : vector<18xf32>
    %615 = vector.multi_reduction <add>, %614, %cst_256 [1] : vector<18x32xf32> to vector<18xf32>
    %616 = vector.shape_cast %615 : vector<18xf32> to vector<18x1xf32>
    %cst_257 = arith.constant 3.200000e+01 : f32
    %617 = vector.broadcast %cst_257 : f32 to vector<18x1xf32>
    %618 = arith.divf %616, %617 : vector<18x1xf32>
    %619 = vector.broadcast %618 : vector<18x1xf32> to vector<18x32xf32>
    %620 = arith.subf %614, %619 : vector<18x32xf32>
    %621 = arith.mulf %620, %620 : vector<18x32xf32>
    %cst_258 = arith.constant dense<0.000000e+00> : vector<18xf32>
    %622 = vector.multi_reduction <add>, %621, %cst_258 [1] : vector<18x32xf32> to vector<18xf32>
    %623 = vector.shape_cast %622 : vector<18xf32> to vector<18x1xf32>
    %cst_259 = arith.constant 3.200000e+01 : f32
    %624 = vector.broadcast %cst_259 : f32 to vector<18x1xf32>
    %625 = arith.divf %623, %624 : vector<18x1xf32>
    %626 = vector.broadcast %618 : vector<18x1xf32> to vector<18x32xf32>
    %627 = arith.subf %614, %626 : vector<18x32xf32>
    %cst_260 = arith.constant 9.99999974E-6 : f32
    %628 = vector.broadcast %cst_260 : f32 to vector<18x1xf32>
    %629 = arith.addf %625, %628 : vector<18x1xf32>
    %630 = math.rsqrt %629 : vector<18x1xf32>
    %631 = vector.broadcast %630 : vector<18x1xf32> to vector<18x32xf32>
    %632 = arith.mulf %627, %631 : vector<18x32xf32>
    %633 = vector.broadcast %354 : vector<1x32xf32> to vector<18x32xf32>
    %634 = arith.mulf %632, %633 : vector<18x32xf32>
    %635 = vector.broadcast %356 : vector<1x32xf32> to vector<18x32xf32>
    %636 = arith.addf %634, %635 : vector<18x32xf32>
    %c0_261 = arith.constant 0 : index
    %c0_262 = arith.constant 0 : index
    %637 = vector.load %arg19[%c0_261, %c0_262] : memref<32x10xf32, #tpu.memory_space<vmem>>, vector<32x10xf32>
    %c0_263 = arith.constant 0 : index
    %c0_264 = arith.constant 0 : index
    %638 = vector.load %arg20[%c0_263, %c0_264] : memref<1x10xf32, #tpu.memory_space<vmem>>, vector<1x10xf32>
    %639 = vector.extract_strided_slice %496 {offsets = [0, 0], sizes = [1, 32], strides = [1, 1]} : vector<18x32xf32> to vector<1x32xf32>
    %cst_265 = arith.constant dense<0.000000e+00> : vector<1x10xf32>
    %640 = tpu.matmul %639, %637, %cst_265 {dimension_numbers = #tpu.dot_dimension_numbers<[1], [0], [0], [1], [0, 0, 1, 1], [], []>} : vector<1x32xf32>, vector<32x10xf32>, vector<1x10xf32> -> vector<1x10xf32>
    %641 = arith.addf %640, %638 : vector<1x10xf32>
    %cst_266 = arith.constant dense<0xFF800000> : vector<1xf32>
    %642 = vector.multi_reduction <maximumf>, %641, %cst_266 [1] : vector<1x10xf32> to vector<1xf32>
    %643 = vector.shape_cast %642 : vector<1xf32> to vector<1x1xf32>
    %644 = vector.broadcast %643 : vector<1x1xf32> to vector<1x10xf32>
    %645 = arith.subf %641, %644 : vector<1x10xf32>
    %646 = math.exp %645 : vector<1x10xf32>
    %cst_267 = arith.constant dense<0.000000e+00> : vector<1xf32>
    %647 = vector.multi_reduction <add>, %646, %cst_267 [1] : vector<1x10xf32> to vector<1xf32>
    %648 = vector.shape_cast %647 : vector<1xf32> to vector<1x1xf32>
    %649 = math.log %648 : vector<1x1xf32>
    %650 = vector.broadcast %649 : vector<1x1xf32> to vector<1x10xf32>
    %651 = arith.subf %645, %650 : vector<1x10xf32>
    %c0_268 = arith.constant 0 : index
    %c0_269 = arith.constant 0 : index
    %652 = vector.load %arg21[%c0_268, %c0_269] : memref<2x10xf32, #tpu.memory_space<vmem>>, vector<1x10xf32>
    tpu.vector_store %arg21[%c0_268, %c0_269], %651 {strides = array<i32>} : memref<2x10xf32, #tpu.memory_space<vmem>>, vector<1x10xf32>,
    %653 = vector.extract_strided_slice %636 {offsets = [0, 0], sizes = [1, 32], strides = [1, 1]} : vector<18x32xf32> to vector<1x32xf32>
    %cst_270 = arith.constant dense<0.000000e+00> : vector<1x10xf32>
    %654 = tpu.matmul %653, %637, %cst_270 {dimension_numbers = #tpu.dot_dimension_numbers<[1], [0], [0], [1], [0, 0, 1, 1], [], []>} : vector<1x32xf32>, vector<32x10xf32>, vector<1x10xf32> -> vector<1x10xf32>
    %655 = arith.addf %654, %638 : vector<1x10xf32>
    %cst_271 = arith.constant dense<0xFF800000> : vector<1xf32>
    %656 = vector.multi_reduction <maximumf>, %655, %cst_271 [1] : vector<1x10xf32> to vector<1xf32>
    %657 = vector.shape_cast %656 : vector<1xf32> to vector<1x1xf32>
    %658 = vector.broadcast %657 : vector<1x1xf32> to vector<1x10xf32>
    %659 = arith.subf %655, %658 : vector<1x10xf32>
    %660 = math.exp %659 : vector<1x10xf32>
    %cst_272 = arith.constant dense<0.000000e+00> : vector<1xf32>
    %661 = vector.multi_reduction <add>, %660, %cst_272 [1] : vector<1x10xf32> to vector<1xf32>
    %662 = vector.shape_cast %661 : vector<1xf32> to vector<1x1xf32>
    %663 = math.log %662 : vector<1x1xf32>
    %664 = vector.broadcast %663 : vector<1x1xf32> to vector<1x10xf32>
    %665 = arith.subf %659, %664 : vector<1x10xf32>
    %c1_273 = arith.constant 1 : index
    %c0_274 = arith.constant 0 : index
    %666 = vector.load %arg21[%c1_273, %c0_274] : memref<2x10xf32, #tpu.memory_space<vmem>>, vector<1x10xf32>
    tpu.vector_store %arg21[%c1_273, %c0_274], %665 {strides = array<i32>} : memref<2x10xf32, #tpu.memory_space<vmem>>, vector<1x10xf32>,
    return
  }
}

</mosaic_0001>

<bundles_post_ra>
// kernel: transformer_forward.1
= control target key start
LH: loop header
LB: loop body
LE: loop exit
PB: predicated region body
PF: predicated region fallthrough
CT: control target
= control target key end

     0   :  { %s13538_s0 = inlined_call_operand.vmem [shape: f32[2,16,48], index: 0, kind: input, shape index: {}]   ;;  %s13539_s1 = inlined_call_operand.vmem [shape: f32[2,18], index: 1, kind: input, shape index: {}]   ;;  %s13540_s2 = inlined_call_operand.vmem [shape: f32[48,32], index: 2, kind: input, shape index: {}]   ;;  %s13541_s3 = inlined_call_operand.vmem [shape: f32[1,32], index: 3, kind: input, shape index: {}]   ;;  %s13542_s4 = inlined_call_operand.vmem [shape: f32[18,32], index: 4, kind: input, shape index: {}]   ;;  %s13543_s5 = inlined_call_operand.vmem [shape: f32[1,32], index: 5, kind: input, shape index: {}]   ;;  %s13544_s6 = inlined_call_operand.vmem [shape: f32[1,32], index: 6, kind: input, shape index: {}]   ;;  %s13545_s7 = inlined_call_operand.vmem [shape: f32[2,32,96], index: 7, kind: input, shape index: {}]   ;;  %s13546_s8 = inlined_call_operand.vmem [shape: f32[2,1,96], index: 8, kind: input, shape index: {}]   ;;  %s13547_s9 = inlined_call_operand.vmem [shape: f32[2,32,32], index: 9, kind: input, shape index: {}]   ;;  %s13548_s10 = inlined_call_operand.vmem [shape: f32[2,1,32], index: 10, kind: input, shape index: {}]   ;;  %s13549_s11 = inlined_call_operand.vmem [shape: f32[2,1,32], index: 11, kind: input, shape index: {}]   ;;  %s13550_s12 = inlined_call_operand.vmem [shape: f32[2,1,32], index: 12, kind: input, shape index: {}]   ;;  %s13551_s13 = inlined_call_operand.vmem [shape: f32[2,32,512], index: 13, kind: input, shape index: {}]   ;;  %s13552_s14 = inlined_call_operand.vmem [shape: f32[2,1,512], index: 14, kind: input, shape index: {}]   ;;  %s13553_s15 = inlined_call_operand.vmem [shape: f32[2,512,32], index: 15, kind: input, shape index: {}]   ;;  %s13554_s16 = inlined_call_operand.vmem [shape: f32[2,1,32], index: 16, kind: input, shape index: {}]   ;;  %s13555_s17 = inlined_call_operand.vmem [shape: f32[2,1,32], index: 17, kind: input, shape index: {}]   ;;  %s13556_s18 = inlined_call_operand.vmem [shape: f32[2,1,32], index: 18, kind: input, shape index: {}]   ;;  %s13557_s19 = inlined_call_operand.vmem [shape: f32[32,10], index: 19, kind: input, shape index: {}]   ;;  %s13558_s20 = inlined_call_operand.vmem [shape: f32[1,10], index: 20, kind: input, shape index: {}]   ;;  %s13559_s21 = inlined_call_operand.hbm [shape: f32[2,10], index: 21, kind: output, shape index: {}]  }
   0x1   :  { %13638 = sst [smem:[#allocation26_spill]] %s13538_s0 }
   0x2   :  { %13639 = sst [smem:[#allocation27_spill]] %s13539_s1 }
   0x3   :  { %13640 = sst [smem:[#allocation28_spill]] %s13540_s2 }
   0x4   :  { %13641 = sst [smem:[#allocation29_spill]] %s13541_s3 }
   0x5   :  { %13642 = sst [smem:[#allocation30_spill]] %s13542_s4 }
   0x6   :  { %13643 = sst [smem:[#allocation31_spill]] %s13543_s5 }
   0x7   :  { %13644 = sst [smem:[#allocation32_spill]] %s13559_s21 }
   0x8   :  { %s13645_s26 = sld [smem:[#allocation28_spill]]  ;;  %s13646_s0 = sld [smem:[#allocation30_spill]]  ;;  %v13581_v4 = vmov 0.0|0.0   ;;  %vm10935_vm0 = vmmov 0   ;;  %v13579_v10 = vmov 0.0   ;;  %vm174_vm1 = vcmask 392192  }
   0x9   :  { %9980 = vmatprep.subr.bf16.mxu0 %v13581_v4  ;;  %9201 = vmatprep.mubr.msk.f32.mxu0 %vm10935_vm0, %v13579_v10  ;;  %s13647_s29 = sld [smem:[#allocation26_spill]]  ;;  %vm84_vm2 = vcmask 1041408  }
   0xe   :  { %v159_v0 = vld [vmem:[%s13645_s26] sm:$0xff]  ;;  %v160_v1 = vld [vmem:[%s13645_s26 + $0x8] sm:$0xff]  ;;  %v161_v6 = vld [vmem:[%s13645_s26 + $0x10] sm:$0xff] }
   0xf   :  { %v70_v2 = vld [vmem:[%s13646_s0] sm:$0xff]  ;;  %v9983_v3 = vpack.c.bf16 %v160_v1, %v159_v0  ;;  %v71_v5 = vld [vmem:[%s13646_s0 + $0x8] sm:$0xff]  ;;  %v162_v7 = vld [vmem:[%s13645_s26 + $0x18] sm:$0xff] }
  0x10   :  { %v9981_v8 = vpack.c.bf16 %v71_v5, %v70_v2  ;;  %v9987_v9 = vpack.c.bf16 %v162_v7, %v161_v6  ;;  %v163_v11 = vld [vmem:[%s13645_s26 + $0x20] sm:$0xff]  ;;  %v164_v12 = vld [vmem:[%s13645_s26 + $0x28] sm:$0xff]  ;;  %v72_v14 = vld [vmem:[%s13646_s0 + $0x10] sm:$0x3] }
  0x11   :  { %9984 = vmatprep.subr.bf16.mxu1 %v9983_v3  ;;  %v166_v13 = vld [vmem:[%s13647_s29] sm:$0xff]  ;;  %v9991_v15 = vpack.c.bf16 %v164_v12, %v163_v11 }
  0x12   :  { %9986 = vmatpush3.bf16.msra.mxu1 %v9983_v3  ;;  %9982 = vmatpush3.bf16.msra.mxu0 %v9981_v8 }
  0x13   :  { %9988 = vmatprep.subr.bf16.mxu1 %v9987_v9  ;;  %9199 = vmatprep.subr.mxu0 %v13579_v10 }
  0x14   :  { %26 = vsyncpa [#allocation4], 0  ;;  %9216 = vmatprep.mubr.msk.f32.mxu1 %vm174_vm1, %v166_v13  ;;  %s13648_s22 = sld [smem:[#allocation27_spill]]  ;;  %vm80_vm3 = vcmask 146432   ;;  %v8193_v17 = vld [vmem:[%s13647_s29 + $0x10] sm:$0xff]  ;;  %v167_v18 = vld [vmem:[%s13647_s29 + $0x8] sm:$0xff] }
  0x15   :  { %v8194_v19 = vld [vmem:[%s13647_s29 + $0x18] sm:$0xff]  ;;  %v158_v20 = vld [vmem:[%s13544_s6] sm:$0x1]  ;;  %vm256_vm4 = vcmask 253952   ;;  %v358_v22 = vld [vmem:[%s13545_s7 + $0x8] sm:$0xff]  ;;  %s13649_s0 = sld [smem:[#allocation31_spill]] }
  0x16   :  { %9990 = vmatpush3.bf16.msra.mxu1 %v9987_v9  ;;  %9200 = vmatpush3.msk.msra.mxu0 %vm84_vm2, %v72_v14  ;;  %257 = vst.msk [vmem:[#allocation2] sm:$0x1] %vm256_vm4, %v158_v20  ;;  %v357_v21 = vld [vmem:[%s13545_s7] sm:$0xff]  ;;  %v359_v24 = vld [vmem:[%s13545_s7 + $0x10] sm:$0xff]  ;;  %v360_v25 = vld [vmem:[%s13545_s7 + $0x18] sm:$0xff]  ;;  %s13650_s25 = sld [smem:[#allocation29_spill]] }
  0x17   :  { %9992 = vmatprep.subr.bf16.mxu1 %v9991_v15  ;;  %9996 = vmatprep.subr.bf16.mxu0 %v9983_v3  ;;  %v11127_v23 = vpack.c.bf16 %v358_v22, %v357_v21  ;;  %v11137_v26 = vpack.c.bf16 %v360_v25, %v359_v24  ;;  %vm259_vm5 = vcmask 261120   ;;  %vm350_vm6 = vcmask 254977   ;;  %v8197_v45 = vld [vmem:[%s13546_s8] ss:$0 sm:$0xff]  ;;  %s13614_s28 = smov 88   ;;  %s13616_s4 = smov 96  }
  0x18   :  { %s13612_s30 = smov 120   ;;  %vm560_vm7 = vcmask 64512   ;;  %vm662_vm9 = vcmask 140288   ;;  %s13610_s29 = smov 64   ;;  %vm1877_vm10 = vcmask 254976   ;;  %v10905_v60 = vld [vmem:[%s13547_s9 + $0x38] sm:$0xff] }
  0x19   :  { %vm11201_vm8 = vmpackc.low %vm560_vm7, %vm560_vm7  ;;  %s13575_s26 = smov 56   ;;  %s13573_s5 = smov 80   ;;  %vm8073_vm11 = vcmask 73728  }
  0x1a   :  { %v69_v16 = vld [vmem:[%s13648_s22] sm:$0x3]  ;;  %9994 = vmatpush3.bf16.msra.mxu1 %v9991_v15  ;;  %s13571_s6 = smov 112   ;;  %s13569_s24 = smov 48  }
  0x1b   :  { %9202 = vmatmul.mubr.msk.f32.vlgmr.msra.gmra.mrb[0].mxu0 %vm80_vm3, %v69_v16  ;;  %10007 = vmatprep.subr.bf16.mxu1 %v13581_v4  ;;  %v8187_v27 = vld [vmem:[%s13649_s0] ss:$0 sm:$0xff]  ;;  %s13567_s2 = smov 72   ;;  %s13563_s22 = smov 40  }
  0x1c   :  { %9998 = vmatpush3.bf16.msra.mxu0 %v9983_v3  ;;  %9231 = vmatprep.mubr.msk.f32.mxu0 %vm174_vm1, %v8193_v17  ;;  %v8190_v31 = vld [vmem:[%s13650_s25] ss:$0 sm:$0xff]  ;;  %s13565_s25 = smov 104   ;;  %s13675_s3 = smov 56  }
  0x1d   :  { %10000 = vmatprep.subr.bf16.mxu0 %v9987_v9  ;;  %9217 = vmatmul.mubr.msk.f32.vlgmr.msra.gmra.mrb[0].mxu1 %vm174_vm1, %v167_v18  ;;  %s13676_s23 = smov 80   ;;  %s13681_s1 = smov 40  }
  0x1e   :  { %9242 = vmatprep.mubr.msk.f32.mxu1 %vm10935_vm0, %v13579_v10  ;;  %10009 = vmatpush3.bf16.msra.mxu1 %v11127_v23  ;;  %s13721_s21 = smov 96   ;;  %s13722_s27 = smov 88  }
  0x1f   :  { %10010 = vmatprep.subr.bf16.mxu1 %v13581_v4 }
  0x20   :  { %10002 = vmatpush3.bf16.msra.mxu0 %v9987_v9 }
  0x21   :  { %10004 = vmatprep.subr.bf16.mxu0 %v9991_v15 }
  0x22   :  { %10012 = vmatpush3.bf16.msra.mxu1 %v11137_v26 }
  0x23   :  { %10017 = vmatprep.subr.bf16.mxu1 %v13581_v4 }
  0x24   :  { %10006 = vmatpush3.bf16.msra.mxu0 %v9991_v15 }
  0x25   :  { %10013 = vmatprep.subr.bf16.mxu0 %v13581_v4 }
  0x27   :  { %9232 = vmatmul.mubr.msk.f32.vlgmr.msra.gmra.mrb[2].mxu0 %vm174_vm1, %v8194_v19 }
  0x28   :  { %9257 = vmatprep.mubr.msk.f32.mxu0 %vm10935_vm0, %v13579_v10 }
  0xee   :  { %v154_v28 = vpop.f32.mrb[0].mxu0 }
  0xef   :  { %v155_v29 = vadd.f32 %v8187_v27, %v154_v28  ;;  %v9203_v30 = vpop.f32.mrb[1].mxu0 }
  0xf0   :  { %v9218_v32 = vpop.f32.mrb[0].mxu1 }
  0xf1   :  { %258 = vst.msk [vmem:[#allocation2 + $0x1] sm:$0x1] %vm256_vm4, %v155_v29  ;;  %v253_v33 = vadd.f32 %v9218_v32, %v8190_v31  ;;  %v247_v34 = vpop.f32.mrb[1].mxu1 }
  0xf2   :  { %v248_v35 = vadd.f32 %v8190_v31, %v247_v34 }
  0xf3   :  { %261 = vst.msk [vmem:[#allocation2 + $0xa] sm:$0xff] %vm259_vm5, %v253_v33 }
  0xf4   :  { %260 = vst.msk [vmem:[#allocation2 + $0x2] sm:$0xff] %vm259_vm5, %v248_v35 }
  0xfa   :  { %v9233_v36 = vpop.f32.mrb[2].mxu0  ;;  %v11154_v42 = vld [vmem:[#allocation2 + $0x10] sm:$0x3] }
  0xfb   :  { %v346_v37 = vadd.f32 %v9233_v36, %v8190_v31  ;;  %v340_v38 = vpop.f32.mrb[3].mxu0  ;;  %v11150_v40 = vld [vmem:[#allocation2] sm:$0xff]  ;;  %v11152_v41 = vld [vmem:[#allocation2 + $0x8] sm:$0xff] }
  0xfc   :  { %v341_v39 = vadd.f32 %v8190_v31, %v340_v38  ;;  %349 = vst.msk [vmem:[#allocation2] sm:$0x1] %vm256_vm4, %v158_v20  ;;  %9243 = vmatmul.mubr.msk.f32.vlgmr.msra.gmra.mrb[2].mxu1 %vm259_vm5, %v11150_v40 }
  0xfd   :  { %351 = vst.msk [vmem:[#allocation2] sm:$0x2] %vm350_vm6, %v155_v29  ;;  %9245 = vmatprep.mubr.msk.f32.mxu1 %vm10935_vm0, %v13579_v10 }
  0xfe   :  { %352 = vst.msk [vmem:[#allocation2 + $0x2] sm:$0xff] %vm259_vm5, %v341_v39  ;;  %353 = vst.msk [vmem:[#allocation2 + $0xa] sm:$0xff] %vm259_vm5, %v346_v37 }
 0x100   :  { %9246 = vmatmul.mubr.msk.f32.gmra.mrb[4].mxu1 %vm259_vm5, %v11152_v41 }
 0x101   :  { %9248 = vmatprep.mubr.msk.f32.mxu1 %vm10935_vm0, %v13579_v10 }
 0x104   :  { %9249 = vmatmul.mubr.msk.f32.gmra.mrb[6].mxu1 %vm259_vm5, %v11154_v42 }
 0x105   :  { %9272 = vmatprep.mubr.msk.f32.mxu1 %vm10935_vm0, %v13579_v10 }
 0x1cf   :  { %v534_v43 = vpop.f32.mrb[2].mxu1 }
 0x1d0   :  { %v9244_v44 = vpop.f32.mrb[3].mxu1  ;;  %v535_v47 = vadd.f32 %v8197_v45, %v534_v43 }
 0x1d2   :  { %v11188_v55 = vmul.f32 0.35355338, %v535_v47 }
 0x1d3   :  { %v539_v46 = vpop.f32.mrb[4].mxu1 }
 0x1d4   :  { %v540_v48 = vadd.f32 %v8197_v45, %v539_v46  ;;  %v9247_v49 = vpop.f32.mrb[5].mxu1 }
 0x1d6   :  { %v11174_v50 = vpack.i.bf16 %v540_v48, %v535_v47  ;;  %v11186_v54 = vmul.f32 0.35355338, %v540_v48 }
 0x1d7   :  { %v544_v51 = vpop.f32.mrb[6].mxu1 }
 0x1d8   :  { %10496 = vrot.lane.b32.xlu1 %v11174_v50, %s13614_s28  ;;  %10491 = vrot.lane.b32.xlu0 %v11174_v50, %s13616_s4  ;;  %v9250_v52 = vpop.f32.mrb[7].mxu1  ;;  %v11180_v53 = vadd.f32 %v8197_v45, %v544_v51 }
 0x1da   :  { %v11195_v56 = vmul.f32 0.35355338, %v11180_v53 }
 0x1dc   :  { %799 = vrot.lane.b32.xlu1 %v11180_v53, %s13614_s28  ;;  %558 = vrot.lane.b32.xlu0 %v11180_v53, %s13616_s4 }
 0x1e0   :  { %791 = vrot.lane.b32.xlu1 %v11186_v54, %s13612_s30  ;;  %789 = vrot.lane.b32.xlu0 %v11188_v55, %s13612_s30 }
 0x1e4   :  { %793 = vrot.lane.b32.xlu0 %v11195_v56, %s13612_s30 }
 0x24a   :  { %v10492_v57 = vpop.permute.xlu0 %10491  ;;  %v10497_v62 = vpop.permute.xlu1 %10496 }
 0x24b   :  { %v10494_v58 = vunpack.i.h.bf16 %v10492_v57  ;;  %v10493_v59 = vunpack.i.l.bf16 %v10492_v57  ;;  %v10499_v63 = vunpack.i.h.bf16 %v10497_v62  ;;  %v10498_v0 = vunpack.i.l.bf16 %v10497_v62 }
 0x24d   :  { %v10014_v61 = vpack.c.bf16 %v10494_v58, %v10493_v59  ;;  %v10021_v2 = vpack.c.bf16 %v10499_v63, %v10498_v0 }
 0x24e   :  { %v559_v1 = vpop.permute.xlu0 %558  ;;  %v800_v3 = vpop.permute.xlu1 %799 }
 0x24f   :  { %10016 = vmatpush3.bf16.xpose.msk.msra.mxu0 %vm11201_vm8, %v10014_v61 }
 0x250   :  { %9255 = vmatprep.subr.mxu0 %v13579_v10 }
 0x252   :  { %v790_v5 = vpop.permute.xlu0 %789  ;;  %v792_v6 = vpop.permute.xlu1 %791 }
 0x256   :  { %v794_v7 = vpop.permute.xlu0 %793 }
 0x257   :  { %9256 = vmatpush3.xpose.msk.msra.mxu0 %vm560_vm7, %v559_v1 }
 0x258   :  { %10020 = vmatprep.subr.bf16.mxu0 %v13581_v4 }
 0x25a   :  { %9258 = vmatmul.mubr.msk.f32.vlgmr.msra.gmra.mrb[4].mxu0 %vm560_vm7, %v11188_v55 }
 0x25b   :  { %10023 = vmatpush3.bf16.xpose.msk.msra.mxu0 %vm11201_vm8, %v10021_v2  ;;  %9260 = vmatprep.mubr.msk.f32.mxu0 %vm10935_vm0, %v13579_v10 }
 0x25c   :  { %9285 = vmatprep.subr.mxu0 %v13579_v10 }
 0x25e   :  { %9261 = vmatmul.mubr.msk.f32.gmra.mrb[6].mxu0 %vm560_vm7, %v11186_v54 }
 0x25f   :  { %9263 = vmatprep.mubr.msk.f32.mxu0 %vm10935_vm0, %v13579_v10 }
 0x262   :  { %9264 = vmatmul.mubr.msk.f32.gmra.mrb[8].mxu0 %vm560_vm7, %v11195_v56 }
 0x263   :  { %9286 = vmatpush3.xpose.msk.msra.mxu0 %vm560_vm7, %v800_v3  ;;  %9287 = vmatprep.mubr.msk.f32.mxu0 %vm10935_vm0, %v13579_v10 }
 0x264   :  { %9311 = vmatprep.subr.mxu0 %v13579_v10 }
 0x266   :  { %9288 = vmatmul.mubr.msk.f32.vlgmr.msra.gmra.mrb[10].mxu0 %vm560_vm7, %v790_v5 }
 0x267   :  { %9290 = vmatprep.mubr.msk.f32.mxu0 %vm10935_vm0, %v13579_v10 }
 0x26a   :  { %9291 = vmatmul.mubr.msk.f32.gmra.mrb[12].mxu0 %vm560_vm7, %v792_v6 }
 0x26b   :  { %9293 = vmatprep.mubr.msk.f32.mxu0 %vm10935_vm0, %v13579_v10 }
 0x26e   :  { %9294 = vmatmul.mubr.msk.f32.gmra.mrb[14].mxu0 %vm560_vm7, %v794_v7 }
 0x26f   :  { %9313 = vmatprep.mubr.msk.f32.mxu0 %vm10935_vm0, %v13579_v10 }
 0x32d   :  { %v642_v8 = vpop.f32.mrb[4].mxu0 }
 0x32e   :  { %v9259_v9 = vpop.f32.mrb[5].mxu0  ;;  %v656_v11 = vsel %vm80_vm3, %v642_v8, -inf }
 0x32f   :  { %657 = vmax.xlane.f32.xlu1 %v656_v11 }
 0x331   :  { %v647_v12 = vpop.f32.mrb[6].mxu0 }
 0x332   :  { %v9262_v13 = vpop.f32.mrb[7].mxu0  ;;  %v659_v14 = vsel %vm80_vm3, %v647_v12, -inf }
 0x333   :  { %660 = vmax.xlane.f32.xlu0 %v659_v14 }
 0x335   :  { %v652_v15 = vpop.f32.mrb[8].mxu0 }
 0x336   :  { %v9265_v16 = vpop.f32.mrb[9].mxu0  ;;  %v663_v17 = vsel %vm662_vm9, %v652_v15, -inf }
 0x337   :  { %664 = vmax.xlane.f32.xlu0 %v663_v17 }
 0x339   :  { %v879_v18 = vpop.f32.mrb[10].mxu0 }
 0x33a   :  { %v9289_v19 = vpop.f32.mrb[11].mxu0  ;;  %v893_v20 = vsel %vm80_vm3, %v879_v18, -inf }
 0x33b   :  { %894 = vmax.xlane.f32.xlu1 %v893_v20 }
 0x33d   :  { %v884_v21 = vpop.f32.mrb[12].mxu0 }
 0x33e   :  { %v9292_v22 = vpop.f32.mrb[13].mxu0  ;;  %v896_v24 = vsel %vm80_vm3, %v884_v21, -inf }
 0x33f   :  { %897 = vmax.xlane.f32.xlu0 %v896_v24 }
 0x341   :  { %v889_v25 = vpop.f32.mrb[14].mxu0 }
 0x342   :  { %v9295_v27 = vpop.f32.mrb[15].mxu0  ;;  %v899_v28 = vsel %vm662_vm9, %v889_v25, -inf }
 0x343   :  { %900 = vmax.xlane.f32.xlu1 %v899_v28 }
 0x354   :  { %10501 = vrot.lane.b32.xlu1 %v11174_v50, %s13610_s29 }
 0x3bc   :  { %v658_v29 = vpop.xlane.xlu1 %657 }
 0x3bd   :  { %v666_v30 = vsub.f32 %v642_v8, %v658_v29 }
 0x3bf   :  { %v669_v31 = vmul.f32 1.442695, %v666_v30 }
 0x3c0   :  { %v661_v32 = vpop.xlane.xlu0 %660 }
 0x3c1   :  { %10650 = vpow2.f32 %v669_v31  ;;  %v667_v33 = vsub.f32 %v647_v12, %v661_v32 }
 0x3c3   :  { %v671_v34 = vmul.f32 1.442695, %v667_v33 }
 0x3c4   :  { %v665_v35 = vpop.xlane.xlu0 %664 }
 0x3c5   :  { %10652 = vpow2.f32 %v671_v34  ;;  %v668_v36 = vsub.f32 %v652_v15, %v665_v35 }
 0x3c7   :  { %v673_v37 = vmul.f32 1.442695, %v668_v36  ;;  %v362_v36 = vld [vmem:[%s13547_s9] sm:$0xff] }
 0x3c8   :  { %v895_v38 = vpop.xlane.xlu1 %894 }
 0x3c9   :  { %10654 = vpow2.f32 %v673_v37  ;;  %v902_v39 = vsub.f32 %v879_v18, %v895_v38  ;;  %v363_v37 = vld [vmem:[%s13547_s9 + $0x8] sm:$0xff] }
 0x3ca   :  { %9312 = vmatpush3.msra.mxu0 %v363_v37 }
 0x3cb   :  { %v10651_v43 = vpop.eup %10650  ;;  %v905_v44 = vmul.f32 1.442695, %v902_v39  ;;  %10027 = vmatprep.subr.bf16.mxu0 %v13581_v4 }
 0x3cc   :  { %v898_v45 = vpop.xlane.xlu0 %897  ;;  %v675_v46 = vsel %vm80_vm3, %v10651_v43, 0.0 }
 0x3cd   :  { %10656 = vpow2.f32 %v905_v44  ;;  %v903_v47 = vsub.f32 %v884_v21, %v898_v45  ;;  %676 = vadd.xlane.f32.xlu0 %v675_v46 }
 0x3cf   :  { %v10653_v48 = vpop.eup %10652  ;;  %v907_v49 = vmul.f32 1.442695, %v903_v47 }
 0x3d0   :  { %v901_v51 = vpop.xlane.xlu1 %900  ;;  %v678_v52 = vsel %vm80_vm3, %v10653_v48, 0.0 }
 0x3d1   :  { %10658 = vpow2.f32 %v907_v49  ;;  %v904_v57 = vsub.f32 %v889_v25, %v901_v51  ;;  %679 = vadd.xlane.f32.xlu1 %v678_v52 }
 0x3d3   :  { %v11246_v58 = vpop.eup %10654  ;;  %v909_v59 = vmul.f32 1.442695, %v904_v57 }
 0x3d4   :  { %v10502_v61 = vpop.permute.xlu1 %10501  ;;  %v681_v62 = vsel %vm662_vm9, %v11246_v58, 0.0 }
 0x3d5   :  { %10660 = vpow2.f32 %v909_v59  ;;  %v10504_v63 = vunpack.i.h.bf16 %v10502_v61  ;;  %v10503_v0 = vunpack.i.l.bf16 %v10502_v61  ;;  %682 = vadd.xlane.f32.xlu0 %v681_v62 }
 0x3d7   :  { %v10657_v1 = vpop.eup %10656  ;;  %v10018_v2 = vpack.c.bf16 %v10504_v63, %v10503_v0 }
 0x3d8   :  { %v911_v3 = vsel %vm80_vm3, %v10657_v1, 0.0 }
 0x3d9   :  { %912 = vadd.xlane.f32.xlu1 %v911_v3  ;;  %10019 = vmatpush3.bf16.msra.mxu1 %v10018_v2 }
 0x3da   :  { %9270 = vmatprep.subr.mxu1 %v13579_v10 }
 0x3db   :  { %v10659_v5 = vpop.eup %10658 }
 0x3dc   :  { %v914_v6 = vsel %vm80_vm3, %v10659_v5, 0.0 }
 0x3dd   :  { %915 = vadd.xlane.f32.xlu0 %v914_v6 }
 0x3df   :  { %v10661_v7 = vpop.eup %10660 }
 0x3e0   :  { %v917_v8 = vsel %vm662_vm9, %v10661_v7, 0.0 }
 0x3e1   :  { %918 = vadd.xlane.f32.xlu0 %v917_v8 }
 0x3ea   :  { %10506 = vrot.lane.b32.xlu1 %v11174_v50, %s13575_s26 }
 0x3ee   :  { %930 = vrot.lane.b32.xlu1 %v11180_v53, %s13575_s26  ;;  %s13679_s26 = smov 72  }
 0x3f2   :  { %10511 = vrot.lane.b32.xlu1 %v11174_v50, %s13573_s5 }
 0x3f6   :  { %1203 = vrot.lane.b32.xlu1 %v11188_v55, %s13571_s6 }
 0x3f7   :  { %694 = vrot.lane.b32.xlu0 %v11180_v53, %s13610_s29 }
 0x3fa   :  { %1207 = vrot.lane.b32.xlu1 %v11195_v56, %s13571_s6 }
 0x3fb   :  { %1213 = vrot.lane.b32.xlu0 %v11180_v53, %s13573_s5  ;;  %s13680_s5 = smov 104  }
 0x3ff   :  { %1205 = vrot.lane.b32.xlu0 %v11186_v54, %s13571_s6 }
 0x45a   :  { %v677_v9 = vpop.xlane.xlu0 %676 }
 0x45b   :  { %10662 = vrcp.f32 %v677_v9 }
 0x45e   :  { %v680_v11 = vpop.xlane.xlu1 %679 }
 0x45f   :  { %10664 = vrcp.f32 %v680_v11 }
 0x462   :  { %v683_v12 = vpop.xlane.xlu0 %682 }
 0x463   :  { %10666 = vrcp.f32 %v683_v12 }
 0x465   :  { %v10663_v17 = vpop.eup %10662 }
 0x466   :  { %v913_v13 = vpop.xlane.xlu1 %912  ;;  %v687_v20 = vmul.f32 %v10663_v17, %v10651_v43 }
 0x467   :  { %10668 = vrcp.f32 %v913_v13 }
 0x469   :  { %v10665_v22 = vpop.eup %10664 }
 0x46a   :  { %v916_v14 = vpop.xlane.xlu0 %915  ;;  %v10507_v15 = vpop.permute.xlu1 %10506  ;;  %v688_v25 = vmul.f32 %v10665_v22, %v10653_v48 }
 0x46b   :  { %v10509_v18 = vunpack.i.h.bf16 %v10507_v15  ;;  %v10508_v19 = vunpack.i.l.bf16 %v10507_v15  ;;  %10670 = vrcp.f32 %v916_v14 }
 0x46d   :  { %v10025_v24 = vpack.c.bf16 %v10509_v18, %v10508_v19  ;;  %v10667_v27 = vpop.eup %10666 }
 0x46e   :  { %v919_v16 = vpop.xlane.xlu0 %918  ;;  %v931_v28 = vpop.permute.xlu1 %930  ;;  %v689_v29 = vmul.f32 %v10667_v27, %v11246_v58 }
 0x46f   :  { %10672 = vrcp.f32 %v919_v16 }
 0x471   :  { %v10669_v30 = vpop.eup %10668 }
 0x472   :  { %v695_v21 = vpop.permute.xlu0 %694  ;;  %v923_v31 = vmul.f32 %v10669_v30, %v10657_v1  ;;  %v10512_v44 = vpop.permute.xlu1 %10511 }
 0x473   :  { %9271 = vmatpush3.msk.msra.mxu1 %vm84_vm2, %v695_v21  ;;  %v10514_v46 = vunpack.i.h.bf16 %v10512_v44  ;;  %v10513_v47 = vunpack.i.l.bf16 %v10512_v44 }
 0x474   :  { %9273 = vmatmul.mubr.msk.f32.vlgmr.msra.gmra.mrb[8].mxu1 %vm80_vm3, %v687_v20  ;;  %10024 = vmatprep.subr.bf16.mxu1 %v13581_v4 }
 0x475   :  { %10026 = vmatpush3.bf16.msra.mxu1 %v10025_v24  ;;  %9275 = vmatprep.mubr.msk.f32.mxu1 %vm10935_vm0, %v13579_v10  ;;  %v10671_v32 = vpop.eup %10670  ;;  %v10028_v51 = vpack.c.bf16 %v10514_v46, %v10513_v47 }
 0x476   :  { %9300 = vmatprep.subr.mxu1 %v13579_v10  ;;  %v924_v33 = vmul.f32 %v10671_v32, %v10659_v5  ;;  %v1214_v62 = vpop.permute.xlu0 %1213  ;;  %v1204_v0 = vpop.permute.xlu1 %1203 }
 0x478   :  { %9276 = vmatmul.mubr.msk.f32.gmra.mrb[10].mxu1 %vm80_vm3, %v688_v25 }
 0x479   :  { %9301 = vmatpush3.msk.msra.mxu1 %vm84_vm2, %v931_v28  ;;  %9278 = vmatprep.mubr.msk.f32.mxu1 %vm10935_vm0, %v13579_v10  ;;  %v10673_v34 = vpop.eup %10672 }
 0x47a   :  { %9322 = vmatprep.subr.mxu1 %v13579_v10  ;;  %v925_v35 = vmul.f32 %v10673_v34, %v10661_v7  ;;  %v1206_v1 = vpop.permute.xlu0 %1205  ;;  %v1208_v2 = vpop.permute.xlu1 %1207 }
 0x47c   :  { %9279 = vmatmul.mubr.msk.f32.gmra.mrb[12].mxu1 %vm80_vm3, %v689_v29 }
 0x47d   :  { %9302 = vmatprep.mubr.msk.f32.mxu1 %vm10935_vm0, %v13579_v10 }
 0x480   :  { %9303 = vmatmul.mubr.msk.f32.vlgmr.msra.gmra.mrb[14].mxu1 %vm80_vm3, %v923_v31 }
 0x481   :  { %9305 = vmatprep.mubr.msk.f32.mxu1 %vm10935_vm0, %v13579_v10  ;;  %9323 = vmatpush3.msra.mxu1 %v362_v36 }
 0x482   :  { %10031 = vmatprep.subr.bf16.mxu1 %v13581_v4 }
 0x484   :  { %9306 = vmatmul.mubr.msk.f32.gmra.mrb[16].mxu1 %vm80_vm3, %v924_v33 }
 0x485   :  { %9308 = vmatprep.mubr.msk.f32.mxu1 %vm10935_vm0, %v13579_v10 }
 0x488   :  { %9309 = vmatmul.mubr.msk.f32.gmra.mrb[18].mxu1 %vm80_vm3, %v925_v35 }
 0x489   :  { %9324 = vmatprep.mubr.msk.f32.mxu1 %vm10935_vm0, %v13579_v10 }
 0x547   :  { %v775_v38 = vpop.f32.mrb[8].mxu1 }
 0x548   :  { %v9274_v39 = vpop.f32.mrb[9].mxu1  ;;  %9325 = vmatmul.mubr.msk.f32.vlgmr.msra.gmra.mrb[20].mxu1 %vm560_vm7, %v775_v38 }
 0x549   :  { %9327 = vmatprep.mubr.msk.f32.mxu1 %vm10935_vm0, %v13579_v10 }
 0x54b   :  { %v780_v43 = vpop.f32.mrb[10].mxu1 }
 0x54c   :  { %v9277_v45 = vpop.f32.mrb[11].mxu1  ;;  %9328 = vmatmul.mubr.msk.f32.gmra.mrb[22].mxu1 %vm560_vm7, %v780_v43 }
 0x54d   :  { %9330 = vmatprep.mubr.msk.f32.mxu1 %vm10935_vm0, %v13579_v10 }
 0x54f   :  { %v785_v48 = vpop.f32.mrb[12].mxu1 }
 0x550   :  { %v9280_v49 = vpop.f32.mrb[13].mxu1  ;;  %9331 = vmatmul.mubr.msk.f32.gmra.mrb[24].mxu1 %vm560_vm7, %v785_v48 }
 0x551   :  { %9354 = vmatprep.mubr.msk.f32.mxu1 %vm10935_vm0, %v13579_v10 }
 0x553   :  { %v1011_v52 = vpop.f32.mrb[14].mxu1 }
 0x554   :  { %v9304_v57 = vpop.f32.mrb[15].mxu1  ;;  %9314 = vmatmul.mubr.msk.f32.vlgmr.msra.gmra.mrb[16].mxu0 %vm560_vm7, %v1011_v52 }
 0x555   :  { %10030 = vmatpush3.bf16.xpose.msk.msra.mxu0 %vm11201_vm8, %v10028_v51  ;;  %9316 = vmatprep.mubr.msk.f32.mxu0 %vm10935_vm0, %v13579_v10 }
 0x556   :  { %9337 = vmatprep.subr.mxu0 %v13579_v10 }
 0x557   :  { %v1016_v58 = vpop.f32.mrb[16].mxu1 }
 0x558   :  { %v9307_v59 = vpop.f32.mrb[17].mxu1  ;;  %9317 = vmatmul.mubr.msk.f32.gmra.mrb[18].mxu0 %vm560_vm7, %v1016_v58 }
 0x559   :  { %9319 = vmatprep.mubr.msk.f32.mxu0 %vm10935_vm0, %v13579_v10 }
 0x55b   :  { %v1021_v61 = vpop.f32.mrb[18].mxu1 }
 0x55c   :  { %v9310_v63 = vpop.f32.mrb[19].mxu1  ;;  %9320 = vmatmul.mubr.msk.f32.gmra.mrb[20].mxu0 %vm560_vm7, %v1021_v61 }
 0x55d   :  { %9338 = vmatpush3.xpose.msk.msra.mxu0 %vm560_vm7, %v1214_v62  ;;  %9339 = vmatprep.mubr.msk.f32.mxu0 %vm10935_vm0, %v13579_v10 }
 0x55e   :  { %9363 = vmatprep.subr.mxu0 %v13579_v10 }
 0x560   :  { %9340 = vmatmul.mubr.msk.f32.vlgmr.msra.gmra.mrb[22].mxu0 %vm560_vm7, %v1204_v0 }
 0x561   :  { %9342 = vmatprep.mubr.msk.f32.mxu0 %vm10935_vm0, %v13579_v10 }
 0x564   :  { %9343 = vmatmul.mubr.msk.f32.gmra.mrb[24].mxu0 %vm560_vm7, %v1206_v1 }
 0x565   :  { %9345 = vmatprep.mubr.msk.f32.mxu0 %vm10935_vm0, %v13579_v10 }
 0x568   :  { %9346 = vmatmul.mubr.msk.f32.gmra.mrb[26].mxu0 %vm560_vm7, %v1208_v2 }
 0x569   :  { %9365 = vmatprep.mubr.msk.f32.mxu0 %vm10935_vm0, %v13579_v10 }
 0x61b   :  { %v1189_v3 = vpop.f32.mrb[20].mxu1 }
 0x61c   :  { %v9326_v5 = vpop.f32.mrb[21].mxu1 }
 0x61f   :  { %v1194_v6 = vpop.f32.mrb[22].mxu1 }
 0x620   :  { %v9329_v7 = vpop.f32.mrb[23].mxu1 }
 0x623   :  { %v1199_v8 = vpop.f32.mrb[24].mxu1 }
 0x624   :  { %v9332_v9 = vpop.f32.mrb[25].mxu1 }
 0x627   :  { %v1100_v11 = vpop.f32.mrb[16].mxu0 }
 0x628   :  { %v11334_v12 = vadd.f32 %v1189_v3, %v1100_v11  ;;  %v9315_v13 = vpop.f32.mrb[17].mxu0 }
 0x629   :  { %v364_v13 = vld [vmem:[%s13547_s9 + $0x10] sm:$0xff] }
 0x62a   :  { %9364 = vmatpush3.msra.mxu0 %v364_v13 }
 0x62b   :  { %v1105_v14 = vpop.f32.mrb[18].mxu0  ;;  %10038 = vmatprep.subr.bf16.mxu0 %v13581_v4 }
 0x62c   :  { %v11336_v15 = vadd.f32 %v1194_v6, %v1105_v14  ;;  %v9318_v16 = vpop.f32.mrb[19].mxu0 }
 0x62f   :  { %v1110_v17 = vpop.f32.mrb[20].mxu0 }
 0x630   :  { %v11338_v18 = vadd.f32 %v1199_v8, %v1110_v17  ;;  %v9321_v19 = vpop.f32.mrb[21].mxu0 }
 0x633   :  { %v1293_v20 = vpop.f32.mrb[22].mxu0 }
 0x634   :  { %v9341_v21 = vpop.f32.mrb[23].mxu0  ;;  %v1307_v22 = vsel %vm80_vm3, %v1293_v20, -inf }
 0x635   :  { %1308 = vmax.xlane.f32.xlu0 %v1307_v22 }
 0x637   :  { %v1298_v24 = vpop.f32.mrb[24].mxu0 }
 0x638   :  { %v9344_v25 = vpop.f32.mrb[25].mxu0  ;;  %v1310_v27 = vsel %vm80_vm3, %v1298_v24, -inf }
 0x639   :  { %1311 = vmax.xlane.f32.xlu1 %v1310_v27 }
 0x63b   :  { %v1303_v28 = vpop.f32.mrb[26].mxu0 }
 0x63c   :  { %v9347_v29 = vpop.f32.mrb[27].mxu0  ;;  %v1313_v30 = vsel %vm662_vm9, %v1303_v28, -inf }
 0x63d   :  { %1314 = vmax.xlane.f32.xlu0 %v1313_v30 }
 0x64a   :  { %10516 = vrot.lane.b32.xlu1 %v11174_v50, %s13569_s24 }
 0x64e   :  { %10521 = vrot.lane.b32.xlu1 %v11174_v50, %s13567_s2 }
 0x6c2   :  { %v1309_v31 = vpop.xlane.xlu0 %1308 }
 0x6c3   :  { %v1316_v32 = vsub.f32 %v1293_v20, %v1309_v31 }
 0x6c5   :  { %v1319_v33 = vmul.f32 1.442695, %v1316_v32 }
 0x6c6   :  { %v1312_v34 = vpop.xlane.xlu1 %1311 }
 0x6c7   :  { %10674 = vpow2.f32 %v1319_v33  ;;  %v1317_v35 = vsub.f32 %v1298_v24, %v1312_v34 }
 0x6c9   :  { %v1321_v36 = vmul.f32 1.442695, %v1317_v35 }
 0x6ca   :  { %v10517_v37 = vpop.permute.xlu1 %10516  ;;  %v1315_v48 = vpop.xlane.xlu0 %1314 }
 0x6cb   :  { %10676 = vpow2.f32 %v1321_v36  ;;  %v10519_v38 = vunpack.i.h.bf16 %v10517_v37  ;;  %v10518_v39 = vunpack.i.l.bf16 %v10517_v37  ;;  %v1318_v49 = vsub.f32 %v1303_v28, %v1315_v48 }
 0x6cd   :  { %v10032_v43 = vpack.c.bf16 %v10519_v38, %v10518_v39  ;;  %v1323_v51 = vmul.f32 1.442695, %v1318_v49 }
 0x6ce   :  { %v10522_v58 = vpop.permute.xlu1 %10521 }
 0x6cf   :  { %10033 = vmatpush3.bf16.msra.mxu1 %v10032_v43  ;;  %10678 = vpow2.f32 %v1323_v51  ;;  %v10523_v63 = vunpack.i.l.bf16 %v10522_v58 }
 0x6d0   :  { %9352 = vmatprep.subr.mxu1 %v13579_v10 }
 0x6d1   :  { %v10675_v44 = vpop.eup %10674 }
 0x6d2   :  { %v1325_v45 = vsel %vm80_vm3, %v10675_v44, 0.0 }
 0x6d3   :  { %1326 = vadd.xlane.f32.xlu0 %v1325_v45 }
 0x6d5   :  { %v10677_v46 = vpop.eup %10676 }
 0x6d6   :  { %v1328_v47 = vsel %vm80_vm3, %v10677_v46, 0.0 }
 0x6d7   :  { %1329 = vadd.xlane.f32.xlu1 %v1328_v47 }
 0x6d9   :  { %v10679_v52 = vpop.eup %10678 }
 0x6da   :  { %v1331_v57 = vsel %vm662_vm9, %v10679_v52, 0.0 }
 0x6e8   :  { %1541 = vrot.lane.b32.xlu1 %v11180_v53, %s13567_s2 }
 0x6e9   :  { %1344 = vrot.lane.b32.xlu0 %v11180_v53, %s13569_s24  ;;  %s13678_s24 = smov 48  }
 0x6ec   :  { %1533 = vrot.lane.b32.xlu1 %v11186_v54, %s13565_s25  ;;  %v10524_v54 = vunpack.i.h.bf16 %v10522_v58 }
 0x6ee   :  { %v10035_v2 = vpack.c.bf16 %v10524_v54, %v10523_v63 }
 0x708   :  { %1332 = vadd.xlane.f32.xlu0 %v1331_v57 }
 0x71e   :  { %1531 = vrot.lane.b32.xlu0 %v11188_v55, %s13565_s25 }
 0x722   :  { %1535 = vrot.lane.b32.xlu0 %v11195_v56, %s13565_s25 }
 0x760   :  { %v1327_v59 = vpop.xlane.xlu0 %1326 }
 0x761   :  { %10680 = vrcp.f32 %v1327_v59 }
 0x764   :  { %v1330_v61 = vpop.xlane.xlu1 %1329  ;;  %v1345_v62 = vpop.permute.xlu0 %1344 }
 0x765   :  { %10682 = vrcp.f32 %v1330_v61  ;;  %9353 = vmatpush3.msk.msra.mxu1 %vm84_vm2, %v1345_v62 }
 0x766   :  { %10034 = vmatprep.subr.bf16.mxu1 %v13581_v4 }
 0x768   :  { %v1542_v3 = vpop.permute.xlu1 %1541 }
 0x76b   :  { %v10681_v0 = vpop.eup %10680 }
 0x76c   :  { %v1337_v1 = vmul.f32 %v10681_v0, %v10675_v44  ;;  %v1534_v9 = vpop.permute.xlu1 %1533 }
 0x76e   :  { %9355 = vmatmul.mubr.msk.f32.vlgmr.msra.gmra.mrb[26].mxu1 %vm80_vm3, %v1337_v1 }
 0x76f   :  { %v10683_v55 = vpop.eup %10682  ;;  %10037 = vmatpush3.bf16.xpose.msk.msra.mxu1 %vm11201_vm8, %v10035_v2  ;;  %9357 = vmatprep.mubr.msk.f32.mxu1 %vm10935_vm0, %v13579_v10 }
 0x770   :  { %v1338_v56 = vmul.f32 %v10683_v55, %v10677_v46  ;;  %9378 = vmatprep.subr.mxu1 %v13579_v10 }
 0x772   :  { %9358 = vmatmul.mubr.msk.f32.gmra.mrb[28].mxu1 %vm80_vm3, %v1338_v56 }
 0x773   :  { %9360 = vmatprep.mubr.msk.f32.mxu1 %vm10935_vm0, %v13579_v10 }
 0x777   :  { %9379 = vmatpush3.xpose.msk.msra.mxu1 %vm560_vm7, %v1542_v3 }
 0x778   :  { %9404 = vmatprep.subr.mxu1 %v13579_v10 }
 0x795   :  { %v1333_v5 = vpop.xlane.xlu0 %1332 }
 0x796   :  { %10684 = vrcp.f32 %v1333_v5 }
 0x799   :  { %v1532_v8 = vpop.permute.xlu0 %1531 }
 0x79d   :  { %v1536_v11 = vpop.permute.xlu0 %1535 }
 0x7a0   :  { %v10685_v6 = vpop.eup %10684 }
 0x7a1   :  { %v1339_v7 = vmul.f32 %v10685_v6, %v10679_v52 }
 0x7a3   :  { %9361 = vmatmul.mubr.msk.f32.gmra.mrb[30].mxu1 %vm80_vm3, %v1339_v7 }
 0x7a4   :  { %9380 = vmatprep.mubr.msk.f32.mxu1 %vm10935_vm0, %v13579_v10 }
 0x7a7   :  { %9381 = vmatmul.mubr.msk.f32.vlgmr.msra.gmra.mrb[32].mxu1 %vm560_vm7, %v1532_v8 }
 0x7a8   :  { %9383 = vmatprep.mubr.msk.f32.mxu1 %vm10935_vm0, %v13579_v10 }
 0x7ab   :  { %9384 = vmatmul.mubr.msk.f32.gmra.mrb[34].mxu1 %vm560_vm7, %v1534_v9 }
 0x7ac   :  { %9386 = vmatprep.mubr.msk.f32.mxu1 %vm10935_vm0, %v13579_v10 }
 0x7af   :  { %9387 = vmatmul.mubr.msk.f32.gmra.mrb[36].mxu1 %vm560_vm7, %v1536_v11 }
 0x7b0   :  { %9406 = vmatprep.mubr.msk.f32.mxu1 %vm10935_vm0, %v13579_v10 }
 0x841   :  { %v1425_v14 = vpop.f32.mrb[26].mxu1 }
 0x842   :  { %v9356_v16 = vpop.f32.mrb[27].mxu1  ;;  %9366 = vmatmul.mubr.msk.f32.vlgmr.msra.gmra.mrb[28].mxu0 %vm560_vm7, %v1425_v14 }
 0x843   :  { %9368 = vmatprep.mubr.msk.f32.mxu0 %vm10935_vm0, %v13579_v10 }
 0x845   :  { %v1430_v17 = vpop.f32.mrb[28].mxu1 }
 0x846   :  { %v9359_v19 = vpop.f32.mrb[29].mxu1  ;;  %9369 = vmatmul.mubr.msk.f32.gmra.mrb[30].mxu0 %vm560_vm7, %v1430_v17 }
 0x847   :  { %9371 = vmatprep.mubr.msk.f32.mxu0 %vm10935_vm0, %v13579_v10 }
 0x876   :  { %v1435_v20 = vpop.f32.mrb[30].mxu1 }
 0x877   :  { %v9362_v21 = vpop.f32.mrb[31].mxu1  ;;  %9372 = vmatmul.mubr.msk.f32.gmra.mrb[32].mxu0 %vm560_vm7, %v1435_v20  ;;  %v8253_v20 = vld [vmem:[%s13548_s10] ss:$0 sm:$0xff] }
 0x878   :  { %9395 = vmatprep.mubr.msk.f32.mxu0 %vm10935_vm0, %v13579_v10 }
 0x87a   :  { %v1621_v22 = vpop.f32.mrb[32].mxu1 }
 0x87b   :  { %v9382_v24 = vpop.f32.mrb[33].mxu1  ;;  %v1635_v25 = vsel %vm80_vm3, %v1621_v22, -inf }
 0x87c   :  { %1636 = vmax.xlane.f32.xlu1 %v1635_v25 }
 0x87e   :  { %v1626_v27 = vpop.f32.mrb[34].mxu1 }
 0x87f   :  { %v9385_v28 = vpop.f32.mrb[35].mxu1  ;;  %v1638_v29 = vsel %vm80_vm3, %v1626_v27, -inf }
 0x880   :  { %1639 = vmax.xlane.f32.xlu0 %v1638_v29 }
 0x882   :  { %v1631_v30 = vpop.f32.mrb[36].mxu1 }
 0x883   :  { %v9388_v31 = vpop.f32.mrb[37].mxu1  ;;  %v1641_v32 = vsel %vm662_vm9, %v1631_v30, -inf }
 0x884   :  { %1642 = vmax.xlane.f32.xlu0 %v1641_v32 }
 0x909   :  { %v1637_v33 = vpop.xlane.xlu1 %1636 }
 0x90a   :  { %v1644_v34 = vsub.f32 %v1621_v22, %v1637_v33 }
 0x90c   :  { %v1647_v35 = vmul.f32 1.442695, %v1644_v34 }
 0x90d   :  { %v1640_v36 = vpop.xlane.xlu0 %1639 }
 0x90e   :  { %10686 = vpow2.f32 %v1647_v35  ;;  %v1645_v37 = vsub.f32 %v1626_v27, %v1640_v36 }
 0x910   :  { %v1649_v38 = vmul.f32 1.442695, %v1645_v37 }
 0x911   :  { %v1643_v39 = vpop.xlane.xlu0 %1642 }
 0x912   :  { %10688 = vpow2.f32 %v1649_v38  ;;  %v1646_v43 = vsub.f32 %v1631_v30, %v1643_v39 }
 0x914   :  { %v1651_v44 = vmul.f32 1.442695, %v1646_v43 }
 0x915   :  { %v1514_v45 = vpop.f32.mrb[28].mxu0 }
 0x916   :  { %10690 = vpow2.f32 %v1651_v44  ;;  %v1528_v46 = vadd.f32 %v1514_v45, %v11334_v12  ;;  %v9367_v47 = vpop.f32.mrb[29].mxu0  ;;  %v365_v12 = vld [vmem:[%s13547_s9 + $0x18] sm:$0xff] }
 0x917   :  { %9405 = vmatpush3.msra.mxu1 %v365_v12  ;;  %v374_v12 = vld [vmem:[%s13551_s13 + $0x28] sm:$0xff] }
 0x918   :  { %v10687_v48 = vpop.eup %10686 }
 0x919   :  { %v1519_v49 = vpop.f32.mrb[30].mxu0  ;;  %v1653_v51 = vsel %vm80_vm3, %v10687_v48, 0.0 }
 0x91a   :  { %v1529_v52 = vadd.f32 %v1519_v49, %v11336_v15  ;;  %1654 = vadd.xlane.f32.xlu1 %v1653_v51  ;;  %v9370_v57 = vpop.f32.mrb[31].mxu0 }
 0x91c   :  { %v10689_v58 = vpop.eup %10688 }
 0x91d   :  { %v1656_v59 = vsel %vm80_vm3, %v10689_v58, 0.0 }
 0x91e   :  { %1657 = vadd.xlane.f32.xlu0 %v1656_v59 }
 0x920   :  { %v10691_v61 = vpop.eup %10690 }
 0x921   :  { %v1659_v62 = vsel %vm662_vm9, %v10691_v61, 0.0 }
 0x922   :  { %1660 = vadd.xlane.f32.xlu1 %v1659_v62  ;;  %v370_v62 = vld [vmem:[%s13551_s13 + $0x8] sm:$0xff] }
 0x933   :  { %1672 = vrot.lane.b32.xlu1 %v11180_v53, %s13563_s22 }
 0x934   :  { %10526 = vrot.lane.b32.xlu0 %v11174_v50, %s13563_s22  ;;  %s13677_s22 = smov 112  }
 0x94a   :  { %v1524_v15 = vpop.f32.mrb[32].mxu0 }
 0x94b   :  { %v1530_v54 = vadd.f32 %v1524_v15, %v11338_v18  ;;  %v9373_v63 = vpop.f32.mrb[33].mxu0  ;;  %v372_v15 = vld [vmem:[%s13551_s13 + $0x18] sm:$0xff] }
 0x94c   :  { %v376_v63 = vld [vmem:[%s13551_s13 + $0x38] sm:$0xff] }
 0x9a7   :  { %v1655_v0 = vpop.xlane.xlu1 %1654 }
 0x9a8   :  { %10692 = vrcp.f32 %v1655_v0  ;;  %v369_v0 = vld [vmem:[%s13551_s13] sm:$0xff] }
 0x9ab   :  { %v1658_v1 = vpop.xlane.xlu0 %1657 }
 0x9ac   :  { %10694 = vrcp.f32 %v1658_v1  ;;  %v373_v1 = vld [vmem:[%s13551_s13 + $0x20] sm:$0xff] }
 0x9af   :  { %v1661_v2 = vpop.xlane.xlu1 %1660  ;;  %v10527_v55 = vpop.permute.xlu0 %10526 }
 0x9b0   :  { %v10529_v56 = vunpack.i.h.bf16 %v10527_v55  ;;  %v10528_v53 = vunpack.i.l.bf16 %v10527_v55  ;;  %10696 = vrcp.f32 %v1661_v2  ;;  %v11477_v2 = vpack.c.bf16 %v376_v63, %v372_v15 }
 0x9b1   :  { %v11479_v55 = vpack.c.bf16 %v373_v1, %v369_v0  ;;  %v421_v0 = vld [vmem:[%s13553_s15 + $0x118] sm:$0xff]  ;;  %v406_v1 = vld [vmem:[%s13553_s15 + $0xa0] sm:$0xff] }
 0x9b2   :  { %v10039_v3 = vpack.c.bf16 %v10529_v56, %v10528_v53  ;;  %v10693_v50 = vpop.eup %10692  ;;  %v371_v56 = vld [vmem:[%s13551_s13 + $0x10] sm:$0xff]  ;;  %10050 = vmatprep.subr.bf16.mxu1 %v11477_v2 }
 0x9b3   :  { %v1665_v5 = vmul.f32 %v10693_v50, %v10687_v48  ;;  %v1673_v6 = vpop.permute.xlu1 %1672  ;;  %v375_v53 = vld [vmem:[%s13551_s13 + $0x30] sm:$0xff]  ;;  %v378_v50 = vld [vmem:[%s13551_s13 + $0x48] sm:$0xff] }
 0x9b4   :  { %10040 = vmatpush3.bf16.msra.mxu0 %v10039_v3  ;;  %v11488_v3 = vpack.c.bf16 %v375_v53, %v371_v56  ;;  %v407_v53 = vld [vmem:[%s13553_s15 + $0xa8] sm:$0xff] }
 0x9b5   :  { %9393 = vmatprep.subr.mxu0 %v13579_v10 }
 0x9b6   :  { %v10695_v7 = vpop.eup %10694 }
 0x9b7   :  { %v1666_v18 = vmul.f32 %v10695_v7, %v10689_v58 }
 0x9b8   :  { %9394 = vmatpush3.msk.msra.mxu0 %vm84_vm2, %v1673_v6  ;;  %v380_v6 = vld [vmem:[%s13551_s13 + $0x58] sm:$0xff] }
 0x9b9   :  { %9396 = vmatmul.mubr.msk.f32.vlgmr.msra.gmra.mrb[34].mxu0 %vm80_vm3, %v1665_v5  ;;  %v382_v5 = vld [vmem:[%s13551_s13 + $0x68] sm:$0xff] }
 0x9ba   :  { %9398 = vmatprep.mubr.msk.f32.mxu0 %vm10935_vm0, %v13579_v10  ;;  %v10697_v8 = vpop.eup %10696  ;;  %v11502_v7 = vpack.c.bf16 %v382_v5, %v378_v50  ;;  %v438_v50 = vld [vmem:[%s13553_s15 + $0x1a0] sm:$0xff]  ;;  %v439_v5 = vld [vmem:[%s13553_s15 + $0x1a8] sm:$0xff] }
 0x9bb   :  { %v1667_v9 = vmul.f32 %v10697_v8, %v10691_v61  ;;  %v377_v8 = vld [vmem:[%s13551_s13 + $0x40] sm:$0xff] }
 0x9bd   :  { %9399 = vmatmul.mubr.msk.f32.gmra.mrb[36].mxu0 %vm80_vm3, %v1666_v18  ;;  %v384_v18 = vld [vmem:[%s13551_s13 + $0x78] sm:$0xff] }
 0x9be   :  { %9401 = vmatprep.mubr.msk.f32.mxu0 %vm10935_vm0, %v13579_v10 }
 0x9c1   :  { %9402 = vmatmul.mubr.msk.f32.gmra.mrb[38].mxu0 %vm80_vm3, %v1667_v9  ;;  %v381_v9 = vld [vmem:[%s13551_s13 + $0x60] sm:$0xff] }
 0x9c2   :  { %2024 = vmatprep.mubr.f32.mxu0 %v13579_v10 }
 0xa8c   :  { %v1753_v11 = vpop.f32.mrb[34].mxu0 }
 0xa8d   :  { %v9397_v13 = vpop.f32.mrb[35].mxu0  ;;  %9407 = vmatmul.mubr.msk.f32.vlgmr.msra.gmra.mrb[38].mxu1 %vm560_vm7, %v1753_v11  ;;  %v11513_v11 = vpack.c.bf16 %v384_v18, %v380_v6 }
 0xa8e   :  { %9409 = vmatprep.mubr.msk.f32.mxu1 %vm10935_vm0, %v13579_v10  ;;  %10052 = vmatpush1.bf16.msra.mxu1 %v11488_v3  ;;  %v11515_v13 = vpack.c.bf16 %v381_v9, %v377_v8 }
 0xa8f   :  { %10054 = vmatprep.subr.bf16.mxu1 %v11513_v11 }
 0xa90   :  { %v1758_v14 = vpop.f32.mrb[36].mxu0 }
 0xa91   :  { %v9400_v16 = vpop.f32.mrb[37].mxu0  ;;  %9410 = vmatmul.mubr.msk.f32.gmra.mrb[40].mxu1 %vm560_vm7, %v1758_v14  ;;  %v379_v14 = vld [vmem:[%s13551_s13 + $0x50] sm:$0xff] }
 0xa92   :  { %9412 = vmatprep.mubr.msk.f32.mxu1 %vm10935_vm0, %v13579_v10  ;;  %v383_v16 = vld [vmem:[%s13551_s13 + $0x70] sm:$0xff] }
 0xa94   :  { %v1763_v17 = vpop.f32.mrb[38].mxu0 }
 0xa95   :  { %v9403_v19 = vpop.f32.mrb[39].mxu0  ;;  %9413 = vmatmul.mubr.msk.f32.gmra.mrb[42].mxu1 %vm560_vm7, %v1763_v17  ;;  %v11524_v17 = vpack.c.bf16 %v383_v16, %v379_v14  ;;  %v390_v16 = vld [vmem:[%s13553_s15 + $0x20] sm:$0xff] }
 0xa96   :  { %2107 = vmatprep.mubr.f32.mxu1 %v13579_v10  ;;  %v402_v19 = vld [vmem:[%s13553_s15 + $0x80] sm:$0xff] }
 0xa97   :  { %10056 = vmatpush1.bf16.msra.mxu1 %v11524_v17 }
 0xb60   :  { %v1842_v21 = vpop.f32.mrb[38].mxu1 }
 0xb61   :  { %v1856_v22 = vadd.f32 %v1842_v21, %v1528_v46  ;;  %v9408_v24 = vpop.f32.mrb[39].mxu1  ;;  %v434_v21 = vld [vmem:[%s13553_s15 + $0x180] sm:$0xff] }
 0xb62   :  { %v435_v24 = vld [vmem:[%s13553_s15 + $0x188] sm:$0xff] }
 0xb63   :  { %v1865_v25 = vadd.f32 %v8253_v20, %v1856_v22 }
 0xb64   :  { %v1847_v27 = vpop.f32.mrb[40].mxu1 }
 0xb65   :  { %v1857_v28 = vadd.f32 %v1847_v27, %v1529_v52  ;;  %v9411_v29 = vpop.f32.mrb[41].mxu1  ;;  %v1868_v30 = vadd.f32 %v1865_v25, %v11150_v40  ;;  %v11543_v25 = vpack.c.bf16 %v435_v24, %v434_v21  ;;  %v422_v21 = vld [vmem:[%s13553_s15 + $0x120] sm:$0xff]  ;;  %v423_v24 = vld [vmem:[%s13553_s15 + $0x128] sm:$0xff] }
 0xb67   :  { %v1866_v31 = vadd.f32 %v8253_v20, %v1857_v28  ;;  %v1871_v32 = vsel %vm259_vm5, %v1868_v30, 0.0  ;;  %10090 = vmatprep.subr.bf16.mxu1 %v11543_v25 }
 0xb68   :  { %1872 = vadd.xlane.f32.xlu1 %v1871_v32  ;;  %v1852_v33 = vpop.f32.mrb[42].mxu1 }
 0xb69   :  { %v1858_v34 = vadd.f32 %v1852_v33, %v1530_v54  ;;  %v9414_v35 = vpop.f32.mrb[43].mxu1  ;;  %v1869_v36 = vadd.f32 %v1866_v31, %v11152_v41  ;;  %v11466_v54 = vpack.c.bf16 %v374_v12, %v370_v62  ;;  %v388_v62 = vld [vmem:[%s13553_s15 + $0x10] sm:$0xff]  ;;  %v389_v12 = vld [vmem:[%s13553_s15 + $0x18] sm:$0xff] }
 0xb6a   :  { %v11619_v18 = vpack.c.bf16 %v389_v12, %v388_v62  ;;  %v426_v62 = vld [vmem:[%s13553_s15 + $0x140] sm:$0xff]  ;;  %v427_v12 = vld [vmem:[%s13553_s15 + $0x148] sm:$0xff] }
 0xb6b   :  { %v1867_v37 = vadd.f32 %v8253_v20, %v1858_v34  ;;  %v1874_v38 = vsel %vm259_vm5, %v1869_v36, 0.0  ;;  %10042 = vmatprep.subr.bf16.mxu0 %v11466_v54  ;;  %v403_v20 = vld [vmem:[%s13553_s15 + $0x88] sm:$0xff] }
 0xb6c   :  { %1875 = vadd.xlane.f32.xlu0 %v1874_v38  ;;  %10044 = vmatpush1.bf16.msra.mxu0 %v11479_v55  ;;  %v11538_v22 = vpack.c.bf16 %v403_v20, %v402_v19  ;;  %v391_v19 = vld [vmem:[%s13553_s15 + $0x28] sm:$0xff]  ;;  %v11636_v20 = vpack.c.bf16 %v407_v53, %v406_v1  ;;  %v444_v1 = vld [vmem:[%s13553_s15 + $0x1d0] sm:$0xff] }
 0xb6d   :  { %v1870_v39 = vadd.f32 %v1867_v37, %v11154_v42  ;;  %10046 = vmatprep.subr.bf16.mxu0 %v11502_v7  ;;  %v8254_v37 = vld [vmem:[%s13549_s11] ss:$0 sm:$0xff] }
 0xb6f   :  { %v1878_v43 = vsel %vm1877_vm10, %v1870_v39, 0.0 }
 0xb70   :  { %1879 = vadd.xlane.f32.xlu0 %v1878_v43  ;;  %10048 = vmatpush1.bf16.msra.mxu0 %v11515_v13  ;;  %v386_v43 = vld [vmem:[%s13553_s15] sm:$0xff] }
 0xb71   :  { %10058 = vmatprep.subr.bf16.mxu0 %v11538_v22 }
 0xbf5   :  { %v1873_v40 = vpop.xlane.xlu1 %1872 }
 0xbf6   :  { %v1882_v44 = vmul.f32 0.03125, %v1873_v40  ;;  %v387_v40 = vld [vmem:[%s13553_s15 + $0x8] sm:$0xff] }
 0xbf8   :  { %v11442_v45 = vsub.f32 %v1868_v30, %v1882_v44  ;;  %v418_v44 = vld [vmem:[%s13553_s15 + $0x100] sm:$0xff] }
 0xbf9   :  { %v1876_v46 = vpop.xlane.xlu0 %1875 }
 0xbfa   :  { %v1883_v47 = vmul.f32 0.03125, %v1876_v46  ;;  %v1888_v48 = vmul.f32 %v11442_v45, %v11442_v45  ;;  %v404_v46 = vld [vmem:[%s13553_s15 + $0x90] sm:$0xff] }
 0xbfc   :  { %v11446_v41 = vsub.f32 %v1869_v36, %v1883_v47  ;;  %v1891_v49 = vsel %vm259_vm5, %v1888_v48, 0.0  ;;  %v405_v48 = vld [vmem:[%s13553_s15 + $0x98] sm:$0xff] }
 0xbfd   :  { %1892 = vadd.xlane.f32.xlu1 %v1891_v49  ;;  %v1880_v51 = vpop.xlane.xlu0 %1879  ;;  %v436_v49 = vld [vmem:[%s13553_s15 + $0x190] sm:$0xff]  ;;  %v11591_v15 = vpack.c.bf16 %v405_v48, %v404_v46  ;;  %v443_v46 = vld [vmem:[%s13553_s15 + $0x1c8] sm:$0xff] }
 0xbfe   :  { %v1884_v52 = vmul.f32 0.03125, %v1880_v51  ;;  %v1889_v42 = vmul.f32 %v11446_v41, %v11446_v41  ;;  %v437_v51 = vld [vmem:[%s13553_s15 + $0x198] sm:$0xff] }
 0xbff   :  { %v11593_v63 = vpack.c.bf16 %v437_v51, %v436_v49  ;;  %v394_v49 = vld [vmem:[%s13553_s15 + $0x40] sm:$0xff]  ;;  %v395_v51 = vld [vmem:[%s13553_s15 + $0x48] sm:$0xff] }
 0xc00   :  { %v11451_v57 = vsub.f32 %v1870_v39, %v1884_v52  ;;  %v1894_v58 = vsel %vm259_vm5, %v1889_v42, 0.0  ;;  %v8255_v39 = vld [vmem:[%s13550_s12] ss:$0 sm:$0xff]  ;;  %v11744_v53 = vpack.c.bf16 %v395_v51, %v394_v49  ;;  %v416_v49 = vld [vmem:[%s13553_s15 + $0xf0] sm:$0xff]  ;;  %v417_v51 = vld [vmem:[%s13553_s15 + $0xf8] sm:$0xff] }
 0xc01   :  { %1895 = vadd.xlane.f32.xlu0 %v1894_v58 }
 0xc02   :  { %v1890_v59 = vmul.f32 %v11451_v57, %v11451_v57  ;;  %13654 = vst [vmem:[#allocation7_spill] sm:$0xff] %v11744_v53 }
 0xc04   :  { %v1897_v61 = vsel %vm1877_vm10, %v1890_v59, 0.0  ;;  %v11581_v59 = vpack.c.bf16 %v387_v40, %v386_v43  ;;  %v425_v43 = vld [vmem:[%s13553_s15 + $0x138] sm:$0xff]  ;;  %v410_v40 = vld [vmem:[%s13553_s15 + $0xc0] sm:$0xff] }
 0xc05   :  { %1898 = vadd.xlane.f32.xlu1 %v1897_v61 }
 0xc8a   :  { %v1893_v27 = vpop.xlane.xlu1 %1892 }
 0xc8b   :  { %v1900_v28 = vmul.f32 0.03125, %v1893_v27  ;;  %v408_v27 = vld [vmem:[%s13553_s15 + $0xb0] sm:$0xff] }
 0xc8d   :  { %v1903_v29 = vadd.f32 1e-05, %v1900_v28 }
 0xc8e   :  { %v1896_v30 = vpop.xlane.xlu0 %1895 }
 0xc8f   :  { %10698 = vrsqrt.f32 %v1903_v29  ;;  %v1901_v31 = vmul.f32 0.03125, %v1896_v30  ;;  %v409_v29 = vld [vmem:[%s13553_s15 + $0xb8] sm:$0xff]  ;;  %v440_v30 = vld [vmem:[%s13553_s15 + $0x1b0] sm:$0xff] }
 0xc91   :  { %v1904_v32 = vadd.f32 1e-05, %v1901_v31  ;;  %v441_v31 = vld [vmem:[%s13553_s15 + $0x1b8] sm:$0xff] }
 0xc92   :  { %v1899_v33 = vpop.xlane.xlu1 %1898 }
 0xc93   :  { %10700 = vrsqrt.f32 %v1904_v32  ;;  %v1902_v34 = vmul.f32 0.03125, %v1899_v33  ;;  %v11668_v33 = vpack.c.bf16 %v391_v19, %v390_v16  ;;  %v428_v19 = vld [vmem:[%s13553_s15 + $0x150] sm:$0xff] }
 0xc95   :  { %v1905_v35 = vadd.f32 1e-05, %v1902_v34  ;;  %v11670_v34 = vpack.c.bf16 %v423_v24, %v422_v21  ;;  %v429_v21 = vld [vmem:[%s13553_s15 + $0x158] sm:$0xff]  ;;  %v414_v24 = vld [vmem:[%s13553_s15 + $0xe0] sm:$0xff] }
 0xc97   :  { %10702 = vrsqrt.f32 %v1905_v35  ;;  %v392_v35 = vld [vmem:[%s13553_s15 + $0x30] sm:$0xff] }
 0xc99   :  { %v10699_v36 = vpop.eup %10698 }
 0xc9a   :  { %v1909_v38 = vmul.f32 %v10699_v36, %v11442_v45  ;;  %v419_v45 = vld [vmem:[%s13553_s15 + $0x108] sm:$0xff]  ;;  %v393_v36 = vld [vmem:[%s13553_s15 + $0x38] sm:$0xff] }
 0xc9b   :  { %v11583_v61 = vpack.c.bf16 %v419_v45, %v418_v44  ;;  %v411_v44 = vld [vmem:[%s13553_s15 + $0xc8] sm:$0xff]  ;;  %v442_v45 = vld [vmem:[%s13553_s15 + $0x1c0] sm:$0xff] }
 0xc9c   :  { %v1918_v47 = vmul.f32 %v8254_v37, %v1909_v38  ;;  %v11682_v38 = vpack.c.bf16 %v441_v31, %v440_v30  ;;  %v11782_v31 = vpack.c.bf16 %v429_v21, %v428_v19  ;;  %v433_v19 = vld [vmem:[%s13553_s15 + $0x178] sm:$0xff] }
 0xc9d   :  { %v10701_v52 = vpop.eup %10700 }
 0xc9e   :  { %v11578_v42 = vadd.f32 %v8255_v39, %v1918_v47  ;;  %v1910_v58 = vmul.f32 %v10701_v52, %v11446_v41  ;;  %v420_v41 = vld [vmem:[%s13553_s15 + $0x110] sm:$0xff]  ;;  %v11708_v47 = vpack.c.bf16 %v393_v36, %v392_v35  ;;  %v11720_v52 = vpack.c.bf16 %v411_v44, %v410_v40  ;;  %13659 = vst [vmem:[#allocation12_spill] sm:$0xff] %v11782_v31  ;;  %v430_v40 = vld [vmem:[%s13553_s15 + $0x160] sm:$0xff] }
 0xc9f   :  { %v11626_v14 = vpack.c.bf16 %v421_v0, %v420_v41  ;;  %v412_v41 = vld [vmem:[%s13553_s15 + $0xd0] sm:$0xff]  ;;  %v413_v0 = vld [vmem:[%s13553_s15 + $0xd8] sm:$0xff] }
 0xca0   :  { %8256 = vmatmul.mubr.msk.f32.vlgmr.msra.gmra.mrb[40].mxu0 %vm259_vm5, %v11578_v42  ;;  %8259 = vmatmul.mubr.msk.f32.vlgmr.msra.gmra.mrb[44].mxu1 %vm259_vm5, %v11578_v42  ;;  %v1919_v56 = vmul.f32 %v8254_v37, %v1910_v58  ;;  %v11722_v58 = vpack.c.bf16 %v443_v46, %v442_v45  ;;  %v431_v45 = vld [vmem:[%s13553_s15 + $0x168] sm:$0xff] }
 0xca1   :  { %v10703_v6 = vpop.eup %10702  ;;  %2030 = vmatprep.mubr.f32.mxu0 %v13579_v10  ;;  %2113 = vmatprep.mubr.f32.mxu1 %v13579_v10  ;;  %v11808_v46 = vpack.c.bf16 %v431_v45, %v430_v40 }
 0xca2   :  { %v11621_v8 = vadd.f32 %v8255_v39, %v1919_v56  ;;  %v1911_v9 = vmul.f32 %v10703_v6, %v11451_v57  ;;  %10060 = vmatpush3.bf16.msra.mxu0 %v11581_v59  ;;  %10092 = vmatpush3.bf16.msra.mxu1 %v11583_v61  ;;  %v11638_v57 = vpack.c.bf16 %v439_v5, %v438_v50  ;;  %v445_v56 = vld [vmem:[%s13553_s15 + $0x1d8] sm:$0xff]  ;;  %v396_v5 = vld [vmem:[%s13553_s15 + $0x50] sm:$0xff] }
 0xca3   :  { %10062 = vmatprep.subr.bf16.mxu0 %v11591_v15  ;;  %10094 = vmatprep.subr.bf16.mxu1 %v11593_v63  ;;  %13653 = vst [vmem:[#allocation6_spill] sm:$0xff] %v11722_v58  ;;  %v11746_v50 = vpack.c.bf16 %v427_v12, %v426_v62  ;;  %v397_v6 = vld [vmem:[%s13553_s15 + $0x58] sm:$0xff]  ;;  %v11758_v16 = vpack.c.bf16 %v445_v56, %v444_v1  ;;  %13663 = vst [vmem:[#allocation16_spill] sm:$0xff] %v11808_v46  ;;  %v448_v62 = vld [vmem:[%s13553_s15 + $0x1f0] sm:$0xff] }
 0xca4   :  { %8257 = vmatmul.mubr.msk.f32.gmra.mrb[42].mxu0 %vm259_vm5, %v11621_v8  ;;  %8260 = vmatmul.mubr.msk.f32.gmra.mrb[46].mxu1 %vm259_vm5, %v11621_v8  ;;  %v1920_v28 = vmul.f32 %v8254_v37, %v1911_v9  ;;  %v11680_v37 = vpack.c.bf16 %v409_v29, %v408_v27  ;;  %v11756_v9 = vpack.c.bf16 %v413_v0, %v412_v41  ;;  %v415_v27 = vld [vmem:[%s13553_s15 + $0xe8] sm:$0xff]  ;;  %v449_v41 = vld [vmem:[%s13553_s15 + $0x1f8] sm:$0xff]  ;;  %v400_v0 = vld [vmem:[%s13553_s15 + $0x70] sm:$0xff] }
 0xca5   :  { %2036 = vmatprep.mubr.f32.mxu0 %v13579_v10  ;;  %2119 = vmatprep.mubr.f32.mxu1 %v13579_v10  ;;  %13655 = vst [vmem:[#allocation8_spill] sm:$0xff] %v11746_v50  ;;  %13657 = vst [vmem:[#allocation10_spill] sm:$0xff] %v11758_v16  ;;  %v447_v29 = vld [vmem:[%s13553_s15 + $0x1e8] sm:$0xff]  ;;  %v11780_v30 = vpack.c.bf16 %v397_v6, %v396_v5  ;;  %v11786_v35 = vpack.c.bf16 %v415_v27, %v414_v24  ;;  %v401_v1 = vld [vmem:[%s13553_s15 + $0x78] sm:$0xff]  ;;  %v1931_v24 = vlaneseq }
 0xca6   :  { %v11664_v32 = vadd.f32 %v8255_v39, %v1920_v28  ;;  %10064 = vmatpush3.bf16.msra.mxu0 %v11619_v18  ;;  %10096 = vmatpush3.bf16.msra.mxu1 %v11626_v14  ;;  %v424_v39 = vld [vmem:[%s13553_s15 + $0x130] sm:$0xff]  ;;  %13656 = vst [vmem:[#allocation9_spill] sm:$0xff] %v11756_v9  ;;  %v446_v28 = vld [vmem:[%s13553_s15 + $0x1e0] sm:$0xff]  ;;  %v11821_v12 = vpack.c.bf16 %v417_v51, %v416_v49 }
 0xca7   :  { %10066 = vmatprep.subr.bf16.mxu0 %v11636_v20  ;;  %10098 = vmatprep.subr.bf16.mxu1 %v11638_v57  ;;  %v11710_v48 = vpack.c.bf16 %v425_v43, %v424_v39  ;;  %13658 = vst [vmem:[#allocation11_spill] sm:$0xff] %v11780_v30  ;;  %13660 = vst [vmem:[#allocation13_spill] sm:$0xff] %v11786_v35  ;;  %v11788_v36 = vpack.c.bf16 %v447_v29, %v446_v28  ;;  %v398_v39 = vld [vmem:[%s13553_s15 + $0x60] sm:$0xff]  ;;  %v399_v43 = vld [vmem:[%s13553_s15 + $0x68] sm:$0xff]  ;;  %v11850_v27 = vshrl.u32 %v1931_v24, 7 }
 0xca8   :  { %8258 = vmatmul.mubr.msk.f32.gmra.mrb[44].mxu0 %vm259_vm5, %v11664_v32  ;;  %8261 = vmatmul.mubr.msk.f32.gmra.mrb[48].mxu1 %vm259_vm5, %v11664_v32  ;;  %v11803_v44 = vpack.c.bf16 %v399_v43, %v398_v39  ;;  %13664 = vst [vmem:[#allocation17_spill] sm:$0xff] %v11821_v12  ;;  %v11832_v56 = vpack.c.bf16 %v449_v41, %v448_v62  ;;  %v432_v6 = vld [vmem:[%s13553_s15 + $0x170] sm:$0xff]  ;;  %v385_v39 = vld [vmem:[%s13552_s14] sm:$0xf] }
 0xca9   :  { %13661 = vst [vmem:[#allocation14_spill] sm:$0xff] %v11788_v36  ;;  %v11834_v5 = vpack.c.bf16 %v401_v1, %v400_v0  ;;  %v11843_v21 = vpack.c.bf16 %v433_v19, %v432_v6  ;;  %13668 = vst [vmem:[#allocation21_spill] sm:$0xff] %v11850_v27  ;;  %v13577_v28 = vsub.s32 0, %v11850_v27  ;;  %v13578_v29 = vsub.s32 2, %v11850_v27 }
 0xcaa   :  { %10068 = vmatpush3.bf16.msra.mxu0 %v11668_v33  ;;  %10100 = vmatpush3.bf16.msra.mxu1 %v11670_v34  ;;  %13662 = vst [vmem:[#allocation15_spill] sm:$0xff] %v11803_v44  ;;  %13665 = vst [vmem:[#allocation18_spill] sm:$0xff] %v11832_v56  ;;  %v13583_v43 = vsub.s32 1, %v11850_v27  ;;  %v13588_v40 = vsub.s32 3, %v11850_v27 }
 0xcab   :  { %10070 = vmatprep.subr.bf16.mxu0 %v11680_v37  ;;  %10102 = vmatprep.subr.bf16.mxu1 %v11682_v38  ;;  %13666 = vst [vmem:[#allocation19_spill] sm:$0xff] %v11834_v5  ;;  %13667 = vst [vmem:[#allocation20_spill] sm:$0xff] %v11843_v21  ;;  %v11861_v45 = vrot.slane %v385_v39, %v13577_v28  ;;  %v11865_v49 = vrot.slane %v385_v39, %v13578_v29 }
 0xcac   :  { %v11869_v51 = vrot.slane %v385_v39, %v13583_v43  ;;  %v11873_v62 = vrot.slane %v385_v39, %v13588_v40 }
 0xcad   :  { %13669 = vst [vmem:[#allocation22_spill] sm:$0xff] %v11861_v45  ;;  %13670 = vst [vmem:[#allocation23_spill] sm:$0xff] %v11865_v49 }
 0xcae   :  { %10072 = vmatpush3.bf16.msra.mxu0 %v11708_v47  ;;  %10104 = vmatpush3.bf16.msra.mxu1 %v11710_v48  ;;  %13671 = vst [vmem:[#allocation24_spill] sm:$0xff] %v11869_v51  ;;  %13672 = vst [vmem:[#allocation25_spill] sm:$0xff] %v11873_v62 }
 0xcaf   :  { %10074 = vmatprep.subr.bf16.mxu0 %v11720_v52  ;;  %10106 = vmatprep.subr.bf16.mxu1 %v11722_v58 }
 0xcb2   :  { %10076 = vmatpush3.bf16.msra.mxu0 %v11744_v53  ;;  %10108 = vmatpush3.bf16.msra.mxu1 %v11746_v50 }
 0xcb3   :  { %10078 = vmatprep.subr.bf16.mxu0 %v11756_v9  ;;  %10110 = vmatprep.subr.bf16.mxu1 %v11758_v16 }
 0xcb6   :  { %10080 = vmatpush3.bf16.msra.mxu0 %v11780_v30  ;;  %10112 = vmatpush3.bf16.msra.mxu1 %v11782_v31 }
 0xcb7   :  { %10082 = vmatprep.subr.bf16.mxu0 %v11786_v35  ;;  %10114 = vmatprep.subr.bf16.mxu1 %v11788_v36 }
 0xcba   :  { %10084 = vmatpush3.bf16.msra.mxu0 %v11803_v44  ;;  %10116 = vmatpush3.bf16.msra.mxu1 %v11808_v46  ;;  %v13673_v44 = vmov 0.0|0.0  }
 0xcbb   :  { %10086 = vmatprep.subr.bf16.mxu0 %v11821_v12  ;;  %10118 = vmatprep.subr.bf16.mxu1 %v11832_v56 }
 0xcbe   :  { %10088 = vmatpush3.bf16.msra.mxu0 %v11834_v5  ;;  %10120 = vmatpush3.bf16.msra.mxu1 %v11843_v21 }
 0xcbf   :  { %10121 = vmatprep.subr.bf16.mxu0 %v13581_v4  ;;  %10127 = vmatprep.subr.bf16.mxu1 %v13581_v4 }
 0xd73   :  { %v2026_v41 = vpop.f32.mrb[40].mxu0  ;;  %v2109_v0 = vpop.f32.mrb[44].mxu1 }
 0xd74   :  { %v2027_v1 = vadd.f32 %v2026_v41, %v11861_v45  ;;  %v2110_v6 = vadd.f32 %v2109_v0, %v11865_v49  ;;  %v2028_v19 = vpop.f32.mrb[41].mxu0  ;;  %v2111_v24 = vpop.f32.mrb[45].mxu1 }
 0xd75   :  { %v2029_v28 = vadd.f32 %v2028_v19, %v11869_v51  ;;  %v2112_v29 = vadd.f32 %v2111_v24, %v11873_v62 }
 0xd76   :  { %v2126_v5 = vmax.f32 %v2027_v1, 0.0  ;;  %v2128_v27 = vmax.f32 %v2110_v6, 0.0 }
 0xd77   :  { %v2127_v10 = vmax.f32 %v2029_v28, 0.0  ;;  %v2129_v4 = vmax.f32 %v2112_v29, 0.0  ;;  %v2032_v43 = vpop.f32.mrb[42].mxu0  ;;  %v2115_v21 = vpop.f32.mrb[46].mxu1 }
 0xd78   :  { %v2033_v39 = vadd.f32 %v2032_v43, %v11861_v45  ;;  %v2116_v40 = vadd.f32 %v2115_v21, %v11865_v49  ;;  %v2034_v56 = vpop.f32.mrb[43].mxu0  ;;  %v2117_v41 = vpop.f32.mrb[47].mxu1 }
 0xd79   :  { %v2035_v0 = vadd.f32 %v2034_v56, %v11869_v51  ;;  %v2118_v12 = vadd.f32 %v2117_v41, %v11873_v62  ;;  %2208 = vmatprep.mubr.f32.mxu0 %v2127_v10  ;;  %2288 = vmatprep.mubr.f32.mxu1 %v2129_v4 }
 0xd7a   :  { %2209 = vmatmul.mubr.f32.vlgmr.msra.gmra.mrb[46].mxu0 %v2126_v5  ;;  %2289 = vmatmul.mubr.f32.vlgmr.msra.gmra.mrb[50].mxu1 %v2128_v27  ;;  %v2130_v1 = vmax.f32 %v2033_v39, 0.0  ;;  %v2132_v43 = vmax.f32 %v2116_v40, 0.0  ;;  %v13674_v40 = vmov 0.0   ;;  %v11907_v39 = vld [vmem:[#allocation2 + $0x10] sm:$0x3] }
 0xd7b   :  { %v2131_v28 = vmax.f32 %v2035_v0, 0.0  ;;  %v2133_v29 = vmax.f32 %v2118_v12, 0.0  ;;  %v2038_v19 = vpop.f32.mrb[44].mxu0  ;;  %v2121_v24 = vpop.f32.mrb[48].mxu1  ;;  %10123 = vmatpush3.bf16.msra.mxu0 %v11127_v23 }
 0xd7c   :  { %v2039_v21 = vadd.f32 %v2038_v19, %v11861_v45  ;;  %v2122_v6 = vadd.f32 %v2121_v24, %v11865_v49  ;;  %v2040_v46 = vpop.f32.mrb[45].mxu0  ;;  %v2123_v56 = vpop.f32.mrb[49].mxu1  ;;  %10124 = vmatprep.subr.bf16.mxu0 %v13673_v44 }
 0xd7d   :  { %v2041_v4 = vadd.f32 %v2040_v46, %v11869_v51  ;;  %v2124_v10 = vadd.f32 %v2123_v56, %v11873_v62  ;;  %2213 = vmatprep.mubr.f32.mxu0 %v2131_v28  ;;  %2293 = vmatprep.mubr.f32.mxu1 %v2133_v29  ;;  %v11895_v46 = vld [vmem:[#allocation2] sm:$0xff] }
 0xd7e   :  { %2214 = vmatmul.mubr.f32.gmra.mrb[48].mxu0 %v2130_v1  ;;  %2294 = vmatmul.mubr.f32.gmra.mrb[52].mxu1 %v2132_v43  ;;  %v2134_v5 = vmax.f32 %v2039_v21, 0.0  ;;  %v2136_v27 = vmax.f32 %v2122_v6, 0.0  ;;  %v8262_v28 = vld [vmem:[%s13554_s16] ss:$0 sm:$0xff] }
 0xd7f   :  { %v2135_v12 = vmax.f32 %v2041_v4, 0.0  ;;  %v2137_v23 = vmax.f32 %v2124_v10, 0.0  ;;  %10126 = vmatpush3.bf16.msra.mxu0 %v11137_v26  ;;  %v11901_v26 = vld [vmem:[#allocation2 + $0x8] sm:$0xff] }
 0xd80   :  { %10131 = vmatprep.subr.bf16.mxu0 %v13673_v44 }
 0xd81   :  { %2218 = vmatprep.mubr.f32.mxu0 %v2135_v12  ;;  %2298 = vmatprep.mubr.f32.mxu1 %v2137_v23 }
 0xd82   :  { %2219 = vmatmul.mubr.f32.gmra.mrb[50].mxu0 %v2134_v5  ;;  %2299 = vmatmul.mubr.f32.gmra.mrb[54].mxu1 %v2136_v27 }
 0xd83   :  { %9423 = vmatprep.mubr.msk.f32.mxu0 %vm10935_vm0, %v13674_v40  ;;  %9438 = vmatprep.mubr.msk.f32.mxu1 %vm10935_vm0, %v13674_v40 }
 0xd86   :  { %9424 = vmatmul.mubr.msk.f32.vlgmr.msra.gmra.mrb[52].mxu0 %vm259_vm5, %v11895_v46 }
 0xd87   :  { %9426 = vmatprep.mubr.msk.f32.mxu0 %vm10935_vm0, %v13674_v40 }
 0xd8a   :  { %9427 = vmatmul.mubr.msk.f32.gmra.mrb[54].mxu0 %vm259_vm5, %v11901_v26 }
 0xd8b   :  { %9429 = vmatprep.mubr.msk.f32.mxu0 %vm10935_vm0, %v13674_v40 }
 0xd8e   :  { %9430 = vmatmul.mubr.msk.f32.gmra.mrb[56].mxu0 %vm259_vm5, %v11907_v39 }
 0xd8f   :  { %9453 = vmatprep.mubr.msk.f32.mxu0 %vm10935_vm0, %v13674_v40 }
 0xe4d   :  { %v8676_v41 = vpop.f32.mrb[46].mxu0  ;;  %v8717_v0 = vpop.f32.mrb[50].mxu1 }
 0xe4e   :  { %v8677_v29 = vpop.f32.mrb[47].mxu0  ;;  %v8718_v19 = vpop.f32.mrb[51].mxu1 }
 0xe4f   :  { %v8678_v24 = vadd.f32 %v8677_v29, %v8676_v41  ;;  %v8719_v1 = vadd.f32 %v8718_v19, %v8717_v0 }
 0xe51   :  { %v2211_v43 = vadd.f32 %v8678_v24, %v8262_v28  ;;  %v8679_v21 = vpop.f32.mrb[48].mxu0  ;;  %v8720_v6 = vpop.f32.mrb[52].mxu1 }
 0xe52   :  { %v8680_v56 = vpop.f32.mrb[49].mxu0  ;;  %v8721_v4 = vpop.f32.mrb[53].mxu1 }
 0xe53   :  { %v11916_v10 = vadd.f32 %v8719_v1, %v2211_v43  ;;  %v8681_v12 = vadd.f32 %v8680_v56, %v8679_v21  ;;  %v8722_v23 = vadd.f32 %v8721_v4, %v8720_v6  ;;  %v10890_v1 = vld [vmem:[%s13546_s8] ss:$0 sm:$0xff] }
 0xe55   :  { %v2216_v5 = vadd.f32 %v8681_v12, %v8262_v28  ;;  %v8682_v27 = vpop.f32.mrb[50].mxu0  ;;  %v8723_v62 = vpop.f32.mrb[54].mxu1 }
 0xe56   :  { %v8683_v51 = vpop.f32.mrb[51].mxu0  ;;  %v8724_v49 = vpop.f32.mrb[55].mxu1 }
 0xe57   :  { %v11918_v45 = vadd.f32 %v8722_v23, %v2216_v5  ;;  %v8684_v36 = vadd.f32 %v8683_v51, %v8682_v27  ;;  %v8725_v35 = vadd.f32 %v8724_v49, %v8723_v62 }
 0xe59   :  { %v2221_v41 = vadd.f32 %v8684_v36, %v8262_v28  ;;  %v2439_v0 = vpop.f32.mrb[52].mxu0 }
 0xe5a   :  { %v9425_v29 = vpop.f32.mrb[53].mxu0  ;;  %v2440_v43 = vadd.f32 %v10890_v1, %v2439_v0 }
 0xe5b   :  { %v11920_v19 = vadd.f32 %v8725_v35, %v2221_v41 }
 0xe5c   :  { %v11941_v49 = vmul.f32 0.35355338, %v2440_v43 }
 0xe5d   :  { %v2444_v24 = vpop.f32.mrb[54].mxu0 }
 0xe5e   :  { %v2445_v21 = vadd.f32 %v10890_v1, %v2444_v24  ;;  %v9428_v6 = vpop.f32.mrb[55].mxu0 }
 0xe60   :  { %v11925_v56 = vpack.i.bf16 %v2445_v21, %v2440_v43  ;;  %v11937_v35 = vmul.f32 0.35355338, %v2445_v21  ;;  %v10891_v21 = vld [vmem:[%s13547_s9 + $0x8] sm:$0xff] }
 0xe61   :  { %v2449_v4 = vpop.f32.mrb[56].mxu0 }
 0xe62   :  { %v11927_v12 = vadd.f32 %v10890_v1, %v2449_v4  ;;  %10531 = vrot.lane.b32.xlu0 %v11925_v56, %s13616_s4  ;;  %v9431_v36 = vpop.f32.mrb[57].mxu0 }
 0xe64   :  { %2463 = vrot.lane.b32.xlu1 %v11927_v12, %s13616_s4  ;;  %v11946_v51 = vmul.f32 0.35355338, %v11927_v12 }
 0xe66   :  { %2702 = vrot.lane.b32.xlu0 %v11927_v12, %s13614_s28 }
 0xe68   :  { %10536 = vrot.lane.b32.xlu1 %v11925_v56, %s13614_s28 }
 0xe6a   :  { %2694 = vrot.lane.b32.xlu0 %v11937_v35, %s13612_s30 }
 0xe6c   :  { %2692 = vrot.lane.b32.xlu1 %v11941_v49, %s13612_s30 }
 0xe70   :  { %2696 = vrot.lane.b32.xlu1 %v11946_v51, %s13612_s30 }
 0xed4   :  { %v10532_v62 = vpop.permute.xlu0 %10531 }
 0xed5   :  { %v10534_v28 = vunpack.i.h.bf16 %v10532_v62  ;;  %v10533_v23 = vunpack.i.l.bf16 %v10532_v62 }
 0xed6   :  { %v2464_v5 = vpop.permute.xlu1 %2463 }
 0xed7   :  { %v10128_v27 = vpack.c.bf16 %v10534_v28, %v10533_v23 }
 0xed8   :  { %v2703_v1 = vpop.permute.xlu0 %2702 }
 0xed9   :  { %10130 = vmatpush3.bf16.xpose.msk.msra.mxu1 %vm11201_vm8, %v10128_v27 }
 0xeda   :  { %9436 = vmatprep.subr.mxu1 %v13674_v40  ;;  %v10537_v41 = vpop.permute.xlu1 %10536 }
 0xedb   :  { %v10539_v0 = vunpack.i.h.bf16 %v10537_v41  ;;  %v10538_v29 = vunpack.i.l.bf16 %v10537_v41 }
 0xedc   :  { %v2695_v6 = vpop.permute.xlu0 %2694 }
 0xedd   :  { %v10135_v24 = vpack.c.bf16 %v10539_v0, %v10538_v29 }
 0xede   :  { %v2693_v43 = vpop.permute.xlu1 %2692 }
 0xee1   :  { %9437 = vmatpush3.xpose.msk.msra.mxu1 %vm560_vm7, %v2464_v5 }
 0xee2   :  { %10134 = vmatprep.subr.bf16.mxu1 %v13673_v44  ;;  %v2697_v4 = vpop.permute.xlu1 %2696 }
 0xee4   :  { %9439 = vmatmul.mubr.msk.f32.vlgmr.msra.gmra.mrb[56].mxu1 %vm560_vm7, %v11941_v49 }
 0xee5   :  { %10137 = vmatpush3.bf16.xpose.msk.msra.mxu1 %vm11201_vm8, %v10135_v24  ;;  %9441 = vmatprep.mubr.msk.f32.mxu1 %vm10935_vm0, %v13674_v40 }
 0xee6   :  { %9466 = vmatprep.subr.mxu1 %v13674_v40 }
 0xee8   :  { %9442 = vmatmul.mubr.msk.f32.gmra.mrb[58].mxu1 %vm560_vm7, %v11937_v35 }
 0xee9   :  { %9444 = vmatprep.mubr.msk.f32.mxu1 %vm10935_vm0, %v13674_v40 }
 0xeec   :  { %9445 = vmatmul.mubr.msk.f32.gmra.mrb[60].mxu1 %vm560_vm7, %v11946_v51 }
 0xeed   :  { %9467 = vmatpush3.xpose.msk.msra.mxu1 %vm560_vm7, %v2703_v1  ;;  %9468 = vmatprep.mubr.msk.f32.mxu1 %vm10935_vm0, %v13674_v40 }
 0xeee   :  { %9492 = vmatprep.subr.mxu1 %v13674_v40 }
 0xef0   :  { %9469 = vmatmul.mubr.msk.f32.vlgmr.msra.gmra.mrb[62].mxu1 %vm560_vm7, %v2693_v43 }
 0xef1   :  { %9471 = vmatprep.mubr.msk.f32.mxu1 %vm10935_vm0, %v13674_v40  ;;  %9493 = vmatpush3.msra.mxu1 %v10891_v21 }
 0xef2   :  { %10141 = vmatprep.subr.bf16.mxu1 %v13673_v44 }
 0xef4   :  { %9472 = vmatmul.mubr.msk.f32.gmra.mrb[64].mxu1 %vm560_vm7, %v2695_v6 }
 0xef5   :  { %9474 = vmatprep.mubr.msk.f32.mxu1 %vm10935_vm0, %v13674_v40 }
 0xef8   :  { %9475 = vmatmul.mubr.msk.f32.gmra.mrb[66].mxu1 %vm560_vm7, %v2697_v4 }
 0xef9   :  { %9494 = vmatprep.mubr.msk.f32.mxu1 %vm10935_vm0, %v13674_v40 }
 0xfb7   :  { %v2546_v36 = vpop.f32.mrb[56].mxu1 }
 0xfb8   :  { %v9440_v62 = vpop.f32.mrb[57].mxu1  ;;  %v2560_v28 = vsel %vm80_vm3, %v2546_v36, -inf }
 0xfb9   :  { %2561 = vmax.xlane.f32.xlu0 %v2560_v28 }
 0xfbb   :  { %v2551_v23 = vpop.f32.mrb[58].mxu1 }
 0xfbc   :  { %v9443_v5 = vpop.f32.mrb[59].mxu1  ;;  %v2563_v27 = vsel %vm80_vm3, %v2551_v23, -inf }
 0xfbd   :  { %2564 = vmax.xlane.f32.xlu1 %v2563_v27 }
 0xfbf   :  { %v2556_v41 = vpop.f32.mrb[60].mxu1 }
 0xfc0   :  { %v9446_v0 = vpop.f32.mrb[61].mxu1  ;;  %v2566_v29 = vsel %vm662_vm9, %v2556_v41, -inf }
 0xfc1   :  { %2567 = vmax.xlane.f32.xlu0 %v2566_v29 }
 0xfc3   :  { %v2782_v24 = vpop.f32.mrb[62].mxu1 }
 0xfc4   :  { %v9470_v1 = vpop.f32.mrb[63].mxu1  ;;  %v2796_v43 = vsel %vm80_vm3, %v2782_v24, -inf }
 0xfc5   :  { %2797 = vmax.xlane.f32.xlu0 %v2796_v43 }
 0xfc7   :  { %v2787_v21 = vpop.f32.mrb[64].mxu1 }
 0xfc8   :  { %v9473_v6 = vpop.f32.mrb[65].mxu1  ;;  %v2799_v4 = vsel %vm80_vm3, %v2787_v21, -inf }
 0xfc9   :  { %2800 = vmax.xlane.f32.xlu1 %v2799_v4 }
 0xfcb   :  { %v2792_v62 = vpop.f32.mrb[66].mxu1 }
 0xfcc   :  { %v9476_v28 = vpop.f32.mrb[67].mxu1  ;;  %v2802_v5 = vsel %vm662_vm9, %v2792_v62, -inf }
 0xfcd   :  { %2803 = vmax.xlane.f32.xlu0 %v2802_v5 }
 0xfda   :  { %2597 = vrot.lane.b32.xlu1 %v11927_v12, %s13610_s29 }
 0xfe3   :  { %10541 = vrot.lane.b32.xlu0 %v11925_v56, %s13610_s29 }
0x1046   :  { %v2562_v27 = vpop.xlane.xlu0 %2561 }
0x1047   :  { %v2569_v0 = vsub.f32 %v2546_v36, %v2562_v27 }
0x1049   :  { %v2572_v29 = vmul.f32 1.442695, %v2569_v0 }
0x104a   :  { %v2565_v1 = vpop.xlane.xlu1 %2564 }
0x104b   :  { %10704 = vpow2.f32 %v2572_v29  ;;  %v2570_v43 = vsub.f32 %v2551_v23, %v2565_v1 }
0x104d   :  { %v2574_v6 = vmul.f32 1.442695, %v2570_v43 }
0x104e   :  { %v2568_v31 = vpop.xlane.xlu0 %2567 }
0x104f   :  { %10706 = vpow2.f32 %v2574_v6  ;;  %v2571_v4 = vsub.f32 %v2556_v41, %v2568_v31 }
0x1051   :  { %v2576_v28 = vmul.f32 1.442695, %v2571_v4 }
0x1052   :  { %v2798_v30 = vpop.xlane.xlu0 %2797 }
0x1053   :  { %10708 = vpow2.f32 %v2576_v28  ;;  %v2805_v5 = vsub.f32 %v2782_v24, %v2798_v30 }
0x1055   :  { %v10705_v16 = vpop.eup %10704  ;;  %v2808_v9 = vmul.f32 1.442695, %v2805_v5 }
0x1056   :  { %v2801_v50 = vpop.xlane.xlu1 %2800  ;;  %v2578_v53 = vsel %vm80_vm3, %v10705_v16, 0.0 }
0x1057   :  { %10710 = vpow2.f32 %v2808_v9  ;;  %v2806_v58 = vsub.f32 %v2787_v21, %v2801_v50  ;;  %2579 = vadd.xlane.f32.xlu1 %v2578_v53 }
0x1059   :  { %v10707_v36 = vpop.eup %10706  ;;  %v2810_v27 = vmul.f32 1.442695, %v2806_v58 }
0x105a   :  { %v2804_v0 = vpop.xlane.xlu0 %2803  ;;  %v2581_v23 = vsel %vm80_vm3, %v10707_v36, 0.0  ;;  %v2598_v21 = vpop.permute.xlu1 %2597 }
0x105b   :  { %10712 = vpow2.f32 %v2810_v27  ;;  %v2807_v29 = vsub.f32 %v2792_v62, %v2804_v0  ;;  %2582 = vadd.xlane.f32.xlu0 %v2581_v23 }
0x105d   :  { %v10709_v31 = vpop.eup %10708  ;;  %v2812_v41 = vmul.f32 1.442695, %v2807_v29 }
0x105e   :  { %v10542_v1 = vpop.permute.xlu0 %10541  ;;  %v2584_v30 = vsel %vm662_vm9, %v10709_v31, 0.0 }
0x105f   :  { %10714 = vpow2.f32 %v2812_v41  ;;  %v10544_v24 = vunpack.i.h.bf16 %v10542_v1  ;;  %v10543_v43 = vunpack.i.l.bf16 %v10542_v1  ;;  %2585 = vadd.xlane.f32.xlu1 %v2584_v30 }
0x1061   :  { %v10711_v9 = vpop.eup %10710  ;;  %v10132_v50 = vpack.c.bf16 %v10544_v24, %v10543_v43 }
0x1062   :  { %v2814_v53 = vsel %vm80_vm3, %v10711_v9, 0.0 }
0x1063   :  { %2815 = vadd.xlane.f32.xlu0 %v2814_v53  ;;  %10133 = vmatpush3.bf16.msra.mxu0 %v10132_v50 }
0x1064   :  { %9451 = vmatprep.subr.mxu0 %v13674_v40 }
0x1065   :  { %v10713_v58 = vpop.eup %10712 }
0x1066   :  { %v2817_v62 = vsel %vm80_vm3, %v10713_v58, 0.0 }
0x1067   :  { %2818 = vadd.xlane.f32.xlu1 %v2817_v62  ;;  %9452 = vmatpush3.msk.msra.mxu0 %vm84_vm2, %v2598_v21 }
0x1068   :  { %10138 = vmatprep.subr.bf16.mxu0 %v13673_v44 }
0x1069   :  { %v10715_v6 = vpop.eup %10714 }
0x106a   :  { %v2820_v4 = vsel %vm662_vm9, %v10715_v6, 0.0 }
0x106b   :  { %2821 = vadd.xlane.f32.xlu1 %v2820_v4 }
0x1079   :  { %10546 = vrot.lane.b32.xlu0 %v11925_v56, %s13675_s3 }
0x107c   :  { %2833 = vrot.lane.b32.xlu1 %v11927_v12, %s13675_s3 }
0x107d   :  { %10551 = vrot.lane.b32.xlu0 %v11925_v56, %s13676_s23 }
0x1080   :  { %3116 = vrot.lane.b32.xlu1 %v11927_v12, %s13676_s23 }
0x1081   :  { %3106 = vrot.lane.b32.xlu0 %v11941_v49, %s13677_s22 }
0x1084   :  { %3108 = vrot.lane.b32.xlu1 %v11937_v35, %s13677_s22 }
0x1085   :  { %3110 = vrot.lane.b32.xlu0 %v11946_v51, %s13677_s22 }
0x10e4   :  { %v2580_v28 = vpop.xlane.xlu1 %2579 }
0x10e5   :  { %10716 = vrcp.f32 %v2580_v28 }
0x10e8   :  { %v2583_v5 = vpop.xlane.xlu0 %2582 }
0x10e9   :  { %10718 = vrcp.f32 %v2583_v5 }
0x10ec   :  { %v2586_v27 = vpop.xlane.xlu1 %2585 }
0x10ed   :  { %10720 = vrcp.f32 %v2586_v27 }
0x10ef   :  { %v10717_v0 = vpop.eup %10716 }
0x10f0   :  { %v2590_v23 = vmul.f32 %v10717_v0, %v10705_v16  ;;  %v2816_v29 = vpop.xlane.xlu0 %2815 }
0x10f1   :  { %10722 = vrcp.f32 %v2816_v29 }
0x10f2   :  { %9454 = vmatmul.mubr.msk.f32.vlgmr.msra.gmra.mrb[58].mxu0 %vm80_vm3, %v2590_v23 }
0x10f3   :  { %v10719_v41 = vpop.eup %10718  ;;  %9456 = vmatprep.mubr.msk.f32.mxu0 %vm10935_vm0, %v13674_v40 }
0x10f4   :  { %v2819_v1 = vpop.xlane.xlu1 %2818  ;;  %v10547_v30 = vpop.permute.xlu0 %10546  ;;  %v2591_v24 = vmul.f32 %v10719_v41, %v10707_v36 }
0x10f5   :  { %10724 = vrcp.f32 %v2819_v1  ;;  %v10549_v43 = vunpack.i.h.bf16 %v10547_v30  ;;  %v10548_v50 = vunpack.i.l.bf16 %v10547_v30 }
0x10f6   :  { %9457 = vmatmul.mubr.msk.f32.gmra.mrb[60].mxu0 %vm80_vm3, %v2591_v24 }
0x10f7   :  { %v10721_v53 = vpop.eup %10720  ;;  %v10139_v21 = vpack.c.bf16 %v10549_v43, %v10548_v50  ;;  %9459 = vmatprep.mubr.msk.f32.mxu0 %vm10935_vm0, %v13674_v40 }
0x10f8   :  { %v2822_v16 = vpop.xlane.xlu1 %2821  ;;  %v2592_v62 = vmul.f32 %v10721_v53, %v10709_v31  ;;  %v10892_v31 = vld [vmem:[%s13547_s9] sm:$0xff]  ;;  %v10552_v41 = vpop.permute.xlu0 %10551 }
0x10f9   :  { %10726 = vrcp.f32 %v2822_v16  ;;  %10140 = vmatpush3.bf16.msra.mxu0 %v10139_v21  ;;  %v10553_v30 = vunpack.i.l.bf16 %v10552_v41 }
0x10fa   :  { %9460 = vmatmul.mubr.msk.f32.gmra.mrb[62].mxu0 %vm80_vm3, %v2592_v62  ;;  %9481 = vmatprep.subr.mxu0 %v13674_v40 }
0x10fb   :  { %v10723_v4 = vpop.eup %10722  ;;  %9483 = vmatprep.mubr.msk.f32.mxu0 %vm10935_vm0, %v13674_v40 }
0x10fc   :  { %v2826_v36 = vmul.f32 %v10723_v4, %v10711_v9  ;;  %v2834_v28 = vpop.permute.xlu1 %2833 }
0x10fd   :  { %9482 = vmatpush3.msk.msra.mxu0 %vm84_vm2, %v2834_v28 }
0x10fe   :  { %9484 = vmatmul.mubr.msk.f32.vlgmr.msra.gmra.mrb[64].mxu0 %vm80_vm3, %v2826_v36  ;;  %9503 = vmatprep.subr.mxu0 %v13674_v40 }
0x10ff   :  { %v10725_v5 = vpop.eup %10724  ;;  %9486 = vmatprep.mubr.msk.f32.mxu0 %vm10935_vm0, %v13674_v40  ;;  %9504 = vmatpush3.msra.mxu0 %v10892_v31  ;;  %v10893_v31 = vld [vmem:[%s13547_s9 + $0x10] sm:$0xff] }
0x1100   :  { %v2827_v27 = vmul.f32 %v10725_v5, %v10713_v58  ;;  %10145 = vmatprep.subr.bf16.mxu0 %v13673_v44  ;;  %v3117_v36 = vpop.permute.xlu1 %3116  ;;  %v3107_v5 = vpop.permute.xlu0 %3106 }
0x1102   :  { %9487 = vmatmul.mubr.msk.f32.gmra.mrb[66].mxu0 %vm80_vm3, %v2827_v27 }
0x1103   :  { %v10727_v9 = vpop.eup %10726  ;;  %9489 = vmatprep.mubr.msk.f32.mxu0 %vm10935_vm0, %v13674_v40 }
0x1104   :  { %v2828_v0 = vmul.f32 %v10727_v9, %v10715_v6  ;;  %v10554_v6 = vunpack.i.h.bf16 %v10552_v41  ;;  %v3109_v27 = vpop.permute.xlu1 %3108  ;;  %v3111_v9 = vpop.permute.xlu0 %3110 }
0x1106   :  { %9490 = vmatmul.mubr.msk.f32.gmra.mrb[68].mxu0 %vm80_vm3, %v2828_v0  ;;  %v10142_v50 = vpack.c.bf16 %v10554_v6, %v10553_v30 }
0x1107   :  { %9505 = vmatprep.mubr.msk.f32.mxu0 %vm10935_vm0, %v13674_v40 }
0x11c5   :  { %v2678_v23 = vpop.f32.mrb[58].mxu0 }
0x11c6   :  { %v9455_v29 = vpop.f32.mrb[59].mxu0  ;;  %9506 = vmatmul.mubr.msk.f32.vlgmr.msra.gmra.mrb[70].mxu0 %vm560_vm7, %v2678_v23 }
0x11c7   :  { %9508 = vmatprep.mubr.msk.f32.mxu0 %vm10935_vm0, %v13674_v40 }
0x11c9   :  { %v2683_v58 = vpop.f32.mrb[60].mxu0 }
0x11ca   :  { %v9458_v1 = vpop.f32.mrb[61].mxu0  ;;  %9509 = vmatmul.mubr.msk.f32.gmra.mrb[72].mxu0 %vm560_vm7, %v2683_v58 }
0x11cb   :  { %9511 = vmatprep.mubr.msk.f32.mxu0 %vm10935_vm0, %v13674_v40 }
0x11cd   :  { %v2688_v24 = vpop.f32.mrb[62].mxu0 }
0x11ce   :  { %v9461_v43 = vpop.f32.mrb[63].mxu0  ;;  %9512 = vmatmul.mubr.msk.f32.gmra.mrb[74].mxu0 %vm560_vm7, %v2688_v24 }
0x11cf   :  { %9535 = vmatprep.mubr.msk.f32.mxu0 %vm10935_vm0, %v13674_v40 }
0x11d1   :  { %v2914_v53 = vpop.f32.mrb[64].mxu0 }
0x11d2   :  { %v9485_v21 = vpop.f32.mrb[65].mxu0  ;;  %9495 = vmatmul.mubr.msk.f32.vlgmr.msra.gmra.mrb[68].mxu1 %vm560_vm7, %v2914_v53 }
0x11d3   :  { %10144 = vmatpush3.bf16.xpose.msk.msra.mxu1 %vm11201_vm8, %v10142_v50  ;;  %9497 = vmatprep.mubr.msk.f32.mxu1 %vm10935_vm0, %v13674_v40 }
0x11d4   :  { %9518 = vmatprep.subr.mxu1 %v13674_v40 }
0x11d5   :  { %v2919_v16 = vpop.f32.mrb[66].mxu0 }
0x11d6   :  { %v9488_v62 = vpop.f32.mrb[67].mxu0  ;;  %9498 = vmatmul.mubr.msk.f32.gmra.mrb[70].mxu1 %vm560_vm7, %v2919_v16 }
0x11d7   :  { %9500 = vmatprep.mubr.msk.f32.mxu1 %vm10935_vm0, %v13674_v40 }
0x11d9   :  { %v2924_v4 = vpop.f32.mrb[68].mxu0 }
0x11da   :  { %v9491_v28 = vpop.f32.mrb[69].mxu0  ;;  %9501 = vmatmul.mubr.msk.f32.gmra.mrb[72].mxu1 %vm560_vm7, %v2924_v4 }
0x11db   :  { %9519 = vmatpush3.xpose.msk.msra.mxu1 %vm560_vm7, %v3117_v36  ;;  %9520 = vmatprep.mubr.msk.f32.mxu1 %vm10935_vm0, %v13674_v40 }
0x11dc   :  { %9544 = vmatprep.subr.mxu1 %v13674_v40 }
0x11de   :  { %9521 = vmatmul.mubr.msk.f32.vlgmr.msra.gmra.mrb[74].mxu1 %vm560_vm7, %v3107_v5 }
0x11df   :  { %9523 = vmatprep.mubr.msk.f32.mxu1 %vm10935_vm0, %v13674_v40  ;;  %9545 = vmatpush3.msra.mxu1 %v10893_v31 }
0x11e0   :  { %10152 = vmatprep.subr.bf16.mxu1 %v13673_v44 }
0x11e2   :  { %9524 = vmatmul.mubr.msk.f32.gmra.mrb[76].mxu1 %vm560_vm7, %v3109_v27 }
0x11e3   :  { %9526 = vmatprep.mubr.msk.f32.mxu1 %vm10935_vm0, %v13674_v40 }
0x11e6   :  { %9527 = vmatmul.mubr.msk.f32.gmra.mrb[78].mxu1 %vm560_vm7, %v3111_v9 }
0x11e7   :  { %9546 = vmatprep.mubr.msk.f32.mxu1 %vm10935_vm0, %v13674_v40 }
0x1299   :  { %v3092_v0 = vpop.f32.mrb[70].mxu0 }
0x129a   :  { %v9507_v23 = vpop.f32.mrb[71].mxu0 }
0x129d   :  { %v3097_v29 = vpop.f32.mrb[72].mxu0 }
0x129e   :  { %v9510_v58 = vpop.f32.mrb[73].mxu0 }
0x12a1   :  { %v3102_v41 = vpop.f32.mrb[74].mxu0 }
0x12a2   :  { %v9513_v1 = vpop.f32.mrb[75].mxu0 }
0x12a5   :  { %v3003_v6 = vpop.f32.mrb[68].mxu1 }
0x12a6   :  { %v12079_v30 = vadd.f32 %v3092_v0, %v3003_v6  ;;  %v9496_v24 = vpop.f32.mrb[69].mxu1 }
0x12a9   :  { %v3008_v43 = vpop.f32.mrb[70].mxu1 }
0x12aa   :  { %v12081_v50 = vadd.f32 %v3097_v29, %v3008_v43  ;;  %v9499_v53 = vpop.f32.mrb[71].mxu1 }
0x12ad   :  { %v3013_v21 = vpop.f32.mrb[72].mxu1 }
0x12ae   :  { %v12083_v16 = vadd.f32 %v3102_v41, %v3013_v21  ;;  %v9502_v62 = vpop.f32.mrb[73].mxu1 }
0x12b1   :  { %v3196_v4 = vpop.f32.mrb[74].mxu1 }
0x12b2   :  { %v9522_v36 = vpop.f32.mrb[75].mxu1  ;;  %v3210_v28 = vsel %vm80_vm3, %v3196_v4, -inf }
0x12b3   :  { %3211 = vmax.xlane.f32.xlu1 %v3210_v28 }
0x12b5   :  { %v3201_v5 = vpop.f32.mrb[76].mxu1 }
0x12b6   :  { %v9525_v31 = vpop.f32.mrb[77].mxu1  ;;  %v3213_v27 = vsel %vm80_vm3, %v3201_v5, -inf }
0x12b7   :  { %3214 = vmax.xlane.f32.xlu0 %v3213_v27 }
0x12b9   :  { %v3206_v9 = vpop.f32.mrb[78].mxu1 }
0x12ba   :  { %v9528_v0 = vpop.f32.mrb[79].mxu1  ;;  %v3216_v23 = vsel %vm662_vm9, %v3206_v9, -inf }
0x12bb   :  { %3217 = vmax.xlane.f32.xlu0 %v3216_v23 }
0x1340   :  { %v3212_v29 = vpop.xlane.xlu1 %3211 }
0x1341   :  { %v3219_v58 = vsub.f32 %v3196_v4, %v3212_v29 }
0x1343   :  { %v3222_v41 = vmul.f32 1.442695, %v3219_v58 }
0x1344   :  { %v3215_v1 = vpop.xlane.xlu0 %3214 }
0x1345   :  { %10728 = vpow2.f32 %v3222_v41  ;;  %v3220_v6 = vsub.f32 %v3201_v5, %v3215_v1 }
0x1347   :  { %v3224_v24 = vmul.f32 1.442695, %v3220_v6 }
0x1348   :  { %v3218_v4 = vpop.xlane.xlu0 %3217 }
0x1349   :  { %10730 = vpow2.f32 %v3224_v24  ;;  %v3221_v36 = vsub.f32 %v3206_v9, %v3218_v4 }
0x134b   :  { %v3226_v28 = vmul.f32 1.442695, %v3221_v36 }
0x134d   :  { %10732 = vpow2.f32 %v3226_v28 }
0x134f   :  { %v10729_v43 = vpop.eup %10728 }
0x1350   :  { %v3228_v53 = vsel %vm80_vm3, %v10729_v43, 0.0 }
0x1351   :  { %3229 = vadd.xlane.f32.xlu1 %v3228_v53 }
0x1353   :  { %v10731_v21 = vpop.eup %10730 }
0x1354   :  { %v3231_v62 = vsel %vm80_vm3, %v10731_v21, 0.0 }
0x1355   :  { %3232 = vadd.xlane.f32.xlu0 %v3231_v62 }
0x1357   :  { %v10733_v5 = vpop.eup %10732 }
0x1358   :  { %v3234_v31 = vsel %vm662_vm9, %v10733_v5, 0.0 }
0x1362   :  { %3247 = vrot.lane.b32.xlu1 %v11927_v12, %s13678_s24 }
0x1366   :  { %10561 = vrot.lane.b32.xlu1 %v11925_v56, %s13679_s26 }
0x136b   :  { %10556 = vrot.lane.b32.xlu0 %v11925_v56, %s13678_s24 }
0x136f   :  { %3444 = vrot.lane.b32.xlu0 %v11927_v12, %s13679_s26 }
0x1373   :  { %3436 = vrot.lane.b32.xlu0 %v11937_v35, %s13680_s5 }
0x138a   :  { %3235 = vadd.xlane.f32.xlu1 %v3234_v31  ;;  %v10894_v31 = vld [vmem:[%s13547_s9 + $0x18] sm:$0xff] }
0x139b   :  { %3434 = vrot.lane.b32.xlu1 %v11941_v49, %s13680_s5 }
0x139f   :  { %3438 = vrot.lane.b32.xlu1 %v11946_v51, %s13680_s5 }
0x13de   :  { %v3230_v27 = vpop.xlane.xlu1 %3229 }
0x13df   :  { %10734 = vrcp.f32 %v3230_v27 }
0x13e2   :  { %v3233_v0 = vpop.xlane.xlu0 %3232  ;;  %v3248_v29 = vpop.permute.xlu1 %3247 }
0x13e3   :  { %10736 = vrcp.f32 %v3233_v0 }
0x13e6   :  { %v10557_v23 = vpop.permute.xlu0 %10556  ;;  %v10562_v1 = vpop.permute.xlu1 %10561 }
0x13e7   :  { %v10559_v35 = vunpack.i.h.bf16 %v10557_v23  ;;  %v10558_v9 = vunpack.i.l.bf16 %v10557_v23  ;;  %v10564_v49 = vunpack.i.h.bf16 %v10562_v1  ;;  %v10563_v51 = vunpack.i.l.bf16 %v10562_v1 }
0x13e9   :  { %v10146_v58 = vpack.c.bf16 %v10559_v35, %v10558_v9  ;;  %v10735_v41 = vpop.eup %10734  ;;  %v10149_v62 = vpack.c.bf16 %v10564_v49, %v10563_v51 }
0x13ea   :  { %v3240_v6 = vmul.f32 %v10735_v41, %v10729_v43  ;;  %v3445_v43 = vpop.permute.xlu0 %3444 }
0x13eb   :  { %10147 = vmatpush3.bf16.msra.mxu0 %v10146_v58 }
0x13ec   :  { %9533 = vmatprep.subr.mxu0 %v13674_v40 }
0x13ed   :  { %v10737_v24 = vpop.eup %10736 }
0x13ee   :  { %v3241_v53 = vmul.f32 %v10737_v24, %v10731_v21  ;;  %v3437_v27 = vpop.permute.xlu0 %3436 }
0x13ef   :  { %9534 = vmatpush3.msk.msra.mxu0 %vm84_vm2, %v3248_v29 }
0x13f0   :  { %9536 = vmatmul.mubr.msk.f32.vlgmr.msra.gmra.mrb[76].mxu0 %vm80_vm3, %v3240_v6  ;;  %10148 = vmatprep.subr.bf16.mxu0 %v13673_v44 }
0x13f1   :  { %9538 = vmatprep.mubr.msk.f32.mxu0 %vm10935_vm0, %v13674_v40 }
0x13f4   :  { %9539 = vmatmul.mubr.msk.f32.gmra.mrb[78].mxu0 %vm80_vm3, %v3241_v53 }
0x13f5   :  { %9541 = vmatprep.mubr.msk.f32.mxu0 %vm10935_vm0, %v13674_v40 }
0x13f6   :  { %10151 = vmatpush3.bf16.xpose.msk.msra.mxu0 %vm11201_vm8, %v10149_v62 }
0x13f7   :  { %9559 = vmatprep.subr.mxu0 %v13674_v40 }
0x13fe   :  { %9560 = vmatpush3.xpose.msk.msra.mxu0 %vm560_vm7, %v3445_v43 }
0x13ff   :  { %9585 = vmatprep.subr.mxu0 %v13674_v40 }
0x1417   :  { %v3236_v4 = vpop.xlane.xlu1 %3235 }
0x1418   :  { %10738 = vrcp.f32 %v3236_v4 }
0x141b   :  { %v3435_v28 = vpop.permute.xlu1 %3434 }
0x1422   :  { %v10739_v36 = vpop.eup %10738 }
0x1423   :  { %v3242_v21 = vmul.f32 %v10739_v36, %v10733_v5  ;;  %v3439_v5 = vpop.permute.xlu1 %3438 }
0x1425   :  { %9542 = vmatmul.mubr.msk.f32.gmra.mrb[80].mxu0 %vm80_vm3, %v3242_v21 }
0x1426   :  { %9561 = vmatprep.mubr.msk.f32.mxu0 %vm10935_vm0, %v13674_v40 }
0x1429   :  { %9562 = vmatmul.mubr.msk.f32.vlgmr.msra.gmra.mrb[82].mxu0 %vm560_vm7, %v3435_v28 }
0x142a   :  { %9564 = vmatprep.mubr.msk.f32.mxu0 %vm10935_vm0, %v13674_v40  ;;  %9586 = vmatpush3.msra.mxu0 %v10894_v31 }
0x142b   :  { %10164 = vmatprep.subr.bf16.mxu0 %v11477_v2 }
0x142d   :  { %9565 = vmatmul.mubr.msk.f32.gmra.mrb[84].mxu0 %vm560_vm7, %v3437_v27 }
0x142e   :  { %9567 = vmatprep.mubr.msk.f32.mxu0 %vm10935_vm0, %v13674_v40 }
0x1431   :  { %9568 = vmatmul.mubr.msk.f32.gmra.mrb[86].mxu0 %vm560_vm7, %v3439_v5 }
0x1432   :  { %9587 = vmatprep.mubr.msk.f32.mxu0 %vm10935_vm0, %v13674_v40 }
0x14c3   :  { %v3328_v0 = vpop.f32.mrb[76].mxu0 }
0x14c4   :  { %v9537_v23 = vpop.f32.mrb[77].mxu0  ;;  %9547 = vmatmul.mubr.msk.f32.vlgmr.msra.gmra.mrb[80].mxu1 %vm560_vm7, %v3328_v0 }
0x14c5   :  { %9549 = vmatprep.mubr.msk.f32.mxu1 %vm10935_vm0, %v13674_v40 }
0x14c7   :  { %v3333_v2 = vpop.f32.mrb[78].mxu0 }
0x14c8   :  { %v9540_v29 = vpop.f32.mrb[79].mxu0  ;;  %9550 = vmatmul.mubr.msk.f32.gmra.mrb[82].mxu1 %vm560_vm7, %v3333_v2 }
0x14c9   :  { %9552 = vmatprep.mubr.msk.f32.mxu1 %vm10935_vm0, %v13674_v40 }
0x14f8   :  { %v3338_v35 = vpop.f32.mrb[80].mxu0 }
0x14f9   :  { %v9543_v9 = vpop.f32.mrb[81].mxu0  ;;  %9553 = vmatmul.mubr.msk.f32.gmra.mrb[84].mxu1 %vm560_vm7, %v3338_v35 }
0x14fa   :  { %9576 = vmatprep.mubr.msk.f32.mxu1 %vm10935_vm0, %v13674_v40 }
0x14fc   :  { %v3524_v58 = vpop.f32.mrb[82].mxu0 }
0x14fd   :  { %v9563_v41 = vpop.f32.mrb[83].mxu0  ;;  %v3538_v1 = vsel %vm80_vm3, %v3524_v58, -inf }
0x14fe   :  { %3539 = vmax.xlane.f32.xlu0 %v3538_v1 }
0x1500   :  { %v3529_v6 = vpop.f32.mrb[84].mxu0 }
0x1501   :  { %v9566_v24 = vpop.f32.mrb[85].mxu0  ;;  %v3541_v49 = vsel %vm80_vm3, %v3529_v6, -inf }
0x1502   :  { %3542 = vmax.xlane.f32.xlu1 %v3541_v49 }
0x1504   :  { %v3534_v51 = vpop.f32.mrb[86].mxu0 }
0x1505   :  { %v9569_v53 = vpop.f32.mrb[87].mxu0  ;;  %v3544_v62 = vsel %vm662_vm9, %v3534_v51, -inf }
0x1506   :  { %3545 = vmax.xlane.f32.xlu0 %v3544_v62 }
0x158b   :  { %v3540_v43 = vpop.xlane.xlu0 %3539 }
0x158c   :  { %v3547_v4 = vsub.f32 %v3524_v58, %v3540_v43 }
0x158e   :  { %v3550_v36 = vmul.f32 1.442695, %v3547_v4 }
0x158f   :  { %v3543_v21 = vpop.xlane.xlu1 %3542 }
0x1590   :  { %10740 = vpow2.f32 %v3550_v36  ;;  %v3548_v28 = vsub.f32 %v3529_v6, %v3543_v21 }
0x1592   :  { %v3552_v31 = vmul.f32 1.442695, %v3548_v28 }
0x1593   :  { %v3546_v27 = vpop.xlane.xlu0 %3545 }
0x1594   :  { %10742 = vpow2.f32 %v3552_v31  ;;  %v3549_v5 = vsub.f32 %v3534_v51, %v3546_v27 }
0x1596   :  { %v3554_v0 = vmul.f32 1.442695, %v3549_v5 }
0x1597   :  { %v3417_v23 = vpop.f32.mrb[80].mxu1 }
0x1598   :  { %10744 = vpow2.f32 %v3554_v0  ;;  %v12148_v2 = vadd.f32 %v3417_v23, %v12079_v30  ;;  %v9548_v29 = vpop.f32.mrb[81].mxu1 }
0x159a   :  { %v10741_v35 = vpop.eup %10740 }
0x159b   :  { %v3422_v9 = vpop.f32.mrb[82].mxu1  ;;  %v3556_v41 = vsel %vm80_vm3, %v10741_v35, 0.0 }
0x159c   :  { %v12152_v58 = vadd.f32 %v3422_v9, %v12081_v50  ;;  %v9551_v1 = vpop.f32.mrb[83].mxu1  ;;  %3557 = vadd.xlane.f32.xlu0 %v3556_v41  ;;  %v10895_v9 = vld [vmem:[%s13548_s10] ss:$0 sm:$0xff] }
0x159e   :  { %v10743_v6 = vpop.eup %10742 }
0x159f   :  { %v3559_v24 = vsel %vm80_vm3, %v10743_v6, 0.0 }
0x15a0   :  { %3560 = vadd.xlane.f32.xlu1 %v3559_v24 }
0x15a2   :  { %v10745_v49 = vpop.eup %10744 }
0x15a3   :  { %v3562_v51 = vsel %vm662_vm9, %v10745_v49, 0.0 }
0x15a4   :  { %3563 = vadd.xlane.f32.xlu0 %v3562_v51 }
0x15b1   :  { %10566 = vrot.lane.b32.xlu1 %v11925_v56, %s13681_s1 }
0x15ba   :  { %3575 = vrot.lane.b32.xlu0 %v11927_v12, %s13681_s1 }
0x15cc   :  { %v3427_v30 = vpop.f32.mrb[84].mxu1 }
0x15cd   :  { %v3433_v50 = vadd.f32 %v3427_v30, %v12083_v16  ;;  %v9554_v53 = vpop.f32.mrb[85].mxu1 }
0x1629   :  { %v3558_v62 = vpop.xlane.xlu0 %3557 }
0x162a   :  { %10746 = vrcp.f32 %v3558_v62 }
0x162d   :  { %v3561_v43 = vpop.xlane.xlu1 %3560 }
0x162e   :  { %10748 = vrcp.f32 %v3561_v43 }
0x1631   :  { %v10567_v4 = vpop.permute.xlu1 %10566  ;;  %v3564_v36 = vpop.xlane.xlu0 %3563 }
0x1632   :  { %v10569_v21 = vunpack.i.h.bf16 %v10567_v4  ;;  %v10568_v28 = vunpack.i.l.bf16 %v10567_v4  ;;  %10750 = vrcp.f32 %v3564_v36 }
0x1634   :  { %v10153_v31 = vpack.c.bf16 %v10569_v21, %v10568_v28  ;;  %v10747_v27 = vpop.eup %10746 }
0x1635   :  { %v3568_v56 = vmul.f32 %v10747_v27, %v10741_v35  ;;  %v3576_v12 = vpop.permute.xlu0 %3575 }
0x1636   :  { %10154 = vmatpush3.bf16.msra.mxu1 %v10153_v31 }
0x1637   :  { %9574 = vmatprep.subr.mxu1 %v13674_v40 }
0x1638   :  { %v10749_v5 = vpop.eup %10748 }
0x1639   :  { %v3569_v16 = vmul.f32 %v10749_v5, %v10743_v6 }
0x163a   :  { %9575 = vmatpush3.msk.msra.mxu1 %vm84_vm2, %v3576_v12 }
0x163b   :  { %9577 = vmatmul.mubr.msk.f32.vlgmr.msra.gmra.mrb[86].mxu1 %vm80_vm3, %v3568_v56  ;;  %10156 = vmatprep.subr.bf16.mxu1 %v11466_v54 }
0x163c   :  { %9579 = vmatprep.mubr.msk.f32.mxu1 %vm10935_vm0, %v13674_v40  ;;  %10158 = vmatpush1.bf16.msra.mxu1 %v11479_v55  ;;  %v10751_v0 = vpop.eup %10750 }
0x163d   :  { %10160 = vmatprep.subr.bf16.mxu1 %v11502_v7  ;;  %v3570_v23 = vmul.f32 %v10751_v0, %v10745_v49 }
0x163f   :  { %9580 = vmatmul.mubr.msk.f32.gmra.mrb[88].mxu1 %vm80_vm3, %v3569_v16 }
0x1640   :  { %9582 = vmatprep.mubr.msk.f32.mxu1 %vm10935_vm0, %v13674_v40  ;;  %10162 = vmatpush1.bf16.msra.mxu1 %v11515_v13 }
0x1641   :  { %10172 = vmatprep.subr.bf16.mxu1 %v11538_v22 }
0x1643   :  { %9583 = vmatmul.mubr.msk.f32.gmra.mrb[90].mxu1 %vm80_vm3, %v3570_v23 }
0x1644   :  { %3886 = vmatprep.mubr.f32.mxu1 %v13674_v40 }
0x170e   :  { %v3656_v54 = vpop.f32.mrb[86].mxu1 }
0x170f   :  { %v9578_v55 = vpop.f32.mrb[87].mxu1  ;;  %9588 = vmatmul.mubr.msk.f32.vlgmr.msra.gmra.mrb[88].mxu0 %vm560_vm7, %v3656_v54 }
0x1710   :  { %9590 = vmatprep.mubr.msk.f32.mxu0 %vm10935_vm0, %v13674_v40  ;;  %10166 = vmatpush1.bf16.msra.mxu0 %v11488_v3 }
0x1711   :  { %10168 = vmatprep.subr.bf16.mxu0 %v11513_v11 }
0x1712   :  { %v3661_v7 = vpop.f32.mrb[88].mxu1 }
0x1713   :  { %v9581_v13 = vpop.f32.mrb[89].mxu1  ;;  %9591 = vmatmul.mubr.msk.f32.gmra.mrb[90].mxu0 %vm560_vm7, %v3661_v7  ;;  %v2306_v7 = vadd.f32 %v11920_v19, %v11664_v32 }
0x1714   :  { %9593 = vmatprep.mubr.msk.f32.mxu0 %vm10935_vm0, %v13674_v40  ;;  %10170 = vmatpush1.bf16.msra.mxu0 %v11524_v17  ;;  %v2305_v13 = vadd.f32 %v11918_v45, %v11621_v8 }
0x1715   :  { %10204 = vmatprep.subr.bf16.mxu0 %v11543_v25 }
0x1716   :  { %v3666_v22 = vpop.f32.mrb[90].mxu1 }
0x1717   :  { %v9584_v29 = vpop.f32.mrb[91].mxu1  ;;  %9594 = vmatmul.mubr.msk.f32.gmra.mrb[92].mxu0 %vm560_vm7, %v3666_v22  ;;  %v2313_v22 = vsel %vm1877_vm10, %v2306_v7, 0.0 }
0x1718   :  { %3969 = vmatprep.mubr.f32.mxu0 %v13674_v40  ;;  %v2310_v29 = vsel %vm259_vm5, %v2305_v13, 0.0 }
0x17e2   :  { %v3745_v3 = vpop.f32.mrb[88].mxu0 }
0x17e3   :  { %v3759_v11 = vadd.f32 %v3745_v3, %v12148_v2  ;;  %v9589_v35 = vpop.f32.mrb[89].mxu0 }
0x17e5   :  { %v3762_v41 = vadd.f32 %v10895_v9, %v3759_v11 }
0x17e6   :  { %v3750_v1 = vpop.f32.mrb[90].mxu0 }
0x17e7   :  { %v3760_v17 = vadd.f32 %v3750_v1, %v12152_v58  ;;  %v9592_v6 = vpop.f32.mrb[91].mxu0  ;;  %v3765_v25 = vadd.f32 %v3762_v41, %v11895_v46 }
0x17e9   :  { %v3763_v24 = vadd.f32 %v10895_v9, %v3760_v17  ;;  %v3768_v49 = vsel %vm259_vm5, %v3765_v25, 0.0 }
0x17ea   :  { %3769 = vadd.xlane.f32.xlu1 %v3768_v49  ;;  %v3755_v51 = vpop.f32.mrb[92].mxu0 }
0x17eb   :  { %v3761_v30 = vadd.f32 %v3755_v51, %v3433_v50  ;;  %v9595_v53 = vpop.f32.mrb[93].mxu0  ;;  %v3766_v2 = vadd.f32 %v3763_v24, %v11901_v26 }
0x17ed   :  { %v3764_v62 = vadd.f32 %v10895_v9, %v3761_v30  ;;  %v3771_v43 = vsel %vm259_vm5, %v3766_v2, 0.0 }
0x17ee   :  { %3772 = vadd.xlane.f32.xlu0 %v3771_v43 }
0x17ef   :  { %v3767_v4 = vadd.f32 %v3764_v62, %v11907_v39  ;;  %v2304_v39 = vadd.f32 %v11916_v10, %v11578_v42 }
0x17f1   :  { %v3774_v58 = vsel %vm1877_vm10, %v3767_v4, 0.0  ;;  %v2307_v54 = vsel %vm259_vm5, %v2304_v39, 0.0 }
0x17f2   :  { %3775 = vadd.xlane.f32.xlu1 %v3774_v58  ;;  %v10896_v58 = vld [vmem:[%s13549_s11] ss:$0 sm:$0xff] }
0x1877   :  { %v3770_v36 = vpop.xlane.xlu1 %3769 }
0x1878   :  { %v3777_v46 = vmul.f32 0.03125, %v3770_v36 }
0x187a   :  { %v3780_v21 = vsub.f32 %v3765_v25, %v3777_v46 }
0x187b   :  { %v3773_v28 = vpop.xlane.xlu0 %3772 }
0x187c   :  { %v3778_v31 = vmul.f32 0.03125, %v3773_v28  ;;  %v3783_v27 = vmul.f32 %v3780_v21, %v3780_v21 }
0x187e   :  { %v3781_v56 = vsub.f32 %v3766_v2, %v3778_v31  ;;  %v3786_v50 = vsel %vm259_vm5, %v3783_v27, 0.0 }
0x187f   :  { %3787 = vadd.xlane.f32.xlu0 %v3786_v50  ;;  %v3776_v26 = vpop.xlane.xlu1 %3775 }
0x1880   :  { %v3779_v12 = vmul.f32 0.03125, %v3776_v26  ;;  %v3784_v5 = vmul.f32 %v3781_v56, %v3781_v56 }
0x1882   :  { %v3782_v16 = vsub.f32 %v3767_v4, %v3779_v12  ;;  %v3789_v0 = vsel %vm259_vm5, %v3784_v5, 0.0 }
0x1883   :  { %3790 = vadd.xlane.f32.xlu1 %v3789_v0 }
0x1884   :  { %v3785_v23 = vmul.f32 %v3782_v16, %v3782_v16 }
0x1886   :  { %v3792_v55 = vsel %vm1877_vm10, %v3785_v23, 0.0 }
0x1887   :  { %2308 = vadd.xlane.f32.xlu1 %v2307_v54  ;;  %3793 = vadd.xlane.f32.xlu0 %v3792_v55 }
0x188b   :  { %2314 = vadd.xlane.f32.xlu1 %v2313_v22  ;;  %2311 = vadd.xlane.f32.xlu0 %v2310_v29 }
0x190c   :  { %v3788_v42 = vpop.xlane.xlu0 %3787 }
0x190d   :  { %v3795_v10 = vmul.f32 0.03125, %v3788_v42 }
0x190f   :  { %v3798_v3 = vadd.f32 1e-05, %v3795_v10 }
0x1910   :  { %v3791_v11 = vpop.xlane.xlu1 %3790 }
0x1911   :  { %10752 = vrsqrt.f32 %v3798_v3  ;;  %v3796_v35 = vmul.f32 0.03125, %v3791_v11  ;;  %v13697_v11 = vld [vmem:[#allocation22_spill] sm:$0xff] }
0x1913   :  { %v3799_v9 = vadd.f32 1e-05, %v3796_v35 }
0x1914   :  { %v3794_v41 = vpop.xlane.xlu0 %3793  ;;  %v2309_v32 = vpop.xlane.xlu1 %2308 }
0x1915   :  { %10754 = vrsqrt.f32 %v3799_v9  ;;  %v3797_v19 = vmul.f32 0.03125, %v3794_v41  ;;  %v2316_v8 = vmul.f32 0.03125, %v2309_v32  ;;  %v13698_v9 = vld [vmem:[#allocation23_spill] sm:$0xff] }
0x1917   :  { %v3800_v45 = vadd.f32 1e-05, %v3797_v19  ;;  %v12211_v1 = vsub.f32 %v2304_v39, %v2316_v8  ;;  %v8326_v8 = vld [vmem:[%s13545_s7 + $0x20] sm:$0xff] }
0x1918   :  { %v2312_v17 = vpop.xlane.xlu0 %2311  ;;  %v2315_v6 = vpop.xlane.xlu1 %2314 }
0x1919   :  { %10756 = vrsqrt.f32 %v3800_v45  ;;  %v2317_v25 = vmul.f32 0.03125, %v2312_v17  ;;  %v2318_v24 = vmul.f32 0.03125, %v2315_v6  ;;  %v2322_v49 = vmul.f32 %v12211_v1, %v12211_v1  ;;  %v8327_v45 = vld [vmem:[%s13545_s7 + $0x28] sm:$0xff] }
0x191a   :  { %v13699_v17 = vld [vmem:[#allocation24_spill] sm:$0xff] }
0x191b   :  { %v10753_v51 = vpop.eup %10752  ;;  %v12215_v30 = vsub.f32 %v2305_v13, %v2317_v25  ;;  %v12217_v53 = vsub.f32 %v2306_v7, %v2318_v24  ;;  %v2325_v2 = vsel %vm259_vm5, %v2322_v49, 0.0  ;;  %v13700_v25 = vld [vmem:[#allocation25_spill] sm:$0xff] }
0x191c   :  { %v3804_v62 = vmul.f32 %v10753_v51, %v3780_v21  ;;  %2326 = vadd.xlane.f32.xlu0 %v2325_v2  ;;  %v10897_v21 = vld [vmem:[%s13550_s12] ss:$0 sm:$0xff] }
0x191d   :  { %v2323_v43 = vmul.f32 %v12215_v30, %v12215_v30  ;;  %v2324_v4 = vmul.f32 %v12217_v53, %v12217_v53 }
0x191e   :  { %v3807_v36 = vmul.f32 %v10896_v58, %v3804_v62 }
0x191f   :  { %v10755_v46 = vpop.eup %10754  ;;  %v2328_v28 = vsel %vm259_vm5, %v2323_v43, 0.0  ;;  %v2331_v31 = vsel %vm1877_vm10, %v2324_v4, 0.0  ;;  %v12296_v43 = vpack.c.bf16 %v8327_v45, %v8326_v8  ;;  %v10898_v8 = vld [vmem:[%s13554_s16] ss:$0 sm:$0xff] }
0x1920   :  { %2329 = vadd.xlane.f32.xlu1 %v2328_v28  ;;  %2332 = vadd.xlane.f32.xlu0 %v2331_v31  ;;  %v12232_v27 = vadd.f32 %v10897_v21, %v3807_v36  ;;  %v3805_v50 = vmul.f32 %v10755_v46, %v3781_v56 }
0x1922   :  { %8320 = vmatmul.mubr.msk.f32.vlgmr.msra.gmra.mrb[92].mxu1 %vm259_vm5, %v12232_v27  ;;  %8323 = vmatmul.mubr.msk.f32.vlgmr.msra.gmra.mrb[94].mxu0 %vm259_vm5, %v12232_v27  ;;  %v3808_v26 = vmul.f32 %v10896_v58, %v3805_v50  ;;  %v8328_v50 = vld [vmem:[%s13545_s7 + $0x30] sm:$0xff] }
0x1923   :  { %v10757_v12 = vpop.eup %10756  ;;  %3892 = vmatprep.mubr.f32.mxu1 %v13674_v40  ;;  %3975 = vmatprep.mubr.f32.mxu0 %v13674_v40 }
0x1924   :  { %v12240_v5 = vadd.f32 %v10897_v21, %v3808_v26  ;;  %v3806_v0 = vmul.f32 %v10757_v12, %v3782_v16  ;;  %10174 = vmatpush3.bf16.msra.mxu1 %v11581_v59  ;;  %10206 = vmatpush3.bf16.msra.mxu0 %v11583_v61  ;;  %v13682_v59 = vld [vmem:[#allocation6_spill] sm:$0xff]  ;;  %v13683_v61 = vld [vmem:[#allocation7_spill] sm:$0xff] }
0x1925   :  { %10176 = vmatprep.subr.bf16.mxu1 %v11591_v15  ;;  %10208 = vmatprep.subr.bf16.mxu0 %v11593_v63  ;;  %v13684_v15 = vld [vmem:[#allocation8_spill] sm:$0xff]  ;;  %v13685_v63 = vld [vmem:[#allocation9_spill] sm:$0xff] }
0x1926   :  { %8321 = vmatmul.mubr.msk.f32.gmra.mrb[94].mxu1 %vm259_vm5, %v12240_v5  ;;  %8324 = vmatmul.mubr.msk.f32.gmra.mrb[96].mxu0 %vm259_vm5, %v12240_v5  ;;  %v3809_v56 = vmul.f32 %v10896_v58, %v3806_v0  ;;  %v8329_v26 = vld [vmem:[%s13545_s7 + $0x38] sm:$0xff] }
0x1927   :  { %3898 = vmatprep.mubr.f32.mxu1 %v13674_v40  ;;  %3981 = vmatprep.mubr.f32.mxu0 %v13674_v40 }
0x1928   :  { %v12252_v16 = vadd.f32 %v10897_v21, %v3809_v56  ;;  %10178 = vmatpush3.bf16.msra.mxu1 %v11619_v18  ;;  %10210 = vmatpush3.bf16.msra.mxu0 %v11626_v14  ;;  %v13686_v18 = vld [vmem:[#allocation10_spill] sm:$0xff]  ;;  %v13687_v14 = vld [vmem:[#allocation11_spill] sm:$0xff] }
0x1929   :  { %10180 = vmatprep.subr.bf16.mxu1 %v11636_v20  ;;  %10212 = vmatprep.subr.bf16.mxu0 %v11638_v57  ;;  %v13688_v20 = vld [vmem:[#allocation12_spill] sm:$0xff]  ;;  %v13689_v57 = vld [vmem:[#allocation13_spill] sm:$0xff] }
0x192a   :  { %8322 = vmatmul.mubr.msk.f32.gmra.mrb[96].mxu1 %vm259_vm5, %v12252_v16  ;;  %8325 = vmatmul.mubr.msk.f32.gmra.mrb[98].mxu0 %vm259_vm5, %v12252_v16 }
0x192c   :  { %10182 = vmatpush3.bf16.msra.mxu1 %v11668_v33  ;;  %10214 = vmatpush3.bf16.msra.mxu0 %v11670_v34  ;;  %v13690_v33 = vld [vmem:[#allocation14_spill] sm:$0xff]  ;;  %v13691_v34 = vld [vmem:[#allocation15_spill] sm:$0xff] }
0x192d   :  { %10184 = vmatprep.subr.bf16.mxu1 %v11680_v37  ;;  %10216 = vmatprep.subr.bf16.mxu0 %v11682_v38  ;;  %v13692_v37 = vld [vmem:[#allocation16_spill] sm:$0xff]  ;;  %v13693_v38 = vld [vmem:[#allocation17_spill] sm:$0xff] }
0x1930   :  { %10186 = vmatpush3.bf16.msra.mxu1 %v11708_v47  ;;  %10218 = vmatpush3.bf16.msra.mxu0 %v11710_v48  ;;  %v13694_v47 = vld [vmem:[#allocation18_spill] sm:$0xff]  ;;  %v13695_v48 = vld [vmem:[#allocation19_spill] sm:$0xff] }
0x1931   :  { %10188 = vmatprep.subr.bf16.mxu1 %v11720_v52  ;;  %10220 = vmatprep.subr.bf16.mxu0 %v13682_v59  ;;  %v13696_v52 = vld [vmem:[#allocation20_spill] sm:$0xff] }
0x1934   :  { %10190 = vmatpush3.bf16.msra.mxu1 %v13683_v61  ;;  %10222 = vmatpush3.bf16.msra.mxu0 %v13684_v15 }
0x1935   :  { %10192 = vmatprep.subr.bf16.mxu1 %v13685_v63  ;;  %10224 = vmatprep.subr.bf16.mxu0 %v13686_v18  ;;  %v12310_v18 = vpack.c.bf16 %v8329_v26, %v8328_v50 }
0x1938   :  { %10194 = vmatpush3.bf16.msra.mxu1 %v13687_v14  ;;  %10226 = vmatpush3.bf16.msra.mxu0 %v13688_v20 }
0x1939   :  { %10196 = vmatprep.subr.bf16.mxu1 %v13689_v57  ;;  %10228 = vmatprep.subr.bf16.mxu0 %v13690_v33 }
0x193c   :  { %10198 = vmatpush3.bf16.msra.mxu1 %v13691_v34  ;;  %10230 = vmatpush3.bf16.msra.mxu0 %v13692_v37 }
0x193d   :  { %10200 = vmatprep.subr.bf16.mxu1 %v13693_v38  ;;  %10232 = vmatprep.subr.bf16.mxu0 %v13694_v47 }
0x1940   :  { %10202 = vmatpush3.bf16.msra.mxu1 %v13695_v48  ;;  %10234 = vmatpush3.bf16.msra.mxu0 %v13696_v52 }
0x1941   :  { %10235 = vmatprep.subr.bf16.mxu1 %v13673_v44  ;;  %10241 = vmatprep.subr.bf16.mxu0 %v13673_v44 }
0x19a9   :  { %v2327_v39 = vpop.xlane.xlu0 %2326 }
0x19aa   :  { %v2334_v23 = vmul.f32 0.03125, %v2327_v39 }
0x19ac   :  { %v2337_v55 = vadd.f32 1e-05, %v2334_v23 }
0x19ad   :  { %v2330_v54 = vpop.xlane.xlu1 %2329  ;;  %v2333_v13 = vpop.xlane.xlu0 %2332 }
0x19ae   :  { %v2335_v7 = vmul.f32 0.03125, %v2330_v54  ;;  %10758 = vrsqrt.f32 %v2337_v55  ;;  %v2336_v22 = vmul.f32 0.03125, %v2333_v13 }
0x19b0   :  { %v2338_v29 = vadd.f32 1e-05, %v2335_v7  ;;  %v2339_v42 = vadd.f32 1e-05, %v2336_v22  ;;  %v8264_v22 = vld [vmem:[%s13556_s18] ss:$0 sm:$0xff] }
0x19b2   :  { %10760 = vrsqrt.f32 %v2338_v29 }
0x19b3   :  { %10762 = vrsqrt.f32 %v2339_v42 }
0x19b8   :  { %v10759_v4 = vpop.eup %10758 }
0x19b9   :  { %v2343_v56 = vmul.f32 %v10759_v4, %v12211_v1  ;;  %v8263_v1 = vld [vmem:[%s13555_s17] ss:$0 sm:$0xff] }
0x19bb   :  { %v2352_v23 = vmul.f32 %v8263_v1, %v2343_v56  ;;  %v8422_v56 = vld [vmem:[%s13546_s8 + $0x1] ss:$0 sm:$0xff] }
0x19bc   :  { %v10761_v38 = vpop.eup %10760 }
0x19bd   :  { %v2344_v7 = vmul.f32 %v10761_v38, %v12215_v30  ;;  %v10763_v13 = vpop.eup %10762  ;;  %v12330_v29 = vadd.f32 %v8264_v22, %v2352_v23 }
0x19be   :  { %v2345_v42 = vmul.f32 %v10763_v13, %v12217_v53 }
0x19bf   :  { %v2353_v30 = vmul.f32 %v8263_v1, %v2344_v7 }
0x19f5   :  { %v3888_v10 = vpop.f32.mrb[92].mxu1  ;;  %v3971_v3 = vpop.f32.mrb[94].mxu0 }
0x19f6   :  { %v3889_v35 = vadd.f32 %v3888_v10, %v13697_v11  ;;  %v3972_v41 = vadd.f32 %v3971_v3, %v13698_v9  ;;  %v3890_v32 = vpop.f32.mrb[93].mxu1  ;;  %v3973_v19 = vpop.f32.mrb[95].mxu0  ;;  %v12337_v10 = vadd.f32 %v8264_v22, %v2353_v30  ;;  %v2354_v3 = vmul.f32 %v8263_v1, %v2345_v42 }
0x19f7   :  { %v3891_v6 = vadd.f32 %v3890_v32, %v13699_v17  ;;  %v3974_v24 = vadd.f32 %v3973_v19, %v13700_v25 }
0x19f8   :  { %v3988_v58 = vmax.f32 %v3889_v35, 0.0  ;;  %v3990_v36 = vmax.f32 %v3972_v41, 0.0 }
0x19f9   :  { %v3989_v49 = vmax.f32 %v3891_v6, 0.0  ;;  %v3991_v51 = vmax.f32 %v3974_v24, 0.0  ;;  %v3894_v2 = vpop.f32.mrb[94].mxu1  ;;  %v3977_v62 = vpop.f32.mrb[96].mxu0 }
0x19fa   :  { %v3895_v46 = vadd.f32 %v3894_v2, %v13697_v11  ;;  %v3978_v28 = vadd.f32 %v3977_v62, %v13698_v9  ;;  %v3896_v31 = vpop.f32.mrb[95].mxu1  ;;  %v3979_v21 = vpop.f32.mrb[97].mxu0 }
0x19fb   :  { %v3897_v12 = vadd.f32 %v3896_v31, %v13699_v17  ;;  %v3980_v0 = vadd.f32 %v3979_v21, %v13700_v25  ;;  %4064 = vmatprep.mubr.f32.mxu1 %v3989_v49  ;;  %4144 = vmatprep.mubr.f32.mxu0 %v3991_v51 }
0x19fc   :  { %4065 = vmatmul.mubr.f32.vlgmr.msra.gmra.mrb[98].mxu1 %v3988_v58  ;;  %4145 = vmatmul.mubr.f32.vlgmr.msra.gmra.mrb[100].mxu0 %v3990_v36  ;;  %v3992_v14 = vmax.f32 %v3895_v46, 0.0  ;;  %v3994_v20 = vmax.f32 %v3978_v28, 0.0 }
0x19fd   :  { %v3993_v59 = vmax.f32 %v3897_v12, 0.0  ;;  %v3995_v61 = vmax.f32 %v3980_v0, 0.0  ;;  %v3900_v15 = vpop.f32.mrb[96].mxu1  ;;  %v3983_v63 = vpop.f32.mrb[98].mxu0  ;;  %10237 = vmatpush3.bf16.msra.mxu1 %v12296_v43 }
0x19fe   :  { %v3901_v57 = vadd.f32 %v3900_v15, %v13697_v11  ;;  %v3984_v33 = vadd.f32 %v3983_v63, %v13698_v9  ;;  %v3902_v34 = vpop.f32.mrb[97].mxu1  ;;  %v3985_v37 = vpop.f32.mrb[99].mxu0  ;;  %10238 = vmatprep.subr.bf16.mxu1 %v13673_v44  ;;  %v12343_v11 = vadd.f32 %v8264_v22, %v2354_v3 }
0x19ff   :  { %v3903_v47 = vadd.f32 %v3902_v34, %v13699_v17  ;;  %v3986_v48 = vadd.f32 %v3985_v37, %v13700_v25  ;;  %4069 = vmatprep.mubr.f32.mxu1 %v3993_v59  ;;  %4149 = vmatprep.mubr.f32.mxu0 %v3995_v61 }
0x1a00   :  { %4070 = vmatmul.mubr.f32.gmra.mrb[100].mxu1 %v3992_v14  ;;  %4150 = vmatmul.mubr.f32.gmra.mrb[102].mxu0 %v3994_v20  ;;  %v3996_v54 = vmax.f32 %v3901_v57, 0.0  ;;  %v3998_v55 = vmax.f32 %v3984_v33, 0.0 }
0x1a01   :  { %v3997_v52 = vmax.f32 %v3903_v47, 0.0  ;;  %v3999_v39 = vmax.f32 %v3986_v48, 0.0  ;;  %10240 = vmatpush3.bf16.msra.mxu1 %v12310_v18 }
0x1a02   :  { %10245 = vmatprep.subr.bf16.mxu1 %v13673_v44 }
0x1a03   :  { %4074 = vmatprep.mubr.f32.mxu1 %v3997_v52  ;;  %4154 = vmatprep.mubr.f32.mxu0 %v3999_v39 }
0x1a04   :  { %4075 = vmatmul.mubr.f32.gmra.mrb[102].mxu1 %v3996_v54  ;;  %4155 = vmatmul.mubr.f32.gmra.mrb[104].mxu0 %v3998_v55 }
0x1a05   :  { %9604 = vmatprep.mubr.msk.f32.mxu1 %vm10935_vm0, %v13674_v40  ;;  %9619 = vmatprep.mubr.msk.f32.mxu0 %vm10935_vm0, %v13674_v40 }
0x1a08   :  { %9605 = vmatmul.mubr.msk.f32.vlgmr.msra.gmra.mrb[104].mxu1 %vm259_vm5, %v12330_v29 }
0x1a09   :  { %9607 = vmatprep.mubr.msk.f32.mxu1 %vm10935_vm0, %v13674_v40 }
0x1a0c   :  { %9608 = vmatmul.mubr.msk.f32.gmra.mrb[106].mxu1 %vm259_vm5, %v12337_v10 }
0x1a0d   :  { %9610 = vmatprep.mubr.msk.f32.mxu1 %vm10935_vm0, %v13674_v40 }
0x1a10   :  { %9611 = vmatmul.mubr.msk.f32.gmra.mrb[108].mxu1 %vm259_vm5, %v12343_v11 }
0x1a11   :  { %9634 = vmatprep.mubr.msk.f32.mxu1 %vm10935_vm0, %v13674_v40 }
0x1acf   :  { %v8829_v53 = vpop.f32.mrb[98].mxu1  ;;  %v8870_v35 = vpop.f32.mrb[100].mxu0 }
0x1ad0   :  { %v8830_v9 = vpop.f32.mrb[99].mxu1  ;;  %v8871_v41 = vpop.f32.mrb[101].mxu0 }
0x1ad1   :  { %v8831_v32 = vadd.f32 %v8830_v9, %v8829_v53  ;;  %v8872_v19 = vadd.f32 %v8871_v41, %v8870_v35 }
0x1ad3   :  { %v4067_v45 = vadd.f32 %v10898_v8, %v8831_v32  ;;  %v8832_v17 = vpop.f32.mrb[100].mxu1  ;;  %v8873_v6 = vpop.f32.mrb[102].mxu0 }
0x1ad4   :  { %v8833_v25 = vpop.f32.mrb[101].mxu1  ;;  %v8874_v24 = vpop.f32.mrb[103].mxu0 }
0x1ad5   :  { %v12352_v49 = vadd.f32 %v8872_v19, %v4067_v45  ;;  %v8834_v51 = vadd.f32 %v8833_v25, %v8832_v17  ;;  %v8875_v2 = vadd.f32 %v8874_v24, %v8873_v6 }
0x1ad7   :  { %v4072_v62 = vadd.f32 %v10898_v8, %v8834_v51  ;;  %v8835_v4 = vpop.f32.mrb[102].mxu1  ;;  %v8876_v58 = vpop.f32.mrb[104].mxu0 }
0x1ad8   :  { %v8836_v36 = vpop.f32.mrb[103].mxu1  ;;  %v8877_v46 = vpop.f32.mrb[105].mxu0 }
0x1ad9   :  { %v12354_v28 = vadd.f32 %v8875_v2, %v4072_v62  ;;  %v8837_v31 = vadd.f32 %v8836_v36, %v8835_v4  ;;  %v8878_v21 = vadd.f32 %v8877_v46, %v8876_v58 }
0x1adb   :  { %v4077_v50 = vadd.f32 %v10898_v8, %v8837_v31  ;;  %v4397_v26 = vpop.f32.mrb[104].mxu1 }
0x1adc   :  { %v9606_v12 = vpop.f32.mrb[105].mxu1  ;;  %v4398_v61 = vadd.f32 %v8422_v56, %v4397_v26 }
0x1add   :  { %v12356_v0 = vadd.f32 %v8878_v21, %v4077_v50 }
0x1ade   :  { %v12371_v34 = vmul.f32 0.35355338, %v4398_v61 }
0x1adf   :  { %v4402_v59 = vpop.f32.mrb[106].mxu1 }
0x1ae0   :  { %v4403_v15 = vadd.f32 %v8422_v56, %v4402_v59  ;;  %v9609_v63 = vpop.f32.mrb[107].mxu1 }
0x1ae2   :  { %v12361_v14 = vpack.i.bf16 %v4403_v15, %v4398_v61  ;;  %v12382_v38 = vmul.f32 0.35355338, %v4403_v15 }
0x1ae3   :  { %v4407_v20 = vpop.f32.mrb[108].mxu1 }
0x1ae4   :  { %v12363_v57 = vadd.f32 %v8422_v56, %v4407_v20  ;;  %10571 = vrot.lane.b32.xlu1 %v12361_v14, %s13616_s4  ;;  %v9612_v33 = vpop.f32.mrb[109].mxu1 }
0x1ae6   :  { %4421 = vrot.lane.b32.xlu0 %v12363_v57, %s13616_s4  ;;  %v12378_v37 = vmul.f32 0.35355338, %v12363_v57 }
0x1ae8   :  { %10576 = vrot.lane.b32.xlu1 %v12361_v14, %s13614_s28 }
0x1aea   :  { %4650 = vrot.lane.b32.xlu0 %v12371_v34, %s13612_s30 }
0x1aec   :  { %4660 = vrot.lane.b32.xlu1 %v12363_v57, %s13614_s28 }
0x1aee   :  { %4654 = vrot.lane.b32.xlu0 %v12378_v37, %s13612_s30 }
0x1af0   :  { %4652 = vrot.lane.b32.xlu1 %v12382_v38, %s13612_s30 }
0x1b56   :  { %v10572_v1 = vpop.permute.xlu1 %10571 }
0x1b57   :  { %v10574_v47 = vunpack.i.h.bf16 %v10572_v1  ;;  %v10573_v48 = vunpack.i.l.bf16 %v10572_v1 }
0x1b58   :  { %v4422_v55 = vpop.permute.xlu0 %4421 }
0x1b59   :  { %v10242_v52 = vpack.c.bf16 %v10574_v47, %v10573_v48 }
0x1b5a   :  { %v10577_v39 = vpop.permute.xlu1 %10576 }
0x1b5b   :  { %10244 = vmatpush3.bf16.xpose.msk.msra.mxu0 %vm11201_vm8, %v10242_v52  ;;  %v10579_v23 = vunpack.i.h.bf16 %v10577_v39  ;;  %v10578_v54 = vunpack.i.l.bf16 %v10577_v39 }
0x1b5c   :  { %9617 = vmatprep.subr.mxu0 %v13674_v40  ;;  %v4651_v22 = vpop.permute.xlu0 %4650 }
0x1b5d   :  { %v10249_v7 = vpack.c.bf16 %v10579_v23, %v10578_v54 }
0x1b5e   :  { %v4661_v13 = vpop.permute.xlu1 %4660 }
0x1b60   :  { %v4655_v42 = vpop.permute.xlu0 %4654 }
0x1b62   :  { %v4653_v30 = vpop.permute.xlu1 %4652 }
0x1b63   :  { %9618 = vmatpush3.xpose.msk.msra.mxu0 %vm560_vm7, %v4422_v55 }
0x1b64   :  { %10248 = vmatprep.subr.bf16.mxu0 %v13673_v44 }
0x1b66   :  { %9620 = vmatmul.mubr.msk.f32.vlgmr.msra.gmra.mrb[106].mxu0 %vm560_vm7, %v12371_v34 }
0x1b67   :  { %10251 = vmatpush3.bf16.xpose.msk.msra.mxu0 %vm11201_vm8, %v10249_v7  ;;  %9622 = vmatprep.mubr.msk.f32.mxu0 %vm10935_vm0, %v13674_v40 }
0x1b68   :  { %9647 = vmatprep.subr.mxu0 %v13674_v40 }
0x1b6a   :  { %9623 = vmatmul.mubr.msk.f32.gmra.mrb[108].mxu0 %vm560_vm7, %v12382_v38 }
0x1b6b   :  { %9625 = vmatprep.mubr.msk.f32.mxu0 %vm10935_vm0, %v13674_v40 }
0x1b6e   :  { %9626 = vmatmul.mubr.msk.f32.gmra.mrb[110].mxu0 %vm560_vm7, %v12378_v37 }
0x1b6f   :  { %9648 = vmatpush3.xpose.msk.msra.mxu0 %vm560_vm7, %v4661_v13  ;;  %9649 = vmatprep.mubr.msk.f32.mxu0 %vm10935_vm0, %v13674_v40 }
0x1b70   :  { %9673 = vmatprep.subr.mxu0 %v13674_v40 }
0x1b72   :  { %9650 = vmatmul.mubr.msk.f32.vlgmr.msra.gmra.mrb[112].mxu0 %vm560_vm7, %v4651_v22 }
0x1b73   :  { %9652 = vmatprep.mubr.msk.f32.mxu0 %vm10935_vm0, %v13674_v40 }
0x1b76   :  { %9653 = vmatmul.mubr.msk.f32.gmra.mrb[114].mxu0 %vm560_vm7, %v4653_v30 }
0x1b77   :  { %9655 = vmatprep.mubr.msk.f32.mxu0 %vm10935_vm0, %v13674_v40 }
0x1b7a   :  { %9656 = vmatmul.mubr.msk.f32.gmra.mrb[116].mxu0 %vm560_vm7, %v4655_v42 }
0x1b7b   :  { %9675 = vmatprep.mubr.msk.f32.mxu0 %vm10935_vm0, %v13674_v40 }
0x1c39   :  { %v4504_v3 = vpop.f32.mrb[106].mxu0 }
0x1c3a   :  { %v9621_v53 = vpop.f32.mrb[107].mxu0  ;;  %v4518_v35 = vsel %vm80_vm3, %v4504_v3, -inf }
0x1c3b   :  { %4519 = vmax.xlane.f32.xlu1 %v4518_v35 }
0x1c3d   :  { %v4509_v9 = vpop.f32.mrb[108].mxu0 }
0x1c3e   :  { %v9624_v41 = vpop.f32.mrb[109].mxu0  ;;  %v4521_v32 = vsel %vm80_vm3, %v4509_v9, -inf }
0x1c3f   :  { %4522 = vmax.xlane.f32.xlu0 %v4521_v32 }
0x1c41   :  { %v4514_v19 = vpop.f32.mrb[110].mxu0 }
0x1c42   :  { %v9627_v8 = vpop.f32.mrb[111].mxu0  ;;  %v4524_v45 = vsel %vm662_vm9, %v4514_v19, -inf }
0x1c43   :  { %4525 = vmax.xlane.f32.xlu0 %v4524_v45 }
0x1c45   :  { %v4740_v17 = vpop.f32.mrb[112].mxu0 }
0x1c46   :  { %v9651_v6 = vpop.f32.mrb[113].mxu0  ;;  %v4754_v25 = vsel %vm80_vm3, %v4740_v17, -inf }
0x1c47   :  { %4755 = vmax.xlane.f32.xlu1 %v4754_v25 }
0x1c49   :  { %v4745_v24 = vpop.f32.mrb[114].mxu0 }
0x1c4a   :  { %v9654_v51 = vpop.f32.mrb[115].mxu0  ;;  %v4757_v2 = vsel %vm80_vm3, %v4745_v24, -inf }
0x1c4b   :  { %4758 = vmax.xlane.f32.xlu0 %v4757_v2 }
0x1c4d   :  { %v4750_v62 = vpop.f32.mrb[116].mxu0 }
0x1c4e   :  { %v9657_v4 = vpop.f32.mrb[117].mxu0  ;;  %v4760_v58 = vsel %vm662_vm9, %v4750_v62, -inf }
0x1c4f   :  { %4761 = vmax.xlane.f32.xlu1 %v4760_v58 }
0x1c60   :  { %10581 = vrot.lane.b32.xlu1 %v12361_v14, %s13610_s29 }
0x1cc8   :  { %v4520_v36 = vpop.xlane.xlu1 %4519 }
0x1cc9   :  { %v4527_v46 = vsub.f32 %v4504_v3, %v4520_v36 }
0x1ccb   :  { %v4530_v31 = vmul.f32 1.442695, %v4527_v46 }
0x1ccc   :  { %v4523_v21 = vpop.xlane.xlu0 %4522 }
0x1ccd   :  { %10764 = vpow2.f32 %v4530_v31  ;;  %v4528_v50 = vsub.f32 %v4509_v9, %v4523_v21 }
0x1ccf   :  { %v4532_v26 = vmul.f32 1.442695, %v4528_v50 }
0x1cd0   :  { %v4526_v12 = vpop.xlane.xlu0 %4525 }
0x1cd1   :  { %10766 = vpow2.f32 %v4532_v26  ;;  %v4529_v56 = vsub.f32 %v4514_v19, %v4526_v12 }
0x1cd3   :  { %v4534_v59 = vmul.f32 1.442695, %v4529_v56 }
0x1cd4   :  { %v4756_v61 = vpop.xlane.xlu1 %4755 }
0x1cd5   :  { %10768 = vpow2.f32 %v4534_v59  ;;  %v4763_v15 = vsub.f32 %v4740_v17, %v4756_v61 }
0x1cd7   :  { %v10765_v63 = vpop.eup %10764  ;;  %v4766_v20 = vmul.f32 1.442695, %v4763_v15 }
0x1cd8   :  { %v4759_v33 = vpop.xlane.xlu0 %4758  ;;  %v4536_v1 = vsel %vm80_vm3, %v10765_v63, 0.0 }
0x1cd9   :  { %10770 = vpow2.f32 %v4766_v20  ;;  %v4764_v47 = vsub.f32 %v4745_v24, %v4759_v33  ;;  %4537 = vadd.xlane.f32.xlu0 %v4536_v1  ;;  %v8331_v33 = vld [vmem:[%s13547_s9 + $0x20] sm:$0xff]  ;;  %v8332_v1 = vld [vmem:[%s13547_s9 + $0x28] sm:$0xff] }
0x1cda   :  { %9674 = vmatpush3.msra.mxu0 %v8332_v1 }
0x1cdb   :  { %v10767_v48 = vpop.eup %10766  ;;  %v4768_v52 = vmul.f32 1.442695, %v4764_v47  ;;  %10255 = vmatprep.subr.bf16.mxu0 %v13673_v44 }
0x1cdc   :  { %v4762_v39 = vpop.xlane.xlu1 %4761  ;;  %v4539_v23 = vsel %vm80_vm3, %v10767_v48, 0.0 }
0x1cdd   :  { %10772 = vpow2.f32 %v4768_v52  ;;  %v4765_v54 = vsub.f32 %v4750_v62, %v4762_v39  ;;  %4540 = vadd.xlane.f32.xlu1 %v4539_v23 }
0x1cdf   :  { %v10769_v55 = vpop.eup %10768  ;;  %v4770_v7 = vmul.f32 1.442695, %v4765_v54 }
0x1ce0   :  { %v10582_v13 = vpop.permute.xlu1 %10581  ;;  %v4542_v22 = vsel %vm662_vm9, %v10769_v55, 0.0 }
0x1ce1   :  { %10774 = vpow2.f32 %v4770_v7  ;;  %v10584_v30 = vunpack.i.h.bf16 %v10582_v13  ;;  %v10583_v42 = vunpack.i.l.bf16 %v10582_v13  ;;  %4543 = vadd.xlane.f32.xlu0 %v4542_v22 }
0x1ce3   :  { %v10771_v3 = vpop.eup %10770  ;;  %v10246_v53 = vpack.c.bf16 %v10584_v30, %v10583_v42 }
0x1ce4   :  { %v4772_v35 = vsel %vm80_vm3, %v10771_v3, 0.0 }
0x1ce5   :  { %4773 = vadd.xlane.f32.xlu1 %v4772_v35  ;;  %10247 = vmatpush3.bf16.msra.mxu1 %v10246_v53 }
0x1ce6   :  { %9632 = vmatprep.subr.mxu1 %v13674_v40 }
0x1ce7   :  { %v10773_v9 = vpop.eup %10772 }
0x1ce8   :  { %v4775_v41 = vsel %vm80_vm3, %v10773_v9, 0.0 }
0x1ce9   :  { %4776 = vadd.xlane.f32.xlu0 %v4775_v41 }
0x1ceb   :  { %v10775_v32 = vpop.eup %10774 }
0x1cec   :  { %v4778_v19 = vsel %vm662_vm9, %v10775_v32, 0.0 }
0x1ced   :  { %4779 = vadd.xlane.f32.xlu0 %v4778_v19 }
0x1cf6   :  { %10586 = vrot.lane.b32.xlu1 %v12361_v14, %s13675_s3 }
0x1cfa   :  { %4791 = vrot.lane.b32.xlu1 %v12363_v57, %s13675_s3 }
0x1cfe   :  { %10591 = vrot.lane.b32.xlu1 %v12361_v14, %s13676_s23 }
0x1d02   :  { %5064 = vrot.lane.b32.xlu1 %v12371_v34, %s13677_s22 }
0x1d03   :  { %4555 = vrot.lane.b32.xlu0 %v12363_v57, %s13610_s29 }
0x1d06   :  { %5068 = vrot.lane.b32.xlu1 %v12378_v37, %s13677_s22 }
0x1d07   :  { %5074 = vrot.lane.b32.xlu0 %v12363_v57, %s13676_s23 }
0x1d0b   :  { %5066 = vrot.lane.b32.xlu0 %v12382_v38, %s13677_s22 }
0x1d66   :  { %v4538_v8 = vpop.xlane.xlu0 %4537 }
0x1d67   :  { %10776 = vrcp.f32 %v4538_v8 }
0x1d6a   :  { %v4541_v45 = vpop.xlane.xlu1 %4540 }
0x1d6b   :  { %10778 = vrcp.f32 %v4541_v45 }
0x1d6e   :  { %v4544_v17 = vpop.xlane.xlu0 %4543 }
0x1d6f   :  { %10780 = vrcp.f32 %v4544_v17 }
0x1d71   :  { %v10777_v2 = vpop.eup %10776 }
0x1d72   :  { %v4774_v6 = vpop.xlane.xlu1 %4773  ;;  %v4548_v58 = vmul.f32 %v10777_v2, %v10765_v63 }
0x1d73   :  { %10782 = vrcp.f32 %v4774_v6 }
0x1d75   :  { %v10779_v46 = vpop.eup %10778 }
0x1d76   :  { %v4777_v25 = vpop.xlane.xlu0 %4776  ;;  %v10587_v24 = vpop.permute.xlu1 %10586  ;;  %v4549_v21 = vmul.f32 %v10779_v46, %v10767_v48 }
0x1d77   :  { %v10589_v62 = vunpack.i.h.bf16 %v10587_v24  ;;  %v10588_v4 = vunpack.i.l.bf16 %v10587_v24  ;;  %10784 = vrcp.f32 %v4777_v25 }
0x1d79   :  { %v10253_v31 = vpack.c.bf16 %v10589_v62, %v10588_v4  ;;  %v10781_v50 = vpop.eup %10780 }
0x1d7a   :  { %v4780_v51 = vpop.xlane.xlu0 %4779  ;;  %v4792_v26 = vpop.permute.xlu1 %4791  ;;  %v4550_v12 = vmul.f32 %v10781_v50, %v10769_v55 }
0x1d7b   :  { %10786 = vrcp.f32 %v4780_v51 }
0x1d7d   :  { %v10783_v56 = vpop.eup %10782 }
0x1d7e   :  { %v4556_v36 = vpop.permute.xlu0 %4555  ;;  %v4784_v59 = vmul.f32 %v10783_v56, %v10771_v3  ;;  %v10592_v39 = vpop.permute.xlu1 %10591 }
0x1d7f   :  { %9633 = vmatpush3.msk.msra.mxu1 %vm84_vm2, %v4556_v36  ;;  %v10594_v54 = vunpack.i.h.bf16 %v10592_v39  ;;  %v10593_v55 = vunpack.i.l.bf16 %v10592_v39 }
0x1d80   :  { %9635 = vmatmul.mubr.msk.f32.vlgmr.msra.gmra.mrb[110].mxu1 %vm80_vm3, %v4548_v58  ;;  %10252 = vmatprep.subr.bf16.mxu1 %v13673_v44 }
0x1d81   :  { %10254 = vmatpush3.bf16.msra.mxu1 %v10253_v31  ;;  %9637 = vmatprep.mubr.msk.f32.mxu1 %vm10935_vm0, %v13674_v40  ;;  %v10785_v61 = vpop.eup %10784  ;;  %v10256_v22 = vpack.c.bf16 %v10594_v54, %v10593_v55 }
0x1d82   :  { %9662 = vmatprep.subr.mxu1 %v13674_v40  ;;  %v4785_v15 = vmul.f32 %v10785_v61, %v10773_v9  ;;  %v5075_v9 = vpop.permute.xlu0 %5074 }
0x1d84   :  { %9638 = vmatmul.mubr.msk.f32.gmra.mrb[112].mxu1 %vm80_vm3, %v4549_v21 }
0x1d85   :  { %9663 = vmatpush3.msk.msra.mxu1 %vm84_vm2, %v4792_v26  ;;  %9640 = vmatprep.mubr.msk.f32.mxu1 %vm10935_vm0, %v13674_v40  ;;  %v10787_v63 = vpop.eup %10786 }
0x1d86   :  { %9684 = vmatprep.subr.mxu1 %v13674_v40  ;;  %v4786_v20 = vmul.f32 %v10787_v63, %v10775_v32  ;;  %v5065_v32 = vpop.permute.xlu1 %5064  ;;  %v5067_v19 = vpop.permute.xlu0 %5066 }
0x1d88   :  { %9641 = vmatmul.mubr.msk.f32.gmra.mrb[114].mxu1 %vm80_vm3, %v4550_v12 }
0x1d89   :  { %9664 = vmatprep.mubr.msk.f32.mxu1 %vm10935_vm0, %v13674_v40 }
0x1d8a   :  { %v5069_v8 = vpop.permute.xlu1 %5068 }
0x1d8c   :  { %9665 = vmatmul.mubr.msk.f32.vlgmr.msra.gmra.mrb[116].mxu1 %vm80_vm3, %v4784_v59 }
0x1d8d   :  { %9667 = vmatprep.mubr.msk.f32.mxu1 %vm10935_vm0, %v13674_v40  ;;  %9685 = vmatpush3.msra.mxu1 %v8331_v33 }
0x1d8e   :  { %10259 = vmatprep.subr.bf16.mxu1 %v13673_v44 }
0x1d90   :  { %9668 = vmatmul.mubr.msk.f32.gmra.mrb[118].mxu1 %vm80_vm3, %v4785_v15 }
0x1d91   :  { %9670 = vmatprep.mubr.msk.f32.mxu1 %vm10935_vm0, %v13674_v40 }
0x1d94   :  { %9671 = vmatmul.mubr.msk.f32.gmra.mrb[120].mxu1 %vm80_vm3, %v4786_v20 }
0x1d95   :  { %9686 = vmatprep.mubr.msk.f32.mxu1 %vm10935_vm0, %v13674_v40 }
0x1e53   :  { %v4636_v47 = vpop.f32.mrb[110].mxu1 }
0x1e54   :  { %v9636_v48 = vpop.f32.mrb[111].mxu1  ;;  %9687 = vmatmul.mubr.msk.f32.vlgmr.msra.gmra.mrb[122].mxu1 %vm560_vm7, %v4636_v47 }
0x1e55   :  { %9689 = vmatprep.mubr.msk.f32.mxu1 %vm10935_vm0, %v13674_v40 }
0x1e57   :  { %v4641_v52 = vpop.f32.mrb[112].mxu1 }
0x1e58   :  { %v9639_v23 = vpop.f32.mrb[113].mxu1  ;;  %9690 = vmatmul.mubr.msk.f32.gmra.mrb[124].mxu1 %vm560_vm7, %v4641_v52 }
0x1e59   :  { %9692 = vmatprep.mubr.msk.f32.mxu1 %vm10935_vm0, %v13674_v40 }
0x1e5b   :  { %v4646_v7 = vpop.f32.mrb[114].mxu1 }
0x1e5c   :  { %v9642_v13 = vpop.f32.mrb[115].mxu1  ;;  %9693 = vmatmul.mubr.msk.f32.gmra.mrb[126].mxu1 %vm560_vm7, %v4646_v7 }
0x1e5d   :  { %9716 = vmatprep.mubr.msk.f32.mxu1 %vm10935_vm0, %v13674_v40 }
0x1e5f   :  { %v4872_v30 = vpop.f32.mrb[116].mxu1 }
0x1e60   :  { %v9666_v42 = vpop.f32.mrb[117].mxu1  ;;  %9676 = vmatmul.mubr.msk.f32.vlgmr.msra.gmra.mrb[118].mxu0 %vm560_vm7, %v4872_v30 }
0x1e61   :  { %10258 = vmatpush3.bf16.xpose.msk.msra.mxu0 %vm11201_vm8, %v10256_v22  ;;  %9678 = vmatprep.mubr.msk.f32.mxu0 %vm10935_vm0, %v13674_v40 }
0x1e62   :  { %9699 = vmatprep.subr.mxu0 %v13674_v40 }
0x1e63   :  { %v4877_v3 = vpop.f32.mrb[118].mxu1 }
0x1e64   :  { %v9669_v53 = vpop.f32.mrb[119].mxu1  ;;  %9679 = vmatmul.mubr.msk.f32.gmra.mrb[120].mxu0 %vm560_vm7, %v4877_v3 }
0x1e65   :  { %9681 = vmatprep.mubr.msk.f32.mxu0 %vm10935_vm0, %v13674_v40 }
0x1e67   :  { %v4882_v35 = vpop.f32.mrb[120].mxu1 }
0x1e68   :  { %v9672_v41 = vpop.f32.mrb[121].mxu1  ;;  %9682 = vmatmul.mubr.msk.f32.gmra.mrb[122].mxu0 %vm560_vm7, %v4882_v35 }
0x1e69   :  { %9700 = vmatpush3.xpose.msk.msra.mxu0 %vm560_vm7, %v5075_v9  ;;  %9701 = vmatprep.mubr.msk.f32.mxu0 %vm10935_vm0, %v13674_v40 }
0x1e6a   :  { %9725 = vmatprep.subr.mxu0 %v13674_v40 }
0x1e6c   :  { %9702 = vmatmul.mubr.msk.f32.vlgmr.msra.gmra.mrb[124].mxu0 %vm560_vm7, %v5065_v32 }
0x1e6d   :  { %9704 = vmatprep.mubr.msk.f32.mxu0 %vm10935_vm0, %v13674_v40 }
0x1e70   :  { %9705 = vmatmul.mubr.msk.f32.gmra.mrb[126].mxu0 %vm560_vm7, %v5067_v19 }
0x1e71   :  { %9707 = vmatprep.mubr.msk.f32.mxu0 %vm10935_vm0, %v13674_v40 }
0x1e74   :  { %9708 = vmatmul.mubr.msk.f32.gmra.mrb[128].mxu0 %vm560_vm7, %v5069_v8 }
0x1e75   :  { %9727 = vmatprep.mubr.msk.f32.mxu0 %vm10935_vm0, %v13674_v40 }
0x1f27   :  { %v5050_v45 = vpop.f32.mrb[122].mxu1 }
0x1f28   :  { %v9688_v17 = vpop.f32.mrb[123].mxu1 }
0x1f2b   :  { %v5055_v6 = vpop.f32.mrb[124].mxu1 }
0x1f2c   :  { %v9691_v25 = vpop.f32.mrb[125].mxu1 }
0x1f2f   :  { %v5060_v24 = vpop.f32.mrb[126].mxu1 }
0x1f30   :  { %v9694_v51 = vpop.f32.mrb[127].mxu1 }
0x1f33   :  { %v4961_v2 = vpop.f32.mrb[118].mxu0 }
0x1f34   :  { %v12511_v62 = vadd.f32 %v5050_v45, %v4961_v2  ;;  %v9677_v4 = vpop.f32.mrb[119].mxu0 }
0x1f37   :  { %v4966_v58 = vpop.f32.mrb[120].mxu0 }
0x1f38   :  { %v12513_v36 = vadd.f32 %v5055_v6, %v4966_v58  ;;  %v9680_v46 = vpop.f32.mrb[121].mxu0 }
0x1f3b   :  { %v4971_v31 = vpop.f32.mrb[122].mxu0 }
0x1f3c   :  { %v12515_v21 = vadd.f32 %v5060_v24, %v4971_v31  ;;  %v9683_v50 = vpop.f32.mrb[123].mxu0 }
0x1f3f   :  { %v5154_v26 = vpop.f32.mrb[124].mxu0 }
0x1f40   :  { %v9703_v12 = vpop.f32.mrb[125].mxu0  ;;  %v5168_v56 = vsel %vm80_vm3, %v5154_v26, -inf }
0x1f41   :  { %5169 = vmax.xlane.f32.xlu0 %v5168_v56  ;;  %v8333_v12 = vld [vmem:[%s13547_s9 + $0x30] sm:$0xff] }
0x1f42   :  { %9726 = vmatpush3.msra.mxu0 %v8333_v12 }
0x1f43   :  { %v5159_v59 = vpop.f32.mrb[126].mxu0  ;;  %10266 = vmatprep.subr.bf16.mxu0 %v13673_v44 }
0x1f44   :  { %v9706_v61 = vpop.f32.mrb[127].mxu0  ;;  %v5171_v15 = vsel %vm80_vm3, %v5159_v59, -inf }
0x1f45   :  { %5172 = vmax.xlane.f32.xlu1 %v5171_v15 }
0x1f47   :  { %v5164_v63 = vpop.f32.mrb[128].mxu0 }
0x1f48   :  { %v9709_v20 = vpop.f32.mrb[129].mxu0  ;;  %v5174_v33 = vsel %vm662_vm9, %v5164_v63, -inf }
0x1f49   :  { %5175 = vmax.xlane.f32.xlu0 %v5174_v33 }
0x1f56   :  { %10596 = vrot.lane.b32.xlu1 %v12361_v14, %s13678_s24 }
0x1f5a   :  { %10601 = vrot.lane.b32.xlu1 %v12361_v14, %s13679_s26 }
0x1fce   :  { %v5170_v1 = vpop.xlane.xlu0 %5169 }
0x1fcf   :  { %v5177_v47 = vsub.f32 %v5154_v26, %v5170_v1 }
0x1fd1   :  { %v5180_v48 = vmul.f32 1.442695, %v5177_v47 }
0x1fd2   :  { %v5173_v52 = vpop.xlane.xlu1 %5172 }
0x1fd3   :  { %10788 = vpow2.f32 %v5180_v48  ;;  %v5178_v39 = vsub.f32 %v5159_v59, %v5173_v52 }
0x1fd5   :  { %v5182_v23 = vmul.f32 1.442695, %v5178_v39 }
0x1fd6   :  { %v10597_v54 = vpop.permute.xlu1 %10596  ;;  %v5176_v53 = vpop.xlane.xlu0 %5175 }
0x1fd7   :  { %10790 = vpow2.f32 %v5182_v23  ;;  %v10599_v55 = vunpack.i.h.bf16 %v10597_v54  ;;  %v10598_v7 = vunpack.i.l.bf16 %v10597_v54  ;;  %v5179_v35 = vsub.f32 %v5164_v63, %v5176_v53 }
0x1fd9   :  { %v10260_v13 = vpack.c.bf16 %v10599_v55, %v10598_v7  ;;  %v5184_v9 = vmul.f32 1.442695, %v5179_v35 }
0x1fda   :  { %v10602_v19 = vpop.permute.xlu1 %10601 }
0x1fdb   :  { %10261 = vmatpush3.bf16.msra.mxu1 %v10260_v13  ;;  %10792 = vpow2.f32 %v5184_v9  ;;  %v10603_v6 = vunpack.i.l.bf16 %v10602_v19 }
0x1fdc   :  { %9714 = vmatprep.subr.mxu1 %v13674_v40 }
0x1fdd   :  { %v10789_v22 = vpop.eup %10788 }
0x1fde   :  { %v5186_v30 = vsel %vm80_vm3, %v10789_v22, 0.0 }
0x1fdf   :  { %5187 = vadd.xlane.f32.xlu0 %v5186_v30 }
0x1fe1   :  { %v10791_v42 = vpop.eup %10790 }
0x1fe2   :  { %v5189_v3 = vsel %vm80_vm3, %v10791_v42, 0.0 }
0x1fe3   :  { %5190 = vadd.xlane.f32.xlu1 %v5189_v3 }
0x1fe5   :  { %v10793_v41 = vpop.eup %10792 }
0x1fe6   :  { %v5192_v32 = vsel %vm662_vm9, %v10793_v41, 0.0 }
0x1ff4   :  { %5402 = vrot.lane.b32.xlu1 %v12363_v57, %s13679_s26 }
0x1ff5   :  { %5205 = vrot.lane.b32.xlu0 %v12363_v57, %s13678_s24 }
0x1ff8   :  { %5394 = vrot.lane.b32.xlu1 %v12382_v38, %s13680_s5  ;;  %v10604_v38 = vunpack.i.h.bf16 %v10602_v19 }
0x1ffa   :  { %v10263_v51 = vpack.c.bf16 %v10604_v38, %v10603_v6 }
0x2014   :  { %5193 = vadd.xlane.f32.xlu0 %v5192_v32 }
0x202a   :  { %5392 = vrot.lane.b32.xlu0 %v12371_v34, %s13680_s5 }
0x202e   :  { %5396 = vrot.lane.b32.xlu0 %v12378_v37, %s13680_s5 }
0x206c   :  { %v5188_v8 = vpop.xlane.xlu0 %5187 }
0x206d   :  { %10794 = vrcp.f32 %v5188_v8 }
0x2070   :  { %v5191_v45 = vpop.xlane.xlu1 %5190  ;;  %v5206_v17 = vpop.permute.xlu0 %5205 }
0x2071   :  { %10796 = vrcp.f32 %v5191_v45  ;;  %9715 = vmatpush3.msk.msra.mxu1 %vm84_vm2, %v5206_v17 }
0x2072   :  { %10262 = vmatprep.subr.bf16.mxu1 %v13673_v44 }
0x2074   :  { %v5403_v2 = vpop.permute.xlu1 %5402 }
0x2077   :  { %v10795_v25 = vpop.eup %10794 }
0x2078   :  { %v5198_v24 = vmul.f32 %v10795_v25, %v10789_v22  ;;  %v5395_v50 = vpop.permute.xlu1 %5394 }
0x207a   :  { %9717 = vmatmul.mubr.msk.f32.vlgmr.msra.gmra.mrb[128].mxu1 %vm80_vm3, %v5198_v24 }
0x207b   :  { %v10797_v34 = vpop.eup %10796  ;;  %10265 = vmatpush3.bf16.xpose.msk.msra.mxu1 %vm11201_vm8, %v10263_v51  ;;  %9719 = vmatprep.mubr.msk.f32.mxu1 %vm10935_vm0, %v13674_v40 }
0x207c   :  { %v5199_v37 = vmul.f32 %v10797_v34, %v10791_v42  ;;  %9740 = vmatprep.subr.mxu1 %v13674_v40 }
0x207e   :  { %9720 = vmatmul.mubr.msk.f32.gmra.mrb[130].mxu1 %vm80_vm3, %v5199_v37 }
0x207f   :  { %9722 = vmatprep.mubr.msk.f32.mxu1 %vm10935_vm0, %v13674_v40 }
0x2083   :  { %9741 = vmatpush3.xpose.msk.msra.mxu1 %vm560_vm7, %v5403_v2 }
0x2084   :  { %9766 = vmatprep.subr.mxu1 %v13674_v40 }
0x20a1   :  { %v5194_v4 = vpop.xlane.xlu0 %5193 }
0x20a2   :  { %10798 = vrcp.f32 %v5194_v4 }
0x20a5   :  { %v5393_v31 = vpop.permute.xlu0 %5392 }
0x20a9   :  { %v5397_v26 = vpop.permute.xlu0 %5396 }
0x20ac   :  { %v10799_v58 = vpop.eup %10798 }
0x20ad   :  { %v5200_v46 = vmul.f32 %v10799_v58, %v10793_v41 }
0x20af   :  { %9723 = vmatmul.mubr.msk.f32.gmra.mrb[132].mxu1 %vm80_vm3, %v5200_v46 }
0x20b0   :  { %9742 = vmatprep.mubr.msk.f32.mxu1 %vm10935_vm0, %v13674_v40 }
0x20b3   :  { %9743 = vmatmul.mubr.msk.f32.vlgmr.msra.gmra.mrb[134].mxu1 %vm560_vm7, %v5393_v31 }
0x20b4   :  { %9745 = vmatprep.mubr.msk.f32.mxu1 %vm10935_vm0, %v13674_v40 }
0x20b7   :  { %9746 = vmatmul.mubr.msk.f32.gmra.mrb[136].mxu1 %vm560_vm7, %v5395_v50 }
0x20b8   :  { %9748 = vmatprep.mubr.msk.f32.mxu1 %vm10935_vm0, %v13674_v40 }
0x20bb   :  { %9749 = vmatmul.mubr.msk.f32.gmra.mrb[138].mxu1 %vm560_vm7, %v5397_v26 }
0x20bc   :  { %9768 = vmatprep.mubr.msk.f32.mxu1 %vm10935_vm0, %v13674_v40 }
0x214d   :  { %v5286_v56 = vpop.f32.mrb[128].mxu1 }
0x214e   :  { %v9718_v59 = vpop.f32.mrb[129].mxu1  ;;  %9728 = vmatmul.mubr.msk.f32.vlgmr.msra.gmra.mrb[130].mxu0 %vm560_vm7, %v5286_v56 }
0x214f   :  { %9730 = vmatprep.mubr.msk.f32.mxu0 %vm10935_vm0, %v13674_v40 }
0x2151   :  { %v5291_v61 = vpop.f32.mrb[130].mxu1 }
0x2152   :  { %v9721_v15 = vpop.f32.mrb[131].mxu1  ;;  %9731 = vmatmul.mubr.msk.f32.gmra.mrb[132].mxu0 %vm560_vm7, %v5291_v61 }
0x2153   :  { %9733 = vmatprep.mubr.msk.f32.mxu0 %vm10935_vm0, %v13674_v40 }
0x2182   :  { %v5296_v63 = vpop.f32.mrb[132].mxu1 }
0x2183   :  { %v9724_v20 = vpop.f32.mrb[133].mxu1  ;;  %9734 = vmatmul.mubr.msk.f32.gmra.mrb[134].mxu0 %vm560_vm7, %v5296_v63 }
0x2184   :  { %9757 = vmatprep.mubr.msk.f32.mxu0 %vm10935_vm0, %v13674_v40 }
0x2186   :  { %v5482_v33 = vpop.f32.mrb[134].mxu1 }
0x2187   :  { %v9744_v1 = vpop.f32.mrb[135].mxu1  ;;  %v5496_v47 = vsel %vm80_vm3, %v5482_v33, -inf }
0x2188   :  { %5497 = vmax.xlane.f32.xlu1 %v5496_v47 }
0x218a   :  { %v5487_v48 = vpop.f32.mrb[136].mxu1 }
0x218b   :  { %v9747_v52 = vpop.f32.mrb[137].mxu1  ;;  %v5499_v39 = vsel %vm80_vm3, %v5487_v48, -inf }
0x218c   :  { %5500 = vmax.xlane.f32.xlu0 %v5499_v39  ;;  %v8478_v52 = vld [vmem:[%s13548_s10 + $0x1] ss:$0 sm:$0xff] }
0x218e   :  { %v5492_v23 = vpop.f32.mrb[138].mxu1 }
0x218f   :  { %v9750_v54 = vpop.f32.mrb[139].mxu1  ;;  %v5502_v55 = vsel %vm662_vm9, %v5492_v23, -inf }
0x2190   :  { %5503 = vmax.xlane.f32.xlu0 %v5502_v55 }
0x2215   :  { %v5498_v7 = vpop.xlane.xlu1 %5497 }
0x2216   :  { %v5505_v13 = vsub.f32 %v5482_v33, %v5498_v7 }
0x2218   :  { %v5508_v22 = vmul.f32 1.442695, %v5505_v13 }
0x2219   :  { %v5501_v30 = vpop.xlane.xlu0 %5500 }
0x221a   :  { %10800 = vpow2.f32 %v5508_v22  ;;  %v5506_v42 = vsub.f32 %v5487_v48, %v5501_v30 }
0x221c   :  { %v5510_v3 = vmul.f32 1.442695, %v5506_v42 }
0x221d   :  { %v5504_v53 = vpop.xlane.xlu0 %5503 }
0x221e   :  { %10802 = vpow2.f32 %v5510_v3  ;;  %v5507_v35 = vsub.f32 %v5492_v23, %v5504_v53 }
0x2220   :  { %v5512_v9 = vmul.f32 1.442695, %v5507_v35 }
0x2221   :  { %v5375_v41 = vpop.f32.mrb[130].mxu0 }
0x2222   :  { %10804 = vpow2.f32 %v5512_v9  ;;  %v5389_v32 = vadd.f32 %v5375_v41, %v12511_v62  ;;  %v9729_v19 = vpop.f32.mrb[131].mxu0  ;;  %v8334_v62 = vld [vmem:[%s13547_s9 + $0x38] sm:$0xff] }
0x2223   :  { %9767 = vmatpush3.msra.mxu1 %v8334_v62 }
0x2224   :  { %v10801_v8 = vpop.eup %10800 }
0x2225   :  { %v5380_v45 = vpop.f32.mrb[132].mxu0  ;;  %v5514_v17 = vsel %vm80_vm3, %v10801_v8, 0.0 }
0x2226   :  { %v5390_v38 = vadd.f32 %v5380_v45, %v12513_v36  ;;  %5515 = vadd.xlane.f32.xlu1 %v5514_v17  ;;  %v9732_v6 = vpop.f32.mrb[133].mxu0 }
0x2228   :  { %v10803_v25 = vpop.eup %10802 }
0x2229   :  { %v5517_v24 = vsel %vm80_vm3, %v10803_v25, 0.0 }
0x222a   :  { %5518 = vadd.xlane.f32.xlu0 %v5517_v24 }
0x222c   :  { %v10805_v51 = vpop.eup %10804 }
0x222d   :  { %v5520_v34 = vsel %vm662_vm9, %v10805_v51, 0.0 }
0x222e   :  { %5521 = vadd.xlane.f32.xlu1 %v5520_v34 }
0x223f   :  { %5533 = vrot.lane.b32.xlu1 %v12363_v57, %s13681_s1 }
0x2240   :  { %10606 = vrot.lane.b32.xlu0 %v12361_v14, %s13681_s1 }
0x2256   :  { %v5385_v36 = vpop.f32.mrb[134].mxu0 }
0x2257   :  { %v5391_v37 = vadd.f32 %v5385_v36, %v12515_v21  ;;  %v9735_v2 = vpop.f32.mrb[135].mxu0 }
0x2258   :  { %v4160_v2 = vadd.f32 %v12352_v49, %v12232_v27  ;;  %v8339_v49 = vld [vmem:[%s13551_s13 + $0x88] sm:$0xff] }
0x22b3   :  { %v5516_v4 = vpop.xlane.xlu1 %5515 }
0x22b4   :  { %10806 = vrcp.f32 %v5516_v4 }
0x22b7   :  { %v5519_v58 = vpop.xlane.xlu0 %5518 }
0x22b8   :  { %10808 = vrcp.f32 %v5519_v58 }
0x22bb   :  { %v5522_v46 = vpop.xlane.xlu1 %5521  ;;  %v10607_v31 = vpop.permute.xlu0 %10606 }
0x22bc   :  { %v10609_v50 = vunpack.i.h.bf16 %v10607_v31  ;;  %v10608_v57 = vunpack.i.l.bf16 %v10607_v31  ;;  %10810 = vrcp.f32 %v5522_v46  ;;  %v4163_v46 = vsel %vm259_vm5, %v4160_v2, 0.0 }
0x22bd   :  { %v4161_v31 = vadd.f32 %v12354_v28, %v12240_v5  ;;  %v8341_v5 = vld [vmem:[%s13551_s13 + $0x98] sm:$0xff] }
0x22be   :  { %v10267_v26 = vpack.c.bf16 %v10609_v50, %v10608_v57  ;;  %v10807_v14 = vpop.eup %10806  ;;  %v4162_v50 = vadd.f32 %v12356_v0, %v12252_v16  ;;  %v8345_v28 = vld [vmem:[%s13551_s13 + $0xb8] sm:$0xff]  ;;  %v8338_v0 = vld [vmem:[%s13551_s13 + $0x80] sm:$0xff] }
0x22bf   :  { %v5526_v12 = vmul.f32 %v10807_v14, %v10801_v8  ;;  %v5534_v56 = vpop.permute.xlu1 %5533  ;;  %v4166_v57 = vsel %vm259_vm5, %v4161_v31, 0.0  ;;  %v8342_v14 = vld [vmem:[%s13551_s13 + $0xa0] sm:$0xff] }
0x22c0   :  { %10268 = vmatpush3.bf16.msra.mxu0 %v10267_v26  ;;  %v4169_v27 = vsel %vm1877_vm10, %v4162_v50, 0.0  ;;  %v8343_v26 = vld [vmem:[%s13551_s13 + $0xa8] sm:$0xff] }
0x22c1   :  { %9755 = vmatprep.subr.mxu0 %v13674_v40  ;;  %v12652_v16 = vpack.c.bf16 %v8343_v26, %v8339_v49 }
0x22c2   :  { %v10809_v59 = vpop.eup %10808 }
0x22c3   :  { %v5527_v21 = vmul.f32 %v10809_v59, %v10803_v25  ;;  %v8340_v59 = vld [vmem:[%s13551_s13 + $0x90] sm:$0xff] }
0x22c4   :  { %9756 = vmatpush3.msk.msra.mxu0 %vm84_vm2, %v5534_v56  ;;  %v12665_v56 = vpack.c.bf16 %v8342_v14, %v8338_v0  ;;  %v8371_v0 = vld [vmem:[%s13553_s15 + $0x280] sm:$0xff] }
0x22c5   :  { %9758 = vmatmul.mubr.msk.f32.vlgmr.msra.gmra.mrb[136].mxu0 %vm80_vm3, %v5526_v12  ;;  %v12663_v12 = vpack.c.bf16 %v8345_v28, %v8341_v5  ;;  %10270 = vmatprep.subr.bf16.mxu0 %v12652_v16  ;;  %v8403_v14 = vld [vmem:[%s13553_s15 + $0x380] sm:$0xff] }
0x22c6   :  { %9760 = vmatprep.mubr.msk.f32.mxu0 %vm10935_vm0, %v13674_v40  ;;  %v10811_v61 = vpop.eup %10810  ;;  %10272 = vmatpush1.bf16.msra.mxu0 %v12665_v56 }
0x22c7   :  { %v5528_v15 = vmul.f32 %v10811_v61, %v10805_v51  ;;  %10278 = vmatprep.subr.bf16.mxu1 %v12663_v12 }
0x22c9   :  { %9761 = vmatmul.mubr.msk.f32.gmra.mrb[138].mxu0 %vm80_vm3, %v5527_v21  ;;  %v8344_v21 = vld [vmem:[%s13551_s13 + $0xb0] sm:$0xff] }
0x22ca   :  { %9763 = vmatprep.mubr.msk.f32.mxu0 %vm10935_vm0, %v13674_v40  ;;  %v12674_v61 = vpack.c.bf16 %v8344_v21, %v8340_v59  ;;  %v8404_v21 = vld [vmem:[%s13553_s15 + $0x388] sm:$0xff] }
0x22cd   :  { %9764 = vmatmul.mubr.msk.f32.gmra.mrb[140].mxu0 %vm80_vm3, %v5528_v15  ;;  %v8347_v15 = vld [vmem:[%s13551_s13 + $0xc8] sm:$0xff] }
0x22ce   :  { %5883 = vmatprep.mubr.f32.mxu0 %v13674_v40 }
0x2398   :  { %v5614_v63 = vpop.f32.mrb[136].mxu0 }
0x2399   :  { %v9759_v20 = vpop.f32.mrb[137].mxu0  ;;  %9769 = vmatmul.mubr.msk.f32.vlgmr.msra.gmra.mrb[140].mxu1 %vm560_vm7, %v5614_v63  ;;  %v8351_v63 = vld [vmem:[%s13551_s13 + $0xe8] sm:$0xff] }
0x239a   :  { %9771 = vmatprep.mubr.msk.f32.mxu1 %vm10935_vm0, %v13674_v40  ;;  %v8349_v20 = vld [vmem:[%s13551_s13 + $0xd8] sm:$0xff]  ;;  %10280 = vmatpush1.bf16.msra.mxu1 %v12674_v61 }
0x239c   :  { %v5619_v33 = vpop.f32.mrb[138].mxu0 }
0x239d   :  { %v9762_v1 = vpop.f32.mrb[139].mxu0  ;;  %9772 = vmatmul.mubr.msk.f32.gmra.mrb[142].mxu1 %vm560_vm7, %v5619_v33  ;;  %v12688_v33 = vpack.c.bf16 %v8351_v63, %v8347_v15  ;;  %v8355_v15 = vld [vmem:[%s13553_s15 + $0x200] sm:$0xff]  ;;  %v8356_v63 = vld [vmem:[%s13553_s15 + $0x208] sm:$0xff] }
0x239e   :  { %9774 = vmatprep.mubr.msk.f32.mxu1 %vm10935_vm0, %v13674_v40  ;;  %v8353_v1 = vld [vmem:[%s13551_s13 + $0xf8] sm:$0xff] }
0x239f   :  { %10274 = vmatprep.subr.bf16.mxu0 %v12688_v33 }
0x23a0   :  { %v5624_v47 = vpop.f32.mrb[140].mxu0 }
0x23a1   :  { %v9765_v48 = vpop.f32.mrb[141].mxu0  ;;  %9775 = vmatmul.mubr.msk.f32.gmra.mrb[144].mxu1 %vm560_vm7, %v5624_v47  ;;  %v8346_v47 = vld [vmem:[%s13551_s13 + $0xc0] sm:$0xff] }
0x23a2   :  { %5966 = vmatprep.mubr.f32.mxu1 %v13674_v40  ;;  %v8350_v48 = vld [vmem:[%s13551_s13 + $0xe0] sm:$0xff] }
0x246c   :  { %v5703_v39 = vpop.f32.mrb[140].mxu1 }
0x246d   :  { %v5717_v23 = vadd.f32 %v5703_v39, %v5389_v32  ;;  %v9770_v54 = vpop.f32.mrb[141].mxu1  ;;  %v12701_v39 = vpack.c.bf16 %v8350_v48, %v8346_v47  ;;  %v8387_v47 = vld [vmem:[%s13553_s15 + $0x300] sm:$0xff]  ;;  %v8388_v48 = vld [vmem:[%s13553_s15 + $0x308] sm:$0xff] }
0x246e   :  { %v8352_v54 = vld [vmem:[%s13551_s13 + $0xf0] sm:$0xff] }
0x246f   :  { %v5726_v55 = vadd.f32 %v8478_v52, %v5717_v23  ;;  %v8348_v23 = vld [vmem:[%s13551_s13 + $0xd0] sm:$0xff]  ;;  %10276 = vmatpush1.bf16.msra.mxu0 %v12701_v39 }
0x2470   :  { %v5708_v7 = vpop.f32.mrb[142].mxu1 }
0x2471   :  { %v5718_v13 = vadd.f32 %v5708_v7, %v5390_v38  ;;  %v9773_v22 = vpop.f32.mrb[143].mxu1  ;;  %v5729_v30 = vadd.f32 %v5726_v55, %v12330_v29  ;;  %v12710_v55 = vpack.c.bf16 %v8352_v54, %v8348_v23  ;;  %v8373_v23 = vld [vmem:[%s13553_s15 + $0x290] sm:$0xff]  ;;  %v12787_v54 = vpack.c.bf16 %v8388_v48, %v8387_v47  ;;  %v8363_v47 = vld [vmem:[%s13553_s15 + $0x240] sm:$0xff]  ;;  %v8364_v48 = vld [vmem:[%s13553_s15 + $0x248] sm:$0xff] }
0x2473   :  { %v5727_v42 = vadd.f32 %v8478_v52, %v5718_v13  ;;  %v5732_v3 = vsel %vm259_vm5, %v5729_v30, 0.0 }
0x2474   :  { %5733 = vadd.xlane.f32.xlu1 %v5732_v3  ;;  %v5713_v53 = vpop.f32.mrb[144].mxu1 }
0x2475   :  { %v5719_v35 = vadd.f32 %v5713_v53, %v5391_v37  ;;  %v9776_v9 = vpop.f32.mrb[145].mxu1  ;;  %v5730_v41 = vadd.f32 %v5727_v42, %v12337_v10 }
0x2477   :  { %v5728_v19 = vadd.f32 %v8478_v52, %v5719_v35  ;;  %v5735_v8 = vsel %vm259_vm5, %v5730_v41, 0.0  ;;  %v12699_v52 = vpack.c.bf16 %v8353_v1, %v8349_v20  ;;  %v12773_v20 = vpack.c.bf16 %v8404_v21, %v8403_v14  ;;  %v8412_v14 = vld [vmem:[%s13553_s15 + $0x3c8] sm:$0xff] }
0x2478   :  { %5736 = vadd.xlane.f32.xlu0 %v5735_v8  ;;  %v12775_v1 = vpack.c.bf16 %v8356_v63, %v8355_v15 }
0x2479   :  { %v5731_v32 = vadd.f32 %v5728_v19, %v12343_v11  ;;  %10282 = vmatprep.subr.bf16.mxu1 %v12699_v52 }
0x247a   :  { %10284 = vmatpush1.bf16.msra.mxu1 %v12710_v55 }
0x247b   :  { %v5738_v45 = vsel %vm1877_vm10, %v5731_v32, 0.0  ;;  %10318 = vmatprep.subr.bf16.mxu1 %v12773_v20 }
0x247c   :  { %5739 = vadd.xlane.f32.xlu0 %v5738_v45 }
0x2501   :  { %v5734_v17 = vpop.xlane.xlu1 %5733 }
0x2502   :  { %v5741_v29 = vmul.f32 0.03125, %v5734_v17 }
0x2504   :  { %v12619_v38 = vsub.f32 %v5729_v30, %v5741_v29 }
0x2505   :  { %v5737_v6 = vpop.xlane.xlu0 %5736 }
0x2506   :  { %v5742_v25 = vmul.f32 0.03125, %v5737_v6  ;;  %v5747_v24 = vmul.f32 %v12619_v38, %v12619_v38 }
0x2508   :  { %v12623_v51 = vsub.f32 %v5730_v41, %v5742_v25  ;;  %v5750_v10 = vsel %vm259_vm5, %v5747_v24, 0.0  ;;  %v8479_v24 = vld [vmem:[%s13549_s11 + $0x1] ss:$0 sm:$0xff] }
0x2509   :  { %5751 = vadd.xlane.f32.xlu1 %v5750_v10  ;;  %v5740_v34 = vpop.xlane.xlu0 %5739 }
0x250a   :  { %v5743_v62 = vmul.f32 0.03125, %v5740_v34  ;;  %v5748_v11 = vmul.f32 %v12623_v51, %v12623_v51 }
0x250c   :  { %v12628_v36 = vsub.f32 %v5731_v32, %v5743_v62  ;;  %v5753_v37 = vsel %vm259_vm5, %v5748_v11, 0.0 }
0x250d   :  { %5754 = vadd.xlane.f32.xlu0 %v5753_v37  ;;  %v8480_v37 = vld [vmem:[%s13550_s12 + $0x1] ss:$0 sm:$0xff] }
0x250e   :  { %v5749_v4 = vmul.f32 %v12628_v36, %v12628_v36 }
0x2510   :  { %v5756_v58 = vsel %vm1877_vm10, %v5749_v4, 0.0 }
0x2511   :  { %5757 = vadd.xlane.f32.xlu1 %v5756_v58  ;;  %4164 = vadd.xlane.f32.xlu0 %v4163_v46 }
0x2515   :  { %4167 = vadd.xlane.f32.xlu1 %v4166_v57  ;;  %4170 = vadd.xlane.f32.xlu0 %v4169_v27 }
0x2596   :  { %v5752_v7 = vpop.xlane.xlu1 %5751 }
0x2597   :  { %v5759_v13 = vmul.f32 0.03125, %v5752_v7  ;;  %v8374_v7 = vld [vmem:[%s13553_s15 + $0x298] sm:$0xff] }
0x2599   :  { %v5762_v22 = vadd.f32 1e-05, %v5759_v13  ;;  %v8405_v13 = vld [vmem:[%s13553_s15 + $0x390] sm:$0xff] }
0x259a   :  { %v5755_v30 = vpop.xlane.xlu0 %5754 }
0x259b   :  { %10812 = vrsqrt.f32 %v5762_v22  ;;  %v5760_v42 = vmul.f32 0.03125, %v5755_v30  ;;  %v8406_v22 = vld [vmem:[%s13553_s15 + $0x398] sm:$0xff]  ;;  %v12800_v30 = vpack.c.bf16 %v8374_v7, %v8373_v23  ;;  %v8395_v23 = vld [vmem:[%s13553_s15 + $0x340] sm:$0xff] }
0x259d   :  { %v5763_v3 = vadd.f32 1e-05, %v5760_v42  ;;  %v12802_v42 = vpack.c.bf16 %v8406_v22, %v8405_v13  ;;  %v8396_v13 = vld [vmem:[%s13553_s15 + $0x348] sm:$0xff]  ;;  %v8381_v22 = vld [vmem:[%s13553_s15 + $0x2d0] sm:$0xff] }
0x259e   :  { %v5758_v53 = vpop.xlane.xlu1 %5757  ;;  %v4165_v35 = vpop.xlane.xlu0 %4164 }
0x259f   :  { %10814 = vrsqrt.f32 %v5763_v3  ;;  %v5761_v9 = vmul.f32 0.03125, %v5758_v53  ;;  %v4172_v41 = vmul.f32 0.03125, %v4165_v35  ;;  %v8357_v3 = vld [vmem:[%s13553_s15 + $0x210] sm:$0xff]  ;;  %v8358_v53 = vld [vmem:[%s13553_s15 + $0x218] sm:$0xff] }
0x25a0   :  { %v8389_v35 = vld [vmem:[%s13553_s15 + $0x310] sm:$0xff] }
0x25a1   :  { %v5764_v19 = vadd.f32 1e-05, %v5761_v9  ;;  %v12715_v8 = vsub.f32 %v4160_v2, %v4172_v41  ;;  %v12814_v9 = vpack.c.bf16 %v8358_v53, %v8357_v3  ;;  %v8390_v41 = vld [vmem:[%s13553_s15 + $0x318] sm:$0xff]  ;;  %v8413_v53 = vld [vmem:[%s13553_s15 + $0x3d0] sm:$0xff] }
0x25a2   :  { %v4168_v32 = vpop.xlane.xlu1 %4167  ;;  %v4171_v45 = vpop.xlane.xlu0 %4170  ;;  %v8382_v3 = vld [vmem:[%s13553_s15 + $0x2d8] sm:$0xff] }
0x25a3   :  { %10816 = vrsqrt.f32 %v5764_v19  ;;  %v4173_v17 = vmul.f32 0.03125, %v4168_v32  ;;  %v4174_v29 = vmul.f32 0.03125, %v4171_v45  ;;  %v4178_v6 = vmul.f32 %v12715_v8, %v12715_v8  ;;  %v8375_v19 = vld [vmem:[%s13553_s15 + $0x2a0] sm:$0xff]  ;;  %v8376_v32 = vld [vmem:[%s13553_s15 + $0x2a8] sm:$0xff] }
0x25a4   :  { %v12827_v45 = vpack.c.bf16 %v8390_v41, %v8389_v35  ;;  %v8414_v35 = vld [vmem:[%s13553_s15 + $0x3d8] sm:$0xff]  ;;  %v12936_v41 = vpack.c.bf16 %v8364_v48, %v8363_v47  ;;  %v8385_v48 = vld [vmem:[%s13553_s15 + $0x2f0] sm:$0xff] }
0x25a5   :  { %v10813_v25 = vpop.eup %10812  ;;  %v12722_v10 = vsub.f32 %v4161_v31, %v4173_v17  ;;  %v12724_v34 = vsub.f32 %v4162_v50, %v4174_v29  ;;  %v4181_v62 = vsel %vm259_vm5, %v4178_v6, 0.0  ;;  %v12829_v17 = vpack.c.bf16 %v8376_v32, %v8375_v19  ;;  %v8407_v29 = vld [vmem:[%s13553_s15 + $0x3a0] sm:$0xff]  ;;  %v8408_v6 = vld [vmem:[%s13553_s15 + $0x3a8] sm:$0xff] }
0x25a6   :  { %v5768_v11 = vmul.f32 %v10813_v25, %v12619_v38  ;;  %4182 = vadd.xlane.f32.xlu1 %v4181_v62  ;;  %v8359_v25 = vld [vmem:[%s13553_s15 + $0x220] sm:$0xff]  ;;  %v8360_v62 = vld [vmem:[%s13553_s15 + $0x228] sm:$0xff]  ;;  %v12940_v19 = vpack.c.bf16 %v8396_v13, %v8395_v23  ;;  %v12942_v32 = vpack.c.bf16 %v8382_v3, %v8381_v22  ;;  %v8386_v23 = vld [vmem:[%s13553_s15 + $0x2f8] sm:$0xff] }
0x25a7   :  { %v4179_v2 = vmul.f32 %v12722_v10, %v12722_v10  ;;  %v4180_v4 = vmul.f32 %v12724_v34, %v12724_v34  ;;  %v8417_v13 = vld [vmem:[%s13553_s15 + $0x3f0] sm:$0xff]  ;;  %v13014_v22 = vpack.c.bf16 %v8386_v23, %v8385_v48  ;;  %v8418_v3 = vld [vmem:[%s13553_s15 + $0x3f8] sm:$0xff] }
0x25a8   :  { %v5777_v58 = vmul.f32 %v8479_v24, %v5768_v11  ;;  %v8391_v11 = vld [vmem:[%s13553_s15 + $0x320] sm:$0xff] }
0x25a9   :  { %v10815_v46 = vpop.eup %10814  ;;  %v4184_v31 = vsel %vm259_vm5, %v4179_v2, 0.0  ;;  %v4187_v50 = vsel %vm1877_vm10, %v4180_v4, 0.0  ;;  %v12852_v2 = vpack.c.bf16 %v8360_v62, %v8359_v25  ;;  %v8377_v4 = vld [vmem:[%s13553_s15 + $0x2b0] sm:$0xff]  ;;  %v12954_v62 = vpack.c.bf16 %v8414_v35, %v8413_v53  ;;  %13708 = vst [vmem:[#allocation13_spill] sm:$0xff] %v13014_v22  ;;  %v8370_v35 = vld [vmem:[%s13553_s15 + $0x278] sm:$0xff] }
0x25aa   :  { %v12737_v57 = vadd.f32 %v8480_v37, %v5777_v58  ;;  %4185 = vadd.xlane.f32.xlu0 %v4184_v31  ;;  %4188 = vadd.xlane.f32.xlu1 %v4187_v50  ;;  %v5769_v38 = vmul.f32 %v10815_v46, %v12623_v51  ;;  %v8378_v58 = vld [vmem:[%s13553_s15 + $0x2b8] sm:$0xff]  ;;  %v8409_v46 = vld [vmem:[%s13553_s15 + $0x3b0] sm:$0xff] }
0x25ab   :  { %v12867_v50 = vpack.c.bf16 %v8378_v58, %v8377_v4  ;;  %v8397_v25 = vld [vmem:[%s13553_s15 + $0x350] sm:$0xff]  ;;  %13701 = vst [vmem:[#allocation6_spill] sm:$0xff] %v12954_v62  ;;  %v8384_v4 = vld [vmem:[%s13553_s15 + $0x2e8] sm:$0xff]  ;;  %v8415_v58 = vld [vmem:[%s13553_s15 + $0x3e0] sm:$0xff] }
0x25ac   :  { %8481 = vmatmul.mubr.msk.f32.vlgmr.msra.gmra.mrb[142].mxu0 %vm259_vm5, %v12737_v57  ;;  %8484 = vmatmul.mubr.msk.f32.vlgmr.msra.gmra.mrb[146].mxu1 %vm259_vm5, %v12737_v57  ;;  %v5778_v27 = vmul.f32 %v8479_v24, %v5769_v38  ;;  %v8410_v38 = vld [vmem:[%s13553_s15 + $0x3b8] sm:$0xff]  ;;  %v8369_v53 = vld [vmem:[%s13553_s15 + $0x270] sm:$0xff] }
0x25ad   :  { %v10817_v49 = vpop.eup %10816  ;;  %5889 = vmatprep.mubr.f32.mxu0 %v13674_v40  ;;  %5972 = vmatprep.mubr.f32.mxu1 %v13674_v40 }
0x25ae   :  { %v5787_v26 = vadd.f32 %v8480_v37, %v5778_v27  ;;  %v5770_v5 = vmul.f32 %v10817_v49, %v12628_v36  ;;  %v8372_v36 = vld [vmem:[%s13553_s15 + $0x288] sm:$0xff]  ;;  %10320 = vmatpush3.bf16.msra.mxu1 %v12787_v54  ;;  %v8361_v27 = vld [vmem:[%s13553_s15 + $0x230] sm:$0xff]  ;;  %v8362_v49 = vld [vmem:[%s13553_s15 + $0x238] sm:$0xff] }
0x25af   :  { %v12762_v59 = vpack.c.bf16 %v8372_v36, %v8371_v0  ;;  %10322 = vmatprep.subr.bf16.mxu1 %v12802_v42  ;;  %v8380_v0 = vld [vmem:[%s13553_s15 + $0x2c8] sm:$0xff]  ;;  %v8411_v36 = vld [vmem:[%s13553_s15 + $0x3c0] sm:$0xff]  ;;  %v12900_v21 = vpack.c.bf16 %v8362_v49, %v8361_v27 }
0x25b0   :  { %8482 = vmatmul.mubr.msk.f32.gmra.mrb[144].mxu0 %vm259_vm5, %v5787_v26  ;;  %8485 = vmatmul.mubr.msk.f32.gmra.mrb[148].mxu1 %vm259_vm5, %v5787_v26  ;;  %v5779_v51 = vmul.f32 %v8479_v24, %v5770_v5  ;;  %v12840_v24 = vpack.c.bf16 %v8408_v6, %v8407_v29  ;;  %v12879_v26 = vpack.c.bf16 %v8410_v38, %v8409_v46  ;;  %v8393_v5 = vld [vmem:[%s13553_s15 + $0x330] sm:$0xff]  ;;  %v8366_v6 = vld [vmem:[%s13553_s15 + $0x258] sm:$0xff]  ;;  %v8416_v46 = vld [vmem:[%s13553_s15 + $0x3e8] sm:$0xff] }
0x25b1   :  { %5895 = vmatprep.mubr.f32.mxu0 %v13674_v40  ;;  %5978 = vmatprep.mubr.f32.mxu1 %v13674_v40  ;;  %v12918_v7 = vpack.c.bf16 %v8412_v14, %v8411_v36  ;;  %v8365_v29 = vld [vmem:[%s13553_s15 + $0x250] sm:$0xff]  ;;  %v8400_v14 = vld [vmem:[%s13553_s15 + $0x368] sm:$0xff] }
0x25b2   :  { %v5788_v28 = vadd.f32 %v8480_v37, %v5779_v51  ;;  %10286 = vmatprep.subr.bf16.mxu0 %v12762_v59  ;;  %v8392_v37 = vld [vmem:[%s13553_s15 + $0x328] sm:$0xff]  ;;  %10324 = vmatpush3.bf16.msra.mxu1 %v12827_v45  ;;  %v8394_v51 = vld [vmem:[%s13553_s15 + $0x338] sm:$0xff]  ;;  %v12972_v38 = vpack.c.bf16 %v8366_v6, %v8365_v29  ;;  %v13025_v29 = vpack.c.bf16 %v8418_v3, %v8417_v13 }
0x25b3   :  { %10288 = vmatpush3.bf16.msra.mxu0 %v12775_v1  ;;  %v12865_v31 = vpack.c.bf16 %v8392_v37, %v8391_v11  ;;  %10326 = vmatprep.subr.bf16.mxu1 %v12840_v24  ;;  %v12904_v15 = vpack.c.bf16 %v8394_v51, %v8393_v5  ;;  %v8398_v11 = vld [vmem:[%s13553_s15 + $0x358] sm:$0xff]  ;;  %v8383_v37 = vld [vmem:[%s13553_s15 + $0x2e0] sm:$0xff]  ;;  %v12981_v5 = vpack.c.bf16 %v8416_v46, %v8415_v58 }
0x25b4   :  { %8483 = vmatmul.mubr.msk.f32.gmra.mrb[146].mxu0 %vm259_vm5, %v5788_v28  ;;  %8486 = vmatmul.mubr.msk.f32.gmra.mrb[150].mxu1 %vm259_vm5, %v5788_v28  ;;  %v8379_v28 = vld [vmem:[%s13553_s15 + $0x2c0] sm:$0xff]  ;;  %13702 = vst [vmem:[#allocation7_spill] sm:$0xff] %v12972_v38  ;;  %v12976_v27 = vpack.c.bf16 %v8398_v11, %v8397_v25  ;;  %v12978_v49 = vpack.c.bf16 %v8384_v4, %v8383_v37  ;;  %13709 = vst [vmem:[#allocation14_spill] sm:$0xff] %v13025_v29  ;;  %v8401_v25 = vld [vmem:[%s13553_s15 + $0x370] sm:$0xff] }
0x25b5   :  { %10290 = vmatprep.subr.bf16.mxu0 %v12800_v30  ;;  %v12906_v63 = vpack.c.bf16 %v8380_v0, %v8379_v28  ;;  %13705 = vst [vmem:[#allocation10_spill] sm:$0xff] %v12981_v5  ;;  %v8367_v51 = vld [vmem:[%s13553_s15 + $0x260] sm:$0xff]  ;;  %v8368_v28 = vld [vmem:[%s13553_s15 + $0x268] sm:$0xff]  ;;  %v13027_v6 = vpack.c.bf16 %v8370_v35, %v8369_v53  ;;  %v8402_v11 = vld [vmem:[%s13553_s15 + $0x378] sm:$0xff] }
0x25b6   :  { %10328 = vmatpush3.bf16.msra.mxu1 %v12865_v31  ;;  %13703 = vst [vmem:[#allocation8_spill] sm:$0xff] %v12976_v27  ;;  %13704 = vst [vmem:[#allocation9_spill] sm:$0xff] %v12978_v49  ;;  %v8399_v0 = vld [vmem:[%s13553_s15 + $0x360] sm:$0xff]  ;;  %v12996_v36 = vpack.c.bf16 %v8368_v28, %v8367_v51  ;;  %v13036_v37 = vpack.c.bf16 %v8402_v11, %v8401_v25  ;;  %v13712_v13 = vld [vmem:[#allocation21_spill] sm:$0xff]  ;;  %s13724_s15 = smov 64  }
0x25b7   :  { %10292 = vmatpush3.bf16.msra.mxu0 %v12814_v9  ;;  %10330 = vmatprep.subr.bf16.mxu1 %v12879_v26  ;;  %v13001_v47 = vpack.c.bf16 %v8400_v14, %v8399_v0  ;;  %13710 = vst [vmem:[#allocation15_spill] sm:$0xff] %v13027_v6  ;;  %v8354_v14 = vld [vmem:[%s13552_s14 + $0x4] sm:$0xf]  ;;  %v13713_v3 = vsub.s32 0, %v13712_v13  ;;  %v13715_v35 = vsub.s32 2, %v13712_v13  ;;  %v13717_v11 = vsub.s32 1, %v13712_v13 }
0x25b8   :  { %10294 = vmatprep.subr.bf16.mxu0 %v12829_v17  ;;  %13706 = vst [vmem:[#allocation11_spill] sm:$0xff] %v12996_v36  ;;  %13711 = vst [vmem:[#allocation16_spill] sm:$0xff] %v13036_v37 }
0x25b9   :  { %13707 = vst [vmem:[#allocation12_spill] sm:$0xff] %v13001_v47  ;;  %v13048_v53 = vrot.slane %v8354_v14, %v13713_v3  ;;  %v13052_v25 = vrot.slane %v8354_v14, %v13715_v35 }
0x25ba   :  { %10332 = vmatpush3.bf16.msra.mxu1 %v12904_v15 }
0x25bb   :  { %10296 = vmatpush3.bf16.msra.mxu0 %v12852_v2  ;;  %10334 = vmatprep.subr.bf16.mxu1 %v12918_v7  ;;  %13714 = vst [vmem:[#allocation17_spill] sm:$0xff] %v13048_v53  ;;  %13716 = vst [vmem:[#allocation18_spill] sm:$0xff] %v13052_v25 }
0x25bc   :  { %10298 = vmatprep.subr.bf16.mxu0 %v12867_v50 }
0x25be   :  { %10336 = vmatpush3.bf16.msra.mxu1 %v12940_v19 }
0x25bf   :  { %10300 = vmatpush3.bf16.msra.mxu0 %v12900_v21  ;;  %10338 = vmatprep.subr.bf16.mxu1 %v12954_v62 }
0x25c0   :  { %10302 = vmatprep.subr.bf16.mxu0 %v12906_v63 }
0x25c2   :  { %10340 = vmatpush3.bf16.msra.mxu1 %v12976_v27 }
0x25c3   :  { %10304 = vmatpush3.bf16.msra.mxu0 %v12936_v41  ;;  %10342 = vmatprep.subr.bf16.mxu1 %v12981_v5 }
0x25c4   :  { %10306 = vmatprep.subr.bf16.mxu0 %v12942_v32 }
0x25c6   :  { %10344 = vmatpush3.bf16.msra.mxu1 %v13001_v47 }
0x25c7   :  { %10308 = vmatpush3.bf16.msra.mxu0 %v12972_v38  ;;  %10346 = vmatprep.subr.bf16.mxu1 %v13025_v29 }
0x25c8   :  { %10310 = vmatprep.subr.bf16.mxu0 %v12978_v49 }
0x25ca   :  { %10348 = vmatpush3.bf16.msra.mxu1 %v13036_v37 }
0x25cb   :  { %10312 = vmatpush3.bf16.msra.mxu0 %v12996_v36  ;;  %10355 = vmatprep.subr.bf16.mxu1 %v13673_v44 }
0x25cc   :  { %10314 = vmatprep.subr.bf16.mxu0 %v13014_v22 }
0x25cf   :  { %10316 = vmatpush3.bf16.msra.mxu0 %v13027_v6 }
0x25d0   :  { %10349 = vmatprep.subr.bf16.mxu0 %v13673_v44 }
0x2633   :  { %v4183_v4 = vpop.xlane.xlu1 %4182 }
0x2634   :  { %v4190_v58 = vmul.f32 0.03125, %v4183_v4  ;;  %v13056_v4 = vrot.slane %v8354_v14, %v13717_v11 }
0x2636   :  { %v4193_v51 = vadd.f32 1e-05, %v4190_v58  ;;  %13718 = vst [vmem:[#allocation19_spill] sm:$0xff] %v13056_v4  ;;  %v13719_v58 = vsub.s32 3, %v13712_v13 }
0x2637   :  { %v4186_v46 = vpop.xlane.xlu0 %4185  ;;  %v4189_v0 = vpop.xlane.xlu1 %4188 }
0x2638   :  { %v4191_v28 = vmul.f32 0.03125, %v4186_v46  ;;  %10818 = vrsqrt.f32 %v4193_v51  ;;  %v4192_v48 = vmul.f32 0.03125, %v4189_v0  ;;  %v13060_v46 = vrot.slane %v8354_v14, %v13719_v58 }
0x263a   :  { %v4194_v23 = vadd.f32 1e-05, %v4191_v28  ;;  %13720 = vst [vmem:[#allocation20_spill] sm:$0xff] %v13060_v46  ;;  %v4195_v37 = vadd.f32 1e-05, %v4192_v48 }
0x263c   :  { %10820 = vrsqrt.f32 %v4194_v23 }
0x263d   :  { %10822 = vrsqrt.f32 %v4195_v37 }
0x2642   :  { %v10819_v58 = vpop.eup %10818 }
0x267f   :  { %v5885_v51 = vpop.f32.mrb[142].mxu0  ;;  %v5968_v28 = vpop.f32.mrb[146].mxu1 }
0x2680   :  { %v5886_v0 = vadd.f32 %v5885_v51, %v13048_v53  ;;  %v5969_v3 = vadd.f32 %v5968_v28, %v13052_v25  ;;  %v5887_v6 = vpop.f32.mrb[143].mxu0  ;;  %v5970_v29 = vpop.f32.mrb[147].mxu1 }
0x2681   :  { %v5888_v35 = vadd.f32 %v5887_v6, %v13056_v4  ;;  %v5971_v22 = vadd.f32 %v5970_v29, %v13060_v46 }
0x2682   :  { %v5985_v48 = vmax.f32 %v5886_v0, 0.0  ;;  %v5987_v23 = vmax.f32 %v5969_v3, 0.0 }
0x2683   :  { %v5986_v11 = vmax.f32 %v5888_v35, 0.0  ;;  %v5988_v47 = vmax.f32 %v5971_v22, 0.0  ;;  %v5891_v13 = vpop.f32.mrb[144].mxu0  ;;  %v5974_v14 = vpop.f32.mrb[148].mxu1  ;;  %v4199_v22 = vmul.f32 %v10819_v58, %v12715_v8 }
0x2684   :  { %v5892_v36 = vadd.f32 %v5891_v13, %v13048_v53  ;;  %v5975_v51 = vadd.f32 %v5974_v14, %v13052_v25  ;;  %v5893_v5 = vpop.f32.mrb[145].mxu0  ;;  %v5976_v28 = vpop.f32.mrb[149].mxu1 }
0x2685   :  { %v5894_v49 = vadd.f32 %v5893_v5, %v13056_v4  ;;  %v5977_v6 = vadd.f32 %v5976_v28, %v13060_v46  ;;  %6067 = vmatprep.mubr.f32.mxu0 %v5986_v11  ;;  %6145 = vmatprep.mubr.f32.mxu1 %v5988_v47  ;;  %v10821_v47 = vpop.eup %10820 }
0x2686   :  { %6068 = vmatmul.mubr.f32.vlgmr.msra.gmra.mrb[148].mxu0 %v5985_v48  ;;  %6146 = vmatmul.mubr.f32.vlgmr.msra.gmra.mrb[152].mxu1 %v5987_v23  ;;  %v5989_v35 = vmax.f32 %v5892_v36, 0.0  ;;  %v5991_v13 = vmax.f32 %v5975_v51, 0.0  ;;  %v10899_v36 = vld [vmem:[%s13555_s17] ss:$0 sm:$0xff]  ;;  %v4200_v51 = vmul.f32 %v10821_v47, %v12722_v10 }
0x2687   :  { %v5990_v29 = vmax.f32 %v5894_v49, 0.0  ;;  %v5992_v37 = vmax.f32 %v5977_v6, 0.0  ;;  %v5897_v0 = vpop.f32.mrb[146].mxu0  ;;  %v5980_v3 = vpop.f32.mrb[150].mxu1  ;;  %10351 = vmatpush3.bf16.msra.mxu0 %v12296_v43  ;;  %v4202_v58 = vmul.f32 %v10899_v36, %v4199_v22 }
0x2688   :  { %v5898_v14 = vadd.f32 %v5897_v0, %v13048_v53  ;;  %v5981_v5 = vadd.f32 %v5980_v3, %v13052_v25  ;;  %v5899_v27 = vpop.f32.mrb[147].mxu0  ;;  %v5982_v28 = vpop.f32.mrb[151].mxu1  ;;  %10352 = vmatprep.subr.bf16.mxu0 %v13673_v44  ;;  %v4203_v10 = vmul.f32 %v10899_v36, %v4200_v51 }
0x2689   :  { %v5900_v11 = vadd.f32 %v5899_v27, %v13056_v4  ;;  %v5983_v8 = vadd.f32 %v5982_v28, %v13060_v46  ;;  %6072 = vmatprep.mubr.f32.mxu0 %v5990_v29  ;;  %6150 = vmatprep.mubr.f32.mxu1 %v5992_v37  ;;  %v10823_v27 = vpop.eup %10822 }
0x268a   :  { %6073 = vmatmul.mubr.f32.gmra.mrb[150].mxu0 %v5989_v35  ;;  %6151 = vmatmul.mubr.f32.gmra.mrb[154].mxu1 %v5991_v13  ;;  %v5993_v48 = vmax.f32 %v5898_v14, 0.0  ;;  %v5995_v23 = vmax.f32 %v5981_v5, 0.0  ;;  %v4201_v22 = vmul.f32 %v10823_v27, %v12724_v34  ;;  %v8487_v35 = vld [vmem:[%s13554_s16 + $0x1] ss:$0 sm:$0xff] }
0x268b   :  { %v5994_v43 = vmax.f32 %v5900_v11, 0.0  ;;  %v5996_v49 = vmax.f32 %v5983_v8, 0.0  ;;  %10354 = vmatpush3.bf16.msra.mxu0 %v12310_v18  ;;  %v10900_v18 = vld [vmem:[%s13556_s18] ss:$0 sm:$0xff] }
0x268c   :  { %10359 = vmatprep.subr.bf16.mxu0 %v13673_v44  ;;  %v13090_v6 = vadd.f32 %v10900_v18, %v4202_v58  ;;  %v13097_v29 = vadd.f32 %v10900_v18, %v4203_v10  ;;  %v4204_v37 = vmul.f32 %v10899_v36, %v4201_v22  ;;  %v10901_v22 = vld [vmem:[%s13546_s8 + $0x1] ss:$0 sm:$0xff]  ;;  %s13723_s8 = smov 120  }
0x268d   :  { %6076 = vmatprep.mubr.f32.mxu0 %v5994_v43  ;;  %6154 = vmatprep.mubr.f32.mxu1 %v5996_v49 }
0x268e   :  { %6077 = vmatmul.mubr.f32.gmra.mrb[152].mxu0 %v5993_v48  ;;  %6155 = vmatmul.mubr.f32.gmra.mrb[156].mxu1 %v5995_v23  ;;  %v13103_v0 = vadd.f32 %v10900_v18, %v4204_v37 }
0x268f   :  { %9785 = vmatprep.mubr.msk.f32.mxu0 %vm10935_vm0, %v13674_v40  ;;  %9800 = vmatprep.mubr.msk.f32.mxu1 %vm10935_vm0, %v13674_v40 }
0x2692   :  { %9786 = vmatmul.mubr.msk.f32.vlgmr.msra.gmra.mrb[154].mxu0 %vm259_vm5, %v13090_v6 }
0x2693   :  { %9788 = vmatprep.mubr.msk.f32.mxu0 %vm10935_vm0, %v13674_v40 }
0x2696   :  { %9789 = vmatmul.mubr.msk.f32.gmra.mrb[156].mxu0 %vm259_vm5, %v13097_v29 }
0x2697   :  { %9791 = vmatprep.mubr.msk.f32.mxu0 %vm10935_vm0, %v13674_v40 }
0x269a   :  { %9792 = vmatmul.mubr.msk.f32.gmra.mrb[158].mxu0 %vm259_vm5, %v13103_v0 }
0x269b   :  { %9815 = vmatprep.mubr.msk.f32.mxu0 %vm10935_vm0, %v13674_v40 }
0x2759   :  { %v8982_v34 = vpop.f32.mrb[148].mxu0  ;;  %v9023_v3 = vpop.f32.mrb[152].mxu1 }
0x275a   :  { %v8983_v13 = vpop.f32.mrb[149].mxu0  ;;  %v9024_v14 = vpop.f32.mrb[153].mxu1 }
0x275b   :  { %v8984_v5 = vadd.f32 %v8983_v13, %v8982_v34  ;;  %v9025_v28 = vadd.f32 %v9024_v14, %v9023_v3 }
0x275d   :  { %v6070_v47 = vadd.f32 %v8984_v5, %v8487_v35  ;;  %v8985_v11 = vpop.f32.mrb[150].mxu0  ;;  %v9026_v8 = vpop.f32.mrb[154].mxu1 }
0x275e   :  { %v8986_v43 = vpop.f32.mrb[151].mxu0  ;;  %v9027_v49 = vpop.f32.mrb[155].mxu1 }
0x275f   :  { %v13112_v36 = vadd.f32 %v9025_v28, %v6070_v47 }
0x2761   :  { %v8988_v58 = vpop.f32.mrb[152].mxu0  ;;  %v9029_v48 = vpop.f32.mrb[156].mxu1 }
0x2762   :  { %v8989_v23 = vpop.f32.mrb[153].mxu0  ;;  %v9030_v51 = vpop.f32.mrb[157].mxu1 }
0x2765   :  { %v6262_v27 = vpop.f32.mrb[154].mxu0 }
0x2766   :  { %v9787_v18 = vpop.f32.mrb[155].mxu0  ;;  %v6263_v37 = vadd.f32 %v10901_v22, %v6262_v27 }
0x2768   :  { %v13133_v47 = vmul.f32 0.35355338, %v6263_v37 }
0x2769   :  { %v6267_v10 = vpop.f32.mrb[156].mxu0 }
0x276a   :  { %v6268_v34 = vadd.f32 %v10901_v22, %v6267_v10  ;;  %v9790_v3 = vpop.f32.mrb[157].mxu0 }
0x276c   :  { %v13117_v35 = vpack.i.bf16 %v6268_v34, %v6263_v37  ;;  %v13129_v28 = vmul.f32 0.35355338, %v6268_v34  ;;  %v10902_v37 = vld [vmem:[%s13547_s9 + $0x28] sm:$0xff] }
0x276d   :  { %v6272_v13 = vpop.f32.mrb[158].mxu0 }
0x276e   :  { %v13119_v14 = vadd.f32 %v10901_v22, %v6272_v13  ;;  %10611 = vrot.lane.b32.xlu0 %v13117_v35, %s13721_s21  ;;  %v9793_v5 = vpop.f32.mrb[159].mxu0 }
0x2770   :  { %6286 = vrot.lane.b32.xlu1 %v13119_v14, %s13721_s21  ;;  %v13138_v11 = vmul.f32 0.35355338, %v13119_v14 }
0x2772   :  { %6525 = vrot.lane.b32.xlu0 %v13119_v14, %s13722_s27 }
0x2774   :  { %10616 = vrot.lane.b32.xlu1 %v13117_v35, %s13722_s27 }
0x2776   :  { %6517 = vrot.lane.b32.xlu0 %v13129_v28, %s13723_s8 }
0x2778   :  { %6515 = vrot.lane.b32.xlu1 %v13133_v47, %s13723_s8 }
0x277c   :  { %6519 = vrot.lane.b32.xlu1 %v13138_v11, %s13723_s8 }
0x27e0   :  { %v10612_v8 = vpop.permute.xlu0 %10611 }
0x27e1   :  { %v10614_v43 = vunpack.i.h.bf16 %v10612_v8  ;;  %v10613_v49 = vunpack.i.l.bf16 %v10612_v8 }
0x27e2   :  { %v6287_v58 = vpop.permute.xlu1 %6286 }
0x27e3   :  { %v10356_v48 = vpack.c.bf16 %v10614_v43, %v10613_v49 }
0x27e4   :  { %v6526_v10 = vpop.permute.xlu0 %6525 }
0x27e5   :  { %10358 = vmatpush3.bf16.xpose.msk.msra.mxu1 %vm11201_vm8, %v10356_v48 }
0x27e6   :  { %9798 = vmatprep.subr.mxu1 %v13674_v40  ;;  %v10617_v23 = vpop.permute.xlu1 %10616 }
0x27e7   :  { %v10619_v51 = vunpack.i.h.bf16 %v10617_v23  ;;  %v10618_v27 = vunpack.i.l.bf16 %v10617_v23 }
0x27e8   :  { %v6518_v34 = vpop.permute.xlu0 %6517 }
0x27e9   :  { %v10363_v18 = vpack.c.bf16 %v10619_v51, %v10618_v27 }
0x27ea   :  { %v6516_v22 = vpop.permute.xlu1 %6515 }
0x27ed   :  { %9799 = vmatpush3.xpose.msk.msra.mxu1 %vm560_vm7, %v6287_v58 }
0x27ee   :  { %10362 = vmatprep.subr.bf16.mxu1 %v13673_v44  ;;  %v6520_v3 = vpop.permute.xlu1 %6519 }
0x27f0   :  { %9801 = vmatmul.mubr.msk.f32.vlgmr.msra.gmra.mrb[158].mxu1 %vm560_vm7, %v13133_v47 }
0x27f1   :  { %10365 = vmatpush3.bf16.xpose.msk.msra.mxu1 %vm11201_vm8, %v10363_v18  ;;  %9803 = vmatprep.mubr.msk.f32.mxu1 %vm10935_vm0, %v13674_v40 }
0x27f2   :  { %9828 = vmatprep.subr.mxu1 %v13674_v40 }
0x27f4   :  { %9804 = vmatmul.mubr.msk.f32.gmra.mrb[160].mxu1 %vm560_vm7, %v13129_v28 }
0x27f5   :  { %9806 = vmatprep.mubr.msk.f32.mxu1 %vm10935_vm0, %v13674_v40 }
0x27f8   :  { %9807 = vmatmul.mubr.msk.f32.gmra.mrb[162].mxu1 %vm560_vm7, %v13138_v11 }
0x27f9   :  { %9829 = vmatpush3.xpose.msk.msra.mxu1 %vm560_vm7, %v6526_v10  ;;  %9830 = vmatprep.mubr.msk.f32.mxu1 %vm10935_vm0, %v13674_v40 }
0x27fa   :  { %9854 = vmatprep.subr.mxu1 %v13674_v40 }
0x27fc   :  { %9831 = vmatmul.mubr.msk.f32.vlgmr.msra.gmra.mrb[164].mxu1 %vm560_vm7, %v6516_v22 }
0x27fd   :  { %9833 = vmatprep.mubr.msk.f32.mxu1 %vm10935_vm0, %v13674_v40  ;;  %9855 = vmatpush3.msra.mxu1 %v10902_v37 }
0x27fe   :  { %10369 = vmatprep.subr.bf16.mxu1 %v13673_v44 }
0x2800   :  { %9834 = vmatmul.mubr.msk.f32.gmra.mrb[166].mxu1 %vm560_vm7, %v6518_v34 }
0x2801   :  { %9836 = vmatprep.mubr.msk.f32.mxu1 %vm10935_vm0, %v13674_v40 }
0x2804   :  { %9837 = vmatmul.mubr.msk.f32.gmra.mrb[168].mxu1 %vm560_vm7, %v6520_v3 }
0x2805   :  { %9856 = vmatprep.mubr.msk.f32.mxu1 %vm10935_vm0, %v13674_v40 }
0x28c3   :  { %v6369_v13 = vpop.f32.mrb[158].mxu1 }
0x28c4   :  { %v9802_v5 = vpop.f32.mrb[159].mxu1  ;;  %v6383_v8 = vsel %vm80_vm3, %v6369_v13, -inf }
0x28c5   :  { %6384 = vmax.xlane.f32.xlu0 %v6383_v8 }
0x28c7   :  { %v6374_v43 = vpop.f32.mrb[160].mxu1 }
0x28c8   :  { %v9805_v49 = vpop.f32.mrb[161].mxu1  ;;  %v6386_v58 = vsel %vm80_vm3, %v6374_v43, -inf }
0x28c9   :  { %6387 = vmax.xlane.f32.xlu1 %v6386_v58 }
0x28cb   :  { %v6379_v48 = vpop.f32.mrb[162].mxu1 }
0x28cc   :  { %v9808_v23 = vpop.f32.mrb[163].mxu1  ;;  %v6389_v51 = vsel %vm662_vm9, %v6379_v48, -inf }
0x28cd   :  { %6390 = vmax.xlane.f32.xlu0 %v6389_v51 }
0x28cf   :  { %v6605_v27 = vpop.f32.mrb[164].mxu1 }
0x28d0   :  { %v9832_v18 = vpop.f32.mrb[165].mxu1  ;;  %v6619_v10 = vsel %vm80_vm3, %v6605_v27, -inf }
0x28d1   :  { %6620 = vmax.xlane.f32.xlu0 %v6619_v10 }
0x28d3   :  { %v6610_v22 = vpop.f32.mrb[166].mxu1 }
0x28d4   :  { %v9835_v37 = vpop.f32.mrb[167].mxu1  ;;  %v6622_v34 = vsel %vm80_vm3, %v6610_v22, -inf }
0x28d5   :  { %6623 = vmax.xlane.f32.xlu1 %v6622_v34 }
0x28d7   :  { %v6615_v3 = vpop.f32.mrb[168].mxu1 }
0x28d8   :  { %v9838_v5 = vpop.f32.mrb[169].mxu1  ;;  %v6625_v8 = vsel %vm662_vm9, %v6615_v3, -inf }
0x28d9   :  { %6626 = vmax.xlane.f32.xlu0 %v6625_v8 }
0x28e6   :  { %6420 = vrot.lane.b32.xlu1 %v13119_v14, %s13724_s15 }
0x28ef   :  { %10621 = vrot.lane.b32.xlu0 %v13117_v35, %s13724_s15 }
0x2952   :  { %v6385_v49 = vpop.xlane.xlu0 %6384 }
0x2953   :  { %v6392_v58 = vsub.f32 %v6369_v13, %v6385_v49 }
0x2955   :  { %v6395_v23 = vmul.f32 1.442695, %v6392_v58 }
0x2956   :  { %v6388_v51 = vpop.xlane.xlu1 %6387 }
0x2957   :  { %10824 = vpow2.f32 %v6395_v23  ;;  %v6393_v18 = vsub.f32 %v6374_v43, %v6388_v51 }
0x2959   :  { %v6397_v10 = vmul.f32 1.442695, %v6393_v18 }
0x295a   :  { %v6391_v37 = vpop.xlane.xlu0 %6390 }
0x295b   :  { %10826 = vpow2.f32 %v6397_v10  ;;  %v6394_v34 = vsub.f32 %v6379_v48, %v6391_v37 }
0x295d   :  { %v6399_v5 = vmul.f32 1.442695, %v6394_v34 }
0x295e   :  { %v6621_v46 = vpop.xlane.xlu0 %6620 }
0x295f   :  { %10828 = vpow2.f32 %v6399_v5  ;;  %v6628_v8 = vsub.f32 %v6605_v27, %v6621_v46 }
0x2961   :  { %v10825_v4 = vpop.eup %10824  ;;  %v6631_v25 = vmul.f32 1.442695, %v6628_v8 }
0x2962   :  { %v6624_v53 = vpop.xlane.xlu1 %6623  ;;  %v6401_v38 = vsel %vm80_vm3, %v10825_v4, 0.0 }
0x2963   :  { %10830 = vpow2.f32 %v6631_v25  ;;  %v6629_v62 = vsub.f32 %v6610_v22, %v6624_v53  ;;  %6402 = vadd.xlane.f32.xlu1 %v6401_v38 }
0x2965   :  { %v10827_v13 = vpop.eup %10826  ;;  %v6633_v49 = vmul.f32 1.442695, %v6629_v62 }
0x2966   :  { %v6627_v58 = vpop.xlane.xlu0 %6626  ;;  %v6404_v43 = vsel %vm80_vm3, %v10827_v13, 0.0  ;;  %v6421_v22 = vpop.permute.xlu1 %6420 }
0x2967   :  { %10832 = vpow2.f32 %v6633_v49  ;;  %v6630_v23 = vsub.f32 %v6615_v3, %v6627_v58  ;;  %6405 = vadd.xlane.f32.xlu0 %v6404_v43 }
0x2969   :  { %v10829_v48 = vpop.eup %10828  ;;  %v6635_v51 = vmul.f32 1.442695, %v6630_v23 }
0x296a   :  { %v10622_v18 = vpop.permute.xlu0 %10621  ;;  %v6407_v46 = vsel %vm662_vm9, %v10829_v48, 0.0 }
0x296b   :  { %10834 = vpow2.f32 %v6635_v51  ;;  %v10624_v27 = vunpack.i.h.bf16 %v10622_v18  ;;  %v10623_v10 = vunpack.i.l.bf16 %v10622_v18  ;;  %6408 = vadd.xlane.f32.xlu1 %v6407_v46 }
0x296d   :  { %v10831_v25 = vpop.eup %10830  ;;  %v10360_v53 = vpack.c.bf16 %v10624_v27, %v10623_v10 }
0x296e   :  { %v6637_v38 = vsel %vm80_vm3, %v10831_v25, 0.0 }
0x296f   :  { %6638 = vadd.xlane.f32.xlu0 %v6637_v38  ;;  %10361 = vmatpush3.bf16.msra.mxu0 %v10360_v53 }
0x2970   :  { %9813 = vmatprep.subr.mxu0 %v13674_v40 }
0x2971   :  { %v10833_v62 = vpop.eup %10832 }
0x2972   :  { %v6640_v3 = vsel %vm80_vm3, %v10833_v62, 0.0 }
0x2973   :  { %6641 = vadd.xlane.f32.xlu1 %v6640_v3  ;;  %9814 = vmatpush3.msk.msra.mxu0 %vm84_vm2, %v6421_v22 }
0x2974   :  { %10366 = vmatprep.subr.bf16.mxu0 %v13673_v44 }
0x2975   :  { %v10835_v37 = vpop.eup %10834 }
0x2976   :  { %v6643_v34 = vsel %vm662_vm9, %v10835_v37, 0.0 }
0x2977   :  { %6644 = vadd.xlane.f32.xlu1 %v6643_v34 }
0x2985   :  { %10626 = vrot.lane.b32.xlu0 %v13117_v35, %s13675_s3 }
0x2988   :  { %6656 = vrot.lane.b32.xlu1 %v13119_v14, %s13675_s3 }
0x2989   :  { %10631 = vrot.lane.b32.xlu0 %v13117_v35, %s13676_s23 }
0x298c   :  { %6939 = vrot.lane.b32.xlu1 %v13119_v14, %s13676_s23 }
0x298d   :  { %6929 = vrot.lane.b32.xlu0 %v13133_v47, %s13677_s22 }
0x2990   :  { %6931 = vrot.lane.b32.xlu1 %v13129_v28, %s13677_s22 }
0x2991   :  { %6933 = vrot.lane.b32.xlu0 %v13138_v11, %s13677_s22 }
0x29f0   :  { %v6403_v5 = vpop.xlane.xlu1 %6402 }
0x29f1   :  { %10836 = vrcp.f32 %v6403_v5 }
0x29f4   :  { %v6406_v8 = vpop.xlane.xlu0 %6405 }
0x29f5   :  { %10838 = vrcp.f32 %v6406_v8 }
0x29f8   :  { %v6409_v49 = vpop.xlane.xlu1 %6408 }
0x29f9   :  { %10840 = vrcp.f32 %v6409_v49 }
0x29fb   :  { %v10837_v58 = vpop.eup %10836 }
0x29fc   :  { %v6413_v43 = vmul.f32 %v10837_v58, %v10825_v4  ;;  %v6639_v23 = vpop.xlane.xlu0 %6638 }
0x29fd   :  { %10842 = vrcp.f32 %v6639_v23 }
0x29fe   :  { %9816 = vmatmul.mubr.msk.f32.vlgmr.msra.gmra.mrb[160].mxu0 %vm80_vm3, %v6413_v43 }
0x29ff   :  { %v10839_v51 = vpop.eup %10838  ;;  %9818 = vmatprep.mubr.msk.f32.mxu0 %vm10935_vm0, %v13674_v40 }
0x2a00   :  { %v6642_v18 = vpop.xlane.xlu1 %6641  ;;  %v10627_v46 = vpop.permute.xlu0 %10626  ;;  %v6414_v27 = vmul.f32 %v10839_v51, %v10827_v13 }
0x2a01   :  { %10844 = vrcp.f32 %v6642_v18  ;;  %v10629_v10 = vunpack.i.h.bf16 %v10627_v46  ;;  %v10628_v53 = vunpack.i.l.bf16 %v10627_v46 }
0x2a02   :  { %9819 = vmatmul.mubr.msk.f32.gmra.mrb[162].mxu0 %vm80_vm3, %v6414_v27 }
0x2a03   :  { %v10841_v38 = vpop.eup %10840  ;;  %v10367_v22 = vpack.c.bf16 %v10629_v10, %v10628_v53  ;;  %9821 = vmatprep.mubr.msk.f32.mxu0 %vm10935_vm0, %v13674_v40 }
0x2a04   :  { %v6645_v4 = vpop.xlane.xlu1 %6644  ;;  %v6415_v3 = vmul.f32 %v10841_v38, %v10829_v48  ;;  %v10903_v48 = vld [vmem:[%s13547_s9 + $0x20] sm:$0xff]  ;;  %v10632_v51 = vpop.permute.xlu0 %10631 }
0x2a05   :  { %10846 = vrcp.f32 %v6645_v4  ;;  %10368 = vmatpush3.bf16.msra.mxu0 %v10367_v22  ;;  %v10633_v46 = vunpack.i.l.bf16 %v10632_v51 }
0x2a06   :  { %9822 = vmatmul.mubr.msk.f32.gmra.mrb[164].mxu0 %vm80_vm3, %v6415_v3  ;;  %9843 = vmatprep.subr.mxu0 %v13674_v40 }
0x2a07   :  { %v10843_v34 = vpop.eup %10842  ;;  %9845 = vmatprep.mubr.msk.f32.mxu0 %vm10935_vm0, %v13674_v40 }
0x2a08   :  { %v6649_v13 = vmul.f32 %v10843_v34, %v10831_v25  ;;  %v6657_v5 = vpop.permute.xlu1 %6656 }
0x2a09   :  { %9844 = vmatpush3.msk.msra.mxu0 %vm84_vm2, %v6657_v5 }
0x2a0a   :  { %9846 = vmatmul.mubr.msk.f32.vlgmr.msra.gmra.mrb[166].mxu0 %vm80_vm3, %v6649_v13  ;;  %9865 = vmatprep.subr.mxu0 %v13674_v40 }
0x2a0b   :  { %v10845_v8 = vpop.eup %10844  ;;  %9848 = vmatprep.mubr.msk.f32.mxu0 %vm10935_vm0, %v13674_v40  ;;  %9866 = vmatpush3.msra.mxu0 %v10903_v48  ;;  %v10904_v48 = vld [vmem:[%s13547_s9 + $0x30] sm:$0xff] }
0x2a0c   :  { %v6650_v49 = vmul.f32 %v10845_v8, %v10833_v62  ;;  %10373 = vmatprep.subr.bf16.mxu0 %v13673_v44  ;;  %v6940_v13 = vpop.permute.xlu1 %6939  ;;  %v6930_v8 = vpop.permute.xlu0 %6929 }
0x2a0e   :  { %9849 = vmatmul.mubr.msk.f32.gmra.mrb[168].mxu0 %vm80_vm3, %v6650_v49 }
0x2a0f   :  { %v10847_v25 = vpop.eup %10846  ;;  %9851 = vmatprep.mubr.msk.f32.mxu0 %vm10935_vm0, %v13674_v40 }
0x2a10   :  { %v6651_v58 = vmul.f32 %v10847_v25, %v10835_v37  ;;  %v10634_v37 = vunpack.i.h.bf16 %v10632_v51  ;;  %v6932_v49 = vpop.permute.xlu1 %6931  ;;  %v6934_v25 = vpop.permute.xlu0 %6933 }
0x2a12   :  { %9852 = vmatmul.mubr.msk.f32.gmra.mrb[170].mxu0 %vm80_vm3, %v6651_v58  ;;  %v10370_v53 = vpack.c.bf16 %v10634_v37, %v10633_v46 }
0x2a13   :  { %9867 = vmatprep.mubr.msk.f32.mxu0 %vm10935_vm0, %v13674_v40 }
0x2ad1   :  { %v6501_v43 = vpop.f32.mrb[160].mxu0 }
0x2ad2   :  { %v9817_v23 = vpop.f32.mrb[161].mxu0  ;;  %9868 = vmatmul.mubr.msk.f32.vlgmr.msra.gmra.mrb[172].mxu0 %vm560_vm7, %v6501_v43 }
0x2ad3   :  { %9870 = vmatprep.mubr.msk.f32.mxu0 %vm10935_vm0, %v13674_v40 }
0x2ad5   :  { %v6506_v62 = vpop.f32.mrb[162].mxu0 }
0x2ad6   :  { %v9820_v18 = vpop.f32.mrb[163].mxu0  ;;  %9871 = vmatmul.mubr.msk.f32.gmra.mrb[174].mxu0 %vm560_vm7, %v6506_v62 }
0x2ad7   :  { %9873 = vmatprep.mubr.msk.f32.mxu0 %vm10935_vm0, %v13674_v40 }
0x2ad9   :  { %v6511_v27 = vpop.f32.mrb[164].mxu0 }
0x2ada   :  { %v9823_v10 = vpop.f32.mrb[165].mxu0  ;;  %9874 = vmatmul.mubr.msk.f32.gmra.mrb[176].mxu0 %vm560_vm7, %v6511_v27 }
0x2adb   :  { %9897 = vmatprep.mubr.msk.f32.mxu0 %vm10935_vm0, %v13674_v40 }
0x2add   :  { %v6737_v38 = vpop.f32.mrb[166].mxu0 }
0x2ade   :  { %v9847_v22 = vpop.f32.mrb[167].mxu0  ;;  %9857 = vmatmul.mubr.msk.f32.vlgmr.msra.gmra.mrb[170].mxu1 %vm560_vm7, %v6737_v38 }
0x2adf   :  { %10372 = vmatpush3.bf16.xpose.msk.msra.mxu1 %vm11201_vm8, %v10370_v53  ;;  %9859 = vmatprep.mubr.msk.f32.mxu1 %vm10935_vm0, %v13674_v40 }
0x2ae0   :  { %9880 = vmatprep.subr.mxu1 %v13674_v40 }
0x2ae1   :  { %v6742_v4 = vpop.f32.mrb[168].mxu0 }
0x2ae2   :  { %v9850_v3 = vpop.f32.mrb[169].mxu0  ;;  %9860 = vmatmul.mubr.msk.f32.gmra.mrb[172].mxu1 %vm560_vm7, %v6742_v4 }
0x2ae3   :  { %9862 = vmatprep.mubr.msk.f32.mxu1 %vm10935_vm0, %v13674_v40 }
0x2ae5   :  { %v6747_v34 = vpop.f32.mrb[170].mxu0 }
0x2ae6   :  { %v9853_v5 = vpop.f32.mrb[171].mxu0  ;;  %9863 = vmatmul.mubr.msk.f32.gmra.mrb[174].mxu1 %vm560_vm7, %v6747_v34 }
0x2ae7   :  { %9881 = vmatpush3.xpose.msk.msra.mxu1 %vm560_vm7, %v6940_v13  ;;  %9882 = vmatprep.mubr.msk.f32.mxu1 %vm10935_vm0, %v13674_v40 }
0x2ae8   :  { %9906 = vmatprep.subr.mxu1 %v13674_v40 }
0x2aea   :  { %9883 = vmatmul.mubr.msk.f32.vlgmr.msra.gmra.mrb[176].mxu1 %vm560_vm7, %v6930_v8 }
0x2aeb   :  { %9885 = vmatprep.mubr.msk.f32.mxu1 %vm10935_vm0, %v13674_v40  ;;  %9907 = vmatpush3.msra.mxu1 %v10904_v48 }
0x2aec   :  { %10380 = vmatprep.subr.bf16.mxu1 %v13673_v44 }
0x2aee   :  { %9886 = vmatmul.mubr.msk.f32.gmra.mrb[178].mxu1 %vm560_vm7, %v6932_v49 }
0x2aef   :  { %9888 = vmatprep.mubr.msk.f32.mxu1 %vm10935_vm0, %v13674_v40 }
0x2af2   :  { %9889 = vmatmul.mubr.msk.f32.gmra.mrb[180].mxu1 %vm560_vm7, %v6934_v25 }
0x2af3   :  { %9908 = vmatprep.mubr.msk.f32.mxu1 %vm10935_vm0, %v13674_v40 }
0x2ba5   :  { %v6915_v58 = vpop.f32.mrb[172].mxu0 }
0x2ba6   :  { %v9869_v43 = vpop.f32.mrb[173].mxu0 }
0x2ba9   :  { %v6920_v23 = vpop.f32.mrb[174].mxu0 }
0x2baa   :  { %v9872_v62 = vpop.f32.mrb[175].mxu0 }
0x2bad   :  { %v6925_v51 = vpop.f32.mrb[176].mxu0 }
0x2bae   :  { %v9875_v18 = vpop.f32.mrb[177].mxu0 }
0x2bb1   :  { %v6826_v37 = vpop.f32.mrb[170].mxu1 }
0x2bb2   :  { %v13271_v46 = vadd.f32 %v6915_v58, %v6826_v37  ;;  %v9858_v27 = vpop.f32.mrb[171].mxu1 }
0x2bb5   :  { %v6831_v10 = vpop.f32.mrb[172].mxu1 }
0x2bb6   :  { %v13273_v53 = vadd.f32 %v6920_v23, %v6831_v10  ;;  %v9861_v38 = vpop.f32.mrb[173].mxu1 }
0x2bb9   :  { %v6836_v22 = vpop.f32.mrb[174].mxu1 }
0x2bba   :  { %v13275_v4 = vadd.f32 %v6925_v51, %v6836_v22  ;;  %v9864_v3 = vpop.f32.mrb[175].mxu1 }
0x2bbd   :  { %v7019_v34 = vpop.f32.mrb[176].mxu1 }
0x2bbe   :  { %v9884_v13 = vpop.f32.mrb[177].mxu1  ;;  %v7033_v5 = vsel %vm80_vm3, %v7019_v34, -inf }
0x2bbf   :  { %7034 = vmax.xlane.f32.xlu1 %v7033_v5 }
0x2bc1   :  { %v7024_v8 = vpop.f32.mrb[178].mxu1 }
0x2bc2   :  { %v9887_v48 = vpop.f32.mrb[179].mxu1  ;;  %v7036_v49 = vsel %vm80_vm3, %v7024_v8, -inf }
0x2bc3   :  { %7037 = vmax.xlane.f32.xlu0 %v7036_v49 }
0x2bc5   :  { %v7029_v25 = vpop.f32.mrb[180].mxu1 }
0x2bc6   :  { %v9890_v58 = vpop.f32.mrb[181].mxu1  ;;  %v7039_v43 = vsel %vm662_vm9, %v7029_v25, -inf }
0x2bc7   :  { %7040 = vmax.xlane.f32.xlu0 %v7039_v43 }
0x2c4c   :  { %v7035_v23 = vpop.xlane.xlu1 %7034 }
0x2c4d   :  { %v7042_v62 = vsub.f32 %v7019_v34, %v7035_v23 }
0x2c4f   :  { %v7045_v51 = vmul.f32 1.442695, %v7042_v62 }
0x2c50   :  { %v7038_v18 = vpop.xlane.xlu0 %7037 }
0x2c51   :  { %10848 = vpow2.f32 %v7045_v51  ;;  %v7043_v37 = vsub.f32 %v7024_v8, %v7038_v18 }
0x2c53   :  { %v7047_v27 = vmul.f32 1.442695, %v7043_v37 }
0x2c54   :  { %v7041_v34 = vpop.xlane.xlu0 %7040 }
0x2c55   :  { %10850 = vpow2.f32 %v7047_v27  ;;  %v7044_v13 = vsub.f32 %v7029_v25, %v7041_v34 }
0x2c57   :  { %v7049_v5 = vmul.f32 1.442695, %v7044_v13 }
0x2c59   :  { %10852 = vpow2.f32 %v7049_v5 }
0x2c5b   :  { %v10849_v10 = vpop.eup %10848 }
0x2c5c   :  { %v7051_v38 = vsel %vm80_vm3, %v10849_v10, 0.0 }
0x2c5d   :  { %7052 = vadd.xlane.f32.xlu1 %v7051_v38 }
0x2c5f   :  { %v10851_v22 = vpop.eup %10850 }
0x2c60   :  { %v7054_v3 = vsel %vm80_vm3, %v10851_v22, 0.0 }
0x2c61   :  { %7055 = vadd.xlane.f32.xlu0 %v7054_v3 }
0x2c63   :  { %v10853_v8 = vpop.eup %10852 }
0x2c64   :  { %v7057_v48 = vsel %vm662_vm9, %v10853_v8, 0.0 }
0x2c6e   :  { %7070 = vrot.lane.b32.xlu1 %v13119_v14, %s13678_s24 }
0x2c72   :  { %10641 = vrot.lane.b32.xlu1 %v13117_v35, %s13679_s26 }
0x2c77   :  { %10636 = vrot.lane.b32.xlu0 %v13117_v35, %s13678_s24 }
0x2c7b   :  { %7267 = vrot.lane.b32.xlu0 %v13119_v14, %s13679_s26 }
0x2c7f   :  { %7259 = vrot.lane.b32.xlu0 %v13129_v28, %s13680_s5 }
0x2c96   :  { %7058 = vadd.xlane.f32.xlu1 %v7057_v48 }
0x2ca7   :  { %7257 = vrot.lane.b32.xlu1 %v13133_v47, %s13680_s5 }
0x2cab   :  { %7261 = vrot.lane.b32.xlu1 %v13138_v11, %s13680_s5 }
0x2cea   :  { %v7053_v49 = vpop.xlane.xlu1 %7052 }
0x2ceb   :  { %10854 = vrcp.f32 %v7053_v49 }
0x2cee   :  { %v7056_v58 = vpop.xlane.xlu0 %7055  ;;  %v7071_v23 = vpop.permute.xlu1 %7070 }
0x2cef   :  { %10856 = vrcp.f32 %v7056_v58 }
0x2cf2   :  { %v10637_v43 = vpop.permute.xlu0 %10636  ;;  %v10642_v18 = vpop.permute.xlu1 %10641 }
0x2cf3   :  { %v10639_v28 = vunpack.i.h.bf16 %v10637_v43  ;;  %v10638_v25 = vunpack.i.l.bf16 %v10637_v43  ;;  %v10644_v47 = vunpack.i.h.bf16 %v10642_v18  ;;  %v10643_v11 = vunpack.i.l.bf16 %v10642_v18 }
0x2cf5   :  { %v10374_v62 = vpack.c.bf16 %v10639_v28, %v10638_v25  ;;  %v10855_v51 = vpop.eup %10854  ;;  %v10377_v3 = vpack.c.bf16 %v10644_v47, %v10643_v11 }
0x2cf6   :  { %v7063_v37 = vmul.f32 %v10855_v51, %v10849_v10  ;;  %v7268_v10 = vpop.permute.xlu0 %7267 }
0x2cf7   :  { %10375 = vmatpush3.bf16.msra.mxu0 %v10374_v62 }
0x2cf8   :  { %9895 = vmatprep.subr.mxu0 %v13674_v40 }
0x2cf9   :  { %v10857_v27 = vpop.eup %10856 }
0x2cfa   :  { %v7064_v38 = vmul.f32 %v10857_v27, %v10851_v22  ;;  %v7260_v48 = vpop.permute.xlu0 %7259 }
0x2cfb   :  { %9896 = vmatpush3.msk.msra.mxu0 %vm84_vm2, %v7071_v23 }
0x2cfc   :  { %9898 = vmatmul.mubr.msk.f32.vlgmr.msra.gmra.mrb[178].mxu0 %vm80_vm3, %v7063_v37  ;;  %10376 = vmatprep.subr.bf16.mxu0 %v13673_v44 }
0x2cfd   :  { %9900 = vmatprep.mubr.msk.f32.mxu0 %vm10935_vm0, %v13674_v40 }
0x2d00   :  { %9901 = vmatmul.mubr.msk.f32.gmra.mrb[180].mxu0 %vm80_vm3, %v7064_v38 }
0x2d01   :  { %9903 = vmatprep.mubr.msk.f32.mxu0 %vm10935_vm0, %v13674_v40 }
0x2d02   :  { %10379 = vmatpush3.bf16.xpose.msk.msra.mxu0 %vm11201_vm8, %v10377_v3 }
0x2d03   :  { %9921 = vmatprep.subr.mxu0 %v13674_v40 }
0x2d0a   :  { %9922 = vmatpush3.xpose.msk.msra.mxu0 %vm560_vm7, %v7268_v10 }
0x2d0b   :  { %9947 = vmatprep.subr.mxu0 %v13674_v40 }
0x2d23   :  { %v7059_v34 = vpop.xlane.xlu1 %7058 }
0x2d24   :  { %10858 = vrcp.f32 %v7059_v34 }
0x2d27   :  { %v7258_v5 = vpop.permute.xlu1 %7257 }
0x2d2e   :  { %v10859_v13 = vpop.eup %10858 }
0x2d2f   :  { %v7065_v22 = vmul.f32 %v10859_v13, %v10853_v8  ;;  %v7262_v8 = vpop.permute.xlu1 %7261 }
0x2d31   :  { %9904 = vmatmul.mubr.msk.f32.gmra.mrb[182].mxu0 %vm80_vm3, %v7065_v22 }
0x2d32   :  { %9923 = vmatprep.mubr.msk.f32.mxu0 %vm10935_vm0, %v13674_v40 }
0x2d35   :  { %9924 = vmatmul.mubr.msk.f32.vlgmr.msra.gmra.mrb[184].mxu0 %vm560_vm7, %v7258_v5 }
0x2d36   :  { %9926 = vmatprep.mubr.msk.f32.mxu0 %vm10935_vm0, %v13674_v40  ;;  %9948 = vmatpush3.msra.mxu0 %v10905_v60 }
0x2d37   :  { %10392 = vmatprep.subr.bf16.mxu0 %v12663_v12 }
0x2d39   :  { %9927 = vmatmul.mubr.msk.f32.gmra.mrb[186].mxu0 %vm560_vm7, %v7260_v48 }
0x2d3a   :  { %9929 = vmatprep.mubr.msk.f32.mxu0 %vm10935_vm0, %v13674_v40 }
0x2d3d   :  { %9930 = vmatmul.mubr.msk.f32.gmra.mrb[188].mxu0 %vm560_vm7, %v7262_v8 }
0x2d3e   :  { %9949 = vmatprep.mubr.msk.f32.mxu0 %vm10935_vm0, %v13674_v40 }
0x2dcf   :  { %v7151_v49 = vpop.f32.mrb[178].mxu0 }
0x2dd0   :  { %v9899_v58 = vpop.f32.mrb[179].mxu0  ;;  %9909 = vmatmul.mubr.msk.f32.vlgmr.msra.gmra.mrb[182].mxu1 %vm560_vm7, %v7151_v49 }
0x2dd1   :  { %9911 = vmatprep.mubr.msk.f32.mxu1 %vm10935_vm0, %v13674_v40 }
0x2dd3   :  { %v7156_v12 = vpop.f32.mrb[180].mxu0 }
0x2dd4   :  { %v9902_v43 = vpop.f32.mrb[181].mxu0  ;;  %9912 = vmatmul.mubr.msk.f32.gmra.mrb[184].mxu1 %vm560_vm7, %v7156_v12 }
0x2dd5   :  { %9914 = vmatprep.mubr.msk.f32.mxu1 %vm10935_vm0, %v13674_v40 }
0x2e04   :  { %v7161_v23 = vpop.f32.mrb[182].mxu0 }
0x2e05   :  { %v9905_v28 = vpop.f32.mrb[183].mxu0  ;;  %9915 = vmatmul.mubr.msk.f32.gmra.mrb[186].mxu1 %vm560_vm7, %v7161_v23 }
0x2e06   :  { %9938 = vmatprep.mubr.msk.f32.mxu1 %vm10935_vm0, %v13674_v40 }
0x2e08   :  { %v7347_v25 = vpop.f32.mrb[184].mxu0 }
0x2e09   :  { %v9925_v62 = vpop.f32.mrb[185].mxu0  ;;  %v7361_v51 = vsel %vm80_vm3, %v7347_v25, -inf }
0x2e0a   :  { %7362 = vmax.xlane.f32.xlu0 %v7361_v51 }
0x2e0c   :  { %v7352_v18 = vpop.f32.mrb[186].mxu0 }
0x2e0d   :  { %v9928_v37 = vpop.f32.mrb[187].mxu0  ;;  %v7364_v11 = vsel %vm80_vm3, %v7352_v18, -inf }
0x2e10   :  { %v7357_v27 = vpop.f32.mrb[188].mxu0 }
0x2e11   :  { %v9931_v47 = vpop.f32.mrb[189].mxu0 }
0x2e20   :  { %10646 = vrot.lane.b32.xlu0 %v13117_v35, %s13681_s1 }
0x2e3f   :  { %7365 = vmax.xlane.f32.xlu0 %v7364_v11 }
0x2e97   :  { %v7363_v38 = vpop.xlane.xlu0 %7362 }
0x2e98   :  { %v7370_v3 = vsub.f32 %v7347_v25, %v7363_v38 }
0x2e9a   :  { %v7373_v10 = vmul.f32 1.442695, %v7370_v3 }
0x2e9b   :  { %v10647_v34 = vpop.permute.xlu0 %10646 }
0x2e9c   :  { %10860 = vpow2.f32 %v7373_v10  ;;  %v10649_v13 = vunpack.i.h.bf16 %v10647_v34  ;;  %v10648_v22 = vunpack.i.l.bf16 %v10647_v34 }
0x2e9e   :  { %v10381_v5 = vpack.c.bf16 %v10649_v13, %v10648_v22 }
0x2ea0   :  { %10382 = vmatpush3.bf16.msra.mxu1 %v10381_v5 }
0x2ea1   :  { %9936 = vmatprep.subr.mxu1 %v13674_v40 }
0x2ea3   :  { %v7240_v60 = vpop.f32.mrb[182].mxu1 }
0x2ea4   :  { %v13342_v48 = vadd.f32 %v7240_v60, %v13271_v46  ;;  %v9910_v8 = vpop.f32.mrb[183].mxu1 }
0x2ea6   :  { %v10861_v35 = vpop.eup %10860 }
0x2ea7   :  { %v7245_v49 = vpop.f32.mrb[184].mxu1  ;;  %v7379_v58 = vsel %vm80_vm3, %v10861_v35, 0.0 }
0x2ea8   :  { %v13346_v12 = vadd.f32 %v7245_v49, %v13273_v53  ;;  %v9913_v43 = vpop.f32.mrb[185].mxu1  ;;  %7380 = vadd.xlane.f32.xlu1 %v7379_v58  ;;  %v7367_v53 = vsel %vm662_vm9, %v7357_v27, -inf }
0x2eb9   :  { %7398 = vrot.lane.b32.xlu1 %v13119_v14, %s13681_s1 }
0x2ecc   :  { %v7366_v23 = vpop.xlane.xlu0 %7365 }
0x2ecd   :  { %v7371_v28 = vsub.f32 %v7352_v18, %v7366_v23 }
0x2ecf   :  { %v7375_v25 = vmul.f32 1.442695, %v7371_v28 }
0x2ed1   :  { %10862 = vpow2.f32 %v7375_v25 }
0x2ed8   :  { %v7250_v62 = vpop.f32.mrb[186].mxu1 }
0x2ed9   :  { %v13351_v46 = vadd.f32 %v7250_v62, %v13275_v4  ;;  %v9916_v51 = vpop.f32.mrb[187].mxu1 }
0x2edb   :  { %v10863_v37 = vpop.eup %10862 }
0x2edc   :  { %v7382_v47 = vsel %vm80_vm3, %v10863_v37, 0.0 }
0x2edd   :  { %7383 = vadd.xlane.f32.xlu0 %v7382_v47  ;;  %7368 = vmax.xlane.f32.xlu1 %v7367_v53 }
0x2f35   :  { %v7381_v11 = vpop.xlane.xlu1 %7380 }
0x2f36   :  { %10864 = vrcp.f32 %v7381_v11 }
0x2f39   :  { %v7399_v38 = vpop.permute.xlu1 %7398 }
0x2f3a   :  { %9937 = vmatpush3.msk.msra.mxu1 %vm84_vm2, %v7399_v38 }
0x2f3b   :  { %10384 = vmatprep.subr.bf16.mxu1 %v12652_v16 }
0x2f40   :  { %v10865_v14 = vpop.eup %10864 }
0x2f41   :  { %v7391_v18 = vmul.f32 %v10865_v14, %v10861_v35 }
0x2f43   :  { %9939 = vmatmul.mubr.msk.f32.vlgmr.msra.gmra.mrb[188].mxu1 %vm80_vm3, %v7391_v18 }
0x2f44   :  { %9941 = vmatprep.mubr.msk.f32.mxu1 %vm10935_vm0, %v13674_v40  ;;  %10386 = vmatpush1.bf16.msra.mxu1 %v12665_v56 }
0x2f45   :  { %10388 = vmatprep.subr.bf16.mxu1 %v12688_v33 }
0x2f48   :  { %10390 = vmatpush1.bf16.msra.mxu1 %v12701_v39 }
0x2f49   :  { %10400 = vmatprep.subr.bf16.mxu1 %v12762_v59 }
0x2f6a   :  { %v7384_v4 = vpop.xlane.xlu0 %7383  ;;  %v7369_v3 = vpop.xlane.xlu1 %7368 }
0x2f6b   :  { %10866 = vrcp.f32 %v7384_v4  ;;  %v7372_v10 = vsub.f32 %v7357_v27, %v7369_v3 }
0x2f6d   :  { %v7377_v16 = vmul.f32 1.442695, %v7372_v10 }
0x2f6f   :  { %10868 = vpow2.f32 %v7377_v16 }
0x2f75   :  { %v10867_v34 = vpop.eup %10866 }
0x2f76   :  { %v7392_v13 = vmul.f32 %v10867_v34, %v10863_v37 }
0x2f78   :  { %9942 = vmatmul.mubr.msk.f32.gmra.mrb[190].mxu1 %vm80_vm3, %v7392_v13 }
0x2f79   :  { %v10869_v22 = vpop.eup %10868  ;;  %9944 = vmatprep.mubr.msk.f32.mxu1 %vm10935_vm0, %v13674_v40 }
0x2f7a   :  { %v7385_v56 = vsel %vm662_vm9, %v10869_v22, 0.0 }
0x2f7b   :  { %7386 = vadd.xlane.f32.xlu0 %v7385_v56 }
0x3008   :  { %v7387_v33 = vpop.xlane.xlu0 %7386 }
0x3009   :  { %10870 = vrcp.f32 %v7387_v33 }
0x3013   :  { %v10871_v39 = vpop.eup %10870 }
0x3014   :  { %v7393_v59 = vmul.f32 %v10871_v39, %v10869_v22 }
0x3016   :  { %v7479_v5 = vpop.f32.mrb[188].mxu1  ;;  %9945 = vmatmul.mubr.msk.f32.gmra.mrb[192].mxu1 %vm80_vm3, %v7393_v59 }
0x3017   :  { %v9940_v27 = vpop.f32.mrb[189].mxu1  ;;  %9950 = vmatmul.mubr.msk.f32.vlgmr.msra.gmra.mrb[190].mxu0 %vm560_vm7, %v7479_v5  ;;  %7709 = vmatprep.mubr.f32.mxu1 %v13674_v40 }
0x3018   :  { %9952 = vmatprep.mubr.msk.f32.mxu0 %vm10935_vm0, %v13674_v40  ;;  %10394 = vmatpush1.bf16.msra.mxu0 %v12674_v61 }
0x3019   :  { %10396 = vmatprep.subr.bf16.mxu0 %v12699_v52  ;;  %v10906_v52 = vld [vmem:[%s13548_s10 + $0x1] ss:$0 sm:$0xff] }
0x301c   :  { %10398 = vmatpush1.bf16.msra.mxu0 %v12710_v55 }
0x301d   :  { %10432 = vmatprep.subr.bf16.mxu0 %v12773_v20 }
0x304b   :  { %v7484_v60 = vpop.f32.mrb[190].mxu1 }
0x304c   :  { %v9943_v8 = vpop.f32.mrb[191].mxu1  ;;  %9953 = vmatmul.mubr.msk.f32.gmra.mrb[192].mxu0 %vm560_vm7, %v7484_v60 }
0x304d   :  { %9955 = vmatprep.mubr.msk.f32.mxu0 %vm10935_vm0, %v13674_v40 }
0x30e9   :  { %v7489_v35 = vpop.f32.mrb[192].mxu1 }
0x30ea   :  { %v9946_v49 = vpop.f32.mrb[193].mxu1  ;;  %v7568_v58 = vpop.f32.mrb[190].mxu0  ;;  %9956 = vmatmul.mubr.msk.f32.gmra.mrb[194].mxu0 %vm560_vm7, %v7489_v35 }
0x30eb   :  { %v7582_v61 = vadd.f32 %v7568_v58, %v13342_v48  ;;  %v9951_v43 = vpop.f32.mrb[191].mxu0  ;;  %7792 = vmatprep.mubr.f32.mxu0 %v13674_v40 }
0x30ed   :  { %v7585_v55 = vadd.f32 %v10906_v52, %v7582_v61 }
0x30ef   :  { %v7588_v20 = vadd.f32 %v7585_v55, %v13090_v6 }
0x30f1   :  { %v7591_v23 = vsel %vm259_vm5, %v7588_v20, 0.0 }
0x30f2   :  { %7592 = vadd.xlane.f32.xlu1 %v7591_v23 }
0x311f   :  { %v7573_v28 = vpop.f32.mrb[192].mxu0 }
0x3120   :  { %v7583_v25 = vadd.f32 %v7573_v28, %v13346_v12  ;;  %v9954_v62 = vpop.f32.mrb[193].mxu0 }
0x3122   :  { %v7586_v51 = vadd.f32 %v10906_v52, %v7583_v25 }
0x3124   :  { %v7589_v48 = vadd.f32 %v7586_v51, %v13097_v29  ;;  %v6159_v29 = vadd.f32 %v13112_v36, %v12737_v57  ;;  %v13406_v36 = vld [vmem:[%s13549_s11 + $0x1] ss:$0 sm:$0xff] }
0x3126   :  { %v7594_v37 = vsel %vm259_vm5, %v7589_v48, 0.0  ;;  %v6160_v13 = vsel %vm259_vm5, %v6159_v29, 0.0 }
0x3127   :  { %7595 = vadd.xlane.f32.xlu1 %v7594_v37 }
0x317f   :  { %v7593_v47 = vpop.xlane.xlu1 %7592 }
0x3180   :  { %v7600_v53 = vmul.f32 0.03125, %v7593_v47 }
0x3182   :  { %v7603_v11 = vsub.f32 %v7588_v20, %v7600_v53 }
0x3184   :  { %v7606_v38 = vmul.f32 %v7603_v11, %v7603_v11 }
0x3186   :  { %v7609_v14 = vsel %vm259_vm5, %v7606_v38, 0.0 }
0x3187   :  { %7610 = vadd.xlane.f32.xlu0 %v7609_v14  ;;  %v13737_v14 = vld [vmem:[#allocation18_spill] sm:$0xff] }
0x31b4   :  { %v7596_v6 = vpop.xlane.xlu1 %7595 }
0x31b5   :  { %v7601_v18 = vmul.f32 0.03125, %v7596_v6 }
0x31b7   :  { %v13392_v4 = vsub.f32 %v7589_v48, %v7601_v18 }
0x31b9   :  { %v7607_v12 = vmul.f32 %v13392_v4, %v13392_v4 }
0x31bb   :  { %v7612_v3 = vsel %vm259_vm5, %v7607_v12, 0.0  ;;  %v13738_v12 = vld [vmem:[#allocation19_spill] sm:$0xff] }
0x31bc   :  { %7613 = vadd.xlane.f32.xlu1 %v7612_v3 }
0x31bd   :  { %v7578_v10 = vpop.f32.mrb[194].mxu0 }
0x31be   :  { %v7584_v16 = vadd.f32 %v7578_v10, %v13351_v46  ;;  %v9957_v34 = vpop.f32.mrb[195].mxu0 }
0x31c0   :  { %v7587_v22 = vadd.f32 %v10906_v52, %v7584_v16  ;;  %6161 = vadd.xlane.f32.xlu1 %v6160_v13 }
0x31c2   :  { %v7590_v56 = vadd.f32 %v7587_v22, %v13103_v0  ;;  %v13412_v0 = vld [vmem:[%s13550_s12 + $0x1] ss:$0 sm:$0xff] }
0x31c4   :  { %v7597_v33 = vsel %vm1877_vm10, %v7590_v56, 0.0 }
0x31c5   :  { %7598 = vadd.xlane.f32.xlu0 %v7597_v33 }
0x3214   :  { %v7611_v39 = vpop.xlane.xlu0 %7610 }
0x3215   :  { %v7618_v59 = vmul.f32 0.03125, %v7611_v39 }
0x3217   :  { %v7621_v5 = vadd.f32 1e-05, %v7618_v59 }
0x3219   :  { %10872 = vrsqrt.f32 %v7621_v5 }
0x3223   :  { %v10873_v27 = vpop.eup %10872 }
0x3224   :  { %v7627_v57 = vmul.f32 %v10873_v27, %v7603_v11  ;;  %v13736_v11 = vld [vmem:[#allocation17_spill] sm:$0xff] }
0x3226   :  { %v7630_v46 = vmul.f32 %v13406_v36, %v7627_v57 }
0x3228   :  { %v13415_v60 = vadd.f32 %v13412_v0, %v7630_v46 }
0x322a   :  { %8545 = vmatmul.mubr.msk.f32.vlgmr.msra.gmra.mrb[194].mxu1 %vm259_vm5, %v13415_v60  ;;  %8548 = vmatmul.mubr.msk.f32.vlgmr.msra.gmra.mrb[196].mxu0 %vm259_vm5, %v13415_v60 }
0x322b   :  { %7715 = vmatprep.mubr.f32.mxu1 %v13674_v40  ;;  %7798 = vmatprep.mubr.f32.mxu0 %v13674_v40 }
0x322c   :  { %10402 = vmatpush3.bf16.msra.mxu1 %v12775_v1  ;;  %10434 = vmatpush3.bf16.msra.mxu0 %v12787_v54  ;;  %v13725_v1 = vld [vmem:[#allocation6_spill] sm:$0xff]  ;;  %v13726_v54 = vld [vmem:[#allocation7_spill] sm:$0xff] }
0x322d   :  { %10404 = vmatprep.subr.bf16.mxu1 %v12800_v30  ;;  %10436 = vmatprep.subr.bf16.mxu0 %v12802_v42  ;;  %v13727_v30 = vld [vmem:[#allocation8_spill] sm:$0xff]  ;;  %v13728_v42 = vld [vmem:[#allocation9_spill] sm:$0xff] }
0x3230   :  { %10406 = vmatpush3.bf16.msra.mxu1 %v12814_v9  ;;  %10438 = vmatpush3.bf16.msra.mxu0 %v12827_v45  ;;  %v13729_v9 = vld [vmem:[#allocation10_spill] sm:$0xff]  ;;  %v13730_v45 = vld [vmem:[#allocation11_spill] sm:$0xff] }
0x3231   :  { %10408 = vmatprep.subr.bf16.mxu1 %v12829_v17  ;;  %10440 = vmatprep.subr.bf16.mxu0 %v12840_v24  ;;  %v13731_v17 = vld [vmem:[#allocation12_spill] sm:$0xff]  ;;  %v13732_v24 = vld [vmem:[#allocation13_spill] sm:$0xff] }
0x3234   :  { %10410 = vmatpush3.bf16.msra.mxu1 %v12852_v2  ;;  %10442 = vmatpush3.bf16.msra.mxu0 %v12865_v31  ;;  %v13733_v2 = vld [vmem:[#allocation14_spill] sm:$0xff]  ;;  %v13734_v31 = vld [vmem:[#allocation15_spill] sm:$0xff] }
0x3235   :  { %10412 = vmatprep.subr.bf16.mxu1 %v12867_v50  ;;  %10444 = vmatprep.subr.bf16.mxu0 %v12879_v26  ;;  %v13735_v50 = vld [vmem:[#allocation16_spill] sm:$0xff] }
0x3238   :  { %10414 = vmatpush3.bf16.msra.mxu1 %v12900_v21  ;;  %10446 = vmatpush3.bf16.msra.mxu0 %v12904_v15 }
0x3239   :  { %10416 = vmatprep.subr.bf16.mxu1 %v12906_v63  ;;  %10448 = vmatprep.subr.bf16.mxu0 %v12918_v7 }
0x323c   :  { %10418 = vmatpush3.bf16.msra.mxu1 %v12936_v41  ;;  %10450 = vmatpush3.bf16.msra.mxu0 %v12940_v19 }
0x323d   :  { %10420 = vmatprep.subr.bf16.mxu1 %v12942_v32  ;;  %10452 = vmatprep.subr.bf16.mxu0 %v13725_v1 }
0x3240   :  { %10422 = vmatpush3.bf16.msra.mxu1 %v13726_v54  ;;  %10454 = vmatpush3.bf16.msra.mxu0 %v13727_v30  ;;  %v7995_v30 = vld [vmem:[%s13557_s19] sm:$0xff] }
0x3241   :  { %10424 = vmatprep.subr.bf16.mxu1 %v13728_v42  ;;  %10456 = vmatprep.subr.bf16.mxu0 %v13729_v9  ;;  %v7996_v42 = vld [vmem:[%s13557_s19 + $0x8] sm:$0xff] }
0x3242   :  { %v10464_v9 = vpack.c.bf16 %v7996_v42, %v7995_v30 }
0x3244   :  { %10426 = vmatpush3.bf16.msra.mxu1 %v13730_v45  ;;  %10458 = vmatpush3.bf16.msra.mxu0 %v13731_v17  ;;  %v7997_v45 = vld [vmem:[%s13557_s19 + $0x10] sm:$0xff]  ;;  %v7998_v17 = vld [vmem:[%s13557_s19 + $0x18] sm:$0xff] }
0x3245   :  { %10428 = vmatprep.subr.bf16.mxu1 %v13732_v24  ;;  %10460 = vmatprep.subr.bf16.mxu0 %v13733_v2  ;;  %v10467_v24 = vpack.c.bf16 %v7998_v17, %v7997_v45 }
0x3248   :  { %10430 = vmatpush3.bf16.msra.mxu1 %v13734_v31  ;;  %10462 = vmatpush3.bf16.msra.mxu0 %v13735_v50 }
0x3249   :  { %v7614_v26 = vpop.xlane.xlu1 %7613  ;;  %10463 = vmatprep.subr.bf16.mxu1 %v13673_v44 }
0x324a   :  { %v7619_v21 = vmul.f32 0.03125, %v7614_v26 }
0x324c   :  { %v7622_v15 = vadd.f32 1e-05, %v7619_v21 }
0x324d   :  { %v6162_v63 = vpop.xlane.xlu1 %6161 }
0x324e   :  { %10874 = vrsqrt.f32 %v7622_v15  ;;  %v6163_v7 = vmul.f32 0.03125, %v6162_v63 }
0x3250   :  { %v13454_v41 = vsub.f32 %v6159_v29, %v6163_v7  ;;  %v13739_v29 = vld [vmem:[#allocation20_spill] sm:$0xff] }
0x3252   :  { %v7599_v19 = vpop.xlane.xlu0 %7598  ;;  %v6165_v32 = vmul.f32 %v13454_v41, %v13454_v41 }
0x3253   :  { %v7602_v8 = vmul.f32 0.03125, %v7599_v19 }
0x3254   :  { %v6166_v35 = vsel %vm259_vm5, %v6165_v32, 0.0 }
0x3255   :  { %v7605_v49 = vsub.f32 %v7590_v56, %v7602_v8  ;;  %6167 = vadd.xlane.f32.xlu1 %v6166_v35  ;;  %v8488_v35 = vld [vmem:[%s13555_s17 + $0x1] ss:$0 sm:$0xff] }
0x3257   :  { %v7608_v58 = vmul.f32 %v7605_v49, %v7605_v49 }
0x3258   :  { %v10875_v61 = vpop.eup %10874 }
0x3259   :  { %v7615_v43 = vsel %vm1877_vm10, %v7608_v58, 0.0  ;;  %v7628_v52 = vmul.f32 %v10875_v61, %v13392_v4 }
0x325a   :  { %7616 = vadd.xlane.f32.xlu0 %v7615_v43 }
0x325b   :  { %v7631_v55 = vmul.f32 %v13406_v36, %v7628_v52 }
0x325d   :  { %v7634_v20 = vadd.f32 %v13412_v0, %v7631_v55 }
0x325f   :  { %8546 = vmatmul.mubr.msk.f32.gmra.mrb[196].mxu1 %vm259_vm5, %v7634_v20  ;;  %8549 = vmatmul.mubr.msk.f32.gmra.mrb[198].mxu0 %vm259_vm5, %v7634_v20 }
0x3260   :  { %7721 = vmatprep.mubr.f32.mxu1 %v13674_v40  ;;  %7804 = vmatprep.mubr.f32.mxu0 %v13674_v40 }
0x32e2   :  { %v6168_v2 = vpop.xlane.xlu1 %6167 }
0x32e3   :  { %v6169_v31 = vmul.f32 0.03125, %v6168_v2 }
0x32e5   :  { %v6170_v50 = vadd.f32 1e-05, %v6169_v31 }
0x32e7   :  { %v7617_v23 = vpop.xlane.xlu0 %7616 }
0x32e8   :  { %v7620_v28 = vmul.f32 0.03125, %v7617_v23 }
0x32ea   :  { %v7623_v25 = vadd.f32 1e-05, %v7620_v28 }
0x32ec   :  { %10876 = vrsqrt.f32 %v7623_v25 }
0x32ed   :  { %10878 = vrsqrt.f32 %v6170_v50 }
0x32f6   :  { %v10877_v62 = vpop.eup %10876 }
0x32f7   :  { %v7629_v51 = vmul.f32 %v10877_v62, %v7605_v49  ;;  %v10879_v26 = vpop.eup %10878 }
0x32f8   :  { %v6172_v63 = vmul.f32 %v10879_v26, %v13454_v41  ;;  %v8489_v41 = vld [vmem:[%s13556_s18 + $0x1] ss:$0 sm:$0xff] }
0x32f9   :  { %v7632_v48 = vmul.f32 %v13406_v36, %v7629_v51 }
0x32fa   :  { %v6179_v52 = vmul.f32 %v8488_v35, %v6172_v63 }
0x32fb   :  { %v7635_v37 = vadd.f32 %v13412_v0, %v7632_v48 }
0x32fc   :  { %v6186_v51 = vadd.f32 %v8489_v41, %v6179_v52 }
0x32fd   :  { %v7711_v47 = vpop.f32.mrb[194].mxu1  ;;  %8547 = vmatmul.mubr.msk.f32.gmra.mrb[198].mxu1 %vm259_vm5, %v7635_v37  ;;  %v7794_v53 = vpop.f32.mrb[196].mxu0  ;;  %8550 = vmatmul.mubr.msk.f32.gmra.mrb[200].mxu0 %vm259_vm5, %v7635_v37 }
0x32fe   :  { %v7712_v38 = vadd.f32 %v7711_v47, %v13736_v11  ;;  %v7795_v6 = vadd.f32 %v7794_v53, %v13737_v14  ;;  %v7713_v18 = vpop.f32.mrb[195].mxu1  ;;  %v7796_v4 = vpop.f32.mrb[197].mxu0  ;;  %v10909_v47 = vld [vmem:[%s13554_s16 + $0x1] ss:$0 sm:$0xff] }
0x32ff   :  { %v7714_v3 = vadd.f32 %v7713_v18, %v13738_v12  ;;  %v7797_v10 = vadd.f32 %v7796_v4, %v13739_v29 }
0x3300   :  { %v7811_v13 = vmax.f32 %v7712_v38, 0.0  ;;  %v7813_v22 = vmax.f32 %v7795_v6, 0.0 }
0x3301   :  { %v7812_v16 = vmax.f32 %v7714_v3, 0.0  ;;  %v7814_v34 = vmax.f32 %v7797_v10, 0.0 }
0x3303   :  { %7887 = vmatprep.mubr.f32.mxu1 %v7812_v16  ;;  %7965 = vmatprep.mubr.f32.mxu0 %v7814_v34 }
0x3304   :  { %7888 = vmatmul.mubr.f32.vlgmr.msra.gmra.mrb[200].mxu1 %v7811_v13  ;;  %7966 = vmatmul.mubr.f32.vlgmr.msra.gmra.mrb[202].mxu0 %v7813_v22 }
0x3305   :  { %10465 = vmatpush3.bf16.msra.mxu1 %v10464_v9 }
0x3306   :  { %10466 = vmatprep.subr.bf16.mxu1 %v13673_v44 }
0x3309   :  { %10468 = vmatpush3.bf16.msra.mxu1 %v10467_v24 }
0x330a   :  { %10469 = vmatprep.subr.bf16.mxu1 %v13673_v44 }
0x3332   :  { %v7717_v56 = vpop.f32.mrb[196].mxu1  ;;  %v7800_v33 = vpop.f32.mrb[198].mxu0 }
0x3333   :  { %v7718_v39 = vadd.f32 %v7717_v56, %v13736_v11  ;;  %v7801_v59 = vadd.f32 %v7800_v33, %v13737_v14  ;;  %v7719_v5 = vpop.f32.mrb[197].mxu1  ;;  %v7802_v27 = vpop.f32.mrb[199].mxu0 }
0x3334   :  { %v7720_v57 = vadd.f32 %v7719_v5, %v13738_v12  ;;  %v7803_v36 = vadd.f32 %v7802_v27, %v13739_v29 }
0x3335   :  { %v7815_v1 = vmax.f32 %v7718_v39, 0.0  ;;  %v7817_v54 = vmax.f32 %v7801_v59, 0.0 }
0x3336   :  { %v7816_v46 = vmax.f32 %v7720_v57, 0.0  ;;  %v7818_v0 = vmax.f32 %v7803_v36, 0.0 }
0x3338   :  { %7892 = vmatprep.mubr.f32.mxu1 %v7816_v46  ;;  %7970 = vmatprep.mubr.f32.mxu0 %v7818_v0 }
0x3339   :  { %7893 = vmatmul.mubr.f32.gmra.mrb[202].mxu1 %v7815_v1  ;;  %7971 = vmatmul.mubr.f32.gmra.mrb[204].mxu0 %v7817_v54 }
0x33d0   :  { %v7723_v21 = vpop.f32.mrb[198].mxu1  ;;  %v7806_v15 = vpop.f32.mrb[200].mxu0 }
0x33d1   :  { %v7724_v7 = vadd.f32 %v7723_v21, %v13736_v11  ;;  %v7807_v19 = vadd.f32 %v7806_v15, %v13737_v14  ;;  %v7725_v32 = vpop.f32.mrb[199].mxu1  ;;  %v7808_v8 = vpop.f32.mrb[201].mxu0 }
0x33d2   :  { %v7726_v49 = vadd.f32 %v7725_v32, %v13738_v12  ;;  %v7809_v58 = vadd.f32 %v7808_v8, %v13739_v29 }
0x33d3   :  { %v7819_v55 = vmax.f32 %v7724_v7, 0.0  ;;  %v7821_v20 = vmax.f32 %v7807_v19, 0.0 }
0x33d4   :  { %v7820_v61 = vmax.f32 %v7726_v49, 0.0  ;;  %v7822_v43 = vmax.f32 %v7809_v58, 0.0 }
0x33d6   :  { %7896 = vmatprep.mubr.f32.mxu1 %v7820_v61  ;;  %7974 = vmatprep.mubr.f32.mxu0 %v7822_v43 }
0x33d7   :  { %v9135_v23 = vpop.f32.mrb[200].mxu1  ;;  %7897 = vmatmul.mubr.f32.gmra.mrb[204].mxu1 %v7819_v55  ;;  %v9176_v28 = vpop.f32.mrb[202].mxu0  ;;  %7975 = vmatmul.mubr.f32.gmra.mrb[206].mxu0 %v7821_v20 }
0x33d8   :  { %v9136_v25 = vpop.f32.mrb[201].mxu1  ;;  %v9177_v62 = vpop.f32.mrb[203].mxu0  ;;  %9966 = vmatprep.mubr.msk.f32.mxu1 %vm10935_vm0, %v13674_v40 }
0x33d9   :  { %v9137_v48 = vadd.f32 %v9136_v25, %v9135_v23  ;;  %v9178_v37 = vadd.f32 %v9177_v62, %v9176_v28 }
0x33db   :  { %v7890_v53 = vadd.f32 %v10909_v47, %v9137_v48  ;;  %9967 = vmatmul.mubr.msk.f32.vlgmr.msra.gmra.mrb[206].mxu1 %vm259_vm5, %v6186_v51 }
0x33dc   :  { %10471 = vmatpush3.bf16.msra.mxu1 %v10464_v9  ;;  %9977 = vmatprep.mubr.msk.f32.mxu1 %vm10935_vm0, %v13674_v40 }
0x33dd   :  { %v7968_v11 = vadd.f32 %v9178_v37, %v7890_v53  ;;  %10472 = vmatprep.subr.bf16.mxu1 %v13673_v44 }
0x33df   :  { %v7979_v38 = vadd.f32 %v7968_v11, %v13415_v60  ;;  %v7999_v60 = vld [vmem:[%s13558_s20] sm:$0x1]  ;;  %s10948_s20 = smov [#allocation3]  }
0x33e0   :  { %10474 = vmatpush3.bf16.msra.mxu1 %v10467_v24  ;;  %s8179_s2 = sshll.u32 %s10948_s20, 4  ;;  %s8180_s2 = int_to_ptr.vmem [resolvable:$true] %s8179_s2 }
0x33e1   :  { %v7980_v14 = vsel %vm259_vm5, %v7979_v38, 0.0  ;;  %s10910_s15 = scalar_lea.vmem %s8180_s2, 32  ;;  %p10915_p1 = scmp.lt.s32.totalorder %s8180_s2, %s8180_s2 }
0x33e2   :  { %7981 = vadd.xlane.f32.xlu0 %v7980_v14  ;;  %p10911_p0 = scmp.ne.s32.totalorder %s8180_s2, %s10910_s15  ;;  %p10916_p2 = scmp.lt.s32.totalorder %s10910_s15, %s10910_s15 }
0x33e4   :  { %p10917_p3 = por %p10916_p2, %p10915_p1 }
0x33e6   :  { %p10918_p4 = pnand %p10917_p3, %p10911_p0 }
0x340c   :  { %v9138_v6 = vpop.f32.mrb[202].mxu1  ;;  %v9179_v18 = vpop.f32.mrb[204].mxu0 }
0x340d   :  { %v9139_v4 = vpop.f32.mrb[203].mxu1  ;;  %v9180_v12 = vpop.f32.mrb[205].mxu0 }
0x346f   :  { %v7982_v3 = vpop.xlane.xlu0 %7981 }
0x3470   :  { %v7983_v29 = vmul.f32 0.03125, %v7982_v3 }
0x3472   :  { %v7984_v10 = vsub.f32 %v7979_v38, %v7983_v29 }
0x3474   :  { %v7985_v16 = vmul.f32 %v7984_v10, %v7984_v10 }
0x3476   :  { %v7986_v34 = vsel %vm259_vm5, %v7985_v16, 0.0 }
0x3477   :  { %7987 = vadd.xlane.f32.xlu0 %v7986_v34 }
0x34aa   :  { %v9141_v40 = vpop.f32.mrb[204].mxu1  ;;  %v9182_v13 = vpop.f32.mrb[206].mxu0 }
0x34ab   :  { %v9142_v44 = vpop.f32.mrb[205].mxu1  ;;  %v9183_v22 = vpop.f32.mrb[207].mxu0 }
0x34ae   :  { %v8069_v56 = vpop.f32.mrb[206].mxu1 }
0x34af   :  { %v8070_v33 = vadd.f32 %v8069_v56, %v7999_v60  ;;  %v9968_v39 = vpop.f32.mrb[207].mxu1 }
0x34b1   :  { %v8074_v59 = vsel %vm8073_vm11, %v8070_v33, -inf }
0x34b2   :  { %8075 = vmax.xlane.f32.xlu1 %v8074_v59 }
0x3504   :  { %v7988_v5 = vpop.xlane.xlu0 %7987 }
0x3505   :  { %v7989_v27 = vmul.f32 0.03125, %v7988_v5 }
0x3507   :  { %v7990_v57 = vadd.f32 1e-05, %v7989_v27 }
0x3509   :  { %10880 = vrsqrt.f32 %v7990_v57 }
0x3513   :  { %v10881_v36 = vpop.eup %10880 }
0x3514   :  { %v7992_v46 = vmul.f32 %v10881_v36, %v7984_v10 }
0x3516   :  { %v7993_v0 = vmul.f32 %v8488_v35, %v7992_v46 }
0x3518   :  { %v7994_v1 = vadd.f32 %v8489_v41, %v7993_v0 }
0x351a   :  { %9978 = vmatmul.mubr.msk.f32.vlgmr.msra.gmra.mrb[208].mxu1 %vm259_vm5, %v7994_v1 }
0x353f   :  { %v8076_v54 = vpop.xlane.xlu1 %8075 }
0x3540   :  { %v8077_v30 = vsub.f32 %v8070_v33, %v8076_v54 }
0x3542   :  { %v8078_v42 = vmul.f32 1.442695, %v8077_v30 }
0x3544   :  { %10882 = vpow2.f32 %v8078_v42 }
0x354e   :  { %v10883_v9 = vpop.eup %10882 }
0x354f   :  { %v8080_v45 = vsel %vm8073_vm11, %v10883_v9, 0.0 }
0x3550   :  { %8081 = vadd.xlane.f32.xlu1 %v8080_v45 }
0x35dd   :  { %v8082_v17 = vpop.xlane.xlu1 %8081 }
0x35de   :  { %10884 = vlog2.f32 %v8082_v17 }
0x35e8   :  { %v10885_v24 = vpop.eup %10884 }
0x35e9   :  { %v8084_v2 = vmul.f32 0.6931472, %v10885_v24 }
0x35eb   :  { %v8085_v31 = vsub.f32 %v8077_v30, %v8084_v2 }
0x35ed   :  { %8086 = vst.msk [vmem:[#allocation3] sm:$0x1] %vm8073_vm11, %v8085_v31  ;;  %v8156_v50 = vpop.f32.mrb[208].mxu1 }
0x35ee   :  { %v8157_v26 = vadd.f32 %v8156_v50, %v7999_v60  ;;  %v9979_v21 = vpop.f32.mrb[209].mxu1 }
0x35f0   :  { %v8160_v15 = vsel %vm8073_vm11, %v8157_v26, -inf }
0x35f1   :  { %8161 = vmax.xlane.f32.xlu0 %v8160_v15 }
0x367e   :  { %v8162_v63 = vpop.xlane.xlu0 %8161 }
0x367f   :  { %v8163_v7 = vsub.f32 %v8157_v26, %v8162_v63 }
0x3681   :  { %v8164_v19 = vmul.f32 1.442695, %v8163_v7 }
0x3683   :  { %10886 = vpow2.f32 %v8164_v19 }
0x368d   :  { %v10887_v32 = vpop.eup %10886 }
0x368e   :  { %v8166_v8 = vsel %vm8073_vm11, %v10887_v32, 0.0 }
0x368f   :  { %8167 = vadd.xlane.f32.xlu0 %v8166_v8 }
0x371c   :  { %v8168_v35 = vpop.xlane.xlu0 %8167 }
0x371d   :  { %10888 = vlog2.f32 %v8168_v35 }
0x3727   :  { %v10889_v49 = vpop.eup %10888 }
0x3728   :  { %v8170_v58 = vmul.f32 0.6931472, %v10889_v49 }
0x372a   :  { %v8171_v61 = vsub.f32 %v8163_v7, %v8170_v58 }
0x372c   :  { %8172 = vst.msk [vmem:[#allocation3 + $0x1] sm:$0x1] %vm8073_vm11, %v8171_v61 }
0x372d   :  { %10921 = shalt.err (!%p10918_p4)
}
0x372e   :  { %s13740_s22 = sld [smem:[#allocation32_spill]] }
0x3734   :  { %s10922_s28 = scalar_lea.hbm %s13740_s22, 32 }
0x3735   :  { %p10923_p5 = scmp.ne.s32.totalorder %s13740_s22, %s10922_s28  ;;  %p10926_p6 = scmp.lt.u32.totalorder %s10922_s28, %s13740_s22 }
0x3737   :  { %p10928_p7 = pnand %p10926_p6, %p10923_p5 }
0x3739   :  { %10931 = shalt.err (!%p10928_p7)
}
0x373a   :  { %8182 = dma.vmem_to_hbm [thread:$0]  %s8180_s2, 32, %s13740_s22, [#allocation4]  }
0x373b   :  { %10932 = dma.done.wait [#allocation4], 32  }
0x373c   :  { %10933 = vsyncadd [#allocation4], 4294967264 }
0x373d   :  { %8186 = vsyncpa [#allocation4], 1 }

</bundles_post_ra>
